<compile_context>
chip_gen: v6e
topology: v6e:2x2x1
jax: 0.10.0
libtpu: 0.0.40
codegen_flags: <defaults>
</compile_context>

<pallas_src>
import numpy as np
import jax
import jax.numpy as jnp
from jax.experimental import pallas as pl
from jax.experimental.pallas import tpu as pltpu

MODES = 8        # modes1  (must satisfy MODES <= (S + PADDING)//2 + 1)
WIDTH = 32       # width
PADDING = 7      # fixed in the module
HIDDEN = 32      # linear_q output features
N_LAYERS = 3     # three fourier layers


def _round_up(n, m):
    return (n + m - 1) // m * m


# ---------------------------------------------------------------------------
# Pallas kernel: full forward for a block of TB batch samples (one grid step).
# ---------------------------------------------------------------------------
def fno1d_kernel(x_ref, la1_ref, b1_ref, a2_ref, b2_ref, a3_ref, b3_ref,
                 q_ref, qb_ref, o_ref, ob_ref, out_ref):
    f32 = jnp.float32
    bf16 = jnp.bfloat16
    x = x_ref[...]                                                 # (TB, S*2) f32

    # layer 1 (lift folded in):  v = tanh(x @ (L @ A1) + b1)   -> bf16
    v = jnp.tanh((jnp.dot(x, la1_ref[...], preferred_element_type=f32)
                  + b1_ref[...]).astype(bf16))                     # (TB, NvP)

    # layers 2 & 3: one fused (NvP, NvP) bf16 MXU matmul each, f32 accumulate
    v = jnp.tanh((jnp.dot(v, a2_ref[...], preferred_element_type=f32)
                  + b2_ref[...]).astype(bf16))
    v = jnp.tanh((jnp.dot(v, a3_ref[...], preferred_element_type=f32)
                  + b3_ref[...]).astype(bf16))

    # projection: crop + permute + linear_q folded into Q (bf16); tanh in f32
    q = jnp.tanh(jnp.dot(v, q_ref[...], preferred_element_type=f32)
                 + qb_ref[...])                                    # (TB, SHp) f32

    # output layer folded into O, lane-padded to 128 output columns
    out_ref[...] = (jnp.dot(q, o_ref[...], preferred_element_type=f32)
                    + ob_ref[...])                                 # (TB, 128)


def fno1d_forward(x, fused, block_b=None, vmem_limit_bytes=None):
    """x: (B, S, 2) float32 -> (B, S, 1) float32."""
    B, S, Cin = x.shape
    assert Cin == 2
    Lp = S + PADDING
    assert MODES <= Lp // 2 + 1, "modes1 must be <= (S + padding)//2 + 1"
    Nx = S * Cin
    out_cols = fused[-1].shape[-1]          # lane-padded output width (>= 128)

    # Explicit batch tile: multiple of 8 sublanes, bounded at 256 by default
    # so per-step activations stay small and large B gives a multi-step grid
    # (overlap + v7x dual-TensorCore sharding).  Raise block_b (and
    # vmem_limit_bytes) to ~1024 on v5e/v6e for extra MXU efficiency.
    TB = min(256, _round_up(B, 8)) if block_b is None else block_b
    assert TB % 8 == 0, "batch tile must be a multiple of 8 sublanes"
    B_pad = _round_up(B, TB)

    x_flat = jnp.pad(x.reshape(B, Nx), ((0, B_pad - B), (0, 0)))

    def build(single_buffer_weights):
        def wspec(w):
            nd = w.ndim
            idx = lambda i, _nd=nd: (0,) * _nd
            if single_buffer_weights:
                # constant across grid steps -> no need to double-buffer
                return pl.BlockSpec(w.shape, idx, pipeline_mode=pl.Buffered(1))
            return pl.BlockSpec(w.shape, idx)

        in_specs = [pl.BlockSpec((TB, Nx), lambda i: (i, 0))]
        in_specs += [wspec(w) for w in fused]
        out_specs = pl.BlockSpec((TB, out_cols), lambda i: (i, 0))

        return pl.pallas_call(
            fno1d_kernel,
            out_shape=jax.ShapeDtypeStruct((B_pad, out_cols), jnp.float32),
            grid=(B_pad // TB,),
            in_specs=in_specs,
            out_specs=out_specs,
            compiler_params=pltpu.CompilerParams(
                dimension_semantics=("parallel",),     # batch: no carried state
                vmem_limit_bytes=vmem_limit_bytes),
        )

    try:
        out = build(True)(x_flat, *fused)
    except Exception:
        # Fallback if this JAX/Mosaic build rejects pipeline_mode=Buffered(1);
        # identical math, just default double-buffered weights.
        out = build(False)(x_flat, *fused)

    return out[:B, :S][..., None]                         # crop padding -> (B, S, 1)


# ---------------------------------------------------------------------------
# Host-side: synthetic raw parameters + exact operator folding (float64).
# ---------------------------------------------------------------------------
def init_raw_params(key):
    """Deterministic synthetic parameters with the module's shapes/layouts."""
    W, M, H = WIDTH, MODES, HIDDEN
    ks = jax.random.split(key, 10)

    def uni(k, shape, bound):
        return np.asarray(jax.random.uniform(k, shape, jnp.float32, -bound, bound),
                          np.float64)

    pw = uni(ks[0], (W, 2), 1.0 / np.sqrt(2.0))            # linear_p.weight (W, 2)
    pb = uni(ks[1], (W,), 1.0 / np.sqrt(2.0))              # linear_p.bias
    scale = 1.0 / (W * W)
    # SpectralConv1d.weights1 (complex), torch layout [in, out, modes]
    wr = scale * np.asarray(jax.random.uniform(ks[2], (N_LAYERS, W, W, M)), np.float64)
    wi = scale * np.asarray(jax.random.uniform(ks[3], (N_LAYERS, W, W, M)), np.float64)
    cw = uni(ks[4], (N_LAYERS, W, W), 1.0 / np.sqrt(W))    # Conv1d(k=1) weight [l, out, in]
    cb = uni(ks[5], (N_LAYERS, W), 1.0 / np.sqrt(W))       # Conv1d bias
    qw = uni(ks[6], (H, W), 1.0 / np.sqrt(W))              # linear_q.weight
    qb = uni(ks[7], (H,), 1.0 / np.sqrt(W))                # linear_q.bias
    ow = uni(ks[8], (1, H), 1.0 / np.sqrt(H))              # output_layer.weight
    ob = uni(ks[9], (1,), 1.0 / np.sqrt(H))                # output_layer.bias
    return dict(pw=pw, pb=pb, wr=wr, wi=wi, cw=cw, cb=cb,
                qw=qw, qb=qb, ow=ow, ob=ob)


def _layer_operator(wc, cw_l, cb_l, Lp):
    """Exact dense operator of one fourier layer (pre-tanh) on (W, Lp) images,
    flattened row-major: out_flat = in_flat @ A + bias.  Built by applying the
    exact reference ops (np.fft based) to the identity basis."""
    W = cw_l.shape[0]
    Nv = W * Lp
    E = np.eye(Nv, dtype=np.float64).reshape(Nv, W, Lp)
    xft = np.fft.rfft(E, axis=-1)
    out_ft = np.zeros((Nv, W, Lp // 2 + 1), dtype=np.complex128)
    out_ft[:, :, :MODES] = np.einsum('bix,iox->box', xft[:, :, :MODES], wc)
    spec = np.fft.irfft(out_ft, n=Lp, axis=-1)
    conv = np.einsum('oi,bil->bol', cw_l, E)
    A = (spec + conv).reshape(Nv, Nv)
    bias = np.repeat(cb_l, Lp)                             # bias[o*Lp + l] = cb[o]
    return A, bias


def _lift_operator(pw, pb, S, Lp):
    """x.reshape(B, S*2) @ L + lb  ==  flatten(pad(permute(linear_p(x))))."""
    W, Cin = pw.shape
    Nx = S * Cin
    E = np.eye(Nx, dtype=np.float64).reshape(Nx, S, Cin)
    h = np.transpose(E @ pw.T, (0, 2, 1))                  # (Nx, W, S)
    L = np.pad(h, ((0, 0), (0, 0), (0, Lp - S))).reshape(Nx, W * Lp)
    bimg = np.pad(np.broadcast_to(pb, (S, W)).T, ((0, 0), (0, Lp - S)))
    return L, bimg.reshape(W * Lp)


def _proj_operators(qw, qb, ow, ob, S, Lp):
    """crop + permute + linear_q, and output_layer, as dense matrices."""
    H, W = qw.shape
    Nv = W * Lp
    E = np.eye(Nv, dtype=np.float64).reshape(Nv, W, Lp)
    vt = np.transpose(E[:, :, :S], (0, 2, 1))              # (Nv, S, W)
    Q = (vt @ qw.T).reshape(Nv, S * H)
    qbias = np.broadcast_to(qb, (S, H)).reshape(S * H)
    Eq = np.eye(S * H, dtype=np.float64).reshape(S * H, S, H)
    O = (Eq @ ow.T).reshape(S * H, S)
    obias = np.broadcast_to(ob, (S,))
    return Q, qbias, O, obias


def fold_params(raw, S):
    """Fold lift / spectral / conv / projection into the kernel operand list,
    zero-padded to lane-aligned (multiple-of-128) shapes (math unchanged)."""
    Lp = S + PADDING
    assert MODES <= Lp // 2 + 1
    W, H = WIDTH, HIDDEN
    Nv = W * Lp
    NvP = _round_up(Nv, 128)        # 736 -> 768
    SH = S * H
    SHp = _round_up(SH, 128)        # 512 -> 512
    OutP = _round_up(S, 128)        # 16  -> 128 (lane-dense output)

    ops, biases = [], []
    for li in range(N_LAYERS):
        wc = raw['wr'][li] + 1j * raw['wi'][li]
        A, b = _layer_operator(wc, raw['cw'][li], raw['cb'][li], Lp)
        ops.append(A)
        biases.append(b)

    L, lb = _lift_operator(raw['pw'], raw['pb'], S, Lp)
    la1 = L @ ops[0]                                       # fold lift into layer 1
    b1 = lb @ ops[0] + biases[0]

    Q, qbias, O, obias = _proj_operators(raw['qw'], raw['qb'],
                                         raw['ow'], raw['ob'], S, Lp)

    def padc(a, cols):              # zero-pad last dim
        return np.pad(a, [(0, 0)] * (a.ndim - 1) + [(0, cols - a.shape[-1])])

    la1 = padc(la1, NvP)                                   # (Nx, NvP)
    b1 = padc(b1, NvP)
    a2 = np.pad(ops[1], ((0, NvP - Nv), (0, NvP - Nv)))    # (NvP, NvP)
    b2 = padc(biases[1], NvP)
    a3 = np.pad(ops[2], ((0, NvP - Nv), (0, NvP - Nv)))
    b3 = padc(biases[2], NvP)
    Qp = np.pad(Q, ((0, NvP - Nv), (0, SHp - SH)))         # (NvP, SHp)
    qbp = padc(qbias, SHp)
    Op = np.pad(O, ((0, SHp - SH), (0, OutP - S)))         # (SHp, OutP)
    obp = padc(obias, OutP)

    def f32(a): return jnp.asarray(a, jnp.float32)
    def bf16(a): return jnp.asarray(a, jnp.bfloat16)
    def row(a): return jnp.asarray(a, jnp.float32)[None, :]

    return (f32(la1), row(b1),
            bf16(a2), row(b2),
            bf16(a3), row(b3),
            bf16(Qp), row(qbp),
            f32(Op), row(obp))


# ---------------------------------------------------------------------------
# float64 numpy replica of the PyTorch FNO1d.forward (np.fft based).
# ---------------------------------------------------------------------------
def reference_forward(x, raw):
    x = np.asarray(x, np.float64)
    B, S, _ = x.shape
    W, M, P = WIDTH, MODES, PADDING
    Lp = S + P

    h = x @ raw['pw'].T + raw['pb']                        # linear_p
    v = np.pad(np.transpose(h, (0, 2, 1)), ((0, 0), (0, 0), (0, P)))
    for li in range(N_LAYERS):
        xft = np.fft.rfft(v, axis=-1)
        wc = raw['wr'][li] + 1j * raw['wi'][li]            # (in, out, modes)
        out_ft = np.zeros((B, W, Lp // 2 + 1), dtype=np.complex128)
        out_ft[:, :, :M] = np.einsum('bix,iox->box', xft[:, :, :M], wc)
        spec = np.fft.irfft(out_ft, n=Lp, axis=-1)
        conv = np.einsum('oi,bil->bol', raw['cw'][li], v) + raw['cb'][li][None, :, None]
        v = np.tanh(spec + conv)
    v = np.transpose(v[:, :, :S], (0, 2, 1))               # (B, S, W)
    q = np.tanh(v @ raw['qw'].T + raw['qb'])
    return q @ raw['ow'].T + raw['ob']                     # (B, S, 1)


if __name__ == "__main__":
    B, S = 2, 16                       # input: (batch, x=S, c=2) as in the module
    key = jax.random.PRNGKey(0)
    kx, kp = jax.random.split(key)
    x = jax.random.normal(kx, (B, S, 2), dtype=jnp.float32)

    raw = init_raw_params(kp)
    fused = fold_params(raw, S)

    out = fno1d_forward(x, fused)
    out = jax.block_until_ready(out)

    ref = reference_forward(np.asarray(x), raw)
    np.testing.assert_allclose(np.asarray(out), ref, rtol=5e-2, atol=5e-2)
    assert out.shape == (B, S, 1) and out.dtype == jnp.float32
    print("KERNEL_OK")
</pallas_src>

<mosaic_0001>
module attributes {stable_mosaic.version = 11 : i64} {
  func.func @fno1d_kernel(%arg0: i32, %arg1: memref<8x32xf32, #tpu.memory_space<vmem>>, %arg2: memref<32x768xf32, #tpu.memory_space<vmem>>, %arg3: memref<1x768xf32, #tpu.memory_space<vmem>>, %arg4: memref<768x768xbf16, #tpu.memory_space<vmem>>, %arg5: memref<1x768xf32, #tpu.memory_space<vmem>>, %arg6: memref<768x768xbf16, #tpu.memory_space<vmem>>, %arg7: memref<1x768xf32, #tpu.memory_space<vmem>>, %arg8: memref<768x512xbf16, #tpu.memory_space<vmem>>, %arg9: memref<1x512xf32, #tpu.memory_space<vmem>>, %arg10: memref<512x128xf32, #tpu.memory_space<vmem>>, %arg11: memref<1x128xf32, #tpu.memory_space<vmem>>, %arg12: memref<8x128xf32, #tpu.memory_space<vmem>>) attributes {dimension_semantics = [#tpu.dimension_semantics<parallel>], iteration_bounds = array<i64: 1>, scalar_prefetch = 0 : i64, scratch_operands = 0 : i64, tpu.core_type = #tpu.core_type<tc>, window_params = [{transform_indices = @transform_0, window_bounds = array<i64: 8, 32>}, {pipeline_mode = #tpu.pipeline_mode<synchronous>, transform_indices = @transform_1, window_bounds = array<i64: 32, 768>}, {pipeline_mode = #tpu.pipeline_mode<synchronous>, transform_indices = @transform_2, window_bounds = array<i64: 1, 768>}, {pipeline_mode = #tpu.pipeline_mode<synchronous>, transform_indices = @transform_3, window_bounds = array<i64: 768, 768>}, {pipeline_mode = #tpu.pipeline_mode<synchronous>, transform_indices = @transform_4, window_bounds = array<i64: 1, 768>}, {pipeline_mode = #tpu.pipeline_mode<synchronous>, transform_indices = @transform_5, window_bounds = array<i64: 768, 768>}, {pipeline_mode = #tpu.pipeline_mode<synchronous>, transform_indices = @transform_6, window_bounds = array<i64: 1, 768>}, {pipeline_mode = #tpu.pipeline_mode<synchronous>, transform_indices = @transform_7, window_bounds = array<i64: 768, 512>}, {pipeline_mode = #tpu.pipeline_mode<synchronous>, transform_indices = @transform_8, window_bounds = array<i64: 1, 512>}, {pipeline_mode = #tpu.pipeline_mode<synchronous>, transform_indices = @transform_9, window_bounds = array<i64: 512, 128>}, {pipeline_mode = #tpu.pipeline_mode<synchronous>, transform_indices = @transform_10, window_bounds = array<i64: 1, 128>}, {transform_indices = @transform_11, window_bounds = array<i64: 8, 128>}]} {
    %c0 = arith.constant 0 : index
    %c0_0 = arith.constant 0 : index
    %0 = vector.load %arg1[%c0, %c0_0] : memref<8x32xf32, #tpu.memory_space<vmem>>, vector<8x32xf32>
    %c0_1 = arith.constant 0 : index
    %c0_2 = arith.constant 0 : index
    %1 = vector.load %arg2[%c0_1, %c0_2] : memref<32x768xf32, #tpu.memory_space<vmem>>, vector<32x768xf32>
    %cst = arith.constant dense<0.000000e+00> : vector<8x768xf32>
    %2 = tpu.matmul %0, %1, %cst {dimension_numbers = #tpu.dot_dimension_numbers<[1], [0], [0], [1], [0, 0, 1, 1], [], []>} : vector<8x32xf32>, vector<32x768xf32>, vector<8x768xf32> -> vector<8x768xf32>
    %c0_3 = arith.constant 0 : index
    %c0_4 = arith.constant 0 : index
    %3 = vector.load %arg3[%c0_3, %c0_4] : memref<1x768xf32, #tpu.memory_space<vmem>>, vector<1x768xf32>
    %4 = vector.broadcast %3 : vector<1x768xf32> to vector<8x768xf32>
    %5 = arith.addf %2, %4 : vector<8x768xf32>
    %6 = arith.truncf %5 : vector<8x768xf32> to vector<8x768xbf16>
    %7 = math.tanh %6 : vector<8x768xbf16>
    %c0_5 = arith.constant 0 : index
    %c0_6 = arith.constant 0 : index
    %8 = vector.load %arg4[%c0_5, %c0_6] : memref<768x768xbf16, #tpu.memory_space<vmem>>, vector<768x768xbf16>
    %cst_7 = arith.constant dense<0.000000e+00> : vector<8x768xf32>
    %9 = tpu.matmul %7, %8, %cst_7 {dimension_numbers = #tpu.dot_dimension_numbers<[1], [0], [0], [1], [0, 0, 1, 1], [], []>} : vector<8x768xbf16>, vector<768x768xbf16>, vector<8x768xf32> -> vector<8x768xf32>
    %c0_8 = arith.constant 0 : index
    %c0_9 = arith.constant 0 : index
    %10 = vector.load %arg5[%c0_8, %c0_9] : memref<1x768xf32, #tpu.memory_space<vmem>>, vector<1x768xf32>
    %11 = vector.broadcast %10 : vector<1x768xf32> to vector<8x768xf32>
    %12 = arith.addf %9, %11 : vector<8x768xf32>
    %13 = arith.truncf %12 : vector<8x768xf32> to vector<8x768xbf16>
    %14 = math.tanh %13 : vector<8x768xbf16>
    %c0_10 = arith.constant 0 : index
    %c0_11 = arith.constant 0 : index
    %15 = vector.load %arg6[%c0_10, %c0_11] : memref<768x768xbf16, #tpu.memory_space<vmem>>, vector<768x768xbf16>
    %cst_12 = arith.constant dense<0.000000e+00> : vector<8x768xf32>
    %16 = tpu.matmul %14, %15, %cst_12 {dimension_numbers = #tpu.dot_dimension_numbers<[1], [0], [0], [1], [0, 0, 1, 1], [], []>} : vector<8x768xbf16>, vector<768x768xbf16>, vector<8x768xf32> -> vector<8x768xf32>
    %c0_13 = arith.constant 0 : index
    %c0_14 = arith.constant 0 : index
    %17 = vector.load %arg7[%c0_13, %c0_14] : memref<1x768xf32, #tpu.memory_space<vmem>>, vector<1x768xf32>
    %18 = vector.broadcast %17 : vector<1x768xf32> to vector<8x768xf32>
    %19 = arith.addf %16, %18 : vector<8x768xf32>
    %20 = arith.truncf %19 : vector<8x768xf32> to vector<8x768xbf16>
    %21 = math.tanh %20 : vector<8x768xbf16>
    %c0_15 = arith.constant 0 : index
    %c0_16 = arith.constant 0 : index
    %22 = vector.load %arg8[%c0_15, %c0_16] : memref<768x512xbf16, #tpu.memory_space<vmem>>, vector<768x512xbf16>
    %cst_17 = arith.constant dense<0.000000e+00> : vector<8x512xf32>
    %23 = tpu.matmul %21, %22, %cst_17 {dimension_numbers = #tpu.dot_dimension_numbers<[1], [0], [0], [1], [0, 0, 1, 1], [], []>} : vector<8x768xbf16>, vector<768x512xbf16>, vector<8x512xf32> -> vector<8x512xf32>
    %c0_18 = arith.constant 0 : index
    %c0_19 = arith.constant 0 : index
    %24 = vector.load %arg9[%c0_18, %c0_19] : memref<1x512xf32, #tpu.memory_space<vmem>>, vector<1x512xf32>
    %25 = vector.broadcast %24 : vector<1x512xf32> to vector<8x512xf32>
    %26 = arith.addf %23, %25 : vector<8x512xf32>
    %27 = math.tanh %26 : vector<8x512xf32>
    %c0_20 = arith.constant 0 : index
    %c0_21 = arith.constant 0 : index
    %28 = vector.load %arg10[%c0_20, %c0_21] : memref<512x128xf32, #tpu.memory_space<vmem>>, vector<512x128xf32>
    %cst_22 = arith.constant dense<0.000000e+00> : vector<8x128xf32>
    %29 = tpu.matmul %27, %28, %cst_22 {dimension_numbers = #tpu.dot_dimension_numbers<[1], [0], [0], [1], [0, 0, 1, 1], [], []>} : vector<8x512xf32>, vector<512x128xf32>, vector<8x128xf32> -> vector<8x128xf32>
    %c0_23 = arith.constant 0 : index
    %c0_24 = arith.constant 0 : index
    %30 = vector.load %arg11[%c0_23, %c0_24] : memref<1x128xf32, #tpu.memory_space<vmem>>, vector<1x128xf32>
    %31 = vector.broadcast %30 : vector<1x128xf32> to vector<8x128xf32>
    %32 = arith.addf %29, %31 : vector<8x128xf32>
    %c0_25 = arith.constant 0 : index
    %c0_26 = arith.constant 0 : index
    %33 = vector.load %arg12[%c0_25, %c0_26] : memref<8x128xf32, #tpu.memory_space<vmem>>, vector<8x128xf32>
    tpu.vector_store %arg12[%c0_25, %c0_26], %32 {strides = array<i32>} : memref<8x128xf32, #tpu.memory_space<vmem>>, vector<8x128xf32>,
    return
  }
  func.func @transform_0(%arg0: i32) -> (i32, i32) {
    %c0_i32 = arith.constant 0 : i32
    %c0_i32_0 = arith.constant 0 : i32
    return %arg0, %c0_i32 : i32, i32
  }
  func.func @transform_1(%arg0: i32) -> (i32, i32) {
    %c0_i32 = arith.constant 0 : i32
    %c0_i32_0 = arith.constant 0 : i32
    %c0_i32_1 = arith.constant 0 : i32
    return %c0_i32, %c0_i32_0 : i32, i32
  }
  func.func @transform_2(%arg0: i32) -> (i32, i32) {
    %c0_i32 = arith.constant 0 : i32
    %c0_i32_0 = arith.constant 0 : i32
    %c0_i32_1 = arith.constant 0 : i32
    return %c0_i32, %c0_i32_0 : i32, i32
  }
  func.func @transform_3(%arg0: i32) -> (i32, i32) {
    %c0_i32 = arith.constant 0 : i32
    %c0_i32_0 = arith.constant 0 : i32
    %c0_i32_1 = arith.constant 0 : i32
    return %c0_i32, %c0_i32_0 : i32, i32
  }
  func.func @transform_4(%arg0: i32) -> (i32, i32) {
    %c0_i32 = arith.constant 0 : i32
    %c0_i32_0 = arith.constant 0 : i32
    %c0_i32_1 = arith.constant 0 : i32
    return %c0_i32, %c0_i32_0 : i32, i32
  }
  func.func @transform_5(%arg0: i32) -> (i32, i32) {
    %c0_i32 = arith.constant 0 : i32
    %c0_i32_0 = arith.constant 0 : i32
    %c0_i32_1 = arith.constant 0 : i32
    return %c0_i32, %c0_i32_0 : i32, i32
  }
  func.func @transform_6(%arg0: i32) -> (i32, i32) {
    %c0_i32 = arith.constant 0 : i32
    %c0_i32_0 = arith.constant 0 : i32
    %c0_i32_1 = arith.constant 0 : i32
    return %c0_i32, %c0_i32_0 : i32, i32
  }
  func.func @transform_7(%arg0: i32) -> (i32, i32) {
    %c0_i32 = arith.constant 0 : i32
    %c0_i32_0 = arith.constant 0 : i32
    %c0_i32_1 = arith.constant 0 : i32
    return %c0_i32, %c0_i32_0 : i32, i32
  }
  func.func @transform_8(%arg0: i32) -> (i32, i32) {
    %c0_i32 = arith.constant 0 : i32
    %c0_i32_0 = arith.constant 0 : i32
    %c0_i32_1 = arith.constant 0 : i32
    return %c0_i32, %c0_i32_0 : i32, i32
  }
  func.func @transform_9(%arg0: i32) -> (i32, i32) {
    %c0_i32 = arith.constant 0 : i32
    %c0_i32_0 = arith.constant 0 : i32
    %c0_i32_1 = arith.constant 0 : i32
    return %c0_i32, %c0_i32_0 : i32, i32
  }
  func.func @transform_10(%arg0: i32) -> (i32, i32) {
    %c0_i32 = arith.constant 0 : i32
    %c0_i32_0 = arith.constant 0 : i32
    %c0_i32_1 = arith.constant 0 : i32
    return %c0_i32, %c0_i32_0 : i32, i32
  }
  func.func @transform_11(%arg0: i32) -> (i32, i32) {
    %c0_i32 = arith.constant 0 : i32
    %c0_i32_0 = arith.constant 0 : i32
    return %arg0, %c0_i32 : i32, i32
  }
}

module attributes {stable_mosaic.version = 11 : i64} {
  func.func @fno1d_kernel(%arg0: i32, %arg1: memref<8x32xf32, #tpu.memory_space<vmem>>, %arg2: memref<32x768xf32, #tpu.memory_space<vmem>>, %arg3: memref<1x768xf32, #tpu.memory_space<vmem>>, %arg4: memref<768x768xbf16, #tpu.memory_space<vmem>>, %arg5: memref<1x768xf32, #tpu.memory_space<vmem>>, %arg6: memref<768x768xbf16, #tpu.memory_space<vmem>>, %arg7: memref<1x768xf32, #tpu.memory_space<vmem>>, %arg8: memref<768x512xbf16, #tpu.memory_space<vmem>>, %arg9: memref<1x512xf32, #tpu.memory_space<vmem>>, %arg10: memref<512x128xf32, #tpu.memory_space<vmem>>, %arg11: memref<1x128xf32, #tpu.memory_space<vmem>>, %arg12: memref<8x128xf32, #tpu.memory_space<vmem>>) attributes {dimension_semantics = [#tpu.dimension_semantics<parallel>], iteration_bounds = array<i64: 1>, scalar_prefetch = 0 : i64, scratch_operands = 0 : i64, tpu.core_type = #tpu.core_type<tc>, window_params = [{transform_indices = @transform_0, window_bounds = array<i64: 8, 32>}, {pipeline_mode = #tpu.pipeline_mode<synchronous>, transform_indices = @transform_1, window_bounds = array<i64: 32, 768>}, {pipeline_mode = #tpu.pipeline_mode<synchronous>, transform_indices = @transform_2, window_bounds = array<i64: 1, 768>}, {pipeline_mode = #tpu.pipeline_mode<synchronous>, transform_indices = @transform_3, window_bounds = array<i64: 768, 768>}, {pipeline_mode = #tpu.pipeline_mode<synchronous>, transform_indices = @transform_4, window_bounds = array<i64: 1, 768>}, {pipeline_mode = #tpu.pipeline_mode<synchronous>, transform_indices = @transform_5, window_bounds = array<i64: 768, 768>}, {pipeline_mode = #tpu.pipeline_mode<synchronous>, transform_indices = @transform_6, window_bounds = array<i64: 1, 768>}, {pipeline_mode = #tpu.pipeline_mode<synchronous>, transform_indices = @transform_7, window_bounds = array<i64: 768, 512>}, {pipeline_mode = #tpu.pipeline_mode<synchronous>, transform_indices = @transform_8, window_bounds = array<i64: 1, 512>}, {pipeline_mode = #tpu.pipeline_mode<synchronous>, transform_indices = @transform_9, window_bounds = array<i64: 512, 128>}, {pipeline_mode = #tpu.pipeline_mode<synchronous>, transform_indices = @transform_10, window_bounds = array<i64: 1, 128>}, {transform_indices = @transform_11, window_bounds = array<i64: 8, 128>}]} {
    %c0 = arith.constant 0 : index
    %c0_0 = arith.constant 0 : index
    %0 = vector.load %arg1[%c0, %c0_0] : memref<8x32xf32, #tpu.memory_space<vmem>>, vector<8x32xf32>
    %c0_1 = arith.constant 0 : index
    %c0_2 = arith.constant 0 : index
    %1 = vector.load %arg2[%c0_1, %c0_2] : memref<32x768xf32, #tpu.memory_space<vmem>>, vector<32x768xf32>
    %cst = arith.constant dense<0.000000e+00> : vector<8x768xf32>
    %2 = tpu.matmul %0, %1, %cst {dimension_numbers = #tpu.dot_dimension_numbers<[1], [0], [0], [1], [0, 0, 1, 1], [], []>} : vector<8x32xf32>, vector<32x768xf32>, vector<8x768xf32> -> vector<8x768xf32>
    %c0_3 = arith.constant 0 : index
    %c0_4 = arith.constant 0 : index
    %3 = vector.load %arg3[%c0_3, %c0_4] : memref<1x768xf32, #tpu.memory_space<vmem>>, vector<1x768xf32>
    %4 = vector.broadcast %3 : vector<1x768xf32> to vector<8x768xf32>
    %5 = arith.addf %2, %4 : vector<8x768xf32>
    %6 = arith.truncf %5 : vector<8x768xf32> to vector<8x768xbf16>
    %7 = math.tanh %6 : vector<8x768xbf16>
    %c0_5 = arith.constant 0 : index
    %c0_6 = arith.constant 0 : index
    %8 = vector.load %arg4[%c0_5, %c0_6] : memref<768x768xbf16, #tpu.memory_space<vmem>>, vector<768x768xbf16>
    %cst_7 = arith.constant dense<0.000000e+00> : vector<8x768xf32>
    %9 = tpu.matmul %7, %8, %cst_7 {dimension_numbers = #tpu.dot_dimension_numbers<[1], [0], [0], [1], [0, 0, 1, 1], [], []>} : vector<8x768xbf16>, vector<768x768xbf16>, vector<8x768xf32> -> vector<8x768xf32>
    %c0_8 = arith.constant 0 : index
    %c0_9 = arith.constant 0 : index
    %10 = vector.load %arg5[%c0_8, %c0_9] : memref<1x768xf32, #tpu.memory_space<vmem>>, vector<1x768xf32>
    %11 = vector.broadcast %10 : vector<1x768xf32> to vector<8x768xf32>
    %12 = arith.addf %9, %11 : vector<8x768xf32>
    %13 = arith.truncf %12 : vector<8x768xf32> to vector<8x768xbf16>
    %14 = math.tanh %13 : vector<8x768xbf16>
    %c0_10 = arith.constant 0 : index
    %c0_11 = arith.constant 0 : index
    %15 = vector.load %arg6[%c0_10, %c0_11] : memref<768x768xbf16, #tpu.memory_space<vmem>>, vector<768x768xbf16>
    %cst_12 = arith.constant dense<0.000000e+00> : vector<8x768xf32>
    %16 = tpu.matmul %14, %15, %cst_12 {dimension_numbers = #tpu.dot_dimension_numbers<[1], [0], [0], [1], [0, 0, 1, 1], [], []>} : vector<8x768xbf16>, vector<768x768xbf16>, vector<8x768xf32> -> vector<8x768xf32>
    %c0_13 = arith.constant 0 : index
    %c0_14 = arith.constant 0 : index
    %17 = vector.load %arg7[%c0_13, %c0_14] : memref<1x768xf32, #tpu.memory_space<vmem>>, vector<1x768xf32>
    %18 = vector.broadcast %17 : vector<1x768xf32> to vector<8x768xf32>
    %19 = arith.addf %16, %18 : vector<8x768xf32>
    %20 = arith.truncf %19 : vector<8x768xf32> to vector<8x768xbf16>
    %21 = math.tanh %20 : vector<8x768xbf16>
    %c0_15 = arith.constant 0 : index
    %c0_16 = arith.constant 0 : index
    %22 = vector.load %arg8[%c0_15, %c0_16] : memref<768x512xbf16, #tpu.memory_space<vmem>>, vector<768x512xbf16>
    %cst_17 = arith.constant dense<0.000000e+00> : vector<8x512xf32>
    %23 = tpu.matmul %21, %22, %cst_17 {dimension_numbers = #tpu.dot_dimension_numbers<[1], [0], [0], [1], [0, 0, 1, 1], [], []>} : vector<8x768xbf16>, vector<768x512xbf16>, vector<8x512xf32> -> vector<8x512xf32>
    %c0_18 = arith.constant 0 : index
    %c0_19 = arith.constant 0 : index
    %24 = vector.load %arg9[%c0_18, %c0_19] : memref<1x512xf32, #tpu.memory_space<vmem>>, vector<1x512xf32>
    %25 = vector.broadcast %24 : vector<1x512xf32> to vector<8x512xf32>
    %26 = arith.addf %23, %25 : vector<8x512xf32>
    %27 = math.tanh %26 : vector<8x512xf32>
    %c0_20 = arith.constant 0 : index
    %c0_21 = arith.constant 0 : index
    %28 = vector.load %arg10[%c0_20, %c0_21] : memref<512x128xf32, #tpu.memory_space<vmem>>, vector<512x128xf32>
    %cst_22 = arith.constant dense<0.000000e+00> : vector<8x128xf32>
    %29 = tpu.matmul %27, %28, %cst_22 {dimension_numbers = #tpu.dot_dimension_numbers<[1], [0], [0], [1], [0, 0, 1, 1], [], []>} : vector<8x512xf32>, vector<512x128xf32>, vector<8x128xf32> -> vector<8x128xf32>
    %c0_23 = arith.constant 0 : index
    %c0_24 = arith.constant 0 : index
    %30 = vector.load %arg11[%c0_23, %c0_24] : memref<1x128xf32, #tpu.memory_space<vmem>>, vector<1x128xf32>
    %31 = vector.broadcast %30 : vector<1x128xf32> to vector<8x128xf32>
    %32 = arith.addf %29, %31 : vector<8x128xf32>
    %c0_25 = arith.constant 0 : index
    %c0_26 = arith.constant 0 : index
    %33 = vector.load %arg12[%c0_25, %c0_26] : memref<8x128xf32, #tpu.memory_space<vmem>>, vector<8x128xf32>
    tpu.vector_store %arg12[%c0_25, %c0_26], %32 {strides = array<i32>} : memref<8x128xf32, #tpu.memory_space<vmem>>, vector<8x128xf32>,
    return
  }
  func.func @transform_0(%arg0: i32) -> (i32, i32) {
    %c0_i32 = arith.constant 0 : i32
    %c0_i32_0 = arith.constant 0 : i32
    return %arg0, %c0_i32 : i32, i32
  }
  func.func @transform_1(%arg0: i32) -> (i32, i32) {
    %c0_i32 = arith.constant 0 : i32
    %c0_i32_0 = arith.constant 0 : i32
    %c0_i32_1 = arith.constant 0 : i32
    return %c0_i32, %c0_i32_0 : i32, i32
  }
  func.func @transform_2(%arg0: i32) -> (i32, i32) {
    %c0_i32 = arith.constant 0 : i32
    %c0_i32_0 = arith.constant 0 : i32
    %c0_i32_1 = arith.constant 0 : i32
    return %c0_i32, %c0_i32_0 : i32, i32
  }
  func.func @transform_3(%arg0: i32) -> (i32, i32) {
    %c0_i32 = arith.constant 0 : i32
    %c0_i32_0 = arith.constant 0 : i32
    %c0_i32_1 = arith.constant 0 : i32
    return %c0_i32, %c0_i32_0 : i32, i32
  }
  func.func @transform_4(%arg0: i32) -> (i32, i32) {
    %c0_i32 = arith.constant 0 : i32
    %c0_i32_0 = arith.constant 0 : i32
    %c0_i32_1 = arith.constant 0 : i32
    return %c0_i32, %c0_i32_0 : i32, i32
  }
  func.func @transform_5(%arg0: i32) -> (i32, i32) {
    %c0_i32 = arith.constant 0 : i32
    %c0_i32_0 = arith.constant 0 : i32
    %c0_i32_1 = arith.constant 0 : i32
    return %c0_i32, %c0_i32_0 : i32, i32
  }
  func.func @transform_6(%arg0: i32) -> (i32, i32) {
    %c0_i32 = arith.constant 0 : i32
    %c0_i32_0 = arith.constant 0 : i32
    %c0_i32_1 = arith.constant 0 : i32
    return %c0_i32, %c0_i32_0 : i32, i32
  }
  func.func @transform_7(%arg0: i32) -> (i32, i32) {
    %c0_i32 = arith.constant 0 : i32
    %c0_i32_0 = arith.constant 0 : i32
    %c0_i32_1 = arith.constant 0 : i32
    return %c0_i32, %c0_i32_0 : i32, i32
  }
  func.func @transform_8(%arg0: i32) -> (i32, i32) {
    %c0_i32 = arith.constant 0 : i32
    %c0_i32_0 = arith.constant 0 : i32
    %c0_i32_1 = arith.constant 0 : i32
    return %c0_i32, %c0_i32_0 : i32, i32
  }
  func.func @transform_9(%arg0: i32) -> (i32, i32) {
    %c0_i32 = arith.constant 0 : i32
    %c0_i32_0 = arith.constant 0 : i32
    %c0_i32_1 = arith.constant 0 : i32
    return %c0_i32, %c0_i32_0 : i32, i32
  }
  func.func @transform_10(%arg0: i32) -> (i32, i32) {
    %c0_i32 = arith.constant 0 : i32
    %c0_i32_0 = arith.constant 0 : i32
    %c0_i32_1 = arith.constant 0 : i32
    return %c0_i32, %c0_i32_0 : i32, i32
  }
  func.func @transform_11(%arg0: i32) -> (i32, i32) {
    %c0_i32 = arith.constant 0 : i32
    %c0_i32_0 = arith.constant 0 : i32
    return %arg0, %c0_i32 : i32, i32
  }
}

</mosaic_0001>

<bundles_post_ra>
// kernel: tpu_custom_call.1
= control target key start
LH: loop header
LB: loop body
LE: loop exit
PB: predicated region body
PF: predicated region fallthrough
CT: control target
= control target key end

     0   :  { %16 = vsyncpa [#allocation3], 0  ;;  %s9062_s0 = inlined_call_operand.hbm [shape: f32[8,32], index: 0, kind: input, shape index: {}]   ;;  %s9063_s1 = inlined_call_operand.hbm [shape: f32[32,768], index: 1, kind: input, shape index: {}]   ;;  %s9064_s2 = inlined_call_operand.hbm [shape: f32[1,768], index: 2, kind: input, shape index: {}]   ;;  %s9065_s3 = inlined_call_operand.hbm [shape: bf16[768,768], index: 3, kind: input, shape index: {}]   ;;  %s9066_s4 = inlined_call_operand.hbm [shape: f32[1,768], index: 4, kind: input, shape index: {}]   ;;  %s9067_s5 = inlined_call_operand.hbm [shape: bf16[768,768], index: 5, kind: input, shape index: {}]   ;;  %s9068_s6 = inlined_call_operand.hbm [shape: f32[1,768], index: 6, kind: input, shape index: {}]   ;;  %s9069_s7 = inlined_call_operand.hbm [shape: bf16[768,512], index: 7, kind: input, shape index: {}]   ;;  %s9070_s8 = inlined_call_operand.hbm [shape: f32[1,512], index: 8, kind: input, shape index: {}]   ;;  %s9071_s9 = inlined_call_operand.hbm [shape: f32[512,128], index: 9, kind: input, shape index: {}]   ;;  %s9072_s10 = inlined_call_operand.hbm [shape: f32[1,128], index: 10, kind: input, shape index: {}]   ;;  %s9073_s11 = inlined_call_operand.hbm [shape: f32[8,128], index: 11, kind: output, shape index: {}]  }
   0x1   :  { %17 = vsyncpa [#allocation6], 0 }
   0x2   :  { %18 = vsyncpa [#allocation9], 0 }
   0x3   :  { %19 = vsyncpa [#allocation12], 0 }
   0x4   :  { %20 = vsyncpa [#allocation15], 0 }
   0x5   :  { %21 = vsyncpa [#allocation18], 0 }
   0x6   :  { %22 = vsyncpa [#allocation4], 0  ;;  %s8713_s17 = smov [#allocation5]  }
   0x7   :  { %s38_s18 = sshll.u32 %s8713_s17, 4  ;;  %s39_s18 = int_to_ptr.vmem [resolvable:$true] %s38_s18 }
   0x8   :  { %s8467_s19 = scalar_lea.vmem %s39_s18, 3072  ;;  %p8472_p1 = scmp.lt.s32.totalorder %s39_s18, %s39_s18 }
   0x9   :  { %p8468_p0 = scmp.ne.s32.totalorder %s39_s18, %s8467_s19  ;;  %p8473_p2 = scmp.lt.s32.totalorder %s8467_s19, %s8467_s19 }
   0xb   :  { %p8474_p3 = por %p8473_p2, %p8472_p1 }
   0xd   :  { %p8475_p4 = pnand %p8474_p3, %p8468_p0 }
   0xf   :  { %8478 = shalt.err (!%p8475_p4)
}
  0x10   :  { %s8714_s20 = smov 768   ;;  %s8715_s21 = smov 48  }
  0x11   :  { %44 = dma.hbm_to_vmem [thread:$0]  %s9063_s1, 3072, %s39_s18, [#allocation6], %s8714_s20, %s8714_s20, %s8715_s21  }
  0x12   :  { %s8716_s24 = smov [#allocation8]  }
  0x13   :  { %s60_s25 = sshll.u32 %s8716_s24, 4  ;;  %s61_s25 = int_to_ptr.vmem [resolvable:$true] %s60_s25 }
  0x14   :  { %s8487_s26 = scalar_lea.vmem %s61_s25, 36864  ;;  %p8492_p6 = scmp.lt.s32.totalorder %s61_s25, %s61_s25 }
  0x15   :  { %p8488_p5 = scmp.ne.s32.totalorder %s61_s25, %s8487_s26  ;;  %p8493_p7 = scmp.lt.s32.totalorder %s8487_s26, %s8487_s26 }
  0x17   :  { %p8494_p8 = por %p8493_p7, %p8492_p6 }
  0x19   :  { %p8495_p9 = pnand %p8494_p8, %p8488_p5 }
  0x1b   :  { %8498 = shalt.err (!%p8495_p9)
}
  0x1c   :  { %s8717_s27 = smov 384   ;;  %s8718_s28 = smov 24  }
  0x1d   :  { %66 = dma.hbm_to_vmem [thread:$0]  %s9065_s3, 36864, %s61_s25, [#allocation9], %s8717_s27, %s8717_s27, %s8718_s28  }
  0x1e   :  { %s8719_s12 = smov [#allocation11]   ;;  %s8720_s14 = smov [#allocation14]  }
  0x1f   :  { %s82_s13 = sshll.u32 %s8719_s12, 4  ;;  %s104_s1 = sshll.u32 %s8720_s14, 4  ;;  %s83_s13 = int_to_ptr.vmem [resolvable:$true] %s82_s13  ;;  %s105_s1 = int_to_ptr.vmem [resolvable:$true] %s104_s1 }
  0x20   :  { %s8507_s15 = scalar_lea.vmem %s83_s13, 36864  ;;  %p8512_p11 = scmp.lt.s32.totalorder %s83_s13, %s83_s13 }
  0x21   :  { %p8508_p10 = scmp.ne.s32.totalorder %s83_s13, %s8507_s15  ;;  %p8513_p12 = scmp.lt.s32.totalorder %s8507_s15, %s8507_s15 }
  0x23   :  { %p8514_p13 = por %p8513_p12, %p8512_p11 }
  0x25   :  { %p8515_p0 = pnand %p8514_p13, %p8508_p10 }
  0x27   :  { %8518 = shalt.err (!%p8515_p0)
}
  0x28   :  { %88 = dma.hbm_to_vmem [thread:$0]  %s9067_s5, 36864, %s83_s13, [#allocation12], %s8717_s27, %s8717_s27, %s8718_s28  }
  0x29   :  { %s8527_s18 = scalar_lea.vmem %s105_s1, 24576  ;;  %p8532_p2 = scmp.lt.s32.totalorder %s105_s1, %s105_s1 }
  0x2a   :  { %p8528_p1 = scmp.ne.s32.totalorder %s105_s1, %s8527_s18  ;;  %p8533_p3 = scmp.lt.s32.totalorder %s8527_s18, %s8527_s18 }
  0x2c   :  { %p8534_p4 = por %p8533_p3, %p8532_p2 }
  0x2e   :  { %p8535_p5 = pnand %p8534_p4, %p8528_p1 }
  0x30   :  { %8538 = shalt.err (!%p8535_p5)
}
  0x31   :  { %s8721_s3 = smov 256   ;;  %s8722_s19 = smov 16  }
  0x32   :  { %110 = dma.hbm_to_vmem [thread:$0]  %s9069_s7, 24576, %s105_s1, [#allocation15], %s8721_s3, %s8721_s3, %s8722_s19  }
  0x33   :  { %s8723_s22 = smov [#allocation17]  }
  0x34   :  { %s126_s23 = sshll.u32 %s8723_s22, 4  ;;  %s127_s23 = int_to_ptr.vmem [resolvable:$true] %s126_s23 }
  0x35   :  { %s8547_s24 = scalar_lea.vmem %s127_s23, 8192  ;;  %p8552_p7 = scmp.lt.s32.totalorder %s127_s23, %s127_s23 }
  0x36   :  { %p8548_p6 = scmp.ne.s32.totalorder %s127_s23, %s8547_s24  ;;  %p8553_p8 = scmp.lt.s32.totalorder %s8547_s24, %s8547_s24 }
  0x38   :  { %p8554_p9 = por %p8553_p8, %p8552_p7 }
  0x3a   :  { %p8555_p10 = pnand %p8554_p9, %p8548_p6 }
  0x3c   :  { %8558 = shalt.err (!%p8555_p10)
}
  0x3d   :  { %s8724_s5 = smov 128   ;;  %s8725_s25 = smov 8  }
  0x3e   :  { %132 = dma.hbm_to_vmem [thread:$0]  %s9071_s9, 8192, %s127_s23, [#allocation18], %s8724_s5, %s8724_s5, %s8725_s25  }
  0x3f   :  { %s8726_s28 = smov [#allocation2]   ;;  %s8727_s7 = smov [#allocation7]  }
  0x40   :  { %s29_s29 = sshll.u32 %s8726_s28, 4  ;;  %s51_s30 = sshll.u32 %s8727_s7, 4  ;;  %s30_s29 = int_to_ptr.vmem [resolvable:$true] %s29_s29  ;;  %s52_s30 = int_to_ptr.vmem [resolvable:$true] %s51_s30 }
  0x41   :  { %s8567_s12 = scalar_lea.vmem %s30_s29, 128  ;;  %p8572_p12 = scmp.lt.s32.totalorder %s30_s29, %s30_s29 }
  0x42   :  { %p8568_p11 = scmp.ne.s32.totalorder %s30_s29, %s8567_s12  ;;  %p8573_p13 = scmp.lt.s32.totalorder %s8567_s12, %s8567_s12 }
  0x44   :  { %p8574_p0 = por %p8573_p13, %p8572_p12 }
  0x46   :  { %p8575_p1 = pnand %p8574_p0, %p8568_p11 }
  0x48   :  { %8578 = shalt.err (!%p8575_p1)
}
  0x49   :  { %32 = dma.hbm_to_vmem [thread:$0]  %s9062_s0, 128, %s30_s29, [#allocation3]  }
  0x4a   :  { %s8587_s1 = scalar_lea.vmem %s52_s30, 96  ;;  %p8592_p3 = scmp.lt.s32.totalorder %s52_s30, %s52_s30 }
  0x4b   :  { %p8588_p2 = scmp.ne.s32.totalorder %s52_s30, %s8587_s1  ;;  %p8593_p4 = scmp.lt.s32.totalorder %s8587_s1, %s8587_s1 }
  0x4d   :  { %p8594_p5 = por %p8593_p4, %p8592_p3 }
  0x4f   :  { %p8595_p6 = pnand %p8594_p5, %p8588_p2 }
  0x51   :  { %8598 = shalt.err (!%p8595_p6)
}
  0x52   :  { %54 = dma.hbm_to_vmem [thread:$0]  %s9064_s2, 96, %s52_s30, [#allocation6]  }
  0x53   :  { %s8728_s16 = smov [#allocation10]   ;;  %s8729_s18 = smov [#allocation13]  }
  0x54   :  { %s73_s17 = sshll.u32 %s8728_s16, 4  ;;  %s95_s3 = sshll.u32 %s8729_s18, 4  ;;  %s74_s17 = int_to_ptr.vmem [resolvable:$true] %s73_s17  ;;  %s96_s3 = int_to_ptr.vmem [resolvable:$true] %s95_s3 }
  0x55   :  { %s8607_s19 = scalar_lea.vmem %s74_s17, 96  ;;  %p8612_p8 = scmp.lt.s32.totalorder %s74_s17, %s74_s17 }
  0x56   :  { %p8608_p7 = scmp.ne.s32.totalorder %s74_s17, %s8607_s19  ;;  %p8613_p9 = scmp.lt.s32.totalorder %s8607_s19, %s8607_s19 }
  0x58   :  { %p8614_p10 = por %p8613_p9, %p8612_p8 }
  0x5a   :  { %p8615_p11 = pnand %p8614_p10, %p8608_p7 }
  0x5c   :  { %8618 = shalt.err (!%p8615_p11)
}
  0x5d   :  { %76 = dma.hbm_to_vmem [thread:$0]  %s9066_s4, 96, %s74_s17, [#allocation9]  }
  0x5e   :  { %s8627_s21 = scalar_lea.vmem %s96_s3, 96  ;;  %p8632_p13 = scmp.lt.s32.totalorder %s96_s3, %s96_s3 }
  0x5f   :  { %p8628_p12 = scmp.ne.s32.totalorder %s96_s3, %s8627_s21  ;;  %p8633_p0 = scmp.lt.s32.totalorder %s8627_s21, %s8627_s21 }
  0x61   :  { %p8634_p1 = por %p8633_p0, %p8632_p13 }
  0x63   :  { %p8635_p2 = pnand %p8634_p1, %p8628_p12 }
  0x65   :  { %8638 = shalt.err (!%p8635_p2)
}
  0x66   :  { %98 = dma.hbm_to_vmem [thread:$0]  %s9068_s6, 96, %s96_s3, [#allocation12]  }
  0x67   :  { %s8730_s23 = smov [#allocation16]   ;;  %s8731_s5 = smov [#allocation19]  }
  0x68   :  { %s117_s24 = sshll.u32 %s8730_s23, 4  ;;  %s139_s25 = sshll.u32 %s8731_s5, 4  ;;  %s118_s24 = int_to_ptr.vmem [resolvable:$true] %s117_s24  ;;  %s140_s25 = int_to_ptr.vmem [resolvable:$true] %s139_s25 }
  0x69   :  { %s8647_s26 = scalar_lea.vmem %s118_s24, 64  ;;  %p8652_p4 = scmp.lt.s32.totalorder %s118_s24, %s118_s24 }
  0x6a   :  { %p8648_p3 = scmp.ne.s32.totalorder %s118_s24, %s8647_s26  ;;  %p8653_p5 = scmp.lt.s32.totalorder %s8647_s26, %s8647_s26 }
  0x6c   :  { %p8654_p6 = por %p8653_p5, %p8652_p4 }
  0x6e   :  { %p8655_p7 = pnand %p8654_p6, %p8648_p3 }
  0x70   :  { %8658 = shalt.err (!%p8655_p7)
}
  0x71   :  { %120 = dma.hbm_to_vmem [thread:$0]  %s9070_s8, 64, %s118_s24, [#allocation15]  }
  0x72   :  { %s8667_s28 = scalar_lea.vmem %s140_s25, 16  ;;  %s8671_s6 = scalar_lea.vmem %s140_s25, 32 }
  0x73   :  { %p8668_p8 = scmp.ne.s32.totalorder %s140_s25, %s8667_s28  ;;  %p8672_p9 = scmp.lt.s32.totalorder %s140_s25, %s140_s25 }
  0x74   :  { %p8673_p10 = scmp.lt.s32.totalorder %s8671_s6, %s8667_s28 }
  0x76   :  { %p8674_p11 = por %p8673_p10, %p8672_p9 }
  0x78   :  { %p8675_p12 = pnand %p8674_p11, %p8668_p8 }
  0x7a   :  { %8678 = shalt.err (!%p8675_p12)
}
  0x7b   :  { %142 = dma.hbm_to_vmem [thread:$0]  %s9072_s10, 16, %s140_s25, [#allocation18]  }
  0x7c   :  { %8699 = dma.done.wait [#allocation3], 128  }
  0x7d   :  { %8700 = vsyncadd [#allocation3], 4294967168 }
  0x7e   :  { %8701 = dma.done.wait [#allocation6], 3168  }
  0x7f   :  { %8702 = vsyncadd [#allocation6], 4294964128 }
  0x80   :  { %8703 = dma.done.wait [#allocation9], 36960  }
  0x81   :  { %8704 = vsyncadd [#allocation9], 4294930336 }
  0x82   :  { %8705 = dma.done.wait [#allocation12], 36960  }
  0x83   :  { %8706 = vsyncadd [#allocation12], 4294930336 }
  0x84   :  { %8707 = dma.done.wait [#allocation15], 24640  }
  0x85   :  { %8708 = vsyncadd [#allocation15], 4294942656 }
  0x86   :  { %8709 = dma.done.wait [#allocation18], 8208  }
  0x87   :  { %8710 = vsyncadd [#allocation18], 4294959088  ;;  %v8732_v0 = vmov 0.0   ;;  %v196_v1 = vld [vmem:[#allocation5 + $0x98] sm:$0xff]  ;;  %v198_v2 = vld [vmem:[#allocation5 + $0xa8] sm:$0xff]  ;;  %vm233_vm0 = vcmask 261120  }
  0x88   :  { %301 = vmatprep.mubr.f32.mxu0 %v8732_v0  ;;  %372 = vmatprep.mubr.f32.mxu1 %v8732_v0  ;;  %v195_v3 = vld [vmem:[#allocation5 + $0x90] sm:$0xff]  ;;  %v197_v4 = vld [vmem:[#allocation5 + $0xa0] sm:$0xff]  ;;  %v190_v5 = vld [vmem:[#allocation5 + $0x68] sm:$0xff]  ;;  %s8733_s8 = smov [#allocation20]  }
  0x89   :  { %261 = vmatprep.subr.mxu0 %v196_v1  ;;  %332 = vmatprep.subr.mxu1 %v198_v2  ;;  %v192_v6 = vld [vmem:[#allocation5 + $0x78] sm:$0xff]  ;;  %v189_v7 = vld [vmem:[#allocation5 + $0x60] sm:$0xff]  ;;  %v191_v8 = vld [vmem:[#allocation5 + $0x70] sm:$0xff]  ;;  %s6386_s10 = sshll.u32 %s8733_s8, 4  ;;  %s6387_s10 = int_to_ptr.vmem [resolvable:$true] %s6386_s10 }
  0x8a   :  { %262 = vmatpush1.msra.mxu0 %v195_v3  ;;  %333 = vmatpush1.msra.mxu1 %v197_v4  ;;  %v184_v9 = vld [vmem:[#allocation5 + $0x38] sm:$0xff]  ;;  %v186_v10 = vld [vmem:[#allocation5 + $0x48] sm:$0xff]  ;;  %v183_v11 = vld [vmem:[#allocation5 + $0x30] sm:$0xff]  ;;  %s8679_s30 = scalar_lea.vmem %s6387_s10, 128  ;;  %p8684_p0 = scmp.lt.s32.totalorder %s6387_s10, %s6387_s10 }
  0x8b   :  { %263 = vmatprep.subr.mxu0 %v190_v5  ;;  %334 = vmatprep.subr.mxu1 %v192_v6  ;;  %v185_v12 = vld [vmem:[#allocation5 + $0x40] sm:$0xff]  ;;  %v178_v13 = vld [vmem:[#allocation5 + $0x8] sm:$0xff]  ;;  %v180_v14 = vld [vmem:[#allocation5 + $0x18] sm:$0xff]  ;;  %p8680_p13 = scmp.ne.s32.totalorder %s6387_s10, %s8679_s30  ;;  %p8685_p1 = scmp.lt.s32.totalorder %s8679_s30, %s8679_s30 }
  0x8c   :  { %264 = vmatpush1.msra.mxu0 %v189_v7  ;;  %335 = vmatpush1.msra.mxu1 %v191_v8  ;;  %v177_v15 = vld [vmem:[#allocation5] sm:$0xff]  ;;  %v179_v16 = vld [vmem:[#allocation5 + $0x10] sm:$0xff]  ;;  %v176_v17 = vld [vmem:[#allocation2] sm:$0xff] }
  0x8d   :  { %265 = vmatprep.subr.mxu0 %v184_v9  ;;  %336 = vmatprep.subr.mxu1 %v186_v10  ;;  %v200_v18 = vld [vmem:[#allocation5 + $0xb8] sm:$0xff]  ;;  %v199_v19 = vld [vmem:[#allocation5 + $0xb0] sm:$0xff]  ;;  %v194_v20 = vld [vmem:[#allocation5 + $0x88] sm:$0xff]  ;;  %p8686_p2 = por %p8685_p1, %p8684_p0 }
  0x8e   :  { %266 = vmatpush1.msra.mxu0 %v183_v11  ;;  %337 = vmatpush1.msra.mxu1 %v185_v12  ;;  %v193_v21 = vld [vmem:[#allocation5 + $0x80] sm:$0xff]  ;;  %v7263_v22 = vld [vmem:[#allocation8 + $0x150] ss:$24 sps:$4 sm:$0xff]   ;;  %v7265_v23 = vld [vmem:[#allocation8 + $0x154] ss:$24 sps:$4 sm:$0xff]  }
  0x8f   :  { %267 = vmatprep.subr.mxu0 %v178_v13  ;;  %338 = vmatprep.subr.mxu1 %v180_v14  ;;  %v188_v24 = vld [vmem:[#allocation5 + $0x58] sm:$0xff]  ;;  %v187_v25 = vld [vmem:[#allocation5 + $0x50] sm:$0xff]  ;;  %v182_v26 = vld [vmem:[#allocation5 + $0x28] sm:$0xff]  ;;  %p8687_p3 = pnand %p8686_p2, %p8680_p13 }
  0x90   :  { %268 = vmatpush1.msra.mxu0 %v177_v15  ;;  %339 = vmatpush1.msra.mxu1 %v179_v16  ;;  %v7269_v27 = vld [vmem:[#allocation8 + $0x120] ss:$24 sps:$4 sm:$0xff]   ;;  %v7271_v28 = vld [vmem:[#allocation8 + $0x124] ss:$24 sps:$4 sm:$0xff]   ;;  %v7266_v30 = vld [vmem:[#allocation8 + $0x450] ss:$24 sps:$4 sm:$0xff]  }
  0x91   :  { %6400 = vmatmul.mubr.msk.f32.vlgmr.msra.gmra.mxu0 %vm233_vm0, %v176_v17  ;;  %6401 = vmatmul.mubr.msk.f32.vlgmr.msra.gmra.mxu1 %vm233_vm0, %v176_v17  ;;  %v181_v29 = vld [vmem:[#allocation5 + $0x20] sm:$0xff]  ;;  %v7268_v31 = vld [vmem:[#allocation8 + $0x454] ss:$24 sps:$4 sm:$0xff]   ;;  %v7275_v34 = vld [vmem:[#allocation8 + $0xf0] ss:$24 sps:$4 sm:$0xff]  }
  0x92   :  { %403 = vmatprep.subr.mxu0 %v200_v18  ;;  %443 = vmatprep.mubr.f32.mxu0 %v8732_v0  ;;  %v7277_v32 = vld [vmem:[#allocation8 + $0xf4] ss:$24 sps:$4 sm:$0xff]   ;;  %v7274_v33 = vld [vmem:[#allocation8 + $0x424] ss:$24 sps:$4 sm:$0xff]   ;;  %v7272_v36 = vld [vmem:[#allocation8 + $0x420] ss:$24 sps:$4 sm:$0xff]  }
  0x93   :  { %404 = vmatpush1.msra.mxu0 %v199_v19  ;;  %2222 = vmatprep.subr.bf16.mxu1 %v7265_v23  ;;  %v7283_v35 = vld [vmem:[#allocation8 + $0xc4] ss:$24 sps:$4 sm:$0xff]   ;;  %v7280_v37 = vld [vmem:[#allocation8 + $0x3f4] ss:$24 sps:$4 sm:$0xff]   ;;  %v7281_v38 = vld [vmem:[#allocation8 + $0xc0] ss:$24 sps:$4 sm:$0xff]  }
  0x94   :  { %405 = vmatprep.subr.mxu0 %v194_v20  ;;  %2223 = vmatpush1.bf16.msra.mxu1 %v7263_v22  ;;  %v7289_v39 = vld [vmem:[#allocation8 + $0x94] ss:$24 sps:$4 sm:$0xff]   ;;  %v7278_v40 = vld [vmem:[#allocation8 + $0x3f0] ss:$24 sps:$4 sm:$0xff]   ;;  %v7286_v41 = vld [vmem:[#allocation8 + $0x3c4] ss:$24 sps:$4 sm:$0xff]  }
  0x95   :  { %406 = vmatpush1.msra.mxu0 %v193_v21  ;;  %2224 = vmatprep.subr.bf16.mxu1 %v7271_v28  ;;  %v7287_v42 = vld [vmem:[#allocation8 + $0x90] ss:$24 sps:$4 sm:$0xff]   ;;  %v7295_v43 = vld [vmem:[#allocation8 + $0x64] ss:$24 sps:$4 sm:$0xff]   ;;  %v7284_v44 = vld [vmem:[#allocation8 + $0x3c0] ss:$24 sps:$4 sm:$0xff]   ;;  %v203_v28 = vlaneseq }
  0x96   :  { %407 = vmatprep.subr.mxu0 %v188_v24  ;;  %v7292_v45 = vld [vmem:[#allocation8 + $0x394] ss:$24 sps:$4 sm:$0xff]   ;;  %v7293_v46 = vld [vmem:[#allocation8 + $0x60] ss:$24 sps:$4 sm:$0xff]   ;;  %v7290_v48 = vld [vmem:[#allocation8 + $0x390] ss:$24 sps:$4 sm:$0xff]  }
  0x97   :  { %408 = vmatpush1.msra.mxu0 %v187_v25  ;;  %v7301_v47 = vld [vmem:[#allocation8 + $0x34] ss:$24 sps:$4 sm:$0xff]   ;;  %v7298_v49 = vld [vmem:[#allocation8 + $0x364] ss:$24 sps:$4 sm:$0xff]   ;;  %v7299_v50 = vld [vmem:[#allocation8 + $0x30] ss:$24 sps:$4 sm:$0xff]  }
  0x98   :  { %409 = vmatprep.subr.mxu0 %v182_v26  ;;  %2225 = vmatpush1.bf16.msra.mxu1 %v7269_v27  ;;  %v7307_v51 = vld [vmem:[#allocation8 + $0x4] ss:$24 sps:$4 sm:$0xff]   ;;  %v7296_v52 = vld [vmem:[#allocation8 + $0x360] ss:$24 sps:$4 sm:$0xff]   ;;  %v7304_v53 = vld [vmem:[#allocation8 + $0x334] ss:$24 sps:$4 sm:$0xff]  }
  0x99   :  { %410 = vmatpush1.msra.mxu0 %v181_v29  ;;  %2226 = vmatprep.subr.bf16.mxu1 %v7277_v32  ;;  %v7305_v54 = vld [vmem:[#allocation8] ss:$24 sps:$4 sm:$0xff]   ;;  %v7302_v55 = vld [vmem:[#allocation8 + $0x330] ss:$24 sps:$4 sm:$0xff]   ;;  %v7313_v56 = vld [vmem:[#allocation8 + $0x2d4] ss:$24 sps:$4 sm:$0xff]  }
  0x9a   :  { %6402 = vmatmul.mubr.msk.f32.vlgmr.msra.gmra.mxu0 %vm233_vm0, %v176_v17  ;;  %2263 = vmatprep.subr.bf16.mxu0 %v7268_v31  ;;  %v7310_v57 = vld [vmem:[#allocation8 + $0x304] ss:$24 sps:$4 sm:$0xff]   ;;  %v7311_v58 = vld [vmem:[#allocation8 + $0x2d0] ss:$24 sps:$4 sm:$0xff]   ;;  %v7308_v60 = vld [vmem:[#allocation8 + $0x300] ss:$24 sps:$4 sm:$0xff]  }
  0x9b   :  { %2264 = vmatpush1.bf16.msra.mxu0 %v7266_v30  ;;  %v7319_v59 = vld [vmem:[#allocation8 + $0x2a4] ss:$24 sps:$4 sm:$0xff]   ;;  %v7316_v61 = vld [vmem:[#allocation8 + $0x5d4] ss:$24 sps:$4 sm:$0xff]   ;;  %v7317_v62 = vld [vmem:[#allocation8 + $0x2a0] ss:$24 sps:$4 sm:$0xff]  }
  0x9c   :  { %2265 = vmatprep.subr.bf16.mxu0 %v7274_v33  ;;  %2227 = vmatpush1.bf16.msra.mxu1 %v7275_v34  ;;  %v7325_v63 = vld [vmem:[#allocation8 + $0x274] ss:$24 sps:$4 sm:$0xff]   ;;  %v7314_v0 = vld [vmem:[#allocation8 + $0x5d0] ss:$24 sps:$4 sm:$0xff]   ;;  %v7322_v1 = vld [vmem:[#allocation8 + $0x5a4] ss:$24 sps:$4 sm:$0xff]  }
  0x9d   :  { %2228 = vmatprep.subr.bf16.mxu1 %v7283_v35  ;;  %v7323_v2 = vld [vmem:[#allocation8 + $0x270] ss:$24 sps:$4 sm:$0xff]   ;;  %v7320_v3 = vld [vmem:[#allocation8 + $0x5a0] ss:$24 sps:$4 sm:$0xff]   ;;  %v7328_v4 = vld [vmem:[#allocation8 + $0x574] ss:$24 sps:$4 sm:$0xff]  }
  0x9e   :  { %v7326_v5 = vld [vmem:[#allocation8 + $0x570] ss:$24 sps:$4 sm:$0xff]   ;;  %v7331_v6 = vld [vmem:[#allocation8 + $0x244] ss:$24 sps:$4 sm:$0xff]   ;;  %v7329_v8 = vld [vmem:[#allocation8 + $0x240] ss:$24 sps:$4 sm:$0xff]  }
  0x9f   :  { %2266 = vmatpush1.bf16.msra.mxu0 %v7272_v36  ;;  %v7334_v7 = vld [vmem:[#allocation8 + $0x544] ss:$24 sps:$4 sm:$0xff]   ;;  %v7332_v9 = vld [vmem:[#allocation8 + $0x540] ss:$24 sps:$4 sm:$0xff]   ;;  %v7337_v10 = vld [vmem:[#allocation8 + $0x214] ss:$24 sps:$4 sm:$0xff]  }
  0xa0   :  { %2267 = vmatprep.subr.bf16.mxu0 %v7280_v37  ;;  %2229 = vmatpush1.bf16.msra.mxu1 %v7281_v38  ;;  %v7340_v11 = vld [vmem:[#allocation8 + $0x514] ss:$24 sps:$4 sm:$0xff]   ;;  %v7335_v12 = vld [vmem:[#allocation8 + $0x210] ss:$24 sps:$4 sm:$0xff]   ;;  %v7341_v14 = vld [vmem:[#allocation8 + $0x1e0] ss:$24 sps:$4 sm:$0xff]  }
  0xa1   :  { %2230 = vmatprep.subr.bf16.mxu1 %v7289_v39  ;;  %v7338_v13 = vld [vmem:[#allocation8 + $0x510] ss:$24 sps:$4 sm:$0xff]   ;;  %v7343_v15 = vld [vmem:[#allocation8 + $0x1e4] ss:$24 sps:$4 sm:$0xff]   ;;  %v7344_v16 = vld [vmem:[#allocation8 + $0x4e0] ss:$24 sps:$4 sm:$0xff]  }
  0xa2   :  { %v7346_v17 = vld [vmem:[#allocation8 + $0x4e4] ss:$24 sps:$4 sm:$0xff]   ;;  %v7349_v18 = vld [vmem:[#allocation8 + $0x1b4] ss:$24 sps:$4 sm:$0xff]   ;;  %v7347_v19 = vld [vmem:[#allocation8 + $0x1b0] ss:$24 sps:$4 sm:$0xff]  }
  0xa3   :  { %2268 = vmatpush1.bf16.msra.mxu0 %v7278_v40  ;;  %v7352_v20 = vld [vmem:[#allocation8 + $0x4b4] ss:$24 sps:$4 sm:$0xff]   ;;  %v7350_v21 = vld [vmem:[#allocation8 + $0x4b0] ss:$24 sps:$4 sm:$0xff]   ;;  %v7355_v22 = vld [vmem:[#allocation8 + $0x184] ss:$24 sps:$4 sm:$0xff]  }
  0xa4   :  { %2269 = vmatprep.subr.bf16.mxu0 %v7286_v41  ;;  %2231 = vmatpush1.bf16.msra.mxu1 %v7287_v42  ;;  %v7358_v23 = vld [vmem:[#allocation8 + $0x484] ss:$24 sps:$4 sm:$0xff]   ;;  %v7353_v24 = vld [vmem:[#allocation8 + $0x180] ss:$24 sps:$4 sm:$0xff]   ;;  %v7361_v26 = vld [vmem:[#allocation8 + $0x754] ss:$24 sps:$4 sm:$0xff]  }
  0xa5   :  { %2232 = vmatprep.subr.bf16.mxu1 %v7295_v43  ;;  %v7356_v25 = vld [vmem:[#allocation8 + $0x480] ss:$24 sps:$4 sm:$0xff]   ;;  %v7364_v27 = vld [vmem:[#allocation8 + $0x15c] ss:$24 sps:$4 sm:$0xff]   ;;  %v8830_v29 = vshrl.u32 %v203_v28, 7 }
  0xa6   :  { %v8838_v32 = vld [vmem:[#allocation7] sm:$0x3f]  ;;  %v7409_v28 = vld [vmem:[#allocation8 + $0x8d4] ss:$24 sps:$4 sm:$0xff]  }
  0xa7   :  { %2270 = vmatpush1.bf16.msra.mxu0 %v7284_v44  ;;  %v8833_v30 = vsub.s32 0, %v8830_v29  ;;  %v8836_v31 = vsub.s32 2, %v8830_v29  ;;  %v8841_v33 = vsub.s32 1, %v8830_v29  ;;  %v8844_v34 = vsub.s32 3, %v8830_v29 }
  0xa8   :  { %2271 = vmatprep.subr.bf16.mxu0 %v7292_v45  ;;  %2233 = vmatpush1.bf16.msra.mxu1 %v7293_v46 }
  0xa9   :  { %2234 = vmatprep.subr.bf16.mxu1 %v7301_v47  ;;  %v206_v35 = vrot.slane %v8838_v32, %v8833_v30  ;;  %v214_v36 = vrot.slane %v8838_v32, %v8836_v31  ;;  %v210_v37 = vrot.slane %v8838_v32, %v8841_v33  ;;  %v218_v38 = vrot.slane %v8838_v32, %v8844_v34 }
  0xab   :  { %2272 = vmatpush1.bf16.msra.mxu0 %v7290_v48 }
  0xac   :  { %2273 = vmatprep.subr.bf16.mxu0 %v7298_v49  ;;  %2235 = vmatpush1.bf16.msra.mxu1 %v7299_v50  ;;  %v8855_v49 = vsub.s32 5, %v8830_v29 }
  0xad   :  { %2236 = vmatprep.subr.bf16.mxu1 %v7307_v51 }
  0xaf   :  { %2274 = vmatpush1.bf16.msra.mxu0 %v7296_v52  ;;  %v226_v52 = vrot.slane %v8838_v32, %v8855_v49 }
  0xb0   :  { %2275 = vmatprep.subr.bf16.mxu0 %v7304_v53  ;;  %2237 = vmatpush1.bf16.msra.mxu1 %v7305_v54 }
  0xb1   :  { %2238 = vmatprep.subr.bf16.mxu1 %v7313_v56 }
  0xb3   :  { %2276 = vmatpush1.bf16.msra.mxu0 %v7302_v55 }
  0xb4   :  { %2277 = vmatprep.subr.bf16.mxu0 %v7310_v57  ;;  %2239 = vmatpush2.bf16.msra.mxu1 %v7311_v58  ;;  %v7359_v57 = vld [vmem:[#allocation8 + $0x750] ss:$24 sps:$4 sm:$0xff]  }
  0xb5   :  { %2240 = vmatprep.subr.bf16.mxu1 %v7319_v59  ;;  %v7362_v59 = vld [vmem:[#allocation8 + $0x158] ss:$24 sps:$4 sm:$0xff]  }
  0xb7   :  { %2278 = vmatpush1.bf16.msra.mxu0 %v7308_v60 }
  0xb8   :  { %2279 = vmatprep.subr.bf16.mxu0 %v7316_v61  ;;  %2241 = vmatpush2.bf16.msra.mxu1 %v7317_v62  ;;  %v7367_v61 = vld [vmem:[#allocation8 + $0x724] ss:$24 sps:$4 sm:$0xff]  }
  0xb9   :  { %2242 = vmatprep.subr.bf16.mxu1 %v7325_v63  ;;  %v7370_v62 = vld [vmem:[#allocation8 + $0x12c] ss:$24 sps:$4 sm:$0xff]  }
  0xbb   :  { %2280 = vmatpush2.bf16.msra.mxu0 %v7314_v0 }
  0xbc   :  { %2281 = vmatprep.subr.bf16.mxu0 %v7322_v1  ;;  %2243 = vmatpush2.bf16.msra.mxu1 %v7323_v2  ;;  %v7365_v1 = vld [vmem:[#allocation8 + $0x720] ss:$24 sps:$4 sm:$0xff]  }
  0xbd   :  { %2244 = vmatprep.subr.bf16.mxu1 %v7331_v6  ;;  %v7368_v2 = vld [vmem:[#allocation8 + $0x128] ss:$24 sps:$4 sm:$0xff]   ;;  %v7374_v6 = vld [vmem:[#allocation8 + $0xf8] ss:$24 sps:$4 sm:$0xff]  }
  0xbf   :  { %2282 = vmatpush2.bf16.msra.mxu0 %v7320_v3  ;;  %v7373_v3 = vld [vmem:[#allocation8 + $0x6f4] ss:$24 sps:$4 sm:$0xff]  }
  0xc0   :  { %2283 = vmatprep.subr.bf16.mxu0 %v7328_v4  ;;  %2245 = vmatpush2.bf16.msra.mxu1 %v7329_v8  ;;  %v7376_v4 = vld [vmem:[#allocation8 + $0xfc] ss:$24 sps:$4 sm:$0xff]  }
  0xc1   :  { %2246 = vmatprep.subr.bf16.mxu1 %v7337_v10  ;;  %v7382_v10 = vld [vmem:[#allocation8 + $0xcc] ss:$24 sps:$4 sm:$0xff]  }
  0xc3   :  { %2284 = vmatpush2.bf16.msra.mxu0 %v7326_v5  ;;  %v7371_v5 = vld [vmem:[#allocation8 + $0x6f0] ss:$24 sps:$4 sm:$0xff]  }
  0xc4   :  { %2285 = vmatprep.subr.bf16.mxu0 %v7334_v7  ;;  %2247 = vmatpush2.bf16.msra.mxu1 %v7335_v12  ;;  %v7379_v7 = vld [vmem:[#allocation8 + $0x6c4] ss:$24 sps:$4 sm:$0xff]   ;;  %v7385_v12 = vld [vmem:[#allocation8 + $0x694] ss:$24 sps:$4 sm:$0xff]  }
  0xc5   :  { %2248 = vmatprep.subr.bf16.mxu1 %v7343_v15  ;;  %v7386_v15 = vld [vmem:[#allocation8 + $0x98] ss:$24 sps:$4 sm:$0xff]  }
  0xc7   :  { %2286 = vmatpush2.bf16.msra.mxu0 %v7332_v9  ;;  %v7377_v9 = vld [vmem:[#allocation8 + $0x6c0] ss:$24 sps:$4 sm:$0xff]  }
  0xc8   :  { %2287 = vmatprep.subr.bf16.mxu0 %v7340_v11  ;;  %2249 = vmatpush2.bf16.msra.mxu1 %v7341_v14  ;;  %v7380_v11 = vld [vmem:[#allocation8 + $0xc8] ss:$24 sps:$4 sm:$0xff]   ;;  %v7388_v14 = vld [vmem:[#allocation8 + $0x9c] ss:$24 sps:$4 sm:$0xff]  }
  0xc9   :  { %2250 = vmatprep.subr.bf16.mxu1 %v7349_v18  ;;  %v7394_v18 = vld [vmem:[#allocation8 + $0x6c] ss:$24 sps:$4 sm:$0xff]  }
  0xcb   :  { %2288 = vmatpush2.bf16.msra.mxu0 %v7338_v13  ;;  %v7383_v13 = vld [vmem:[#allocation8 + $0x690] ss:$24 sps:$4 sm:$0xff]  }
  0xcc   :  { %2289 = vmatprep.subr.bf16.mxu0 %v7346_v17  ;;  %2251 = vmatpush2.bf16.msra.mxu1 %v7347_v19  ;;  %v7389_v17 = vld [vmem:[#allocation8 + $0x660] ss:$24 sps:$4 sm:$0xff]  }
  0xcd   :  { %2252 = vmatprep.subr.bf16.mxu1 %v7355_v22  ;;  %v7392_v19 = vld [vmem:[#allocation8 + $0x68] ss:$24 sps:$4 sm:$0xff]   ;;  %v7400_v22 = vld [vmem:[#allocation8 + $0x3c] ss:$24 sps:$4 sm:$0xff]  }
  0xcf   :  { %2290 = vmatpush2.bf16.msra.mxu0 %v7344_v16  ;;  %v7391_v16 = vld [vmem:[#allocation8 + $0x664] ss:$24 sps:$4 sm:$0xff]  }
  0xd0   :  { %2291 = vmatprep.subr.bf16.mxu0 %v7352_v20  ;;  %2253 = vmatpush2.bf16.msra.mxu1 %v7353_v24  ;;  %v7397_v20 = vld [vmem:[#allocation8 + $0x634] ss:$24 sps:$4 sm:$0xff]   ;;  %v7403_v24 = vld [vmem:[#allocation8 + $0x604] ss:$24 sps:$4 sm:$0xff]  }
  0xd1   :  { %2304 = vmatprep.subr.bf16.mxu1 %v7361_v26  ;;  %v7406_v26 = vld [vmem:[#allocation8 + $0xc] ss:$24 sps:$4 sm:$0xff]  }
  0xd3   :  { %2292 = vmatpush2.bf16.msra.mxu0 %v7350_v21  ;;  %v7395_v21 = vld [vmem:[#allocation8 + $0x630] ss:$24 sps:$4 sm:$0xff]  }
  0xd4   :  { %2293 = vmatprep.subr.bf16.mxu0 %v7358_v23  ;;  %v7398_v23 = vld [vmem:[#allocation8 + $0x38] ss:$24 sps:$4 sm:$0xff]  }
  0xd7   :  { %2294 = vmatpush2.bf16.msra.mxu0 %v7356_v25  ;;  %v7401_v25 = vld [vmem:[#allocation8 + $0x600] ss:$24 sps:$4 sm:$0xff]  }
  0xd8   :  { %2345 = vmatprep.subr.bf16.mxu0 %v7364_v27  ;;  %v7404_v27 = vld [vmem:[#allocation8 + $0x8] ss:$24 sps:$4 sm:$0xff]  }
 0x151   :  { %v303_v39 = vpop.f32.mrf.mxu0  ;;  %v374_v40 = vpop.f32.mrf.mxu1 }
 0x152   :  { %v304_v41 = vadd.f32 %v303_v39, %v206_v35  ;;  %v375_v42 = vadd.f32 %v374_v40, %v214_v36  ;;  %v7407_v35 = vld [vmem:[#allocation8 + $0x8d0] ss:$24 sps:$4 sm:$0xff]   ;;  %v7412_v36 = vld [vmem:[#allocation8 + $0x2dc] ss:$24 sps:$4 sm:$0xff]   ;;  %v7413_v39 = vld [vmem:[#allocation8 + $0x8a0] ss:$24 sps:$4 sm:$0xff]  }
 0x153   :  { %v305_v43 = vpop.f32.mrf.mxu0  ;;  %v376_v44 = vpop.f32.mrf.mxu1  ;;  %v7418_v40 = vld [vmem:[#allocation8 + $0x2ac] ss:$24 sps:$4 sm:$0xff]  }
 0x154   :  { %v450_v45 = vpack.c.bf16 %v304_v41, %v304_v41  ;;  %v452_v46 = vpack.c.bf16 %v375_v42, %v375_v42  ;;  %v306_v47 = vadd.f32 %v305_v43, %v210_v37  ;;  %v377_v48 = vadd.f32 %v376_v44, %v218_v38  ;;  %v7410_v37 = vld [vmem:[#allocation8 + $0x2d8] ss:$24 sps:$4 sm:$0xff]   ;;  %v7415_v38 = vld [vmem:[#allocation8 + $0x8a4] ss:$24 sps:$4 sm:$0xff]   ;;  %v7416_v42 = vld [vmem:[#allocation8 + $0x2a8] ss:$24 sps:$4 sm:$0xff]  }
 0x155   :  { %v8878_v41 = vsub.s32 4, %v8830_v29  ;;  %v7421_v43 = vld [vmem:[#allocation8 + $0x874] ss:$24 sps:$4 sm:$0xff]   ;;  %v7419_v44 = vld [vmem:[#allocation8 + $0x870] ss:$24 sps:$4 sm:$0xff]  }
 0x156   :  { %8415 = vtanh.bf16 %v450_v45  ;;  %v451_v50 = vpack.c.bf16 %v306_v47, %v306_v47  ;;  %v453_v51 = vpack.c.bf16 %v377_v48, %v377_v48  ;;  %v7424_v45 = vld [vmem:[#allocation8 + $0x27c] ss:$24 sps:$4 sm:$0xff]   ;;  %v7422_v47 = vld [vmem:[#allocation8 + $0x278] ss:$24 sps:$4 sm:$0xff]  }
 0x157   :  { %8417 = vtanh.bf16 %v452_v46  ;;  %v222_v46 = vrot.slane %v8838_v32, %v8878_v41  ;;  %v7427_v48 = vld [vmem:[#allocation8 + $0x844] ss:$24 sps:$4 sm:$0xff]   ;;  %v7434_v32 = vld [vmem:[#allocation8 + $0x218] ss:$24 sps:$4 sm:$0xff]  }
 0x158   :  { %8419 = vtanh.bf16 %v451_v50  ;;  %v7425_v50 = vld [vmem:[#allocation8 + $0x840] ss:$24 sps:$4 sm:$0xff]  }
 0x159   :  { %8421 = vtanh.bf16 %v453_v51  ;;  %v7430_v51 = vld [vmem:[#allocation8 + $0x24c] ss:$24 sps:$4 sm:$0xff]  }
 0x15a   :  { %v8859_v53 = vpop.f32.mrf.mxu0 }
 0x15b   :  { %v446_v29 = vadd.f32 %v8859_v53, %v222_v46  ;;  %v7440_v53 = vld [vmem:[#allocation8 + $0x1e8] ss:$24 sps:$4 sm:$0xff]   ;;  %v7499_v46 = vld [vmem:[#allocation8 + $0x30c] ss:$24 sps:$4 sm:$0xff]  }
 0x15c   :  { %v447_v54 = vpop.f32.mrf.mxu0 }
 0x15d   :  { %v448_v55 = vadd.f32 %v447_v54, %v226_v52  ;;  %v7428_v52 = vld [vmem:[#allocation8 + $0x248] ss:$24 sps:$4 sm:$0xff]   ;;  %v7433_v54 = vld [vmem:[#allocation8 + $0x814] ss:$24 sps:$4 sm:$0xff]  }
 0x15f   :  { %v455_v56 = vpack.c.bf16 %v448_v55, %v448_v55  ;;  %v7431_v55 = vld [vmem:[#allocation8 + $0x810] ss:$24 sps:$4 sm:$0xff]  }
 0x161   :  { %8423 = vtanh.bf16 %v455_v56  ;;  %v7436_v56 = vld [vmem:[#allocation8 + $0x21c] ss:$24 sps:$4 sm:$0xff]  }
 0x164   :  { %v8861_v58 = vpop.eup %8415 }
 0x165   :  { %v8863_v60 = vpop.eup %8417 }
 0x166   :  { %v8865_v63 = vpop.eup %8419 }
 0x167   :  { %v8867_v0 = vpop.eup %8421  ;;  %2254 = vmatprep.mubr.bf16.mxu1 %v8865_v63 }
 0x168   :  { %2295 = vmatprep.mubr.bf16.mxu0 %v8867_v0  ;;  %2255 = vmatmul.mubr.bf16.vlgmr.msra.gmra.mxu1 %v8861_v58 }
 0x169   :  { %2296 = vmatmul.mubr.bf16.vlgmr.msra.gmra.mxu0 %v8863_v60  ;;  %2305 = vmatpush1.bf16.msra.mxu1 %v7359_v57  ;;  %v454_v57 = vpack.c.bf16 %v446_v29, %v446_v29  ;;  %v7508_v29 = vld [vmem:[#allocation8 + $0x8dc] ss:$24 sps:$4 sm:$0xff]  }
 0x16a   :  { %2346 = vmatpush1.bf16.msra.mxu0 %v7362_v59  ;;  %2377 = vmatprep.mubr.bf16.mxu0 %v8865_v63  ;;  %v7439_v59 = vld [vmem:[#allocation8 + $0x7e4] ss:$24 sps:$4 sm:$0xff]  }
 0x16b   :  { %2306 = vmatprep.subr.bf16.mxu1 %v7367_v61  ;;  %2347 = vmatprep.subr.bf16.mxu0 %v7370_v62  ;;  %v7437_v61 = vld [vmem:[#allocation8 + $0x7e0] ss:$24 sps:$4 sm:$0xff]   ;;  %v7442_v62 = vld [vmem:[#allocation8 + $0x1ec] ss:$24 sps:$4 sm:$0xff]   ;;  %8425 = vtanh.bf16 %v454_v57 }
 0x16c   :  { %v7509_v57 = vld [vmem:[#allocation8 + $0x5a8] ss:$24 sps:$4 sm:$0xff]  }
 0x16d   :  { %2307 = vmatpush1.bf16.msra.mxu1 %v7365_v1  ;;  %v7445_v1 = vld [vmem:[#allocation8 + $0x7b4] ss:$24 sps:$4 sm:$0xff]  }
 0x16e   :  { %2348 = vmatpush1.bf16.msra.mxu0 %v7368_v2  ;;  %2308 = vmatprep.subr.bf16.mxu1 %v7373_v3  ;;  %v7443_v2 = vld [vmem:[#allocation8 + $0x7b0] ss:$24 sps:$4 sm:$0xff]   ;;  %v7448_v3 = vld [vmem:[#allocation8 + $0x1bc] ss:$24 sps:$4 sm:$0xff]  }
 0x16f   :  { %v8874_v8 = vpop.eup %8423  ;;  %2349 = vmatprep.subr.bf16.mxu0 %v7376_v4  ;;  %v7446_v4 = vld [vmem:[#allocation8 + $0x1b8] ss:$24 sps:$4 sm:$0xff]  }
 0x170   :  { %2336 = vmatprep.mubr.bf16.mxu1 %v8874_v8 }
 0x171   :  { %2309 = vmatpush1.bf16.msra.mxu1 %v7371_v5  ;;  %v7451_v5 = vld [vmem:[#allocation8 + $0x784] ss:$24 sps:$4 sm:$0xff]  }
 0x172   :  { %2350 = vmatpush1.bf16.msra.mxu0 %v7374_v6  ;;  %2310 = vmatprep.subr.bf16.mxu1 %v7379_v7  ;;  %v7449_v6 = vld [vmem:[#allocation8 + $0x780] ss:$24 sps:$4 sm:$0xff]   ;;  %v7454_v7 = vld [vmem:[#allocation8 + $0x18c] ss:$24 sps:$4 sm:$0xff]  }
 0x173   :  { %2351 = vmatprep.subr.bf16.mxu0 %v7382_v10  ;;  %v7457_v10 = vld [vmem:[#allocation8 + $0x45c] ss:$24 sps:$4 sm:$0xff]  }
 0x175   :  { %2311 = vmatpush1.bf16.msra.mxu1 %v7377_v9  ;;  %v7452_v9 = vld [vmem:[#allocation8 + $0x188] ss:$24 sps:$4 sm:$0xff]  }
 0x176   :  { %2352 = vmatpush1.bf16.msra.mxu0 %v7380_v11  ;;  %2312 = vmatprep.subr.bf16.mxu1 %v7385_v12  ;;  %v7460_v11 = vld [vmem:[#allocation8 + $0x75c] ss:$24 sps:$4 sm:$0xff]   ;;  %v7455_v12 = vld [vmem:[#allocation8 + $0x458] ss:$24 sps:$4 sm:$0xff]  }
 0x177   :  { %2353 = vmatprep.subr.bf16.mxu0 %v7388_v14  ;;  %v7463_v14 = vld [vmem:[#allocation8 + $0x42c] ss:$24 sps:$4 sm:$0xff]  }
 0x179   :  { %2313 = vmatpush1.bf16.msra.mxu1 %v7383_v13  ;;  %v7458_v13 = vld [vmem:[#allocation8 + $0x758] ss:$24 sps:$4 sm:$0xff]  }
 0x17a   :  { %2354 = vmatpush1.bf16.msra.mxu0 %v7386_v15  ;;  %2314 = vmatprep.subr.bf16.mxu1 %v7391_v16  ;;  %v8883_v15 = vpop.eup %8425  ;;  %v7461_v16 = vld [vmem:[#allocation8 + $0x428] ss:$24 sps:$4 sm:$0xff]  }
 0x17b   :  { %2355 = vmatprep.subr.bf16.mxu0 %v7394_v18  ;;  %v7464_v18 = vld [vmem:[#allocation8 + $0x728] ss:$24 sps:$4 sm:$0xff]  }
 0x17d   :  { %2315 = vmatpush1.bf16.msra.mxu1 %v7389_v17  ;;  %v7466_v17 = vld [vmem:[#allocation8 + $0x72c] ss:$24 sps:$4 sm:$0xff]  }
 0x17e   :  { %2356 = vmatpush1.bf16.msra.mxu0 %v7392_v19  ;;  %2316 = vmatprep.subr.bf16.mxu1 %v7397_v20  ;;  %v7469_v19 = vld [vmem:[#allocation8 + $0x3fc] ss:$24 sps:$4 sm:$0xff]   ;;  %v7467_v20 = vld [vmem:[#allocation8 + $0x3f8] ss:$24 sps:$4 sm:$0xff]  }
 0x17f   :  { %2357 = vmatprep.subr.bf16.mxu0 %v7400_v22  ;;  %v7470_v22 = vld [vmem:[#allocation8 + $0x6f8] ss:$24 sps:$4 sm:$0xff]  }
 0x181   :  { %2317 = vmatpush1.bf16.msra.mxu1 %v7395_v21  ;;  %v7472_v21 = vld [vmem:[#allocation8 + $0x6fc] ss:$24 sps:$4 sm:$0xff]  }
 0x182   :  { %2358 = vmatpush1.bf16.msra.mxu0 %v7398_v23  ;;  %2318 = vmatprep.subr.bf16.mxu1 %v7403_v24  ;;  %v7475_v23 = vld [vmem:[#allocation8 + $0x3cc] ss:$24 sps:$4 sm:$0xff]  }
 0x183   :  { %2359 = vmatprep.subr.bf16.mxu0 %v7406_v26  ;;  %v7478_v24 = vld [vmem:[#allocation8 + $0x6cc] ss:$24 sps:$4 sm:$0xff]   ;;  %v7476_v26 = vld [vmem:[#allocation8 + $0x6c8] ss:$24 sps:$4 sm:$0xff]  }
 0x185   :  { %2319 = vmatpush1.bf16.msra.mxu1 %v7401_v25  ;;  %v7473_v25 = vld [vmem:[#allocation8 + $0x3c8] ss:$24 sps:$4 sm:$0xff]  }
 0x186   :  { %2360 = vmatpush1.bf16.msra.mxu0 %v7404_v27  ;;  %2320 = vmatprep.subr.bf16.mxu1 %v7409_v28  ;;  %v7481_v27 = vld [vmem:[#allocation8 + $0x39c] ss:$24 sps:$4 sm:$0xff]  }
 0x187   :  { %2361 = vmatprep.subr.bf16.mxu0 %v7412_v36  ;;  %v7484_v28 = vld [vmem:[#allocation8 + $0x69c] ss:$24 sps:$4 sm:$0xff]   ;;  %v7482_v36 = vld [vmem:[#allocation8 + $0x698] ss:$24 sps:$4 sm:$0xff]  }
 0x189   :  { %2321 = vmatpush2.bf16.msra.mxu1 %v7407_v35  ;;  %v7479_v35 = vld [vmem:[#allocation8 + $0x398] ss:$24 sps:$4 sm:$0xff]  }
 0x18a   :  { %2362 = vmatpush2.bf16.msra.mxu0 %v7410_v37  ;;  %2322 = vmatprep.subr.bf16.mxu1 %v7415_v38  ;;  %v7487_v37 = vld [vmem:[#allocation8 + $0x36c] ss:$24 sps:$4 sm:$0xff]  }
 0x18b   :  { %2363 = vmatprep.subr.bf16.mxu0 %v7418_v40  ;;  %v7490_v38 = vld [vmem:[#allocation8 + $0x66c] ss:$24 sps:$4 sm:$0xff]   ;;  %v7488_v40 = vld [vmem:[#allocation8 + $0x668] ss:$24 sps:$4 sm:$0xff]  }
 0x18d   :  { %2323 = vmatpush2.bf16.msra.mxu1 %v7413_v39  ;;  %v7485_v39 = vld [vmem:[#allocation8 + $0x368] ss:$24 sps:$4 sm:$0xff]  }
 0x18e   :  { %2364 = vmatpush2.bf16.msra.mxu0 %v7416_v42  ;;  %2324 = vmatprep.subr.bf16.mxu1 %v7421_v43  ;;  %v7493_v42 = vld [vmem:[#allocation8 + $0x33c] ss:$24 sps:$4 sm:$0xff]  }
 0x18f   :  { %2365 = vmatprep.subr.bf16.mxu0 %v7424_v45  ;;  %v7496_v43 = vld [vmem:[#allocation8 + $0x63c] ss:$24 sps:$4 sm:$0xff]   ;;  %v7494_v45 = vld [vmem:[#allocation8 + $0x638] ss:$24 sps:$4 sm:$0xff]  }
 0x191   :  { %2325 = vmatpush2.bf16.msra.mxu1 %v7419_v44  ;;  %v7491_v44 = vld [vmem:[#allocation8 + $0x338] ss:$24 sps:$4 sm:$0xff]  }
 0x192   :  { %2366 = vmatpush2.bf16.msra.mxu0 %v7422_v47  ;;  %2326 = vmatprep.subr.bf16.mxu1 %v7427_v48  ;;  %v7502_v47 = vld [vmem:[#allocation8 + $0x60c] ss:$24 sps:$4 sm:$0xff]   ;;  %v7497_v48 = vld [vmem:[#allocation8 + $0x308] ss:$24 sps:$4 sm:$0xff]  }
 0x193   :  { %2367 = vmatprep.subr.bf16.mxu0 %v7430_v51  ;;  %v7505_v51 = vld [vmem:[#allocation8 + $0x5dc] ss:$24 sps:$4 sm:$0xff]  }
 0x195   :  { %2327 = vmatpush2.bf16.msra.mxu1 %v7425_v50  ;;  %v7500_v50 = vld [vmem:[#allocation8 + $0x608] ss:$24 sps:$4 sm:$0xff]  }
 0x196   :  { %2368 = vmatpush2.bf16.msra.mxu0 %v7428_v52  ;;  %2328 = vmatprep.subr.bf16.mxu1 %v7433_v54  ;;  %v7503_v52 = vld [vmem:[#allocation8 + $0x5d8] ss:$24 sps:$4 sm:$0xff]  }
 0x197   :  { %2369 = vmatprep.subr.bf16.mxu0 %v7436_v56  ;;  %v7506_v54 = vld [vmem:[#allocation8 + $0x8d8] ss:$24 sps:$4 sm:$0xff]   ;;  %v7514_v56 = vld [vmem:[#allocation8 + $0x8ac] ss:$24 sps:$4 sm:$0xff]  }
 0x199   :  { %2329 = vmatpush2.bf16.msra.mxu1 %v7431_v55  ;;  %v7511_v55 = vld [vmem:[#allocation8 + $0x5ac] ss:$24 sps:$4 sm:$0xff]  }
 0x19a   :  { %2370 = vmatpush2.bf16.msra.mxu0 %v7434_v32  ;;  %2330 = vmatprep.subr.bf16.mxu1 %v7439_v59  ;;  %v7512_v32 = vld [vmem:[#allocation8 + $0x8a8] ss:$24 sps:$4 sm:$0xff]   ;;  %v7517_v59 = vld [vmem:[#allocation8 + $0x57c] ss:$24 sps:$4 sm:$0xff]  }
 0x19b   :  { %2371 = vmatprep.subr.bf16.mxu0 %v7442_v62  ;;  %v7515_v62 = vld [vmem:[#allocation8 + $0x578] ss:$24 sps:$4 sm:$0xff]  }
 0x19d   :  { %2331 = vmatpush2.bf16.msra.mxu1 %v7437_v61  ;;  %v7520_v61 = vld [vmem:[#allocation8 + $0x87c] ss:$24 sps:$4 sm:$0xff]  }
 0x19e   :  { %2372 = vmatpush2.bf16.msra.mxu0 %v7440_v53  ;;  %2332 = vmatprep.subr.bf16.mxu1 %v7445_v1  ;;  %v7518_v53 = vld [vmem:[#allocation8 + $0x878] ss:$24 sps:$4 sm:$0xff]   ;;  %v7523_v1 = vld [vmem:[#allocation8 + $0x54c] ss:$24 sps:$4 sm:$0xff]  }
 0x19f   :  { %2373 = vmatprep.subr.bf16.mxu0 %v7448_v3  ;;  %v7521_v3 = vld [vmem:[#allocation8 + $0x548] ss:$24 sps:$4 sm:$0xff]  }
 0x1a1   :  { %2333 = vmatpush2.bf16.msra.mxu1 %v7443_v2  ;;  %v7526_v2 = vld [vmem:[#allocation8 + $0x84c] ss:$24 sps:$4 sm:$0xff]  }
 0x1a2   :  { %2374 = vmatpush2.bf16.msra.mxu0 %v7446_v4  ;;  %2334 = vmatprep.subr.bf16.mxu1 %v7451_v5  ;;  %v7524_v4 = vld [vmem:[#allocation8 + $0x848] ss:$24 sps:$4 sm:$0xff]   ;;  %v7529_v5 = vld [vmem:[#allocation8 + $0x51c] ss:$24 sps:$4 sm:$0xff]  }
 0x1a3   :  { %2375 = vmatprep.subr.bf16.mxu0 %v7454_v7  ;;  %v7527_v7 = vld [vmem:[#allocation8 + $0x518] ss:$24 sps:$4 sm:$0xff]  }
 0x1a5   :  { %2335 = vmatpush2.bf16.msra.mxu1 %v7449_v6  ;;  %v7532_v6 = vld [vmem:[#allocation8 + $0x81c] ss:$24 sps:$4 sm:$0xff]  }
 0x1a6   :  { %2376 = vmatpush2.bf16.msra.mxu0 %v7452_v9  ;;  %2386 = vmatprep.subr.bf16.mxu1 %v7457_v10  ;;  %v7530_v9 = vld [vmem:[#allocation8 + $0x818] ss:$24 sps:$4 sm:$0xff]   ;;  %v7535_v10 = vld [vmem:[#allocation8 + $0x4ec] ss:$24 sps:$4 sm:$0xff]  }
 0x1a7   :  { %2427 = vmatprep.subr.bf16.mxu0 %v7460_v11  ;;  %v7538_v11 = vld [vmem:[#allocation8 + $0x7ec] ss:$24 sps:$4 sm:$0xff]  }
 0x1a8   :  { %2337 = vmatmul.mubr.bf16.vlgmr.msra.gmra.mxu1 %v8883_v15 }
 0x1a9   :  { %2378 = vmatmul.mubr.bf16.vlgmr.msra.gmra.mxu0 %v8861_v58  ;;  %2387 = vmatpush1.bf16.msra.mxu1 %v7455_v12  ;;  %v7533_v12 = vld [vmem:[#allocation8 + $0x4e8] ss:$24 sps:$4 sm:$0xff]  }
 0x1aa   :  { %2418 = vmatprep.mubr.bf16.mxu1 %v8867_v0  ;;  %2428 = vmatpush1.bf16.msra.mxu0 %v7458_v13  ;;  %v7536_v13 = vld [vmem:[#allocation8 + $0x7e8] ss:$24 sps:$4 sm:$0xff]  }
 0x1ab   :  { %2459 = vmatprep.mubr.bf16.mxu0 %v8874_v8  ;;  %2388 = vmatprep.subr.bf16.mxu1 %v7463_v14  ;;  %v7541_v14 = vld [vmem:[#allocation8 + $0x4bc] ss:$24 sps:$4 sm:$0xff]  }
 0x1ac   :  { %2429 = vmatprep.subr.bf16.mxu0 %v7466_v17  ;;  %v7539_v17 = vld [vmem:[#allocation8 + $0x4b8] ss:$24 sps:$4 sm:$0xff]  }
 0x1ad   :  { %2389 = vmatpush1.bf16.msra.mxu1 %v7461_v16  ;;  %v7544_v16 = vld [vmem:[#allocation8 + $0x7bc] ss:$24 sps:$4 sm:$0xff]  }
 0x1ae   :  { %2430 = vmatpush1.bf16.msra.mxu0 %v7464_v18  ;;  %2390 = vmatprep.subr.bf16.mxu1 %v7469_v19  ;;  %v7542_v18 = vld [vmem:[#allocation8 + $0x7b8] ss:$24 sps:$4 sm:$0xff]   ;;  %v7547_v19 = vld [vmem:[#allocation8 + $0x48c] ss:$24 sps:$4 sm:$0xff]  }
 0x1af   :  { %2431 = vmatprep.subr.bf16.mxu0 %v7472_v21  ;;  %v7545_v21 = vld [vmem:[#allocation8 + $0x488] ss:$24 sps:$4 sm:$0xff]  }
 0x1b1   :  { %2391 = vmatpush1.bf16.msra.mxu1 %v7467_v20  ;;  %v7550_v20 = vld [vmem:[#allocation8 + $0x78c] ss:$24 sps:$4 sm:$0xff]  }
 0x1b2   :  { %2432 = vmatpush1.bf16.msra.mxu0 %v7470_v22  ;;  %2392 = vmatprep.subr.bf16.mxu1 %v7475_v23  ;;  %v7548_v22 = vld [vmem:[#allocation8 + $0x788] ss:$24 sps:$4 sm:$0xff]   ;;  %v7553_v23 = vld [vmem:[#allocation8 + $0x164] ss:$24 sps:$4 sm:$0xff]  }
 0x1b3   :  { %2433 = vmatprep.subr.bf16.mxu0 %v7478_v24  ;;  %v7556_v24 = vld [vmem:[#allocation8 + $0x464] ss:$24 sps:$4 sm:$0xff]  }
 0x1b5   :  { %2393 = vmatpush1.bf16.msra.mxu1 %v7473_v25  ;;  %v7551_v25 = vld [vmem:[#allocation8 + $0x160] ss:$24 sps:$4 sm:$0xff]  }
 0x1b6   :  { %2434 = vmatpush1.bf16.msra.mxu0 %v7476_v26  ;;  %2394 = vmatprep.subr.bf16.mxu1 %v7481_v27  ;;  %v7554_v26 = vld [vmem:[#allocation8 + $0x460] ss:$24 sps:$4 sm:$0xff]   ;;  %v7559_v27 = vld [vmem:[#allocation8 + $0x134] ss:$24 sps:$4 sm:$0xff]  }
 0x1b7   :  { %2435 = vmatprep.subr.bf16.mxu0 %v7484_v28  ;;  %v7562_v28 = vld [vmem:[#allocation8 + $0x434] ss:$24 sps:$4 sm:$0xff]  }
 0x1b9   :  { %2395 = vmatpush1.bf16.msra.mxu1 %v7479_v35  ;;  %v7557_v35 = vld [vmem:[#allocation8 + $0x130] ss:$24 sps:$4 sm:$0xff]  }
 0x1ba   :  { %2436 = vmatpush1.bf16.msra.mxu0 %v7482_v36  ;;  %2396 = vmatprep.subr.bf16.mxu1 %v7487_v37  ;;  %v7560_v36 = vld [vmem:[#allocation8 + $0x430] ss:$24 sps:$4 sm:$0xff]   ;;  %v7565_v37 = vld [vmem:[#allocation8 + $0x104] ss:$24 sps:$4 sm:$0xff]  }
 0x1bb   :  { %2437 = vmatprep.subr.bf16.mxu0 %v7490_v38  ;;  %v7563_v38 = vld [vmem:[#allocation8 + $0x100] ss:$24 sps:$4 sm:$0xff]  }
 0x1bd   :  { %2397 = vmatpush1.bf16.msra.mxu1 %v7485_v39  ;;  %v7568_v39 = vld [vmem:[#allocation8 + $0x404] ss:$24 sps:$4 sm:$0xff]  }
 0x1be   :  { %2438 = vmatpush1.bf16.msra.mxu0 %v7488_v40  ;;  %2398 = vmatprep.subr.bf16.mxu1 %v7493_v42  ;;  %v7566_v40 = vld [vmem:[#allocation8 + $0x400] ss:$24 sps:$4 sm:$0xff]   ;;  %v7571_v42 = vld [vmem:[#allocation8 + $0xd4] ss:$24 sps:$4 sm:$0xff]  }
 0x1bf   :  { %2439 = vmatprep.subr.bf16.mxu0 %v7496_v43  ;;  %v7574_v43 = vld [vmem:[#allocation8 + $0x3d4] ss:$24 sps:$4 sm:$0xff]  }
 0x1c1   :  { %2399 = vmatpush1.bf16.msra.mxu1 %v7491_v44  ;;  %v7569_v44 = vld [vmem:[#allocation8 + $0xd0] ss:$24 sps:$4 sm:$0xff]  }
 0x1c2   :  { %2440 = vmatpush1.bf16.msra.mxu0 %v7494_v45  ;;  %2400 = vmatprep.subr.bf16.mxu1 %v7499_v46  ;;  %v7572_v45 = vld [vmem:[#allocation8 + $0x3d0] ss:$24 sps:$4 sm:$0xff]   ;;  %v7577_v46 = vld [vmem:[#allocation8 + $0xa4] ss:$24 sps:$4 sm:$0xff]  }
 0x1c3   :  { %2441 = vmatprep.subr.bf16.mxu0 %v7502_v47  ;;  %v7580_v47 = vld [vmem:[#allocation8 + $0x3a4] ss:$24 sps:$4 sm:$0xff]  }
 0x1c5   :  { %2401 = vmatpush1.bf16.msra.mxu1 %v7497_v48  ;;  %v7583_v48 = vld [vmem:[#allocation8 + $0x74] ss:$24 sps:$4 sm:$0xff]  }
 0x1c6   :  { %2442 = vmatpush1.bf16.msra.mxu0 %v7500_v50  ;;  %2402 = vmatprep.subr.bf16.mxu1 %v7505_v51  ;;  %v7586_v50 = vld [vmem:[#allocation8 + $0x374] ss:$24 sps:$4 sm:$0xff]   ;;  %v7581_v51 = vld [vmem:[#allocation8 + $0x70] ss:$24 sps:$4 sm:$0xff]  }
 0x1c7   :  { %2443 = vmatprep.subr.bf16.mxu0 %v7508_v29  ;;  %v7584_v29 = vld [vmem:[#allocation8 + $0x370] ss:$24 sps:$4 sm:$0xff]  }
 0x1c9   :  { %2403 = vmatpush2.bf16.msra.mxu1 %v7503_v52  ;;  %v7589_v52 = vld [vmem:[#allocation8 + $0x44] ss:$24 sps:$4 sm:$0xff]  }
 0x1ca   :  { %2444 = vmatpush2.bf16.msra.mxu0 %v7506_v54  ;;  %2404 = vmatprep.subr.bf16.mxu1 %v7511_v55  ;;  %v7592_v54 = vld [vmem:[#allocation8 + $0x344] ss:$24 sps:$4 sm:$0xff]   ;;  %v7587_v55 = vld [vmem:[#allocation8 + $0x40] ss:$24 sps:$4 sm:$0xff]  }
 0x1cb   :  { %2445 = vmatprep.subr.bf16.mxu0 %v7514_v56  ;;  %v7590_v56 = vld [vmem:[#allocation8 + $0x340] ss:$24 sps:$4 sm:$0xff]  }
 0x1cd   :  { %2405 = vmatpush2.bf16.msra.mxu1 %v7509_v57  ;;  %v7595_v57 = vld [vmem:[#allocation8 + $0x14] ss:$24 sps:$4 sm:$0xff]  }
 0x1ce   :  { %2446 = vmatpush2.bf16.msra.mxu0 %v7512_v32  ;;  %2406 = vmatprep.subr.bf16.mxu1 %v7517_v59  ;;  %v7598_v32 = vld [vmem:[#allocation8 + $0x314] ss:$24 sps:$4 sm:$0xff]   ;;  %v7593_v59 = vld [vmem:[#allocation8 + $0x10] ss:$24 sps:$4 sm:$0xff]  }
 0x1cf   :  { %2447 = vmatprep.subr.bf16.mxu0 %v7520_v61  ;;  %v7596_v61 = vld [vmem:[#allocation8 + $0x310] ss:$24 sps:$4 sm:$0xff]  }
 0x1d1   :  { %2407 = vmatpush2.bf16.msra.mxu1 %v7515_v62  ;;  %v7601_v62 = vld [vmem:[#allocation8 + $0x2e4] ss:$24 sps:$4 sm:$0xff]  }
 0x1d2   :  { %2448 = vmatpush2.bf16.msra.mxu0 %v7518_v53  ;;  %2408 = vmatprep.subr.bf16.mxu1 %v7523_v1  ;;  %v7604_v53 = vld [vmem:[#allocation8 + $0x5e4] ss:$24 sps:$4 sm:$0xff]   ;;  %v7599_v1 = vld [vmem:[#allocation8 + $0x2e0] ss:$24 sps:$4 sm:$0xff]  }
 0x1d3   :  { %2449 = vmatprep.subr.bf16.mxu0 %v7526_v2  ;;  %v7602_v2 = vld [vmem:[#allocation8 + $0x5e0] ss:$24 sps:$4 sm:$0xff]  }
 0x1d5   :  { %2409 = vmatpush2.bf16.msra.mxu1 %v7521_v3  ;;  %v7607_v3 = vld [vmem:[#allocation8 + $0x2b4] ss:$24 sps:$4 sm:$0xff]  }
 0x1d6   :  { %2450 = vmatpush2.bf16.msra.mxu0 %v7524_v4  ;;  %2410 = vmatprep.subr.bf16.mxu1 %v7529_v5  ;;  %v7610_v4 = vld [vmem:[#allocation8 + $0x5b4] ss:$24 sps:$4 sm:$0xff]   ;;  %v7605_v5 = vld [vmem:[#allocation8 + $0x2b0] ss:$24 sps:$4 sm:$0xff]  }
 0x1d7   :  { %2451 = vmatprep.subr.bf16.mxu0 %v7532_v6  ;;  %v7608_v6 = vld [vmem:[#allocation8 + $0x5b0] ss:$24 sps:$4 sm:$0xff]  }
 0x1d9   :  { %2411 = vmatpush2.bf16.msra.mxu1 %v7527_v7  ;;  %v7613_v7 = vld [vmem:[#allocation8 + $0x284] ss:$24 sps:$4 sm:$0xff]  }
 0x1da   :  { %2452 = vmatpush2.bf16.msra.mxu0 %v7530_v9  ;;  %2412 = vmatprep.subr.bf16.mxu1 %v7535_v10  ;;  %v7616_v9 = vld [vmem:[#allocation8 + $0x584] ss:$24 sps:$4 sm:$0xff]   ;;  %v7611_v10 = vld [vmem:[#allocation8 + $0x280] ss:$24 sps:$4 sm:$0xff]  }
 0x1db   :  { %2453 = vmatprep.subr.bf16.mxu0 %v7538_v11  ;;  %v7614_v11 = vld [vmem:[#allocation8 + $0x580] ss:$24 sps:$4 sm:$0xff]  }
 0x1dd   :  { %2413 = vmatpush2.bf16.msra.mxu1 %v7533_v12  ;;  %v7619_v12 = vld [vmem:[#allocation8 + $0x254] ss:$24 sps:$4 sm:$0xff]  }
 0x1de   :  { %2454 = vmatpush2.bf16.msra.mxu0 %v7536_v13  ;;  %2414 = vmatprep.subr.bf16.mxu1 %v7541_v14  ;;  %v7622_v13 = vld [vmem:[#allocation8 + $0x554] ss:$24 sps:$4 sm:$0xff]   ;;  %v7617_v14 = vld [vmem:[#allocation8 + $0x250] ss:$24 sps:$4 sm:$0xff]  }
 0x1df   :  { %2455 = vmatprep.subr.bf16.mxu0 %v7544_v16  ;;  %v7620_v16 = vld [vmem:[#allocation8 + $0x550] ss:$24 sps:$4 sm:$0xff]  }
 0x1e1   :  { %2415 = vmatpush2.bf16.msra.mxu1 %v7539_v17  ;;  %v7625_v17 = vld [vmem:[#allocation8 + $0x224] ss:$24 sps:$4 sm:$0xff]  }
 0x1e2   :  { %2456 = vmatpush2.bf16.msra.mxu0 %v7542_v18  ;;  %2416 = vmatprep.subr.bf16.mxu1 %v7547_v19  ;;  %v7628_v18 = vld [vmem:[#allocation8 + $0x524] ss:$24 sps:$4 sm:$0xff]   ;;  %v7623_v19 = vld [vmem:[#allocation8 + $0x220] ss:$24 sps:$4 sm:$0xff]  }
 0x1e3   :  { %2457 = vmatprep.subr.bf16.mxu0 %v7550_v20  ;;  %v7626_v20 = vld [vmem:[#allocation8 + $0x520] ss:$24 sps:$4 sm:$0xff]  }
 0x1e5   :  { %2417 = vmatpush2.bf16.msra.mxu1 %v7545_v21  ;;  %v7631_v21 = vld [vmem:[#allocation8 + $0x1f4] ss:$24 sps:$4 sm:$0xff]  }
 0x1e6   :  { %2458 = vmatpush2.bf16.msra.mxu0 %v7548_v22  ;;  %2468 = vmatprep.subr.bf16.mxu1 %v7553_v23  ;;  %v7634_v22 = vld [vmem:[#allocation8 + $0x4f4] ss:$24 sps:$4 sm:$0xff]   ;;  %v7629_v23 = vld [vmem:[#allocation8 + $0x1f0] ss:$24 sps:$4 sm:$0xff]  }
 0x1e7   :  { %2509 = vmatprep.subr.bf16.mxu0 %v7556_v24  ;;  %v7632_v24 = vld [vmem:[#allocation8 + $0x4f0] ss:$24 sps:$4 sm:$0xff]  }
 0x1e8   :  { %2419 = vmatmul.mubr.bf16.vlgmr.msra.gmra.mxu1 %v8863_v60 }
 0x1e9   :  { %2460 = vmatmul.mubr.bf16.vlgmr.msra.gmra.mxu0 %v8883_v15  ;;  %2469 = vmatpush1.bf16.msra.mxu1 %v7551_v25  ;;  %v7637_v25 = vld [vmem:[#allocation8 + $0x1c4] ss:$24 sps:$4 sm:$0xff]  }
 0x1ea   :  { %2500 = vmatprep.mubr.bf16.mxu1 %v8865_v63  ;;  %2510 = vmatpush1.bf16.msra.mxu0 %v7554_v26  ;;  %v7575_v63 = vld [vmem:[#allocation8 + $0xa0] ss:$24 sps:$4 sm:$0xff]   ;;  %v7640_v26 = vld [vmem:[#allocation8 + $0x4c4] ss:$24 sps:$4 sm:$0xff]  }
 0x1eb   :  { %2541 = vmatprep.mubr.bf16.mxu0 %v8867_v0  ;;  %2470 = vmatprep.subr.bf16.mxu1 %v7559_v27  ;;  %v7578_v0 = vld [vmem:[#allocation8 + $0x3a0] ss:$24 sps:$4 sm:$0xff]  }
 0x1ec   :  { %2511 = vmatprep.subr.bf16.mxu0 %v7562_v28  ;;  %v7635_v27 = vld [vmem:[#allocation8 + $0x1c0] ss:$24 sps:$4 sm:$0xff]  }
 0x1ed   :  { %2471 = vmatpush1.bf16.msra.mxu1 %v7557_v35  ;;  %v7638_v28 = vld [vmem:[#allocation8 + $0x4c0] ss:$24 sps:$4 sm:$0xff]   ;;  %v7643_v35 = vld [vmem:[#allocation8 + $0x194] ss:$24 sps:$4 sm:$0xff]  }
 0x1ee   :  { %2512 = vmatpush1.bf16.msra.mxu0 %v7560_v36  ;;  %2472 = vmatprep.subr.bf16.mxu1 %v7565_v37  ;;  %v7646_v36 = vld [vmem:[#allocation8 + $0x494] ss:$24 sps:$4 sm:$0xff]   ;;  %v7641_v37 = vld [vmem:[#allocation8 + $0x190] ss:$24 sps:$4 sm:$0xff]  }
 0x1ef   :  { %2513 = vmatprep.subr.bf16.mxu0 %v7568_v39  ;;  %v7649_v39 = vld [vmem:[#allocation8 + $0x764] ss:$24 sps:$4 sm:$0xff]  }
 0x1f1   :  { %2473 = vmatpush1.bf16.msra.mxu1 %v7563_v38  ;;  %v7644_v38 = vld [vmem:[#allocation8 + $0x490] ss:$24 sps:$4 sm:$0xff]  }
 0x1f2   :  { %2514 = vmatpush1.bf16.msra.mxu0 %v7566_v40  ;;  %2474 = vmatprep.subr.bf16.mxu1 %v7571_v42  ;;  %v7667_v40 = vld [vmem:[#allocation11 + $0x154] ss:$24 sps:$4 sm:$0xff]  }
 0x1f3   :  { %2515 = vmatprep.subr.bf16.mxu0 %v7574_v43  ;;  %v7647_v42 = vld [vmem:[#allocation8 + $0x760] ss:$24 sps:$4 sm:$0xff]   ;;  %v7652_v43 = vld [vmem:[#allocation8 + $0x734] ss:$24 sps:$4 sm:$0xff]  }
 0x1f5   :  { %2475 = vmatpush1.bf16.msra.mxu1 %v7569_v44  ;;  %v7665_v44 = vld [vmem:[#allocation11 + $0x150] ss:$24 sps:$4 sm:$0xff]  }
 0x1f6   :  { %2516 = vmatpush1.bf16.msra.mxu0 %v7572_v45  ;;  %2476 = vmatprep.subr.bf16.mxu1 %v7577_v46  ;;  %v7673_v46 = vld [vmem:[#allocation11 + $0x124] ss:$24 sps:$4 sm:$0xff]  }
 0x1f7   :  { %2517 = vmatprep.subr.bf16.mxu0 %v7580_v47 }
 0x1f9   :  { %2477 = vmatpush1.bf16.msra.mxu1 %v7575_v63  ;;  %v7650_v63 = vld [vmem:[#allocation8 + $0x730] ss:$24 sps:$4 sm:$0xff]  }
 0x1fa   :  { %2518 = vmatpush1.bf16.msra.mxu0 %v7578_v0  ;;  %2478 = vmatprep.subr.bf16.mxu1 %v7583_v48  ;;  %v7655_v48 = vld [vmem:[#allocation8 + $0x704] ss:$24 sps:$4 sm:$0xff]  }
 0x1fb   :  { %2519 = vmatprep.subr.bf16.mxu0 %v7586_v50 }
 0x1fd   :  { %2479 = vmatpush1.bf16.msra.mxu1 %v7581_v51  ;;  %v7671_v51 = vld [vmem:[#allocation11 + $0x120] ss:$24 sps:$4 sm:$0xff]  }
 0x1fe   :  { %2520 = vmatpush1.bf16.msra.mxu0 %v7584_v29  ;;  %2480 = vmatprep.subr.bf16.mxu1 %v7589_v52  ;;  %v7679_v29 = vld [vmem:[#allocation11 + $0xf4] ss:$24 sps:$4 sm:$0xff]  }
 0x1ff   :  { %2521 = vmatprep.subr.bf16.mxu0 %v7592_v54  ;;  %v7653_v52 = vld [vmem:[#allocation8 + $0x700] ss:$24 sps:$4 sm:$0xff]  }
 0x201   :  { %2481 = vmatpush1.bf16.msra.mxu1 %v7587_v55  ;;  %v7658_v55 = vld [vmem:[#allocation8 + $0x6d4] ss:$24 sps:$4 sm:$0xff]  }
 0x202   :  { %2522 = vmatpush1.bf16.msra.mxu0 %v7590_v56  ;;  %2482 = vmatprep.subr.bf16.mxu1 %v7595_v57  ;;  %v7677_v56 = vld [vmem:[#allocation11 + $0xf0] ss:$24 sps:$4 sm:$0xff]   ;;  %v7685_v57 = vld [vmem:[#allocation11 + $0xc4] ss:$24 sps:$4 sm:$0xff]  }
 0x203   :  { %2523 = vmatprep.subr.bf16.mxu0 %v7598_v32  ;;  %v7656_v32 = vld [vmem:[#allocation8 + $0x6d0] ss:$24 sps:$4 sm:$0xff]  }
 0x205   :  { %2483 = vmatpush1.bf16.msra.mxu1 %v7593_v59  ;;  %v7661_v59 = vld [vmem:[#allocation8 + $0x6a4] ss:$24 sps:$4 sm:$0xff]  }
 0x206   :  { %2524 = vmatpush1.bf16.msra.mxu0 %v7596_v61  ;;  %2484 = vmatprep.subr.bf16.mxu1 %v7601_v62  ;;  %v7683_v61 = vld [vmem:[#allocation11 + $0xc0] ss:$24 sps:$4 sm:$0xff]   ;;  %v7691_v62 = vld [vmem:[#allocation11 + $0x94] ss:$24 sps:$4 sm:$0xff]  }
 0x207   :  { %2525 = vmatprep.subr.bf16.mxu0 %v7604_v53  ;;  %v7659_v53 = vld [vmem:[#allocation8 + $0x6a0] ss:$24 sps:$4 sm:$0xff]  }
 0x209   :  { %2485 = vmatpush2.bf16.msra.mxu1 %v7599_v1  ;;  %v7664_v1 = vld [vmem:[#allocation8 + $0x674] ss:$24 sps:$4 sm:$0xff]  }
 0x20a   :  { %2526 = vmatpush2.bf16.msra.mxu0 %v7602_v2  ;;  %2486 = vmatprep.subr.bf16.mxu1 %v7607_v3  ;;  %v7689_v2 = vld [vmem:[#allocation11 + $0x90] ss:$24 sps:$4 sm:$0xff]   ;;  %v7697_v3 = vld [vmem:[#allocation11 + $0x64] ss:$24 sps:$4 sm:$0xff]  }
 0x20b   :  { %2527 = vmatprep.subr.bf16.mxu0 %v7610_v4  ;;  %v7662_v4 = vld [vmem:[#allocation8 + $0x670] ss:$24 sps:$4 sm:$0xff]  }
 0x20d   :  { %2487 = vmatpush2.bf16.msra.mxu1 %v7605_v5  ;;  %v7670_v5 = vld [vmem:[#allocation8 + $0x644] ss:$24 sps:$4 sm:$0xff]  }
 0x20e   :  { %2528 = vmatpush2.bf16.msra.mxu0 %v7608_v6  ;;  %2488 = vmatprep.subr.bf16.mxu1 %v7613_v7  ;;  %v7695_v6 = vld [vmem:[#allocation11 + $0x60] ss:$24 sps:$4 sm:$0xff]   ;;  %v7703_v7 = vld [vmem:[#allocation11 + $0x34] ss:$24 sps:$4 sm:$0xff]  }
 0x20f   :  { %2529 = vmatprep.subr.bf16.mxu0 %v7616_v9  ;;  %v7668_v9 = vld [vmem:[#allocation8 + $0x640] ss:$24 sps:$4 sm:$0xff]  }
 0x211   :  { %2489 = vmatpush2.bf16.msra.mxu1 %v7611_v10  ;;  %v7676_v10 = vld [vmem:[#allocation8 + $0x614] ss:$24 sps:$4 sm:$0xff]  }
 0x212   :  { %2530 = vmatpush2.bf16.msra.mxu0 %v7614_v11  ;;  %2490 = vmatprep.subr.bf16.mxu1 %v7619_v12  ;;  %v7701_v11 = vld [vmem:[#allocation11 + $0x30] ss:$24 sps:$4 sm:$0xff]   ;;  %v7709_v12 = vld [vmem:[#allocation11 + $0x4] ss:$24 sps:$4 sm:$0xff]  }
 0x213   :  { %2531 = vmatprep.subr.bf16.mxu0 %v7622_v13  ;;  %v7674_v13 = vld [vmem:[#allocation8 + $0x610] ss:$24 sps:$4 sm:$0xff]  }
 0x215   :  { %2491 = vmatpush2.bf16.msra.mxu1 %v7617_v14  ;;  %v7682_v14 = vld [vmem:[#allocation8 + $0x8e4] ss:$24 sps:$4 sm:$0xff]  }
 0x216   :  { %2532 = vmatpush2.bf16.msra.mxu0 %v7620_v16  ;;  %2492 = vmatprep.subr.bf16.mxu1 %v7625_v17  ;;  %v7707_v16 = vld [vmem:[#allocation11] ss:$24 sps:$4 sm:$0xff]   ;;  %v7715_v17 = vld [vmem:[#allocation11 + $0x2d4] ss:$24 sps:$4 sm:$0xff]  }
 0x217   :  { %2533 = vmatprep.subr.bf16.mxu0 %v7628_v18  ;;  %v7680_v18 = vld [vmem:[#allocation8 + $0x8e0] ss:$24 sps:$4 sm:$0xff]  }
 0x219   :  { %2493 = vmatpush2.bf16.msra.mxu1 %v7623_v19  ;;  %v7688_v19 = vld [vmem:[#allocation8 + $0x8b4] ss:$24 sps:$4 sm:$0xff]  }
 0x21a   :  { %2534 = vmatpush2.bf16.msra.mxu0 %v7626_v20  ;;  %2494 = vmatprep.subr.bf16.mxu1 %v7631_v21  ;;  %v7713_v20 = vld [vmem:[#allocation11 + $0x2d0] ss:$24 sps:$4 sm:$0xff]   ;;  %v7721_v21 = vld [vmem:[#allocation11 + $0x2a4] ss:$24 sps:$4 sm:$0xff]  }
 0x21b   :  { %2535 = vmatprep.subr.bf16.mxu0 %v7634_v22  ;;  %v7686_v22 = vld [vmem:[#allocation8 + $0x8b0] ss:$24 sps:$4 sm:$0xff]  }
 0x21d   :  { %2495 = vmatpush2.bf16.msra.mxu1 %v7629_v23  ;;  %v7694_v23 = vld [vmem:[#allocation8 + $0x884] ss:$24 sps:$4 sm:$0xff]  }
 0x21e   :  { %2536 = vmatpush2.bf16.msra.mxu0 %v7632_v24  ;;  %2496 = vmatprep.subr.bf16.mxu1 %v7637_v25  ;;  %v7719_v24 = vld [vmem:[#allocation11 + $0x2a0] ss:$24 sps:$4 sm:$0xff]   ;;  %v7727_v25 = vld [vmem:[#allocation11 + $0x274] ss:$24 sps:$4 sm:$0xff]  }
 0x21f   :  { %2537 = vmatprep.subr.bf16.mxu0 %v7640_v26  ;;  %v7692_v26 = vld [vmem:[#allocation8 + $0x880] ss:$24 sps:$4 sm:$0xff]  }
 0x221   :  { %2497 = vmatpush2.bf16.msra.mxu1 %v7635_v27  ;;  %v7700_v27 = vld [vmem:[#allocation8 + $0x854] ss:$24 sps:$4 sm:$0xff]  }
 0x222   :  { %2538 = vmatpush2.bf16.msra.mxu0 %v7638_v28  ;;  %2498 = vmatprep.subr.bf16.mxu1 %v7643_v35  ;;  %v7725_v28 = vld [vmem:[#allocation11 + $0x270] ss:$24 sps:$4 sm:$0xff]   ;;  %v7730_v35 = vld [vmem:[#allocation11 + $0x244] ss:$24 sps:$4 sm:$0xff]  }
 0x223   :  { %2539 = vmatprep.subr.bf16.mxu0 %v7646_v36  ;;  %v7698_v36 = vld [vmem:[#allocation8 + $0x850] ss:$24 sps:$4 sm:$0xff]  }
 0x225   :  { %2499 = vmatpush2.bf16.msra.mxu1 %v7641_v37  ;;  %v7706_v37 = vld [vmem:[#allocation8 + $0x824] ss:$24 sps:$4 sm:$0xff]  }
 0x226   :  { %2540 = vmatpush2.bf16.msra.mxu0 %v7644_v38  ;;  %2550 = vmatprep.subr.bf16.mxu1 %v7649_v39  ;;  %v7728_v38 = vld [vmem:[#allocation11 + $0x240] ss:$24 sps:$4 sm:$0xff]   ;;  %v7733_v39 = vld [vmem:[#allocation11 + $0x214] ss:$24 sps:$4 sm:$0xff]  }
 0x227   :  { %4363 = vmatprep.subr.bf16.mxu0 %v7667_v40  ;;  %v7704_v40 = vld [vmem:[#allocation8 + $0x820] ss:$24 sps:$4 sm:$0xff]  }
 0x228   :  { %2501 = vmatmul.mubr.bf16.vlgmr.msra.gmra.mxu1 %v8861_v58  ;;  %v8894_v45 = vpop.f32.mrf.mxu1 }
 0x229   :  { %2542 = vmatmul.mubr.bf16.vlgmr.msra.gmra.mxu0 %v8863_v60  ;;  %2551 = vmatpush1.bf16.msra.mxu1 %v7647_v42  ;;  %v8897_v47 = vpop.f32.mrf.mxu0  ;;  %v7712_v42 = vld [vmem:[#allocation8 + $0x7f4] ss:$24 sps:$4 sm:$0xff]  }
 0x22a   :  { %2582 = vmatprep.mubr.bf16.mxu1 %v8874_v8  ;;  %v8900_v0 = vpop.f32.mrf.mxu1  ;;  %2552 = vmatprep.subr.bf16.mxu1 %v7652_v43  ;;  %v7731_v43 = vld [vmem:[#allocation11 + $0x210] ss:$24 sps:$4 sm:$0xff]  }
 0x22b   :  { %v8902_v50 = vpop.f32.mrf.mxu0  ;;  %4364 = vmatpush1.bf16.msra.mxu0 %v7665_v44  ;;  %v7736_v44 = vld [vmem:[#allocation11 + $0x1e4] ss:$24 sps:$4 sm:$0xff]  }
 0x22c   :  { %v2260_v58 = vpop.f32.mrf.mxu1  ;;  %4365 = vmatprep.subr.bf16.mxu0 %v7673_v46  ;;  %v7710_v46 = vld [vmem:[#allocation8 + $0x7f0] ss:$24 sps:$4 sm:$0xff]  }
 0x22d   :  { %2553 = vmatpush1.bf16.msra.mxu1 %v7650_v63  ;;  %v2301_v60 = vpop.f32.mrf.mxu0  ;;  %v7718_v63 = vld [vmem:[#allocation8 + $0x7c4] ss:$24 sps:$4 sm:$0xff]  }
 0x22e   :  { %v2261_v54 = vpop.f32.mrf.mxu1  ;;  %2554 = vmatprep.subr.bf16.mxu1 %v7655_v48  ;;  %v7734_v48 = vld [vmem:[#allocation11 + $0x1e0] ss:$24 sps:$4 sm:$0xff]   ;;  %v7739_v58 = vld [vmem:[#allocation11 + $0x1b4] ss:$24 sps:$4 sm:$0xff]  }
 0x22f   :  { %4366 = vmatpush1.bf16.msra.mxu0 %v7671_v51  ;;  %v2302_v8 = vpop.f32.mrf.mxu0  ;;  %v8904_v51 = vld [vmem:[#allocation10] sm:$0x3f]  ;;  %v7737_v54 = vld [vmem:[#allocation11 + $0x1b0] ss:$24 sps:$4 sm:$0xff]  }
 0x230   :  { %4367 = vmatprep.subr.bf16.mxu0 %v7679_v29  ;;  %v7716_v29 = vld [vmem:[#allocation8 + $0x7c0] ss:$24 sps:$4 sm:$0xff]   ;;  %v755_v60 = vrot.slane %v8904_v51, %v8833_v30  ;;  %v7722_v8 = vld [vmem:[#allocation8 + $0x790] ss:$24 sps:$4 sm:$0xff]  }
 0x231   :  { %2555 = vmatpush1.bf16.msra.mxu1 %v7653_v52  ;;  %v7724_v52 = vld [vmem:[#allocation8 + $0x794] ss:$24 sps:$4 sm:$0xff]  }
 0x232   :  { %2556 = vmatprep.subr.bf16.mxu1 %v7658_v55  ;;  %v7742_v55 = vld [vmem:[#allocation11 + $0x184] ss:$24 sps:$4 sm:$0xff]  }
 0x233   :  { %4368 = vmatpush1.bf16.msra.mxu0 %v7677_v56  ;;  %v759_v56 = vrot.slane %v8904_v51, %v8841_v33 }
 0x234   :  { %4369 = vmatprep.subr.bf16.mxu0 %v7685_v57  ;;  %v7745_v57 = vld [vmem:[#allocation11 + $0x454] ss:$24 sps:$4 sm:$0xff]  }
 0x235   :  { %2557 = vmatpush1.bf16.msra.mxu1 %v7656_v32  ;;  %v2257_v32 = vadd.f32 %v8894_v45, %v755_v60  ;;  %v7746_v45 = vld [vmem:[#allocation11 + $0x420] ss:$24 sps:$4 sm:$0xff]  }
 0x236   :  { %2558 = vmatprep.subr.bf16.mxu1 %v7661_v59  ;;  %v7740_v59 = vld [vmem:[#allocation11 + $0x180] ss:$24 sps:$4 sm:$0xff]  }
 0x237   :  { %4370 = vmatpush1.bf16.msra.mxu0 %v7683_v61  ;;  %v2259_v61 = vadd.f32 %v8900_v0, %v759_v56  ;;  %v7751_v0 = vld [vmem:[#allocation11 + $0x3f4] ss:$24 sps:$4 sm:$0xff]   ;;  %v7776_v60 = vld [vmem:[#allocation11 + $0x540] ss:$24 sps:$4 sm:$0xff]   ;;  %v7871_v56 = vld [vmem:[#allocation11 + $0x664] ss:$24 sps:$4 sm:$0xff]  }
 0x238   :  { %4371 = vmatprep.subr.bf16.mxu0 %v7691_v62  ;;  %v7743_v62 = vld [vmem:[#allocation11 + $0x450] ss:$24 sps:$4 sm:$0xff]  }
 0x239   :  { %2559 = vmatpush1.bf16.msra.mxu1 %v7659_v53  ;;  %v7748_v53 = vld [vmem:[#allocation11 + $0x424] ss:$24 sps:$4 sm:$0xff]  }
 0x23a   :  { %2560 = vmatprep.subr.bf16.mxu1 %v7664_v1  ;;  %v2298_v1 = vadd.f32 %v8897_v47, %v2257_v32  ;;  %v7875_v32 = vld [vmem:[#allocation11 + $0x630] ss:$24 sps:$4 sm:$0xff]  }
 0x23b   :  { %4372 = vmatpush1.bf16.msra.mxu0 %v7689_v2 }
 0x23c   :  { %4373 = vmatprep.subr.bf16.mxu0 %v7697_v3  ;;  %v2300_v3 = vadd.f32 %v8902_v50, %v2259_v61  ;;  %v7754_v50 = vld [vmem:[#allocation11 + $0x3c4] ss:$24 sps:$4 sm:$0xff]   ;;  %v7782_v61 = vld [vmem:[#allocation11 + $0x4e0] ss:$24 sps:$4 sm:$0xff]  }
 0x23d   :  { %2561 = vmatpush1.bf16.msra.mxu1 %v7662_v4 }
 0x23e   :  { %2562 = vmatprep.subr.bf16.mxu1 %v7670_v5 }
 0x23f   :  { %4374 = vmatpush1.bf16.msra.mxu0 %v7695_v6 }
 0x240   :  { %4375 = vmatprep.subr.bf16.mxu0 %v7703_v7 }
 0x241   :  { %2563 = vmatpush1.bf16.msra.mxu1 %v7668_v9 }
 0x242   :  { %2564 = vmatprep.subr.bf16.mxu1 %v7676_v10 }
 0x243   :  { %4376 = vmatpush1.bf16.msra.mxu0 %v7701_v11 }
 0x244   :  { %4377 = vmatprep.subr.bf16.mxu0 %v7709_v12 }
 0x245   :  { %2565 = vmatpush1.bf16.msra.mxu1 %v7674_v13  ;;  %v7749_v13 = vld [vmem:[#allocation11 + $0x3f0] ss:$24 sps:$4 sm:$0xff]  }
 0x246   :  { %2566 = vmatprep.subr.bf16.mxu1 %v7682_v14 }
 0x247   :  { %4378 = vmatpush1.bf16.msra.mxu0 %v7707_v16  ;;  %v7752_v16 = vld [vmem:[#allocation11 + $0x3c0] ss:$24 sps:$4 sm:$0xff]  }
 0x248   :  { %4379 = vmatprep.subr.bf16.mxu0 %v7715_v17  ;;  %v7757_v17 = vld [vmem:[#allocation11 + $0x394] ss:$24 sps:$4 sm:$0xff]  }
 0x249   :  { %2567 = vmatpush2.bf16.msra.mxu1 %v7680_v18  ;;  %v7755_v18 = vld [vmem:[#allocation11 + $0x390] ss:$24 sps:$4 sm:$0xff]  }
 0x24a   :  { %2568 = vmatprep.subr.bf16.mxu1 %v7688_v19  ;;  %v7760_v19 = vld [vmem:[#allocation11 + $0x364] ss:$24 sps:$4 sm:$0xff]  }
 0x24b   :  { %4380 = vmatpush2.bf16.msra.mxu0 %v7713_v20  ;;  %v7758_v20 = vld [vmem:[#allocation11 + $0x360] ss:$24 sps:$4 sm:$0xff]  }
 0x24c   :  { %4381 = vmatprep.subr.bf16.mxu0 %v7721_v21  ;;  %v7763_v21 = vld [vmem:[#allocation11 + $0x334] ss:$24 sps:$4 sm:$0xff]  }
 0x24d   :  { %2569 = vmatpush2.bf16.msra.mxu1 %v7686_v22 }
 0x24e   :  { %2570 = vmatprep.subr.bf16.mxu1 %v7694_v23  ;;  %v7761_v23 = vld [vmem:[#allocation11 + $0x330] ss:$24 sps:$4 sm:$0xff]  }
 0x24f   :  { %4382 = vmatpush2.bf16.msra.mxu0 %v7719_v24 }
 0x250   :  { %4383 = vmatprep.subr.bf16.mxu0 %v7727_v25  ;;  %v7766_v25 = vld [vmem:[#allocation11 + $0x304] ss:$24 sps:$4 sm:$0xff]  }
 0x251   :  { %2571 = vmatpush2.bf16.msra.mxu1 %v7692_v26  ;;  %v7839_v26 = vld [vmem:[#allocation11 + $0x750] ss:$24 sps:$4 sm:$0xff]  }
 0x252   :  { %2572 = vmatprep.subr.bf16.mxu1 %v7700_v27  ;;  %v7841_v27 = vld [vmem:[#allocation11 + $0x754] ss:$24 sps:$4 sm:$0xff]  }
 0x253   :  { %4384 = vmatpush2.bf16.msra.mxu0 %v7725_v28  ;;  %v7764_v28 = vld [vmem:[#allocation11 + $0x300] ss:$24 sps:$4 sm:$0xff]  }
 0x254   :  { %4385 = vmatprep.subr.bf16.mxu0 %v7730_v35  ;;  %v7769_v35 = vld [vmem:[#allocation11 + $0x5d4] ss:$24 sps:$4 sm:$0xff]  }
 0x255   :  { %2573 = vmatpush2.bf16.msra.mxu1 %v7698_v36  ;;  %v7845_v36 = vld [vmem:[#allocation11 + $0x720] ss:$24 sps:$4 sm:$0xff]  }
 0x256   :  { %2574 = vmatprep.subr.bf16.mxu1 %v7706_v37  ;;  %v7847_v37 = vld [vmem:[#allocation11 + $0x724] ss:$24 sps:$4 sm:$0xff]  }
 0x257   :  { %4386 = vmatpush2.bf16.msra.mxu0 %v7728_v38  ;;  %v7767_v38 = vld [vmem:[#allocation11 + $0x5d0] ss:$24 sps:$4 sm:$0xff]  }
 0x258   :  { %4387 = vmatprep.subr.bf16.mxu0 %v7733_v39  ;;  %v7772_v39 = vld [vmem:[#allocation11 + $0x5a4] ss:$24 sps:$4 sm:$0xff]  }
 0x259   :  { %2575 = vmatpush2.bf16.msra.mxu1 %v7704_v40  ;;  %v7851_v40 = vld [vmem:[#allocation11 + $0x6f0] ss:$24 sps:$4 sm:$0xff]  }
 0x25a   :  { %2576 = vmatprep.subr.bf16.mxu1 %v7712_v42  ;;  %v7853_v42 = vld [vmem:[#allocation11 + $0x6f4] ss:$24 sps:$4 sm:$0xff]  }
 0x25b   :  { %4388 = vmatpush2.bf16.msra.mxu0 %v7731_v43  ;;  %v7770_v43 = vld [vmem:[#allocation11 + $0x5a0] ss:$24 sps:$4 sm:$0xff]  }
 0x25c   :  { %4389 = vmatprep.subr.bf16.mxu0 %v7736_v44  ;;  %v7775_v44 = vld [vmem:[#allocation11 + $0x574] ss:$24 sps:$4 sm:$0xff]  }
 0x25d   :  { %2577 = vmatpush2.bf16.msra.mxu1 %v7710_v46  ;;  %v7857_v46 = vld [vmem:[#allocation11 + $0x6c0] ss:$24 sps:$4 sm:$0xff]  }
 0x25e   :  { %2578 = vmatprep.subr.bf16.mxu1 %v7718_v63  ;;  %v7859_v63 = vld [vmem:[#allocation11 + $0x6c4] ss:$24 sps:$4 sm:$0xff]  }
 0x25f   :  { %4390 = vmatpush2.bf16.msra.mxu0 %v7734_v48  ;;  %v7773_v48 = vld [vmem:[#allocation11 + $0x570] ss:$24 sps:$4 sm:$0xff]  }
 0x260   :  { %4391 = vmatprep.subr.bf16.mxu0 %v7739_v58  ;;  %v7778_v58 = vld [vmem:[#allocation11 + $0x544] ss:$24 sps:$4 sm:$0xff]  }
 0x261   :  { %2579 = vmatpush2.bf16.msra.mxu1 %v7716_v29  ;;  %v7863_v29 = vld [vmem:[#allocation11 + $0x690] ss:$24 sps:$4 sm:$0xff]  }
 0x262   :  { %2580 = vmatprep.subr.bf16.mxu1 %v7724_v52  ;;  %v7865_v52 = vld [vmem:[#allocation11 + $0x694] ss:$24 sps:$4 sm:$0xff]  }
 0x263   :  { %4392 = vmatpush2.bf16.msra.mxu0 %v7737_v54  ;;  %v7781_v54 = vld [vmem:[#allocation11 + $0x514] ss:$24 sps:$4 sm:$0xff]  }
 0x264   :  { %4393 = vmatprep.subr.bf16.mxu0 %v7742_v55  ;;  %v7869_v55 = vld [vmem:[#allocation11 + $0x660] ss:$24 sps:$4 sm:$0xff]  }
 0x265   :  { %2581 = vmatpush2.bf16.msra.mxu1 %v7722_v8  ;;  %v7779_v8 = vld [vmem:[#allocation11 + $0x510] ss:$24 sps:$4 sm:$0xff]  }
 0x266   :  { %4404 = vmatprep.subr.bf16.mxu1 %v7745_v57  ;;  %v7784_v57 = vld [vmem:[#allocation11 + $0x4e4] ss:$24 sps:$4 sm:$0xff]  }
 0x267   :  { %4394 = vmatpush2.bf16.msra.mxu0 %v7740_v59  ;;  %v7877_v59 = vld [vmem:[#allocation11 + $0x634] ss:$24 sps:$4 sm:$0xff]  }
 0x268   :  { %v2338_v2 = vpop.f32.mrf.mxu1  ;;  %2583 = vmatmul.mubr.bf16.vlgmr.msra.gmra.mxu1 %v8883_v15  ;;  %4445 = vmatprep.subr.bf16.mxu0 %v7841_v27 }
 0x269   :  { %v2339_v4 = vadd.f32 %v2338_v2, %v2298_v1  ;;  %v8915_v5 = vpop.f32.mrf.mxu0  ;;  %4405 = vmatpush1.bf16.msra.mxu1 %v7743_v62  ;;  %v7787_v62 = vld [vmem:[#allocation11 + $0x4b4] ss:$24 sps:$4 sm:$0xff]   ;;  %v7883_v1 = vld [vmem:[#allocation11 + $0x604] ss:$24 sps:$4 sm:$0xff]   ;;  %v7785_v2 = vld [vmem:[#allocation11 + $0x4b0] ss:$24 sps:$4 sm:$0xff]  }
 0x26a   :  { %v2340_v6 = vpop.f32.mrf.mxu1  ;;  %4406 = vmatprep.subr.bf16.mxu1 %v7748_v53  ;;  %v7881_v53 = vld [vmem:[#allocation11 + $0x600] ss:$24 sps:$4 sm:$0xff]  }
 0x26b   :  { %v2341_v7 = vadd.f32 %v2340_v6, %v2300_v3  ;;  %v8917_v9 = vpop.f32.mrf.mxu0  ;;  %v2591_v10 = vpack.c.bf16 %v2339_v4, %v2339_v4  ;;  %v7790_v3 = vld [vmem:[#allocation11 + $0x484] ss:$24 sps:$4 sm:$0xff]   ;;  %v7887_v4 = vld [vmem:[#allocation11 + $0x8d0] ss:$24 sps:$4 sm:$0xff]   ;;  %v7788_v6 = vld [vmem:[#allocation11 + $0x480] ss:$24 sps:$4 sm:$0xff]  }
 0x26c   :  { %v2342_v11 = vpop.f32.mrf.mxu1 }
 0x26d   :  { %v2592_v47 = vpack.c.bf16 %v2341_v7, %v2341_v7  ;;  %v2383_v12 = vpop.f32.mrf.mxu0  ;;  %4407 = vmatpush1.bf16.msra.mxu1 %v7746_v45  ;;  %v7889_v45 = vld [vmem:[#allocation11 + $0x8d4] ss:$24 sps:$4 sm:$0xff]   ;;  %v7893_v7 = vld [vmem:[#allocation11 + $0x8a0] ss:$24 sps:$4 sm:$0xff]   ;;  %v763_v11 = vrot.slane %v8904_v51, %v8836_v31 }
 0x26e   :  { %v2343_v15 = vpop.f32.mrf.mxu1  ;;  %4408 = vmatprep.subr.bf16.mxu1 %v7751_v0  ;;  %v7793_v0 = vld [vmem:[#allocation11 + $0x15c] ss:$24 sps:$4 sm:$0xff]   ;;  %v7899_v12 = vld [vmem:[#allocation11 + $0x870] ss:$24 sps:$4 sm:$0xff]  }
 0x26f   :  { %8427 = vtanh.bf16 %v2592_v47  ;;  %v2384_v14 = vpop.f32.mrf.mxu0  ;;  %v767_v47 = vrot.slane %v8904_v51, %v8844_v34  ;;  %v2380_v15 = vadd.f32 %v8915_v5, %v763_v11 }
 0x270   :  { %8429 = vtanh.bf16 %v2591_v10  ;;  %v7895_v10 = vld [vmem:[#allocation11 + $0x8a4] ss:$24 sps:$4 sm:$0xff]  }
 0x271   :  { %4409 = vmatpush1.bf16.msra.mxu1 %v7749_v13  ;;  %v7901_v13 = vld [vmem:[#allocation11 + $0x874] ss:$24 sps:$4 sm:$0xff]   ;;  %v2382_v14 = vadd.f32 %v8917_v9, %v767_v47  ;;  %v7911_v9 = vld [vmem:[#allocation11 + $0x810] ss:$24 sps:$4 sm:$0xff]  }
 0x272   :  { %4410 = vmatprep.subr.bf16.mxu1 %v7754_v50 }
 0x275   :  { %4411 = vmatpush1.bf16.msra.mxu1 %v7752_v16 }
 0x276   :  { %4412 = vmatprep.subr.bf16.mxu1 %v7757_v17 }
 0x279   :  { %4413 = vmatpush1.bf16.msra.mxu1 %v7755_v18 }
 0x27a   :  { %4414 = vmatprep.subr.bf16.mxu1 %v7760_v19  ;;  %v7907_v19 = vld [vmem:[#allocation11 + $0x844] ss:$24 sps:$4 sm:$0xff]  }
 0x27d   :  { %v8919_v22 = vpop.eup %8427  ;;  %4415 = vmatpush1.bf16.msra.mxu1 %v7758_v20 }
 0x27e   :  { %v8921_v24 = vpop.eup %8429  ;;  %4395 = vmatprep.mubr.bf16.mxu0 %v8919_v22  ;;  %4416 = vmatprep.subr.bf16.mxu1 %v7763_v21 }
 0x27f   :  { %4396 = vmatmul.mubr.bf16.vlgmr.msra.gmra.mxu0 %v8921_v24 }
 0x280   :  { %4446 = vmatpush1.bf16.msra.mxu0 %v7839_v26 }
 0x281   :  { %4417 = vmatpush1.bf16.msra.mxu1 %v7761_v23  ;;  %4447 = vmatprep.subr.bf16.mxu0 %v7847_v37 }
 0x282   :  { %4418 = vmatprep.subr.bf16.mxu1 %v7766_v25  ;;  %v7905_v25 = vld [vmem:[#allocation11 + $0x840] ss:$24 sps:$4 sm:$0xff]  }
 0x284   :  { %4448 = vmatpush1.bf16.msra.mxu0 %v7845_v36  ;;  %v7913_v36 = vld [vmem:[#allocation11 + $0x814] ss:$24 sps:$4 sm:$0xff]  }
 0x285   :  { %4419 = vmatpush1.bf16.msra.mxu1 %v7764_v28  ;;  %4449 = vmatprep.subr.bf16.mxu0 %v7853_v42  ;;  %v7923_v42 = vld [vmem:[#allocation11 + $0x7b0] ss:$24 sps:$4 sm:$0xff]  }
 0x286   :  { %4420 = vmatprep.subr.bf16.mxu1 %v7769_v35 }
 0x288   :  { %4450 = vmatpush1.bf16.msra.mxu0 %v7851_v40  ;;  %v7919_v40 = vld [vmem:[#allocation11 + $0x7e4] ss:$24 sps:$4 sm:$0xff]  }
 0x289   :  { %4421 = vmatpush2.bf16.msra.mxu1 %v7767_v38  ;;  %4451 = vmatprep.subr.bf16.mxu0 %v7859_v63  ;;  %v7791_v63 = vld [vmem:[#allocation11 + $0x158] ss:$24 sps:$4 sm:$0xff]  }
 0x28a   :  { %4422 = vmatprep.subr.bf16.mxu1 %v7772_v39  ;;  %v7917_v39 = vld [vmem:[#allocation11 + $0x7e0] ss:$24 sps:$4 sm:$0xff]  }
 0x28c   :  { %4452 = vmatpush1.bf16.msra.mxu0 %v7857_v46  ;;  %v7931_v46 = vld [vmem:[#allocation11 + $0x784] ss:$24 sps:$4 sm:$0xff]  }
 0x28d   :  { %4423 = vmatpush2.bf16.msra.mxu1 %v7770_v43  ;;  %4453 = vmatprep.subr.bf16.mxu0 %v7865_v52  ;;  %v7925_v43 = vld [vmem:[#allocation11 + $0x7b4] ss:$24 sps:$4 sm:$0xff]  }
 0x28e   :  { %4424 = vmatprep.subr.bf16.mxu1 %v7775_v44  ;;  %v7929_v44 = vld [vmem:[#allocation11 + $0x780] ss:$24 sps:$4 sm:$0xff]  }
 0x290   :  { %4454 = vmatpush1.bf16.msra.mxu0 %v7863_v29  ;;  %v7796_v29 = vld [vmem:[#allocation11 + $0x12c] ss:$24 sps:$4 sm:$0xff]  }
 0x291   :  { %4425 = vmatpush2.bf16.msra.mxu1 %v7773_v48  ;;  %4455 = vmatprep.subr.bf16.mxu0 %v7871_v56  ;;  %v7937_v48 = vld [vmem:[#allocation11 + $0x45c] ss:$24 sps:$4 sm:$0xff]   ;;  %v7802_v56 = vld [vmem:[#allocation11 + $0xcc] ss:$24 sps:$4 sm:$0xff]  }
 0x292   :  { %4426 = vmatprep.subr.bf16.mxu1 %v7778_v58 }
 0x294   :  { %4456 = vmatpush1.bf16.msra.mxu0 %v7869_v55  ;;  %v7797_v55 = vld [vmem:[#allocation11 + $0xf8] ss:$24 sps:$4 sm:$0xff]  }
 0x295   :  { %4427 = vmatpush2.bf16.msra.mxu1 %v7776_v60  ;;  %4457 = vmatprep.subr.bf16.mxu0 %v7877_v59  ;;  %v7794_v60 = vld [vmem:[#allocation11 + $0x128] ss:$24 sps:$4 sm:$0xff]   ;;  %v7808_v59 = vld [vmem:[#allocation11 + $0x6c] ss:$24 sps:$4 sm:$0xff]  }
 0x296   :  { %4428 = vmatprep.subr.bf16.mxu1 %v7781_v54  ;;  %v7799_v54 = vld [vmem:[#allocation11 + $0xfc] ss:$24 sps:$4 sm:$0xff]  }
 0x298   :  { %4458 = vmatpush1.bf16.msra.mxu0 %v7875_v32  ;;  %v7803_v32 = vld [vmem:[#allocation11 + $0x98] ss:$24 sps:$4 sm:$0xff]  }
 0x299   :  { %4429 = vmatpush2.bf16.msra.mxu1 %v7779_v8  ;;  %4459 = vmatprep.subr.bf16.mxu0 %v7883_v1  ;;  %v7800_v8 = vld [vmem:[#allocation11 + $0xc8] ss:$24 sps:$4 sm:$0xff]   ;;  %v7814_v1 = vld [vmem:[#allocation11 + $0xc] ss:$24 sps:$4 sm:$0xff]  }
 0x29a   :  { %4430 = vmatprep.subr.bf16.mxu1 %v7784_v57  ;;  %v7805_v57 = vld [vmem:[#allocation11 + $0x9c] ss:$24 sps:$4 sm:$0xff]  }
 0x29c   :  { %4460 = vmatpush1.bf16.msra.mxu0 %v7881_v53  ;;  %v7809_v53 = vld [vmem:[#allocation11 + $0x38] ss:$24 sps:$4 sm:$0xff]  }
 0x29d   :  { %4431 = vmatpush2.bf16.msra.mxu1 %v7782_v61  ;;  %4461 = vmatprep.subr.bf16.mxu0 %v7889_v45  ;;  %v7806_v61 = vld [vmem:[#allocation11 + $0x68] ss:$24 sps:$4 sm:$0xff]   ;;  %v7820_v45 = vld [vmem:[#allocation11 + $0x2ac] ss:$24 sps:$4 sm:$0xff]  }
 0x29e   :  { %4432 = vmatprep.subr.bf16.mxu1 %v7787_v62  ;;  %v7811_v62 = vld [vmem:[#allocation11 + $0x3c] ss:$24 sps:$4 sm:$0xff]  }
 0x2a0   :  { %4462 = vmatpush2.bf16.msra.mxu0 %v7887_v4  ;;  %v7815_v4 = vld [vmem:[#allocation11 + $0x2d8] ss:$24 sps:$4 sm:$0xff]  }
 0x2a1   :  { %4433 = vmatpush2.bf16.msra.mxu1 %v7785_v2  ;;  %4463 = vmatprep.subr.bf16.mxu0 %v7895_v10  ;;  %v7812_v2 = vld [vmem:[#allocation11 + $0x8] ss:$24 sps:$4 sm:$0xff]   ;;  %v7826_v10 = vld [vmem:[#allocation11 + $0x24c] ss:$24 sps:$4 sm:$0xff]  }
 0x2a2   :  { %4434 = vmatprep.subr.bf16.mxu1 %v7790_v3  ;;  %v7817_v3 = vld [vmem:[#allocation11 + $0x2dc] ss:$24 sps:$4 sm:$0xff]  }
 0x2a4   :  { %4464 = vmatpush2.bf16.msra.mxu0 %v7893_v7  ;;  %v7821_v7 = vld [vmem:[#allocation11 + $0x278] ss:$24 sps:$4 sm:$0xff]  }
 0x2a5   :  { %4435 = vmatpush2.bf16.msra.mxu1 %v7788_v6  ;;  %4465 = vmatprep.subr.bf16.mxu0 %v7901_v13  ;;  %v7818_v6 = vld [vmem:[#allocation11 + $0x2a8] ss:$24 sps:$4 sm:$0xff]  }
 0x2a6   :  { %4486 = vmatprep.subr.bf16.mxu1 %v7793_v0  ;;  %v7823_v0 = vld [vmem:[#allocation11 + $0x27c] ss:$24 sps:$4 sm:$0xff]   ;;  %v7824_v13 = vld [vmem:[#allocation11 + $0x248] ss:$24 sps:$4 sm:$0xff]  }
 0x2a8   :  { %v2420_v50 = vpop.f32.mrf.mxu1  ;;  %4466 = vmatpush2.bf16.msra.mxu0 %v7899_v12 }
 0x2a9   :  { %v2421_v16 = vadd.f32 %v2420_v50, %v2380_v15  ;;  %v2461_v17 = vpop.f32.mrf.mxu0  ;;  %4467 = vmatprep.subr.bf16.mxu0 %v7907_v19  ;;  %v7829_v50 = vld [vmem:[#allocation11 + $0x21c] ss:$24 sps:$4 sm:$0xff]  }
 0x2aa   :  { %v2422_v18 = vpop.f32.mrf.mxu1 }
 0x2ab   :  { %v2462_v20 = vadd.f32 %v2461_v17, %v2421_v16  ;;  %v2423_v21 = vadd.f32 %v2422_v18, %v2382_v14  ;;  %v2463_v23 = vpop.f32.mrf.mxu0  ;;  %v7827_v18 = vld [vmem:[#allocation11 + $0x218] ss:$24 sps:$4 sm:$0xff]  }
 0x2ac   :  { %v2424_v26 = vpop.f32.mrf.mxu1  ;;  %4468 = vmatpush2.bf16.msra.mxu0 %v7905_v25  ;;  %v7833_v25 = vld [vmem:[#allocation11 + $0x1b8] ss:$24 sps:$4 sm:$0xff]  }
 0x2ad   :  { %v2464_v27 = vadd.f32 %v2463_v23, %v2423_v21  ;;  %v2465_v28 = vpop.f32.mrf.mxu0  ;;  %v2593_v35 = vpack.c.bf16 %v2462_v20, %v2462_v20  ;;  %4469 = vmatprep.subr.bf16.mxu0 %v7913_v36  ;;  %v7832_v20 = vld [vmem:[#allocation11 + $0x1ec] ss:$24 sps:$4 sm:$0xff]   ;;  %v7830_v21 = vld [vmem:[#allocation11 + $0x1e8] ss:$24 sps:$4 sm:$0xff]   ;;  %v7835_v23 = vld [vmem:[#allocation11 + $0x1bc] ss:$24 sps:$4 sm:$0xff]  }
 0x2ae   :  { %v2425_v5 = vpop.f32.mrf.mxu1  ;;  %v7838_v26 = vld [vmem:[#allocation11 + $0x18c] ss:$24 sps:$4 sm:$0xff]   ;;  %v7844_v28 = vld [vmem:[#allocation11 + $0x75c] ss:$24 sps:$4 sm:$0xff]   ;;  %v7848_v36 = vld [vmem:[#allocation11 + $0x728] ss:$24 sps:$4 sm:$0xff]  }
 0x2af   :  { %v2594_v37 = vpack.c.bf16 %v2464_v27, %v2464_v27  ;;  %v2466_v38 = vpop.f32.mrf.mxu0  ;;  %v7836_v27 = vld [vmem:[#allocation11 + $0x188] ss:$24 sps:$4 sm:$0xff]   ;;  %v7850_v5 = vld [vmem:[#allocation11 + $0x72c] ss:$24 sps:$4 sm:$0xff]  }
 0x2b0   :  { %4470 = vmatpush2.bf16.msra.mxu0 %v7911_v9  ;;  %v7854_v38 = vld [vmem:[#allocation11 + $0x6f8] ss:$24 sps:$4 sm:$0xff]   ;;  %v7862_v9 = vld [vmem:[#allocation11 + $0x6cc] ss:$24 sps:$4 sm:$0xff]  }
 0x2b1   :  { %8431 = vtanh.bf16 %v2594_v37  ;;  %4471 = vmatprep.subr.bf16.mxu0 %v7919_v40  ;;  %v7856_v37 = vld [vmem:[#allocation11 + $0x6fc] ss:$24 sps:$4 sm:$0xff]  }
 0x2b2   :  { %8433 = vtanh.bf16 %v2593_v35  ;;  %v7842_v35 = vld [vmem:[#allocation11 + $0x758] ss:$24 sps:$4 sm:$0xff]   ;;  %v7868_v40 = vld [vmem:[#allocation11 + $0x69c] ss:$24 sps:$4 sm:$0xff]  }
 0x2b4   :  { %4472 = vmatpush2.bf16.msra.mxu0 %v7917_v39  ;;  %v7860_v39 = vld [vmem:[#allocation11 + $0x6c8] ss:$24 sps:$4 sm:$0xff]  }
 0x2b5   :  { %4473 = vmatprep.subr.bf16.mxu0 %v7925_v43  ;;  %v7874_v43 = vld [vmem:[#allocation11 + $0x66c] ss:$24 sps:$4 sm:$0xff]  }
 0x2b8   :  { %4474 = vmatpush2.bf16.msra.mxu0 %v7923_v42  ;;  %v7866_v42 = vld [vmem:[#allocation11 + $0x698] ss:$24 sps:$4 sm:$0xff]  }
 0x2b9   :  { %4475 = vmatprep.subr.bf16.mxu0 %v7931_v46  ;;  %v7880_v46 = vld [vmem:[#allocation11 + $0x63c] ss:$24 sps:$4 sm:$0xff]  }
 0x2bc   :  { %4476 = vmatpush2.bf16.msra.mxu0 %v7929_v44  ;;  %v7872_v44 = vld [vmem:[#allocation11 + $0x668] ss:$24 sps:$4 sm:$0xff]  }
 0x2bd   :  { %4527 = vmatprep.subr.bf16.mxu0 %v7937_v48  ;;  %v7886_v48 = vld [vmem:[#allocation11 + $0x60c] ss:$24 sps:$4 sm:$0xff]  }
 0x2bf   :  { %v8931_v58 = vpop.eup %8431 }
 0x2c0   :  { %v8933_v52 = vpop.eup %8433  ;;  %4436 = vmatprep.mubr.bf16.mxu1 %v8931_v58 }
 0x2c1   :  { %4437 = vmatmul.mubr.bf16.vlgmr.msra.gmra.mxu1 %v8933_v52 }
 0x2c2   :  { %4487 = vmatpush1.bf16.msra.mxu1 %v7791_v63  ;;  %4518 = vmatprep.mubr.bf16.mxu1 %v8919_v22  ;;  %v7878_v63 = vld [vmem:[#allocation11 + $0x638] ss:$24 sps:$4 sm:$0xff]  }
 0x2c3   :  { %4488 = vmatprep.subr.bf16.mxu1 %v7796_v29  ;;  %v7884_v29 = vld [vmem:[#allocation11 + $0x608] ss:$24 sps:$4 sm:$0xff]  }
 0x2c6   :  { %4489 = vmatpush1.bf16.msra.mxu1 %v7794_v60  ;;  %v7892_v60 = vld [vmem:[#allocation11 + $0x8dc] ss:$24 sps:$4 sm:$0xff]  }
 0x2c7   :  { %4490 = vmatprep.subr.bf16.mxu1 %v7799_v54  ;;  %v7890_v54 = vld [vmem:[#allocation11 + $0x8d8] ss:$24 sps:$4 sm:$0xff]  }
 0x2ca   :  { %4491 = vmatpush1.bf16.msra.mxu1 %v7797_v55  ;;  %v771_v55 = vrot.slane %v8904_v51, %v8878_v41 }
 0x2cb   :  { %4492 = vmatprep.subr.bf16.mxu1 %v7802_v56  ;;  %v7898_v56 = vld [vmem:[#allocation11 + $0x8ac] ss:$24 sps:$4 sm:$0xff]  }
 0x2ce   :  { %4493 = vmatpush1.bf16.msra.mxu1 %v7800_v8  ;;  %v775_v8 = vrot.slane %v8904_v51, %v8855_v49 }
 0x2cf   :  { %4494 = vmatprep.subr.bf16.mxu1 %v7805_v57  ;;  %v7896_v57 = vld [vmem:[#allocation11 + $0x8a8] ss:$24 sps:$4 sm:$0xff]  }
 0x2d2   :  { %4495 = vmatpush1.bf16.msra.mxu1 %v7803_v32 }
 0x2d3   :  { %4496 = vmatprep.subr.bf16.mxu1 %v7808_v59  ;;  %v7904_v59 = vld [vmem:[#allocation11 + $0x87c] ss:$24 sps:$4 sm:$0xff]  }
 0x2d6   :  { %4497 = vmatpush1.bf16.msra.mxu1 %v7806_v61 }
 0x2d7   :  { %4498 = vmatprep.subr.bf16.mxu1 %v7811_v62  ;;  %v7902_v62 = vld [vmem:[#allocation11 + $0x878] ss:$24 sps:$4 sm:$0xff]  }
 0x2da   :  { %4499 = vmatpush1.bf16.msra.mxu1 %v7809_v53 }
 0x2db   :  { %4500 = vmatprep.subr.bf16.mxu1 %v7814_v1  ;;  %v7910_v1 = vld [vmem:[#allocation11 + $0x84c] ss:$24 sps:$4 sm:$0xff]  }
 0x2de   :  { %4501 = vmatpush1.bf16.msra.mxu1 %v7812_v2 }
 0x2df   :  { %4502 = vmatprep.subr.bf16.mxu1 %v7817_v3 }
 0x2e2   :  { %4503 = vmatpush2.bf16.msra.mxu1 %v7815_v4 }
 0x2e3   :  { %4504 = vmatprep.subr.bf16.mxu1 %v7820_v45  ;;  %v7908_v45 = vld [vmem:[#allocation11 + $0x848] ss:$24 sps:$4 sm:$0xff]  }
 0x2e6   :  { %4505 = vmatpush2.bf16.msra.mxu1 %v7818_v6 }
 0x2e7   :  { %4506 = vmatprep.subr.bf16.mxu1 %v7823_v0  ;;  %v7916_v0 = vld [vmem:[#allocation11 + $0x81c] ss:$24 sps:$4 sm:$0xff]  }
 0x2e8   :  { %v8938_v11 = vpop.f32.mrf.mxu1 }
 0x2e9   :  { %v8940_v47 = vpop.f32.mrf.mxu0  ;;  %v2503_v32 = vadd.f32 %v8938_v11, %v771_v55  ;;  %v7965_v55 = vld [vmem:[#allocation11 + $0x368] ss:$24 sps:$4 sm:$0xff]  }
 0x2ea   :  { %4507 = vmatpush2.bf16.msra.mxu1 %v7821_v7  ;;  %v8942_v12 = vpop.f32.mrf.mxu1 }
 0x2eb   :  { %v8944_v15 = vpop.f32.mrf.mxu0  ;;  %4508 = vmatprep.subr.bf16.mxu1 %v7826_v10  ;;  %v2505_v61 = vadd.f32 %v8942_v12, %v775_v8  ;;  %v2544_v53 = vadd.f32 %v8940_v47, %v2503_v32  ;;  %v7922_v47 = vld [vmem:[#allocation11 + $0x7ec] ss:$24 sps:$4 sm:$0xff]   ;;  %v7968_v8 = vld [vmem:[#allocation11 + $0x370] ss:$24 sps:$4 sm:$0xff]  }
 0x2ec   :  { %v2506_v14 = vpop.f32.mrf.mxu1  ;;  %v7971_v32 = vld [vmem:[#allocation11 + $0x338] ss:$24 sps:$4 sm:$0xff]  }
 0x2ed   :  { %v2547_v16 = vpop.f32.mrf.mxu0  ;;  %v2546_v3 = vadd.f32 %v8944_v15, %v2505_v61  ;;  %v7928_v15 = vld [vmem:[#allocation11 + $0x7bc] ss:$24 sps:$4 sm:$0xff]   ;;  %v7926_v14 = vld [vmem:[#allocation11 + $0x7b8] ss:$24 sps:$4 sm:$0xff]  }
 0x2ee   :  { %4509 = vmatpush2.bf16.msra.mxu1 %v7824_v13  ;;  %v2507_v17 = vpop.f32.mrf.mxu1  ;;  %v7914_v13 = vld [vmem:[#allocation11 + $0x818] ss:$24 sps:$4 sm:$0xff]   ;;  %v7934_v16 = vld [vmem:[#allocation11 + $0x78c] ss:$24 sps:$4 sm:$0xff]  }
 0x2ef   :  { %v2548_v19 = vpop.f32.mrf.mxu0  ;;  %4510 = vmatprep.subr.bf16.mxu1 %v7829_v50  ;;  %v7920_v50 = vld [vmem:[#allocation11 + $0x7e8] ss:$24 sps:$4 sm:$0xff]  }
 0x2f0   :  { %v7932_v17 = vld [vmem:[#allocation11 + $0x788] ss:$24 sps:$4 sm:$0xff]  }
 0x2f1   :  { %v7974_v61 = vld [vmem:[#allocation11 + $0x340] ss:$24 sps:$4 sm:$0xff]  }
 0x2f2   :  { %4511 = vmatpush2.bf16.msra.mxu1 %v7827_v18  ;;  %v7935_v18 = vld [vmem:[#allocation11 + $0x458] ss:$24 sps:$4 sm:$0xff]  }
 0x2f3   :  { %4512 = vmatprep.subr.bf16.mxu1 %v7832_v20  ;;  %v7940_v20 = vld [vmem:[#allocation11 + $0x464] ss:$24 sps:$4 sm:$0xff]  }
 0x2f6   :  { %4513 = vmatpush2.bf16.msra.mxu1 %v7830_v21 }
 0x2f7   :  { %4514 = vmatprep.subr.bf16.mxu1 %v7835_v23  ;;  %v7938_v23 = vld [vmem:[#allocation11 + $0x460] ss:$24 sps:$4 sm:$0xff]  }
 0x2fa   :  { %4515 = vmatpush2.bf16.msra.mxu1 %v7833_v25 }
 0x2fb   :  { %4516 = vmatprep.subr.bf16.mxu1 %v7838_v26  ;;  %v7943_v26 = vld [vmem:[#allocation11 + $0x42c] ss:$24 sps:$4 sm:$0xff]  }
 0x2fe   :  { %4517 = vmatpush2.bf16.msra.mxu1 %v7836_v27  ;;  %v7946_v27 = vld [vmem:[#allocation11 + $0x434] ss:$24 sps:$4 sm:$0xff]  }
 0x2ff   :  { %4568 = vmatprep.subr.bf16.mxu1 %v7844_v28  ;;  %v7941_v28 = vld [vmem:[#allocation11 + $0x428] ss:$24 sps:$4 sm:$0xff]  }
 0x301   :  { %4519 = vmatmul.mubr.bf16.vlgmr.msra.gmra.mxu1 %v8921_v24 }
 0x302   :  { %4569 = vmatpush1.bf16.msra.mxu1 %v7842_v35 }
 0x303   :  { %4570 = vmatprep.subr.bf16.mxu1 %v7850_v5  ;;  %v7949_v5 = vld [vmem:[#allocation11 + $0x3fc] ss:$24 sps:$4 sm:$0xff]  }
 0x306   :  { %4571 = vmatpush1.bf16.msra.mxu1 %v7848_v36  ;;  %v7944_v36 = vld [vmem:[#allocation11 + $0x430] ss:$24 sps:$4 sm:$0xff]  }
 0x307   :  { %4572 = vmatprep.subr.bf16.mxu1 %v7856_v37 }
 0x30a   :  { %4573 = vmatpush1.bf16.msra.mxu1 %v7854_v38  ;;  %v7952_v38 = vld [vmem:[#allocation11 + $0x404] ss:$24 sps:$4 sm:$0xff]  }
 0x30b   :  { %4574 = vmatprep.subr.bf16.mxu1 %v7862_v9  ;;  %v7947_v9 = vld [vmem:[#allocation11 + $0x3f8] ss:$24 sps:$4 sm:$0xff]  }
 0x30e   :  { %4575 = vmatpush1.bf16.msra.mxu1 %v7860_v39 }
 0x30f   :  { %4576 = vmatprep.subr.bf16.mxu1 %v7868_v40  ;;  %v7955_v40 = vld [vmem:[#allocation11 + $0x3cc] ss:$24 sps:$4 sm:$0xff]  }
 0x312   :  { %4577 = vmatpush1.bf16.msra.mxu1 %v7866_v42  ;;  %v7950_v42 = vld [vmem:[#allocation11 + $0x400] ss:$24 sps:$4 sm:$0xff]  }
 0x313   :  { %4578 = vmatprep.subr.bf16.mxu1 %v7874_v43  ;;  %v7958_v43 = vld [vmem:[#allocation11 + $0x3d4] ss:$24 sps:$4 sm:$0xff]  }
 0x316   :  { %4579 = vmatpush1.bf16.msra.mxu1 %v7872_v44  ;;  %v7953_v44 = vld [vmem:[#allocation11 + $0x3c8] ss:$24 sps:$4 sm:$0xff]  }
 0x317   :  { %4580 = vmatprep.subr.bf16.mxu1 %v7880_v46  ;;  %v7961_v46 = vld [vmem:[#allocation11 + $0x39c] ss:$24 sps:$4 sm:$0xff]  }
 0x31a   :  { %4581 = vmatpush1.bf16.msra.mxu1 %v7878_v63  ;;  %v7964_v63 = vld [vmem:[#allocation11 + $0x3a4] ss:$24 sps:$4 sm:$0xff]  }
 0x31b   :  { %4582 = vmatprep.subr.bf16.mxu1 %v7886_v48  ;;  %v7959_v48 = vld [vmem:[#allocation11 + $0x398] ss:$24 sps:$4 sm:$0xff]  }
 0x31e   :  { %4583 = vmatpush1.bf16.msra.mxu1 %v7884_v29  ;;  %v7967_v29 = vld [vmem:[#allocation11 + $0x36c] ss:$24 sps:$4 sm:$0xff]  }
 0x31f   :  { %4584 = vmatprep.subr.bf16.mxu1 %v7892_v60  ;;  %v7962_v60 = vld [vmem:[#allocation11 + $0x3a0] ss:$24 sps:$4 sm:$0xff]  }
 0x322   :  { %4585 = vmatpush2.bf16.msra.mxu1 %v7890_v54  ;;  %v7970_v54 = vld [vmem:[#allocation11 + $0x374] ss:$24 sps:$4 sm:$0xff]  }
 0x323   :  { %4586 = vmatprep.subr.bf16.mxu1 %v7898_v56  ;;  %v7973_v56 = vld [vmem:[#allocation11 + $0x33c] ss:$24 sps:$4 sm:$0xff]  }
 0x326   :  { %4587 = vmatpush2.bf16.msra.mxu1 %v7896_v57  ;;  %v7976_v57 = vld [vmem:[#allocation11 + $0x344] ss:$24 sps:$4 sm:$0xff]  }
 0x327   :  { %4588 = vmatprep.subr.bf16.mxu1 %v7904_v59  ;;  %v7979_v59 = vld [vmem:[#allocation11 + $0x30c] ss:$24 sps:$4 sm:$0xff]  }
 0x328   :  { %v2584_v2 = vpop.f32.mrf.mxu1 }
 0x329   :  { %v2585_v4 = vadd.f32 %v2584_v2, %v2544_v53  ;;  %v7977_v53 = vld [vmem:[#allocation11 + $0x308] ss:$24 sps:$4 sm:$0xff]  }
 0x32a   :  { %4589 = vmatpush2.bf16.msra.mxu1 %v7902_v62  ;;  %v2586_v51 = vpop.f32.mrf.mxu1  ;;  %v7982_v62 = vld [vmem:[#allocation11 + $0x314] ss:$24 sps:$4 sm:$0xff]   ;;  %v7980_v2 = vld [vmem:[#allocation11 + $0x310] ss:$24 sps:$4 sm:$0xff]  }
 0x32b   :  { %v2587_v6 = vadd.f32 %v2586_v51, %v2546_v3  ;;  %4590 = vmatprep.subr.bf16.mxu1 %v7910_v1  ;;  %v2595_v7 = vpack.c.bf16 %v2585_v4, %v2585_v4  ;;  %v7985_v1 = vld [vmem:[#allocation11 + $0x5dc] ss:$24 sps:$4 sm:$0xff]   ;;  %v7983_v4 = vld [vmem:[#allocation11 + $0x5d8] ss:$24 sps:$4 sm:$0xff]   ;;  %v7991_v51 = vld [vmem:[#allocation11 + $0x5ac] ss:$24 sps:$4 sm:$0xff]  }
 0x32c   :  { %v2588_v10 = vpop.f32.mrf.mxu1  ;;  %v7988_v3 = vld [vmem:[#allocation11 + $0x5e4] ss:$24 sps:$4 sm:$0xff]  }
 0x32d   :  { %v2596_v11 = vpack.c.bf16 %v2587_v6, %v2587_v6  ;;  %v7994_v6 = vld [vmem:[#allocation11 + $0x5b4] ss:$24 sps:$4 sm:$0xff]   ;;  %v7992_v10 = vld [vmem:[#allocation11 + $0x5b0] ss:$24 sps:$4 sm:$0xff]  }
 0x32e   :  { %4591 = vmatpush2.bf16.msra.mxu1 %v7908_v45  ;;  %v2589_v12 = vpop.f32.mrf.mxu1  ;;  %v7986_v45 = vld [vmem:[#allocation11 + $0x5e0] ss:$24 sps:$4 sm:$0xff]  }
 0x32f   :  { %8435 = vtanh.bf16 %v2596_v11  ;;  %4592 = vmatprep.subr.bf16.mxu1 %v7916_v0  ;;  %v7989_v0 = vld [vmem:[#allocation11 + $0x5a8] ss:$24 sps:$4 sm:$0xff]   ;;  %v8000_v11 = vld [vmem:[#allocation11 + $0x584] ss:$24 sps:$4 sm:$0xff]   ;;  %v7995_v12 = vld [vmem:[#allocation11 + $0x578] ss:$24 sps:$4 sm:$0xff]  }
 0x330   :  { %8437 = vtanh.bf16 %v2595_v7  ;;  %v7997_v7 = vld [vmem:[#allocation11 + $0x57c] ss:$24 sps:$4 sm:$0xff]  }
 0x332   :  { %4593 = vmatpush2.bf16.msra.mxu1 %v7914_v13  ;;  %v8003_v13 = vld [vmem:[#allocation11 + $0x54c] ss:$24 sps:$4 sm:$0xff]  }
 0x333   :  { %4594 = vmatprep.subr.bf16.mxu1 %v7922_v47  ;;  %v7998_v47 = vld [vmem:[#allocation11 + $0x580] ss:$24 sps:$4 sm:$0xff]  }
 0x336   :  { %4595 = vmatpush2.bf16.msra.mxu1 %v7920_v50  ;;  %v8006_v50 = vld [vmem:[#allocation11 + $0x554] ss:$24 sps:$4 sm:$0xff]  }
 0x337   :  { %4596 = vmatprep.subr.bf16.mxu1 %v7928_v15  ;;  %v8001_v15 = vld [vmem:[#allocation11 + $0x548] ss:$24 sps:$4 sm:$0xff]  }
 0x33a   :  { %4597 = vmatpush2.bf16.msra.mxu1 %v7926_v14  ;;  %v8009_v14 = vld [vmem:[#allocation11 + $0x51c] ss:$24 sps:$4 sm:$0xff]  }
 0x33b   :  { %4598 = vmatprep.subr.bf16.mxu1 %v7934_v16  ;;  %v8004_v16 = vld [vmem:[#allocation11 + $0x550] ss:$24 sps:$4 sm:$0xff]  }
 0x33d   :  { %v8955_v19 = vpop.eup %8435 }
 0x33e   :  { %v8957_v21 = vpop.eup %8437  ;;  %4599 = vmatpush2.bf16.msra.mxu1 %v7932_v17  ;;  %4477 = vmatprep.mubr.bf16.mxu0 %v8955_v19  ;;  %v8012_v17 = vld [vmem:[#allocation11 + $0x524] ss:$24 sps:$4 sm:$0xff]  }
 0x33f   :  { %4600 = vmatprep.mubr.bf16.mxu1 %v8955_v19  ;;  %v8961_v25 = vpop.f32.mrf.mxu0  ;;  %4478 = vmatmul.mubr.bf16.vlgmr.msra.gmra.mxu0 %v8957_v21 }
 0x340   :  { %4528 = vmatpush1.bf16.msra.mxu0 %v7935_v18  ;;  %4559 = vmatprep.mubr.bf16.mxu0 %v8931_v58  ;;  %v8007_v18 = vld [vmem:[#allocation11 + $0x518] ss:$24 sps:$4 sm:$0xff]  }
 0x341   :  { %4601 = vmatmul.mubr.bf16.vlgmr.msra.gmra.mxu1 %v8957_v21  ;;  %4650 = vmatprep.subr.bf16.mxu1 %v7940_v20  ;;  %v8966_v35 = vpop.f32.mrf.mxu0  ;;  %v8015_v20 = vld [vmem:[#allocation11 + $0x4ec] ss:$24 sps:$4 sm:$0xff]  }
 0x342   :  { %4651 = vmatpush1.bf16.msra.mxu1 %v7938_v23  ;;  %4682 = vmatprep.mubr.bf16.mxu1 %v8931_v58  ;;  %v7956_v58 = vld [vmem:[#allocation11 + $0x3d0] ss:$24 sps:$4 sm:$0xff]   ;;  %v8010_v23 = vld [vmem:[#allocation11 + $0x520] ss:$24 sps:$4 sm:$0xff]  }
 0x343   :  { %4529 = vmatprep.subr.bf16.mxu0 %v7943_v26  ;;  %v4401_v37 = vpop.f32.mrf.mxu0  ;;  %4652 = vmatprep.subr.bf16.mxu1 %v7946_v27  ;;  %v8018_v26 = vld [vmem:[#allocation11 + $0x4f4] ss:$24 sps:$4 sm:$0xff]   ;;  %v8013_v27 = vld [vmem:[#allocation11 + $0x4e8] ss:$24 sps:$4 sm:$0xff]  }
 0x344   :  { %4530 = vmatpush1.bf16.msra.mxu0 %v7941_v28  ;;  %v8021_v28 = vld [vmem:[#allocation11 + $0x4bc] ss:$24 sps:$4 sm:$0xff]   ;;  %v8019_v37 = vld [vmem:[#allocation11 + $0x4b8] ss:$24 sps:$4 sm:$0xff]  }
 0x345   :  { %v4402_v39 = vpop.f32.mrf.mxu0  ;;  %4531 = vmatprep.subr.bf16.mxu0 %v7949_v5  ;;  %v8016_v5 = vld [vmem:[#allocation11 + $0x4f0] ss:$24 sps:$4 sm:$0xff]  }
 0x346   :  { %4653 = vmatpush1.bf16.msra.mxu1 %v7944_v36  ;;  %v8024_v36 = vld [vmem:[#allocation11 + $0x4c4] ss:$24 sps:$4 sm:$0xff]   ;;  %v8030_v39 = vld [vmem:[#allocation11 + $0x494] ss:$24 sps:$4 sm:$0xff]  }
 0x347   :  { %4654 = vmatprep.subr.bf16.mxu1 %v7952_v38  ;;  %v8027_v38 = vld [vmem:[#allocation11 + $0x48c] ss:$24 sps:$4 sm:$0xff]  }
 0x348   :  { %4532 = vmatpush1.bf16.msra.mxu0 %v7947_v9  ;;  %v8022_v9 = vld [vmem:[#allocation11 + $0x4c0] ss:$24 sps:$4 sm:$0xff]  }
 0x349   :  { %4533 = vmatprep.subr.bf16.mxu0 %v7955_v40  ;;  %v8025_v40 = vld [vmem:[#allocation11 + $0x488] ss:$24 sps:$4 sm:$0xff]  }
 0x34a   :  { %4655 = vmatpush1.bf16.msra.mxu1 %v7950_v42  ;;  %v8969_v42 = vld [vmem:[#allocation13] sm:$0x3f] }
 0x34b   :  { %4656 = vmatprep.subr.bf16.mxu1 %v7958_v43  ;;  %v8033_v43 = vld [vmem:[#allocation11 + $0x164] ss:$24 sps:$4 sm:$0xff]  }
 0x34c   :  { %4534 = vmatpush1.bf16.msra.mxu0 %v7953_v44  ;;  %v8028_v44 = vld [vmem:[#allocation11 + $0x490] ss:$24 sps:$4 sm:$0xff]  }
 0x34d   :  { %4535 = vmatprep.subr.bf16.mxu0 %v7961_v46  ;;  %v8102_v46 = vld [vmem:[#allocation14 + $0xe4] ss:$16 sps:$4 sm:$0xff]  }
 0x34e   :  { %4657 = vmatpush1.bf16.msra.mxu1 %v7956_v58  ;;  %v2896_v58 = vrot.slane %v8969_v42, %v8833_v30 }
 0x34f   :  { %4658 = vmatprep.subr.bf16.mxu1 %v7964_v63  ;;  %v8031_v63 = vld [vmem:[#allocation11 + $0x160] ss:$24 sps:$4 sm:$0xff]  }
 0x350   :  { %4536 = vmatpush1.bf16.msra.mxu0 %v7959_v48  ;;  %v8036_v48 = vld [vmem:[#allocation11 + $0x134] ss:$24 sps:$4 sm:$0xff]  }
 0x351   :  { %4537 = vmatprep.subr.bf16.mxu0 %v7967_v29  ;;  %v2900_v29 = vrot.slane %v8969_v42, %v8841_v33 }
 0x352   :  { %4659 = vmatpush1.bf16.msra.mxu1 %v7962_v60  ;;  %v8100_v60 = vld [vmem:[#allocation14 + $0xe0] ss:$16 sps:$4 sm:$0xff]  }
 0x353   :  { %4660 = vmatprep.subr.bf16.mxu1 %v7970_v54  ;;  %v8108_v54 = vld [vmem:[#allocation14 + $0xc4] ss:$16 sps:$4 sm:$0xff]  }
 0x354   :  { %4538 = vmatpush1.bf16.msra.mxu0 %v7965_v55  ;;  %v4398_v55 = vadd.f32 %v8961_v25, %v2896_v58  ;;  %v8037_v25 = vld [vmem:[#allocation11 + $0x100] ss:$24 sps:$4 sm:$0xff]   ;;  %v8064_v58 = vld [vmem:[#allocation11 + $0x250] ss:$24 sps:$4 sm:$0xff]  }
 0x355   :  { %4539 = vmatprep.subr.bf16.mxu0 %v7973_v56  ;;  %v8034_v56 = vld [vmem:[#allocation11 + $0x130] ss:$24 sps:$4 sm:$0xff]  }
 0x356   :  { %4661 = vmatpush1.bf16.msra.mxu1 %v7968_v8 }
 0x357   :  { %4662 = vmatprep.subr.bf16.mxu1 %v7976_v57  ;;  %v8039_v57 = vld [vmem:[#allocation11 + $0x104] ss:$24 sps:$4 sm:$0xff]  }
 0x358   :  { %4540 = vmatpush1.bf16.msra.mxu0 %v7971_v32  ;;  %v4400_v32 = vadd.f32 %v8966_v35, %v2900_v29  ;;  %v8040_v35 = vld [vmem:[#allocation11 + $0xd0] ss:$24 sps:$4 sm:$0xff]  }
 0x359   :  { %4541 = vmatprep.subr.bf16.mxu0 %v7979_v59  ;;  %v8165_v29 = vld [vmem:[#allocation14 + $0x164] ss:$16 sps:$4 sm:$0xff]  }
 0x35a   :  { %4663 = vmatpush1.bf16.msra.mxu1 %v7974_v61  ;;  %v8106_v61 = vld [vmem:[#allocation14 + $0xc0] ss:$16 sps:$4 sm:$0xff]  }
 0x35b   :  { %4664 = vmatprep.subr.bf16.mxu1 %v7982_v62 }
 0x35c   :  { %4542 = vmatpush1.bf16.msra.mxu0 %v7977_v53  ;;  %v8114_v53 = vld [vmem:[#allocation14 + $0xa4] ss:$16 sps:$4 sm:$0xff]  }
 0x35d   :  { %4543 = vmatprep.subr.bf16.mxu0 %v7985_v1 }
 0x35e   :  { %4665 = vmatpush1.bf16.msra.mxu1 %v7980_v2  ;;  %v8042_v2 = vld [vmem:[#allocation11 + $0xd4] ss:$24 sps:$4 sm:$0xff]  }
 0x35f   :  { %4666 = vmatprep.subr.bf16.mxu1 %v7988_v3 }
 0x360   :  { %4544 = vmatpush2.bf16.msra.mxu0 %v7983_v4  ;;  %v8120_v4 = vld [vmem:[#allocation14 + $0x84] ss:$16 sps:$4 sm:$0xff]  }
 0x361   :  { %4545 = vmatprep.subr.bf16.mxu0 %v7991_v51  ;;  %v8045_v51 = vld [vmem:[#allocation11 + $0xa4] ss:$24 sps:$4 sm:$0xff]  }
 0x362   :  { %4667 = vmatpush2.bf16.msra.mxu1 %v7986_v45  ;;  %v8118_v45 = vld [vmem:[#allocation14 + $0x80] ss:$16 sps:$4 sm:$0xff]  }
 0x363   :  { %4668 = vmatprep.subr.bf16.mxu1 %v7994_v6  ;;  %v8126_v6 = vld [vmem:[#allocation14 + $0x64] ss:$16 sps:$4 sm:$0xff]  }
 0x364   :  { %4546 = vmatpush2.bf16.msra.mxu0 %v7989_v0  ;;  %v8043_v0 = vld [vmem:[#allocation11 + $0xa0] ss:$24 sps:$4 sm:$0xff]  }
 0x365   :  { %4547 = vmatprep.subr.bf16.mxu0 %v7997_v7  ;;  %v8048_v7 = vld [vmem:[#allocation11 + $0x74] ss:$24 sps:$4 sm:$0xff]  }
 0x366   :  { %4669 = vmatpush2.bf16.msra.mxu1 %v7992_v10  ;;  %v8124_v10 = vld [vmem:[#allocation14 + $0x60] ss:$16 sps:$4 sm:$0xff]  }
 0x367   :  { %4670 = vmatprep.subr.bf16.mxu1 %v8000_v11  ;;  %v8132_v11 = vld [vmem:[#allocation14 + $0x44] ss:$16 sps:$4 sm:$0xff]  }
 0x368   :  { %4548 = vmatpush2.bf16.msra.mxu0 %v7995_v12  ;;  %v8046_v12 = vld [vmem:[#allocation11 + $0x70] ss:$24 sps:$4 sm:$0xff]  }
 0x369   :  { %4549 = vmatprep.subr.bf16.mxu0 %v8003_v13  ;;  %v8051_v13 = vld [vmem:[#allocation11 + $0x44] ss:$24 sps:$4 sm:$0xff]  }
 0x36a   :  { %4671 = vmatpush2.bf16.msra.mxu1 %v7998_v47  ;;  %v8130_v47 = vld [vmem:[#allocation14 + $0x40] ss:$16 sps:$4 sm:$0xff]  }
 0x36b   :  { %4672 = vmatprep.subr.bf16.mxu1 %v8006_v50  ;;  %v8138_v50 = vld [vmem:[#allocation14 + $0x24] ss:$16 sps:$4 sm:$0xff]  }
 0x36c   :  { %4550 = vmatpush2.bf16.msra.mxu0 %v8001_v15  ;;  %v8049_v15 = vld [vmem:[#allocation11 + $0x40] ss:$24 sps:$4 sm:$0xff]  }
 0x36d   :  { %4551 = vmatprep.subr.bf16.mxu0 %v8009_v14  ;;  %v8054_v14 = vld [vmem:[#allocation11 + $0x14] ss:$24 sps:$4 sm:$0xff]  }
 0x36e   :  { %4673 = vmatpush2.bf16.msra.mxu1 %v8004_v16  ;;  %v8136_v16 = vld [vmem:[#allocation14 + $0x20] ss:$16 sps:$4 sm:$0xff]  }
 0x36f   :  { %4674 = vmatprep.subr.bf16.mxu1 %v8012_v17  ;;  %v8144_v17 = vld [vmem:[#allocation14 + $0x4] ss:$16 sps:$4 sm:$0xff]  }
 0x370   :  { %4552 = vmatpush2.bf16.msra.mxu0 %v8007_v18  ;;  %v8052_v18 = vld [vmem:[#allocation11 + $0x10] ss:$24 sps:$4 sm:$0xff]  }
 0x371   :  { %4553 = vmatprep.subr.bf16.mxu0 %v8015_v20  ;;  %v8057_v20 = vld [vmem:[#allocation11 + $0x2e4] ss:$24 sps:$4 sm:$0xff]  }
 0x372   :  { %4675 = vmatpush2.bf16.msra.mxu1 %v8010_v23  ;;  %v8142_v23 = vld [vmem:[#allocation14] ss:$16 sps:$4 sm:$0xff]  }
 0x373   :  { %4676 = vmatprep.subr.bf16.mxu1 %v8018_v26  ;;  %v8150_v26 = vld [vmem:[#allocation14 + $0x1e4] ss:$16 sps:$4 sm:$0xff]  }
 0x374   :  { %4554 = vmatpush2.bf16.msra.mxu0 %v8013_v27  ;;  %v8055_v27 = vld [vmem:[#allocation11 + $0x2e0] ss:$24 sps:$4 sm:$0xff]  }
 0x375   :  { %4555 = vmatprep.subr.bf16.mxu0 %v8021_v28  ;;  %v8060_v28 = vld [vmem:[#allocation11 + $0x2b4] ss:$24 sps:$4 sm:$0xff]  }
 0x376   :  { %4677 = vmatpush2.bf16.msra.mxu1 %v8016_v5  ;;  %v8148_v5 = vld [vmem:[#allocation14 + $0x1e0] ss:$16 sps:$4 sm:$0xff]  }
 0x377   :  { %4678 = vmatprep.subr.bf16.mxu1 %v8024_v36  ;;  %v8156_v36 = vld [vmem:[#allocation14 + $0x1c4] ss:$16 sps:$4 sm:$0xff]  }
 0x378   :  { %4556 = vmatpush2.bf16.msra.mxu0 %v8019_v37  ;;  %v8058_v37 = vld [vmem:[#allocation11 + $0x2b0] ss:$24 sps:$4 sm:$0xff]  }
 0x379   :  { %4557 = vmatprep.subr.bf16.mxu0 %v8027_v38  ;;  %v8063_v38 = vld [vmem:[#allocation11 + $0x284] ss:$24 sps:$4 sm:$0xff]  }
 0x37a   :  { %4679 = vmatpush2.bf16.msra.mxu1 %v8022_v9  ;;  %v8154_v9 = vld [vmem:[#allocation14 + $0x1c0] ss:$16 sps:$4 sm:$0xff]  }
 0x37b   :  { %4680 = vmatprep.subr.bf16.mxu1 %v8030_v39  ;;  %v8159_v39 = vld [vmem:[#allocation14 + $0x1a4] ss:$16 sps:$4 sm:$0xff]  }
 0x37c   :  { %4558 = vmatpush2.bf16.msra.mxu0 %v8025_v40  ;;  %v8061_v40 = vld [vmem:[#allocation11 + $0x280] ss:$24 sps:$4 sm:$0xff]  }
 0x37d   :  { %4609 = vmatprep.subr.bf16.mxu0 %v8033_v43  ;;  %v8066_v43 = vld [vmem:[#allocation11 + $0x254] ss:$24 sps:$4 sm:$0xff]  }
 0x37e   :  { %4681 = vmatpush2.bf16.msra.mxu1 %v8028_v44  ;;  %v8157_v44 = vld [vmem:[#allocation14 + $0x1a0] ss:$16 sps:$4 sm:$0xff]  }
 0x37f   :  { %4560 = vmatmul.mubr.bf16.vlgmr.msra.gmra.mxu0 %v8933_v52  ;;  %5918 = vmatprep.subr.bf16.mxu1 %v8102_v46  ;;  %v8162_v46 = vld [vmem:[#allocation14 + $0x184] ss:$16 sps:$4 sm:$0xff]  }
 0x380   :  { %4610 = vmatpush1.bf16.msra.mxu0 %v8031_v63  ;;  %4641 = vmatprep.mubr.bf16.mxu0 %v8919_v22  ;;  %v8069_v63 = vld [vmem:[#allocation11 + $0x224] ss:$24 sps:$4 sm:$0xff]  }
 0x381   :  { %4683 = vmatmul.mubr.bf16.vlgmr.msra.gmra.mxu1 %v8933_v52  ;;  %v4438_v8 = vpop.f32.mrf.mxu1  ;;  %4611 = vmatprep.subr.bf16.mxu0 %v8036_v48  ;;  %v8112_v52 = vld [vmem:[#allocation14 + $0xa0] ss:$16 sps:$4 sm:$0xff]  }
 0x382   :  { %v8980_v59 = vadd.f32 %v4438_v8, %v4398_v55  ;;  %5919 = vmatpush1.bf16.msra.mxu1 %v8100_v60  ;;  %v8160_v48 = vld [vmem:[#allocation14 + $0x180] ss:$16 sps:$4 sm:$0xff]  }
 0x383   :  { %v4440_v62 = vpop.f32.mrf.mxu1  ;;  %5920 = vmatprep.subr.bf16.mxu1 %v8108_v54  ;;  %v8067_v60 = vld [vmem:[#allocation11 + $0x220] ss:$24 sps:$4 sm:$0xff]   ;;  %v8072_v54 = vld [vmem:[#allocation11 + $0x1f4] ss:$24 sps:$4 sm:$0xff]   ;;  %v8070_v8 = vld [vmem:[#allocation11 + $0x1f0] ss:$24 sps:$4 sm:$0xff]  }
 0x384   :  { %v8982_v1 = vadd.f32 %v4440_v62, %v4400_v32  ;;  %4612 = vmatpush1.bf16.msra.mxu0 %v8034_v56  ;;  %v8163_v55 = vld [vmem:[#allocation14 + $0x160] ss:$16 sps:$4 sm:$0xff]   ;;  %v8168_v56 = vld [vmem:[#allocation14 + $0x144] ss:$16 sps:$4 sm:$0xff]  }
 0x385   :  { %v4442_v22 = vpop.f32.mrf.mxu1  ;;  %4613 = vmatprep.subr.bf16.mxu0 %v8039_v57  ;;  %v8075_v57 = vld [vmem:[#allocation11 + $0x1c4] ss:$24 sps:$4 sm:$0xff]   ;;  %v8073_v62 = vld [vmem:[#allocation11 + $0x1c0] ss:$24 sps:$4 sm:$0xff]  }
 0x386   :  { %5921 = vmatpush1.bf16.msra.mxu1 %v8106_v61  ;;  %v8166_v32 = vld [vmem:[#allocation14 + $0x140] ss:$16 sps:$4 sm:$0xff]   ;;  %v8171_v61 = vld [vmem:[#allocation14 + $0x124] ss:$16 sps:$4 sm:$0xff]  }
 0x387   :  { %v4443_v3 = vpop.f32.mrf.mxu1  ;;  %5922 = vmatprep.subr.bf16.mxu1 %v8114_v53  ;;  %v8078_v53 = vld [vmem:[#allocation11 + $0x194] ss:$24 sps:$4 sm:$0xff]  }
 0x388   :  { %4614 = vmatpush1.bf16.msra.mxu0 %v8037_v25  ;;  %v8169_v25 = vld [vmem:[#allocation14 + $0x120] ss:$16 sps:$4 sm:$0xff]   ;;  %v8174_v22 = vld [vmem:[#allocation14 + $0x104] ss:$16 sps:$4 sm:$0xff]  }
 0x389   :  { %4615 = vmatprep.subr.bf16.mxu0 %v8042_v2  ;;  %v8076_v2 = vld [vmem:[#allocation11 + $0x190] ss:$24 sps:$4 sm:$0xff]  }
 0x38a   :  { %5923 = vmatpush1.bf16.msra.mxu1 %v8112_v52  ;;  %v8081_v52 = vld [vmem:[#allocation11 + $0x764] ss:$24 sps:$4 sm:$0xff]  }
 0x38b   :  { %5924 = vmatprep.subr.bf16.mxu1 %v8120_v4  ;;  %v8172_v3 = vld [vmem:[#allocation14 + $0x100] ss:$16 sps:$4 sm:$0xff]  }
 0x38c   :  { %4616 = vmatpush1.bf16.msra.mxu0 %v8040_v35  ;;  %v8079_v4 = vld [vmem:[#allocation11 + $0x760] ss:$24 sps:$4 sm:$0xff]   ;;  %v8084_v35 = vld [vmem:[#allocation11 + $0x734] ss:$24 sps:$4 sm:$0xff]  }
 0x38d   :  { %4617 = vmatprep.subr.bf16.mxu0 %v8045_v51  ;;  %v8082_v51 = vld [vmem:[#allocation11 + $0x730] ss:$24 sps:$4 sm:$0xff]  }
 0x38e   :  { %5925 = vmatpush1.bf16.msra.mxu1 %v8118_v45 }
 0x38f   :  { %5926 = vmatprep.subr.bf16.mxu1 %v8126_v6  ;;  %v8087_v6 = vld [vmem:[#allocation11 + $0x704] ss:$24 sps:$4 sm:$0xff]  }
 0x390   :  { %4618 = vmatpush1.bf16.msra.mxu0 %v8043_v0 }
 0x391   :  { %4619 = vmatprep.subr.bf16.mxu0 %v8048_v7  ;;  %v8085_v7 = vld [vmem:[#allocation11 + $0x700] ss:$24 sps:$4 sm:$0xff]  }
 0x392   :  { %5927 = vmatpush1.bf16.msra.mxu1 %v8124_v10 }
 0x393   :  { %5928 = vmatprep.subr.bf16.mxu1 %v8132_v11  ;;  %v8090_v11 = vld [vmem:[#allocation11 + $0x6d4] ss:$24 sps:$4 sm:$0xff]  }
 0x394   :  { %4620 = vmatpush1.bf16.msra.mxu0 %v8046_v12 }
 0x395   :  { %4621 = vmatprep.subr.bf16.mxu0 %v8051_v13  ;;  %v8088_v13 = vld [vmem:[#allocation11 + $0x6d0] ss:$24 sps:$4 sm:$0xff]  }
 0x396   :  { %5929 = vmatpush1.bf16.msra.mxu1 %v8130_v47  ;;  %v8091_v47 = vld [vmem:[#allocation11 + $0x6a0] ss:$24 sps:$4 sm:$0xff]  }
 0x397   :  { %5930 = vmatprep.subr.bf16.mxu1 %v8138_v50  ;;  %v8094_v50 = vld [vmem:[#allocation11 + $0x670] ss:$24 sps:$4 sm:$0xff]  }
 0x398   :  { %4622 = vmatpush1.bf16.msra.mxu0 %v8049_v15  ;;  %v8099_v15 = vld [vmem:[#allocation11 + $0x644] ss:$24 sps:$4 sm:$0xff]  }
 0x399   :  { %4623 = vmatprep.subr.bf16.mxu0 %v8054_v14  ;;  %v8097_v14 = vld [vmem:[#allocation11 + $0x640] ss:$24 sps:$4 sm:$0xff]  }
 0x39a   :  { %5931 = vmatpush1.bf16.msra.mxu1 %v8136_v16  ;;  %v8105_v16 = vld [vmem:[#allocation11 + $0x614] ss:$24 sps:$4 sm:$0xff]  }
 0x39b   :  { %5932 = vmatprep.subr.bf16.mxu1 %v8144_v17  ;;  %v8103_v17 = vld [vmem:[#allocation11 + $0x610] ss:$24 sps:$4 sm:$0xff]  }
 0x39c   :  { %4624 = vmatpush1.bf16.msra.mxu0 %v8052_v18  ;;  %v8111_v18 = vld [vmem:[#allocation11 + $0x8e4] ss:$24 sps:$4 sm:$0xff]  }
 0x39d   :  { %4625 = vmatprep.subr.bf16.mxu0 %v8057_v20  ;;  %v8109_v20 = vld [vmem:[#allocation11 + $0x8e0] ss:$24 sps:$4 sm:$0xff]  }
 0x39e   :  { %5933 = vmatpush1.bf16.msra.mxu1 %v8142_v23  ;;  %v8117_v23 = vld [vmem:[#allocation11 + $0x8b4] ss:$24 sps:$4 sm:$0xff]  }
 0x39f   :  { %5934 = vmatprep.subr.bf16.mxu1 %v8150_v26  ;;  %v8115_v26 = vld [vmem:[#allocation11 + $0x8b0] ss:$24 sps:$4 sm:$0xff]  }
 0x3a0   :  { %4626 = vmatpush2.bf16.msra.mxu0 %v8055_v27  ;;  %v8123_v27 = vld [vmem:[#allocation11 + $0x884] ss:$24 sps:$4 sm:$0xff]  }
 0x3a1   :  { %4627 = vmatprep.subr.bf16.mxu0 %v8060_v28  ;;  %v8121_v28 = vld [vmem:[#allocation11 + $0x880] ss:$24 sps:$4 sm:$0xff]  }
 0x3a2   :  { %5935 = vmatpush2.bf16.msra.mxu1 %v8148_v5  ;;  %v8129_v5 = vld [vmem:[#allocation11 + $0x854] ss:$24 sps:$4 sm:$0xff]  }
 0x3a3   :  { %5936 = vmatprep.subr.bf16.mxu1 %v8156_v36  ;;  %v8127_v36 = vld [vmem:[#allocation11 + $0x850] ss:$24 sps:$4 sm:$0xff]  }
 0x3a4   :  { %4628 = vmatpush2.bf16.msra.mxu0 %v8058_v37  ;;  %v8135_v37 = vld [vmem:[#allocation11 + $0x824] ss:$24 sps:$4 sm:$0xff]  }
 0x3a5   :  { %4629 = vmatprep.subr.bf16.mxu0 %v8063_v38  ;;  %v8133_v38 = vld [vmem:[#allocation11 + $0x820] ss:$24 sps:$4 sm:$0xff]  }
 0x3a6   :  { %5937 = vmatpush2.bf16.msra.mxu1 %v8154_v9  ;;  %v8141_v9 = vld [vmem:[#allocation11 + $0x7f4] ss:$24 sps:$4 sm:$0xff]  }
 0x3a7   :  { %5938 = vmatprep.subr.bf16.mxu1 %v8159_v39  ;;  %v8139_v39 = vld [vmem:[#allocation11 + $0x7f0] ss:$24 sps:$4 sm:$0xff]  }
 0x3a8   :  { %4630 = vmatpush2.bf16.msra.mxu0 %v8061_v40  ;;  %v8147_v40 = vld [vmem:[#allocation11 + $0x7c4] ss:$24 sps:$4 sm:$0xff]  }
 0x3a9   :  { %4631 = vmatprep.subr.bf16.mxu0 %v8066_v43  ;;  %v8145_v43 = vld [vmem:[#allocation11 + $0x7c0] ss:$24 sps:$4 sm:$0xff]  }
 0x3aa   :  { %5939 = vmatpush2.bf16.msra.mxu1 %v8157_v44  ;;  %v8153_v44 = vld [vmem:[#allocation11 + $0x794] ss:$24 sps:$4 sm:$0xff]  }
 0x3ab   :  { %5940 = vmatprep.subr.bf16.mxu1 %v8162_v46  ;;  %v8151_v46 = vld [vmem:[#allocation11 + $0x790] ss:$24 sps:$4 sm:$0xff]  }
 0x3ac   :  { %4632 = vmatpush2.bf16.msra.mxu0 %v8064_v58  ;;  %v8177_v58 = vld [vmem:[#allocation14 + $0x2e4] ss:$16 sps:$4 sm:$0xff]  }
 0x3ad   :  { %4633 = vmatprep.subr.bf16.mxu0 %v8069_v63  ;;  %v8175_v63 = vld [vmem:[#allocation14 + $0x2e0] ss:$16 sps:$4 sm:$0xff]  }
 0x3ae   :  { %5941 = vmatpush2.bf16.msra.mxu1 %v8160_v48  ;;  %v8180_v48 = vld [vmem:[#allocation14 + $0x2c4] ss:$16 sps:$4 sm:$0xff]  }
 0x3af   :  { %5942 = vmatprep.subr.bf16.mxu1 %v8165_v29 }
 0x3b0   :  { %4634 = vmatpush2.bf16.msra.mxu0 %v8067_v60 }
 0x3b1   :  { %4635 = vmatprep.subr.bf16.mxu0 %v8072_v54  ;;  %v8178_v54 = vld [vmem:[#allocation14 + $0x2c0] ss:$16 sps:$4 sm:$0xff]  }
 0x3b2   :  { %5943 = vmatpush2.bf16.msra.mxu1 %v8163_v55 }
 0x3b3   :  { %5944 = vmatprep.subr.bf16.mxu1 %v8168_v56 }
 0x3b4   :  { %4636 = vmatpush2.bf16.msra.mxu0 %v8070_v8  ;;  %v8183_v8 = vld [vmem:[#allocation14 + $0x2a4] ss:$16 sps:$4 sm:$0xff]  }
 0x3b5   :  { %4637 = vmatprep.subr.bf16.mxu0 %v8075_v57 }
 0x3b6   :  { %5945 = vmatpush2.bf16.msra.mxu1 %v8166_v32 }
 0x3b7   :  { %5946 = vmatprep.subr.bf16.mxu1 %v8171_v61 }
 0x3b8   :  { %4638 = vmatpush2.bf16.msra.mxu0 %v8073_v62 }
 0x3b9   :  { %4639 = vmatprep.subr.bf16.mxu0 %v8078_v53 }
 0x3ba   :  { %5947 = vmatpush2.bf16.msra.mxu1 %v8169_v25  ;;  %v8181_v25 = vld [vmem:[#allocation14 + $0x2a0] ss:$16 sps:$4 sm:$0xff]  }
 0x3bb   :  { %5948 = vmatprep.subr.bf16.mxu1 %v8174_v22 }
 0x3bc   :  { %4640 = vmatpush2.bf16.msra.mxu0 %v8076_v2 }
 0x3bd   :  { %4691 = vmatprep.subr.bf16.mxu0 %v8081_v52  ;;  %v8184_v52 = vld [vmem:[#allocation14 + $0x280] ss:$16 sps:$4 sm:$0xff]  }
 0x3be   :  { %5949 = vmatpush2.bf16.msra.mxu1 %v8172_v3  ;;  %v8189_v3 = vld [vmem:[#allocation14 + $0x264] ss:$16 sps:$4 sm:$0xff]  }
 0x3bf   :  { %4642 = vmatmul.mubr.bf16.vlgmr.msra.gmra.mxu0 %v8921_v24  ;;  %v8093_v24 = vld [vmem:[#allocation11 + $0x6a4] ss:$24 sps:$4 sm:$0xff]  }
 0x3c0   :  { %4692 = vmatpush1.bf16.msra.mxu0 %v8079_v4  ;;  %4723 = vmatprep.mubr.bf16.mxu0 %v8955_v19  ;;  %v8096_v19 = vld [vmem:[#allocation11 + $0x674] ss:$24 sps:$4 sm:$0xff]  }
 0x3c1   :  { %v8986_v45 = vpop.f32.mrf.mxu1  ;;  %4693 = vmatprep.subr.bf16.mxu0 %v8084_v35  ;;  %v8192_v4 = vld [vmem:[#allocation14 + $0x244] ss:$16 sps:$4 sm:$0xff]   ;;  %v8190_v35 = vld [vmem:[#allocation14 + $0x240] ss:$16 sps:$4 sm:$0xff]  }
 0x3c3   :  { %v8988_v0 = vpop.f32.mrf.mxu1 }
 0x3c4   :  { %4694 = vmatpush1.bf16.msra.mxu0 %v8082_v51  ;;  %v8195_v51 = vld [vmem:[#allocation14 + $0x224] ss:$16 sps:$4 sm:$0xff]  }
 0x3c5   :  { %v4524_v10 = vpop.f32.mrf.mxu1  ;;  %4695 = vmatprep.subr.bf16.mxu0 %v8087_v6 }
 0x3c6   :  { %v8273_v10 = vld [vmem:[#allocation14 + $0x4e4] ss:$16 sps:$4 sm:$0xff]  }
 0x3c7   :  { %v4525_v12 = vpop.f32.mrf.mxu1  ;;  %6000 = vmatprep.subr.bf16.mxu1 %v8273_v10 }
 0x3c8   :  { %4696 = vmatpush1.bf16.msra.mxu0 %v8085_v7  ;;  %v8193_v7 = vld [vmem:[#allocation14 + $0x220] ss:$16 sps:$4 sm:$0xff]   ;;  %v8198_v12 = vld [vmem:[#allocation14 + $0x204] ss:$16 sps:$4 sm:$0xff]  }
 0x3c9   :  { %4697 = vmatprep.subr.bf16.mxu0 %v8090_v11 }
 0x3cc   :  { %4698 = vmatpush1.bf16.msra.mxu0 %v8088_v13  ;;  %v8271_v13 = vld [vmem:[#allocation14 + $0x4e0] ss:$16 sps:$4 sm:$0xff]  }
 0x3cd   :  { %4699 = vmatprep.subr.bf16.mxu0 %v8093_v24  ;;  %v8196_v24 = vld [vmem:[#allocation14 + $0x200] ss:$16 sps:$4 sm:$0xff]  }
 0x3d0   :  { %4700 = vmatpush1.bf16.msra.mxu0 %v8091_v47  ;;  %v8279_v47 = vld [vmem:[#allocation14 + $0x4c4] ss:$16 sps:$4 sm:$0xff]  }
 0x3d1   :  { %4701 = vmatprep.subr.bf16.mxu0 %v8096_v19  ;;  %v8201_v19 = vld [vmem:[#allocation14 + $0x3e4] ss:$16 sps:$4 sm:$0xff]  }
 0x3d4   :  { %4702 = vmatpush1.bf16.msra.mxu0 %v8094_v50  ;;  %v8277_v50 = vld [vmem:[#allocation14 + $0x4c0] ss:$16 sps:$4 sm:$0xff]  }
 0x3d5   :  { %4703 = vmatprep.subr.bf16.mxu0 %v8099_v15  ;;  %v8199_v15 = vld [vmem:[#allocation14 + $0x3e0] ss:$16 sps:$4 sm:$0xff]  }
 0x3d8   :  { %4704 = vmatpush1.bf16.msra.mxu0 %v8097_v14  ;;  %v8285_v14 = vld [vmem:[#allocation14 + $0x4a4] ss:$16 sps:$4 sm:$0xff]  }
 0x3d9   :  { %4705 = vmatprep.subr.bf16.mxu0 %v8105_v16  ;;  %v8204_v16 = vld [vmem:[#allocation14 + $0x3c4] ss:$16 sps:$4 sm:$0xff]  }
 0x3dc   :  { %4706 = vmatpush1.bf16.msra.mxu0 %v8103_v17  ;;  %v8283_v17 = vld [vmem:[#allocation14 + $0x4a0] ss:$16 sps:$4 sm:$0xff]  }
 0x3dd   :  { %4707 = vmatprep.subr.bf16.mxu0 %v8111_v18  ;;  %v8202_v18 = vld [vmem:[#allocation14 + $0x3c0] ss:$16 sps:$4 sm:$0xff]  }
 0x3e0   :  { %4708 = vmatpush2.bf16.msra.mxu0 %v8109_v20  ;;  %v8291_v20 = vld [vmem:[#allocation14 + $0x484] ss:$16 sps:$4 sm:$0xff]  }
 0x3e1   :  { %4709 = vmatprep.subr.bf16.mxu0 %v8117_v23  ;;  %v8207_v23 = vld [vmem:[#allocation14 + $0x3a4] ss:$16 sps:$4 sm:$0xff]  }
 0x3e4   :  { %4710 = vmatpush2.bf16.msra.mxu0 %v8115_v26  ;;  %v8289_v26 = vld [vmem:[#allocation14 + $0x480] ss:$16 sps:$4 sm:$0xff]  }
 0x3e5   :  { %4711 = vmatprep.subr.bf16.mxu0 %v8123_v27  ;;  %v8205_v27 = vld [vmem:[#allocation14 + $0x3a0] ss:$16 sps:$4 sm:$0xff]  }
 0x3e8   :  { %4712 = vmatpush2.bf16.msra.mxu0 %v8121_v28  ;;  %v8297_v28 = vld [vmem:[#allocation14 + $0x464] ss:$16 sps:$4 sm:$0xff]  }
 0x3e9   :  { %4713 = vmatprep.subr.bf16.mxu0 %v8129_v5  ;;  %v8210_v5 = vld [vmem:[#allocation14 + $0x384] ss:$16 sps:$4 sm:$0xff]  }
 0x3ec   :  { %4714 = vmatpush2.bf16.msra.mxu0 %v8127_v36  ;;  %v8295_v36 = vld [vmem:[#allocation14 + $0x460] ss:$16 sps:$4 sm:$0xff]  }
 0x3ed   :  { %4715 = vmatprep.subr.bf16.mxu0 %v8135_v37  ;;  %v8208_v37 = vld [vmem:[#allocation14 + $0x380] ss:$16 sps:$4 sm:$0xff]  }
 0x3f0   :  { %4716 = vmatpush2.bf16.msra.mxu0 %v8133_v38  ;;  %v8303_v38 = vld [vmem:[#allocation14 + $0x444] ss:$16 sps:$4 sm:$0xff]  }
 0x3f1   :  { %4717 = vmatprep.subr.bf16.mxu0 %v8141_v9  ;;  %v8213_v9 = vld [vmem:[#allocation14 + $0x364] ss:$16 sps:$4 sm:$0xff]  }
 0x3f4   :  { %4718 = vmatpush2.bf16.msra.mxu0 %v8139_v39  ;;  %v8301_v39 = vld [vmem:[#allocation14 + $0x440] ss:$16 sps:$4 sm:$0xff]  }
 0x3f5   :  { %4719 = vmatprep.subr.bf16.mxu0 %v8147_v40  ;;  %v8211_v40 = vld [vmem:[#allocation14 + $0x360] ss:$16 sps:$4 sm:$0xff]  }
 0x3f8   :  { %4720 = vmatpush2.bf16.msra.mxu0 %v8145_v43  ;;  %v8309_v43 = vld [vmem:[#allocation14 + $0x424] ss:$16 sps:$4 sm:$0xff]  }
 0x3f9   :  { %4721 = vmatprep.subr.bf16.mxu0 %v8153_v44  ;;  %v8216_v44 = vld [vmem:[#allocation14 + $0x344] ss:$16 sps:$4 sm:$0xff]  }
 0x3fc   :  { %4722 = vmatpush2.bf16.msra.mxu0 %v8151_v46  ;;  %v8307_v46 = vld [vmem:[#allocation14 + $0x420] ss:$16 sps:$4 sm:$0xff]  }
 0x3fd   :  { %5959 = vmatprep.subr.bf16.mxu0 %v8177_v58  ;;  %v8214_v58 = vld [vmem:[#allocation14 + $0x340] ss:$16 sps:$4 sm:$0xff]  }
 0x3ff   :  { %4724 = vmatmul.mubr.bf16.vlgmr.msra.gmra.mxu0 %v8957_v21  ;;  %v4479_v29 = vpop.f32.mrf.mxu0 }
 0x400   :  { %v4480_v60 = vadd.f32 %v4479_v29, %v8980_v59  ;;  %5960 = vmatpush1.bf16.msra.mxu0 %v8175_v63  ;;  %v8186_v59 = vld [vmem:[#allocation14 + $0x284] ss:$16 sps:$4 sm:$0xff]   ;;  %v8313_v29 = vld [vmem:[#allocation14 + $0x400] ss:$16 sps:$4 sm:$0xff]  }
 0x401   :  { %v8992_v55 = vpop.f32.mrf.mxu1  ;;  %v4481_v56 = vpop.f32.mrf.mxu0  ;;  %5961 = vmatprep.subr.bf16.mxu0 %v8180_v48  ;;  %v8315_v63 = vld [vmem:[#allocation14 + $0x404] ss:$16 sps:$4 sm:$0xff]  }
 0x402   :  { %v4482_v57 = vadd.f32 %v4481_v56, %v8982_v1  ;;  %v4732_v32 = vpack.c.bf16 %v4480_v60, %v4480_v60  ;;  %v8187_v1 = vld [vmem:[#allocation14 + $0x260] ss:$16 sps:$4 sm:$0xff]   ;;  %v8219_v48 = vld [vmem:[#allocation14 + $0x324] ss:$16 sps:$4 sm:$0xff]  }
 0x403   :  { %v8995_v61 = vpop.f32.mrf.mxu1  ;;  %v4483_v62 = vpop.f32.mrf.mxu0  ;;  %v8217_v60 = vld [vmem:[#allocation14 + $0x320] ss:$16 sps:$4 sm:$0xff]   ;;  %v8222_v56 = vld [vmem:[#allocation14 + $0x304] ss:$16 sps:$4 sm:$0xff]  }
 0x404   :  { %v4733_v53 = vpack.c.bf16 %v4482_v57, %v4482_v57  ;;  %5962 = vmatpush1.bf16.msra.mxu0 %v8178_v54  ;;  %v8321_v54 = vld [vmem:[#allocation14 + $0x5e4] ss:$16 sps:$4 sm:$0xff]   ;;  %v8220_v57 = vld [vmem:[#allocation14 + $0x300] ss:$16 sps:$4 sm:$0xff]   ;;  %v8225_v62 = vld [vmem:[#allocation14 + $0xec] ss:$16 sps:$4 sm:$0xff]  }
 0x405   :  { %v4606_v21 = vpop.f32.mrf.mxu1  ;;  %v4484_v22 = vpop.f32.mrf.mxu0  ;;  %5963 = vmatprep.subr.bf16.mxu0 %v8183_v8  ;;  %v8319_v8 = vld [vmem:[#allocation14 + $0x5e0] ss:$16 sps:$4 sm:$0xff]  }
 0x406   :  { %8439 = vtanh.bf16 %v4733_v53  ;;  %v8325_v53 = vld [vmem:[#allocation14 + $0x5c0] ss:$16 sps:$4 sm:$0xff]   ;;  %v2908_v21 = vrot.slane %v8969_v42, %v8844_v34  ;;  %v8333_v22 = vld [vmem:[#allocation14 + $0x5a4] ss:$16 sps:$4 sm:$0xff]  }
 0x407   :  { %8441 = vtanh.bf16 %v4732_v32  ;;  %v4607_v2 = vpop.f32.mrf.mxu1  ;;  %v8327_v32 = vld [vmem:[#allocation14 + $0x5c4] ss:$16 sps:$4 sm:$0xff]  }
 0x408   :  { %5964 = vmatpush1.bf16.msra.mxu0 %v8181_v25  ;;  %v2904_v25 = vrot.slane %v8969_v42, %v8836_v31 }
 0x409   :  { %5965 = vmatprep.subr.bf16.mxu0 %v8186_v59  ;;  %v8331_v59 = vld [vmem:[#allocation14 + $0x5a0] ss:$16 sps:$4 sm:$0xff]  }
 0x40a   :  { %v4521_v2 = vadd.f32 %v8986_v45, %v2904_v25 }
 0x40c   :  { %5966 = vmatpush1.bf16.msra.mxu0 %v8184_v52 }
 0x40d   :  { %5967 = vmatprep.subr.bf16.mxu0 %v8189_v3  ;;  %v4523_v3 = vadd.f32 %v8988_v0, %v2908_v21  ;;  %v8256_v21 = vld [vmem:[#allocation14 + $0x188] ss:$16 sps:$4 sm:$0xff]  }
 0x410   :  { %5968 = vmatpush1.bf16.msra.mxu0 %v8187_v1 }
 0x411   :  { %5969 = vmatprep.subr.bf16.mxu0 %v8192_v4  ;;  %v8339_v4 = vld [vmem:[#allocation14 + $0x584] ss:$16 sps:$4 sm:$0xff]  }
 0x414   :  { %v8997_v6 = vpop.eup %8439  ;;  %5970 = vmatpush1.bf16.msra.mxu0 %v8190_v35 }
 0x415   :  { %v8999_v11 = vpop.eup %8441  ;;  %5950 = vmatprep.mubr.bf16.mxu1 %v8997_v6  ;;  %5971 = vmatprep.subr.bf16.mxu0 %v8195_v51 }
 0x416   :  { %5951 = vmatmul.mubr.bf16.vlgmr.msra.gmra.mxu1 %v8999_v11 }
 0x417   :  { %6001 = vmatpush1.bf16.msra.mxu1 %v8271_v13 }
 0x418   :  { %5972 = vmatpush1.bf16.msra.mxu0 %v8193_v7  ;;  %6002 = vmatprep.subr.bf16.mxu1 %v8279_v47  ;;  %v8337_v7 = vld [vmem:[#allocation14 + $0x580] ss:$16 sps:$4 sm:$0xff]   ;;  %v8345_v47 = vld [vmem:[#allocation14 + $0x564] ss:$16 sps:$4 sm:$0xff]  }
 0x419   :  { %5973 = vmatprep.subr.bf16.mxu0 %v8198_v12 }
 0x41b   :  { %6003 = vmatpush1.bf16.msra.mxu1 %v8277_v50 }
 0x41c   :  { %5974 = vmatpush1.bf16.msra.mxu0 %v8196_v24  ;;  %6004 = vmatprep.subr.bf16.mxu1 %v8285_v14 }
 0x41d   :  { %5975 = vmatprep.subr.bf16.mxu0 %v8201_v19 }
 0x41f   :  { %6005 = vmatpush1.bf16.msra.mxu1 %v8283_v17  ;;  %v8351_v17 = vld [vmem:[#allocation14 + $0x544] ss:$16 sps:$4 sm:$0xff]  }
 0x420   :  { %5976 = vmatpush2.bf16.msra.mxu0 %v8199_v15  ;;  %6006 = vmatprep.subr.bf16.mxu1 %v8291_v20  ;;  %v8343_v15 = vld [vmem:[#allocation14 + $0x560] ss:$16 sps:$4 sm:$0xff]  }
 0x421   :  { %5977 = vmatprep.subr.bf16.mxu0 %v8204_v16  ;;  %v8355_v20 = vld [vmem:[#allocation14 + $0x520] ss:$16 sps:$4 sm:$0xff]  }
 0x423   :  { %6007 = vmatpush1.bf16.msra.mxu1 %v8289_v26  ;;  %v8369_v26 = vld [vmem:[#allocation14 + $0x2ec] ss:$16 sps:$4 sm:$0xff]  }
 0x424   :  { %5978 = vmatpush2.bf16.msra.mxu0 %v8202_v18  ;;  %6008 = vmatprep.subr.bf16.mxu1 %v8297_v28  ;;  %v8357_v18 = vld [vmem:[#allocation14 + $0x524] ss:$16 sps:$4 sm:$0xff]  }
 0x425   :  { %5979 = vmatprep.subr.bf16.mxu0 %v8207_v23  ;;  %v8361_v23 = vld [vmem:[#allocation14 + $0x500] ss:$16 sps:$4 sm:$0xff]  }
 0x427   :  { %6009 = vmatpush1.bf16.msra.mxu1 %v8295_v36 }
 0x428   :  { %5980 = vmatpush2.bf16.msra.mxu0 %v8205_v27  ;;  %6010 = vmatprep.subr.bf16.mxu1 %v8303_v38  ;;  %v8223_v27 = vld [vmem:[#allocation14 + $0xe8] ss:$16 sps:$4 sm:$0xff]   ;;  %v8231_v38 = vld [vmem:[#allocation14 + $0xac] ss:$16 sps:$4 sm:$0xff]  }
 0x429   :  { %5981 = vmatprep.subr.bf16.mxu0 %v8210_v5  ;;  %v8228_v5 = vld [vmem:[#allocation14 + $0xcc] ss:$16 sps:$4 sm:$0xff]  }
 0x42b   :  { %6011 = vmatpush1.bf16.msra.mxu1 %v8301_v39  ;;  %v8234_v39 = vld [vmem:[#allocation14 + $0x8c] ss:$16 sps:$4 sm:$0xff]  }
 0x42c   :  { %5982 = vmatpush2.bf16.msra.mxu0 %v8208_v37  ;;  %6012 = vmatprep.subr.bf16.mxu1 %v8309_v43  ;;  %v8226_v37 = vld [vmem:[#allocation14 + $0xc8] ss:$16 sps:$4 sm:$0xff]   ;;  %v8237_v43 = vld [vmem:[#allocation14 + $0x6c] ss:$16 sps:$4 sm:$0xff]  }
 0x42d   :  { %5983 = vmatprep.subr.bf16.mxu0 %v8213_v9  ;;  %v8229_v9 = vld [vmem:[#allocation14 + $0xa8] ss:$16 sps:$4 sm:$0xff]  }
 0x42f   :  { %6013 = vmatpush1.bf16.msra.mxu1 %v8307_v46  ;;  %v8240_v46 = vld [vmem:[#allocation14 + $0x4c] ss:$16 sps:$4 sm:$0xff]  }
 0x430   :  { %5984 = vmatpush2.bf16.msra.mxu0 %v8211_v40  ;;  %6014 = vmatprep.subr.bf16.mxu1 %v8315_v63  ;;  %v8232_v40 = vld [vmem:[#allocation14 + $0x88] ss:$16 sps:$4 sm:$0xff]   ;;  %v8243_v63 = vld [vmem:[#allocation14 + $0x2c] ss:$16 sps:$4 sm:$0xff]  }
 0x431   :  { %5985 = vmatprep.subr.bf16.mxu0 %v8216_v44  ;;  %v8235_v44 = vld [vmem:[#allocation14 + $0x68] ss:$16 sps:$4 sm:$0xff]  }
 0x433   :  { %6015 = vmatpush1.bf16.msra.mxu1 %v8313_v29  ;;  %v8244_v29 = vld [vmem:[#allocation14 + $0x8] ss:$16 sps:$4 sm:$0xff]  }
 0x434   :  { %5986 = vmatpush2.bf16.msra.mxu0 %v8214_v58  ;;  %6016 = vmatprep.subr.bf16.mxu1 %v8321_v54  ;;  %v8238_v58 = vld [vmem:[#allocation14 + $0x48] ss:$16 sps:$4 sm:$0xff]  }
 0x435   :  { %5987 = vmatprep.subr.bf16.mxu0 %v8219_v48  ;;  %v8246_v48 = vld [vmem:[#allocation14 + $0xc] ss:$16 sps:$4 sm:$0xff]   ;;  %v8247_v54 = vld [vmem:[#allocation14 + $0x1e8] ss:$16 sps:$4 sm:$0xff]  }
 0x437   :  { %6017 = vmatpush2.bf16.msra.mxu1 %v8319_v8  ;;  %v8250_v8 = vld [vmem:[#allocation14 + $0x1c8] ss:$16 sps:$4 sm:$0xff]  }
 0x438   :  { %5988 = vmatpush2.bf16.msra.mxu0 %v8217_v60  ;;  %6018 = vmatprep.subr.bf16.mxu1 %v8327_v32  ;;  %v8249_v60 = vld [vmem:[#allocation14 + $0x1ec] ss:$16 sps:$4 sm:$0xff]   ;;  %v8253_v32 = vld [vmem:[#allocation14 + $0x1a8] ss:$16 sps:$4 sm:$0xff]  }
 0x439   :  { %5989 = vmatprep.subr.bf16.mxu0 %v8222_v56  ;;  %v8252_v56 = vld [vmem:[#allocation14 + $0x1cc] ss:$16 sps:$4 sm:$0xff]  }
 0x43b   :  { %6019 = vmatpush2.bf16.msra.mxu1 %v8325_v53 }
 0x43c   :  { %5990 = vmatpush2.bf16.msra.mxu0 %v8220_v57  ;;  %6020 = vmatprep.subr.bf16.mxu1 %v8333_v22  ;;  %v8255_v57 = vld [vmem:[#allocation14 + $0x1ac] ss:$16 sps:$4 sm:$0xff]  }
 0x43d   :  { %6041 = vmatprep.subr.bf16.mxu0 %v8225_v62  ;;  %v8258_v62 = vld [vmem:[#allocation14 + $0x18c] ss:$16 sps:$4 sm:$0xff]  }
 0x43e   :  { %v8261_v22 = vld [vmem:[#allocation14 + $0x16c] ss:$16 sps:$4 sm:$0xff]  }
 0x43f   :  { %v4561_v52 = vpop.f32.mrf.mxu0  ;;  %6021 = vmatpush2.bf16.msra.mxu1 %v8331_v59 }
 0x440   :  { %v4562_v1 = vadd.f32 %v4561_v52, %v4521_v2  ;;  %6022 = vmatprep.subr.bf16.mxu1 %v8339_v4  ;;  %v8259_v52 = vld [vmem:[#allocation14 + $0x168] ss:$16 sps:$4 sm:$0xff]   ;;  %v8267_v4 = vld [vmem:[#allocation14 + $0x12c] ss:$16 sps:$4 sm:$0xff]  }
 0x441   :  { %v4563_v35 = vpop.f32.mrf.mxu0  ;;  %v9009_v51 = vpop.f32.mrf.mxu1 }
 0x442   :  { %v4603_v10 = vadd.f32 %v8992_v55, %v4562_v1  ;;  %v4564_v12 = vadd.f32 %v4563_v35, %v4523_v3  ;;  %v8349_v55 = vld [vmem:[#allocation14 + $0x540] ss:$16 sps:$4 sm:$0xff]   ;;  %v8264_v3 = vld [vmem:[#allocation14 + $0x14c] ss:$16 sps:$4 sm:$0xff]   ;;  %v8262_v1 = vld [vmem:[#allocation14 + $0x148] ss:$16 sps:$4 sm:$0xff]  }
 0x443   :  { %v4565_v13 = vpop.f32.mrf.mxu0  ;;  %v9012_v24 = vpop.f32.mrf.mxu1  ;;  %6023 = vmatpush2.bf16.msra.mxu1 %v8337_v7  ;;  %v8265_v35 = vld [vmem:[#allocation14 + $0x128] ss:$16 sps:$4 sm:$0xff]   ;;  %v8270_v7 = vld [vmem:[#allocation14 + $0x10c] ss:$16 sps:$4 sm:$0xff]  }
 0x444   :  { %v4605_v45 = vadd.f32 %v8995_v61, %v4564_v12  ;;  %v4734_v19 = vpack.c.bf16 %v4603_v10, %v4603_v10  ;;  %6024 = vmatprep.subr.bf16.mxu1 %v8345_v47  ;;  %v8363_v61 = vld [vmem:[#allocation14 + $0x504] ss:$16 sps:$4 sm:$0xff]   ;;  %v8268_v10 = vld [vmem:[#allocation14 + $0x108] ss:$16 sps:$4 sm:$0xff]   ;;  %v8276_v12 = vld [vmem:[#allocation14 + $0x4ec] ss:$16 sps:$4 sm:$0xff]  }
 0x445   :  { %v4566_v50 = vpop.f32.mrf.mxu0  ;;  %v4688_v0 = vpop.f32.mrf.mxu1  ;;  %v8274_v13 = vld [vmem:[#allocation14 + $0x4e8] ss:$16 sps:$4 sm:$0xff]  }
 0x446   :  { %v4735_v14 = vpack.c.bf16 %v4605_v45, %v4605_v45  ;;  %v8282_v45 = vld [vmem:[#allocation14 + $0x4cc] ss:$16 sps:$4 sm:$0xff]   ;;  %v8280_v47 = vld [vmem:[#allocation14 + $0x4c8] ss:$16 sps:$4 sm:$0xff]  }
 0x447   :  { %v4689_v16 = vpop.f32.mrf.mxu1  ;;  %6025 = vmatpush2.bf16.msra.mxu1 %v8343_v15  ;;  %v8286_v50 = vld [vmem:[#allocation14 + $0x4a8] ss:$16 sps:$4 sm:$0xff]   ;;  %v8294_v0 = vld [vmem:[#allocation14 + $0x48c] ss:$16 sps:$4 sm:$0xff]  }
 0x448   :  { %8443 = vtanh.bf16 %v4735_v14  ;;  %6026 = vmatprep.subr.bf16.mxu1 %v8351_v17  ;;  %v8292_v15 = vld [vmem:[#allocation14 + $0x488] ss:$16 sps:$4 sm:$0xff]   ;;  %v8300_v14 = vld [vmem:[#allocation14 + $0x46c] ss:$16 sps:$4 sm:$0xff]  }
 0x449   :  { %8445 = vtanh.bf16 %v4734_v19  ;;  %v8288_v19 = vld [vmem:[#allocation14 + $0x4ac] ss:$16 sps:$4 sm:$0xff]   ;;  %v8298_v16 = vld [vmem:[#allocation14 + $0x468] ss:$16 sps:$4 sm:$0xff]  }
 0x44a   :  { %v8306_v17 = vld [vmem:[#allocation14 + $0x44c] ss:$16 sps:$4 sm:$0xff]  }
 0x44b   :  { %6027 = vmatpush2.bf16.msra.mxu1 %v8349_v55  ;;  %v8304_v55 = vld [vmem:[#allocation14 + $0x448] ss:$16 sps:$4 sm:$0xff]  }
 0x44c   :  { %6028 = vmatprep.subr.bf16.mxu1 %v8357_v18  ;;  %v8310_v18 = vld [vmem:[#allocation14 + $0x428] ss:$16 sps:$4 sm:$0xff]  }
 0x44f   :  { %6029 = vmatpush2.bf16.msra.mxu1 %v8355_v20  ;;  %v8318_v20 = vld [vmem:[#allocation14 + $0x40c] ss:$16 sps:$4 sm:$0xff]  }
 0x450   :  { %6030 = vmatprep.subr.bf16.mxu1 %v8363_v61  ;;  %v8316_v61 = vld [vmem:[#allocation14 + $0x408] ss:$16 sps:$4 sm:$0xff]  }
 0x453   :  { %6031 = vmatpush2.bf16.msra.mxu1 %v8361_v23  ;;  %v8324_v23 = vld [vmem:[#allocation14 + $0x5ec] ss:$16 sps:$4 sm:$0xff]  }
 0x454   :  { %6082 = vmatprep.subr.bf16.mxu1 %v8369_v26  ;;  %v8322_v26 = vld [vmem:[#allocation14 + $0x5e8] ss:$16 sps:$4 sm:$0xff]  }
 0x456   :  { %v9015_v28 = vpop.eup %8443 }
 0x457   :  { %v9017_v36 = vpop.eup %8445  ;;  %5991 = vmatprep.mubr.bf16.mxu0 %v9015_v28 }
 0x458   :  { %5992 = vmatmul.mubr.bf16.vlgmr.msra.gmra.mxu0 %v9017_v36 }
 0x459   :  { %6042 = vmatpush1.bf16.msra.mxu0 %v8223_v27  ;;  %6073 = vmatprep.mubr.bf16.mxu0 %v8997_v6  ;;  %v8241_v6 = vld [vmem:[#allocation14 + $0x28] ss:$16 sps:$4 sm:$0xff]   ;;  %v2912_v27 = vrot.slane %v8969_v42, %v8878_v41 }
 0x45a   :  { %6043 = vmatprep.subr.bf16.mxu0 %v8228_v5  ;;  %v8330_v5 = vld [vmem:[#allocation14 + $0x5cc] ss:$16 sps:$4 sm:$0xff]  }
 0x45d   :  { %6044 = vmatpush1.bf16.msra.mxu0 %v8226_v37  ;;  %v2916_v37 = vrot.slane %v8969_v42, %v8855_v49  ;;  %v8340_v42 = vld [vmem:[#allocation14 + $0x588] ss:$16 sps:$4 sm:$0xff]  }
 0x45e   :  { %6045 = vmatprep.subr.bf16.mxu0 %v8231_v38  ;;  %v8328_v38 = vld [vmem:[#allocation14 + $0x5c8] ss:$16 sps:$4 sm:$0xff]  }
 0x461   :  { %6046 = vmatpush1.bf16.msra.mxu0 %v8229_v9 }
 0x462   :  { %6047 = vmatprep.subr.bf16.mxu0 %v8234_v39  ;;  %v8336_v39 = vld [vmem:[#allocation14 + $0x5ac] ss:$16 sps:$4 sm:$0xff]  }
 0x465   :  { %6048 = vmatpush1.bf16.msra.mxu0 %v8232_v40 }
 0x466   :  { %6049 = vmatprep.subr.bf16.mxu0 %v8237_v43  ;;  %v8334_v43 = vld [vmem:[#allocation14 + $0x5a8] ss:$16 sps:$4 sm:$0xff]  }
 0x469   :  { %6050 = vmatpush1.bf16.msra.mxu0 %v8235_v44 }
 0x46a   :  { %6051 = vmatprep.subr.bf16.mxu0 %v8240_v46  ;;  %v8342_v46 = vld [vmem:[#allocation14 + $0x58c] ss:$16 sps:$4 sm:$0xff]  }
 0x46d   :  { %6052 = vmatpush1.bf16.msra.mxu0 %v8238_v58 }
 0x46e   :  { %6053 = vmatprep.subr.bf16.mxu0 %v8243_v63 }
 0x471   :  { %6054 = vmatpush1.bf16.msra.mxu0 %v8241_v6 }
 0x472   :  { %6055 = vmatprep.subr.bf16.mxu0 %v8246_v48  ;;  %v8348_v48 = vld [vmem:[#allocation14 + $0x56c] ss:$16 sps:$4 sm:$0xff]  }
 0x475   :  { %6056 = vmatpush1.bf16.msra.mxu0 %v8244_v29 }
 0x476   :  { %6057 = vmatprep.subr.bf16.mxu0 %v8249_v60 }
 0x479   :  { %6058 = vmatpush2.bf16.msra.mxu0 %v8247_v54 }
 0x47a   :  { %6059 = vmatprep.subr.bf16.mxu0 %v8252_v56 }
 0x47d   :  { %6060 = vmatpush2.bf16.msra.mxu0 %v8250_v8  ;;  %v8346_v8 = vld [vmem:[#allocation14 + $0x568] ss:$16 sps:$4 sm:$0xff]  }
 0x47e   :  { %6061 = vmatprep.subr.bf16.mxu0 %v8255_v57  ;;  %v8352_v57 = vld [vmem:[#allocation14 + $0x548] ss:$16 sps:$4 sm:$0xff]  }
 0x47f   :  { %v9022_v53 = vpop.f32.mrf.mxu0 }
 0x480   :  { %v4644_v9 = vadd.f32 %v9022_v53, %v2912_v27  ;;  %v8364_v53 = vld [vmem:[#allocation14 + $0x508] ss:$16 sps:$4 sm:$0xff]   ;;  %v8408_v27 = vld [vmem:[#allocation14 + $0x34c] ss:$16 sps:$4 sm:$0xff]  }
 0x481   :  { %6062 = vmatpush2.bf16.msra.mxu0 %v8253_v32  ;;  %v9024_v25 = vpop.f32.mrf.mxu0  ;;  %v8358_v32 = vld [vmem:[#allocation14 + $0x528] ss:$16 sps:$4 sm:$0xff]  }
 0x482   :  { %6063 = vmatprep.subr.bf16.mxu0 %v8258_v62  ;;  %v4646_v40 = vadd.f32 %v9024_v25, %v2916_v37  ;;  %v4685_v44 = vadd.f32 %v9009_v51, %v4644_v9  ;;  %v8354_v51 = vld [vmem:[#allocation14 + $0x54c] ss:$16 sps:$4 sm:$0xff]   ;;  %v8367_v25 = vld [vmem:[#allocation14 + $0x2e8] ss:$16 sps:$4 sm:$0xff]  }
 0x483   :  { %v4647_v59 = vpop.f32.mrf.mxu0  ;;  %v8366_v62 = vld [vmem:[#allocation14 + $0x50c] ss:$16 sps:$4 sm:$0xff]  }
 0x484   :  { %v4687_v63 = vadd.f32 %v9012_v24, %v4646_v40  ;;  %v8360_v24 = vld [vmem:[#allocation14 + $0x52c] ss:$16 sps:$4 sm:$0xff]   ;;  %v9040_v40 = vld [vmem:[#allocation16] sm:$0xf] }
 0x485   :  { %6064 = vmatpush2.bf16.msra.mxu0 %v8256_v21  ;;  %v4648_v2 = vpop.f32.mrf.mxu0  ;;  %v8411_v37 = vld [vmem:[#allocation14 + $0x32c] ss:$16 sps:$4 sm:$0xff]  }
 0x486   :  { %6065 = vmatprep.subr.bf16.mxu0 %v8261_v22  ;;  %v8372_v22 = vld [vmem:[#allocation14 + $0x2cc] ss:$16 sps:$4 sm:$0xff]  }
 0x487   :  { %v8414_v9 = vld [vmem:[#allocation14 + $0x30c] ss:$16 sps:$4 sm:$0xff]  }
 0x489   :  { %6066 = vmatpush2.bf16.msra.mxu0 %v8259_v52  ;;  %v8370_v52 = vld [vmem:[#allocation14 + $0x2c8] ss:$16 sps:$4 sm:$0xff]  }
 0x48a   :  { %6067 = vmatprep.subr.bf16.mxu0 %v8264_v3 }
 0x48d   :  { %6068 = vmatpush2.bf16.msra.mxu0 %v8262_v1  ;;  %v8375_v1 = vld [vmem:[#allocation14 + $0x2ac] ss:$16 sps:$4 sm:$0xff]  }
 0x48e   :  { %6069 = vmatprep.subr.bf16.mxu0 %v8267_v4 }
 0x491   :  { %6070 = vmatpush2.bf16.msra.mxu0 %v8265_v35  ;;  %v8373_v35 = vld [vmem:[#allocation14 + $0x2a8] ss:$16 sps:$4 sm:$0xff]  }
 0x492   :  { %6071 = vmatprep.subr.bf16.mxu0 %v8270_v7 }
 0x495   :  { %6072 = vmatpush2.bf16.msra.mxu0 %v8268_v10  ;;  %v8378_v10 = vld [vmem:[#allocation14 + $0x28c] ss:$16 sps:$4 sm:$0xff]  }
 0x496   :  { %6123 = vmatprep.subr.bf16.mxu0 %v8276_v12  ;;  %v8376_v12 = vld [vmem:[#allocation14 + $0x288] ss:$16 sps:$4 sm:$0xff]  }
 0x498   :  { %6074 = vmatmul.mubr.bf16.vlgmr.msra.gmra.mxu0 %v8999_v11  ;;  %v8312_v11 = vld [vmem:[#allocation14 + $0x42c] ss:$16 sps:$4 sm:$0xff]  }
 0x499   :  { %6124 = vmatpush1.bf16.msra.mxu0 %v8274_v13  ;;  %v8381_v13 = vld [vmem:[#allocation14 + $0x26c] ss:$16 sps:$4 sm:$0xff]  }
 0x49a   :  { %6125 = vmatprep.subr.bf16.mxu0 %v8282_v45  ;;  %v8379_v45 = vld [vmem:[#allocation14 + $0x268] ss:$16 sps:$4 sm:$0xff]  }
 0x49d   :  { %6126 = vmatpush1.bf16.msra.mxu0 %v8280_v47  ;;  %v8382_v47 = vld [vmem:[#allocation14 + $0x248] ss:$16 sps:$4 sm:$0xff]  }
 0x49e   :  { %6127 = vmatprep.subr.bf16.mxu0 %v8288_v19  ;;  %v8387_v19 = vld [vmem:[#allocation14 + $0x22c] ss:$16 sps:$4 sm:$0xff]  }
 0x4a1   :  { %6128 = vmatpush1.bf16.msra.mxu0 %v8286_v50  ;;  %v8385_v50 = vld [vmem:[#allocation14 + $0x228] ss:$16 sps:$4 sm:$0xff]  }
 0x4a2   :  { %6129 = vmatprep.subr.bf16.mxu0 %v8294_v0  ;;  %v8390_v0 = vld [vmem:[#allocation14 + $0x20c] ss:$16 sps:$4 sm:$0xff]  }
 0x4a5   :  { %6130 = vmatpush1.bf16.msra.mxu0 %v8292_v15  ;;  %v8388_v15 = vld [vmem:[#allocation14 + $0x208] ss:$16 sps:$4 sm:$0xff]  }
 0x4a6   :  { %6131 = vmatprep.subr.bf16.mxu0 %v8300_v14  ;;  %v8393_v14 = vld [vmem:[#allocation14 + $0x3ec] ss:$16 sps:$4 sm:$0xff]  }
 0x4a9   :  { %6132 = vmatpush1.bf16.msra.mxu0 %v8298_v16  ;;  %v8391_v16 = vld [vmem:[#allocation14 + $0x3e8] ss:$16 sps:$4 sm:$0xff]  }
 0x4aa   :  { %6133 = vmatprep.subr.bf16.mxu0 %v8306_v17  ;;  %v8396_v17 = vld [vmem:[#allocation14 + $0x3cc] ss:$16 sps:$4 sm:$0xff]  }
 0x4ad   :  { %6134 = vmatpush1.bf16.msra.mxu0 %v8304_v55  ;;  %v8394_v55 = vld [vmem:[#allocation14 + $0x3c8] ss:$16 sps:$4 sm:$0xff]  }
 0x4ae   :  { %6135 = vmatprep.subr.bf16.mxu0 %v8312_v11  ;;  %v8399_v11 = vld [vmem:[#allocation14 + $0x3ac] ss:$16 sps:$4 sm:$0xff]  }
 0x4b1   :  { %6136 = vmatpush1.bf16.msra.mxu0 %v8310_v18  ;;  %v8397_v18 = vld [vmem:[#allocation14 + $0x3a8] ss:$16 sps:$4 sm:$0xff]  }
 0x4b2   :  { %6137 = vmatprep.subr.bf16.mxu0 %v8318_v20  ;;  %v8402_v20 = vld [vmem:[#allocation14 + $0x38c] ss:$16 sps:$4 sm:$0xff]  }
 0x4b5   :  { %6138 = vmatpush1.bf16.msra.mxu0 %v8316_v61  ;;  %v8400_v61 = vld [vmem:[#allocation14 + $0x388] ss:$16 sps:$4 sm:$0xff]  }
 0x4b6   :  { %6139 = vmatprep.subr.bf16.mxu0 %v8324_v23  ;;  %v8405_v23 = vld [vmem:[#allocation14 + $0x36c] ss:$16 sps:$4 sm:$0xff]  }
 0x4b9   :  { %6140 = vmatpush2.bf16.msra.mxu0 %v8322_v26  ;;  %v8403_v26 = vld [vmem:[#allocation14 + $0x368] ss:$16 sps:$4 sm:$0xff]  }
 0x4ba   :  { %6141 = vmatprep.subr.bf16.mxu0 %v8330_v5  ;;  %v8406_v5 = vld [vmem:[#allocation14 + $0x348] ss:$16 sps:$4 sm:$0xff]  }
 0x4bd   :  { %6142 = vmatpush2.bf16.msra.mxu0 %v8328_v38  ;;  %v8409_v38 = vld [vmem:[#allocation14 + $0x328] ss:$16 sps:$4 sm:$0xff]  }
 0x4be   :  { %6143 = vmatprep.subr.bf16.mxu0 %v8336_v39  ;;  %v8412_v39 = vld [vmem:[#allocation14 + $0x308] ss:$16 sps:$4 sm:$0xff]  }
 0x4bf   :  { %v4725_v41 = vpop.f32.mrf.mxu0 }
 0x4c0   :  { %v4726_v58 = vadd.f32 %v4725_v41, %v4685_v44  ;;  %v4941_v44 = vrot.slane %v9040_v40, %v8833_v30  ;;  %v4945_v41 = vrot.slane %v9040_v40, %v8841_v33  ;;  %v6180_v33 = vld [vmem:[#allocation17 + $0x60] sm:$0xff] }
 0x4c1   :  { %6144 = vmatpush2.bf16.msra.mxu0 %v8334_v43  ;;  %v4727_v49 = vpop.f32.mrf.mxu0  ;;  %v6199_v43 = vld [vmem:[#allocation17 + $0xf8] sm:$0xff] }
 0x4c2   :  { %v4728_v6 = vadd.f32 %v4727_v49, %v4687_v63  ;;  %6145 = vmatprep.subr.bf16.mxu0 %v8342_v46  ;;  %v4736_v29 = vpack.c.bf16 %v4726_v58, %v4726_v58  ;;  %v6183_v46 = vld [vmem:[#allocation17 + $0x78] sm:$0xff]  ;;  %v6198_v58 = vld [vmem:[#allocation17 + $0xf0] sm:$0xff] }
 0x4c3   :  { %v4729_v60 = vpop.f32.mrf.mxu0  ;;  %v6182_v63 = vld [vmem:[#allocation17 + $0x70] sm:$0xff] }
 0x4c4   :  { %v4737_v54 = vpack.c.bf16 %v4728_v6, %v4728_v6  ;;  %v6196_v60 = vld [vmem:[#allocation17 + $0xe0] sm:$0xff] }
 0x4c5   :  { %6146 = vmatpush2.bf16.msra.mxu0 %v8340_v42  ;;  %v4730_v56 = vpop.f32.mrf.mxu0  ;;  %v6197_v42 = vld [vmem:[#allocation17 + $0xe8] sm:$0xff] }
 0x4c6   :  { %8447 = vtanh.bf16 %v4737_v54  ;;  %6147 = vmatprep.subr.bf16.mxu0 %v8348_v48  ;;  %v6181_v48 = vld [vmem:[#allocation17 + $0x68] sm:$0xff] }
 0x4c7   :  { %8449 = vtanh.bf16 %v4736_v29 }
 0x4c9   :  { %6148 = vmatpush2.bf16.msra.mxu0 %v8346_v8 }
 0x4ca   :  { %6149 = vmatprep.subr.bf16.mxu0 %v8354_v51  ;;  %v6179_v51 = vld [vmem:[#allocation17 + $0x58] sm:$0xff] }
 0x4cd   :  { %6150 = vmatpush2.bf16.msra.mxu0 %v8352_v57  ;;  %v6194_v57 = vld [vmem:[#allocation17 + $0xd0] sm:$0xff] }
 0x4ce   :  { %6151 = vmatprep.subr.bf16.mxu0 %v8360_v24 }
 0x4d1   :  { %6152 = vmatpush2.bf16.msra.mxu0 %v8358_v32  ;;  %v6178_v32 = vld [vmem:[#allocation17 + $0x50] sm:$0xff] }
 0x4d2   :  { %6153 = vmatprep.subr.bf16.mxu0 %v8366_v62  ;;  %v6193_v62 = vld [vmem:[#allocation17 + $0xc8] sm:$0xff] }
 0x4d4   :  { %v8448_v21 = vpop.eup %8447 }
 0x4d5   :  { %v8450_v59 = vpop.eup %8449  ;;  %6154 = vmatpush2.bf16.msra.mxu0 %v8364_v53  ;;  %6032 = vmatprep.mubr.bf16.mxu1 %v8448_v21  ;;  %v6177_v53 = vld [vmem:[#allocation17 + $0x48] sm:$0xff] }
 0x4d6   :  { %6155 = vmatprep.mubr.bf16.mxu0 %v8448_v21  ;;  %6033 = vmatmul.mubr.bf16.vlgmr.msra.gmra.mxu1 %v8450_v59  ;;  %v9035_v2 = vpop.f32.mrf.mxu1  ;;  %v6176_v21 = vld [vmem:[#allocation17 + $0x40] sm:$0xff] }
 0x4d7   :  { %6083 = vmatpush1.bf16.msra.mxu1 %v8367_v25  ;;  %6114 = vmatprep.mubr.bf16.mxu1 %v9015_v28  ;;  %v8384_v28 = vld [vmem:[#allocation14 + $0x24c] ss:$16 sps:$4 sm:$0xff]   ;;  %v5953_v49 = vadd.f32 %v9035_v2, %v4941_v44  ;;  %v6192_v25 = vld [vmem:[#allocation17 + $0xc0] sm:$0xff]  ;;  %v6190_v2 = vld [vmem:[#allocation17 + $0xb0] sm:$0xff] }
 0x4d8   :  { %6156 = vmatmul.mubr.bf16.vlgmr.msra.gmra.mxu0 %v8450_v59  ;;  %v9038_v3 = vpop.f32.mrf.mxu1  ;;  %6084 = vmatprep.subr.bf16.mxu1 %v8372_v22  ;;  %v6191_v22 = vld [vmem:[#allocation17 + $0xb8] sm:$0xff] }
 0x4d9   :  { %v5955_v29 = vadd.f32 %v9038_v3, %v4945_v41  ;;  %v6175_v59 = vld [vmem:[#allocation17 + $0x38] sm:$0xff]  ;;  %v6189_v3 = vld [vmem:[#allocation17 + $0xa8] sm:$0xff]  ;;  %v6206_v41 = vld [vmem:[#allocation17 + $0x130] sm:$0xff] }
 0x4da   :  { %v5956_v4 = vpop.f32.mrf.mxu1  ;;  %v6207_v44 = vld [vmem:[#allocation17 + $0x138] sm:$0xff] }
 0x4db   :  { %6085 = vmatpush1.bf16.msra.mxu1 %v8370_v52  ;;  %v6174_v52 = vld [vmem:[#allocation17 + $0x30] sm:$0xff]  ;;  %v6188_v4 = vld [vmem:[#allocation17 + $0xa0] sm:$0xff] }
 0x4dc   :  { %v5957_v7 = vpop.f32.mrf.mxu1  ;;  %6086 = vmatprep.subr.bf16.mxu1 %v8375_v1  ;;  %v6173_v1 = vld [vmem:[#allocation17 + $0x28] sm:$0xff] }
 0x4dd   :  { %v6231_v7 = vld [vmem:[#allocation17 + $0x1f8] sm:$0xff] }
 0x4de   :  { %7207 = vmatprep.subr.mxu0 %v6231_v7 }
 0x4df   :  { %6087 = vmatpush1.bf16.msra.mxu1 %v8373_v35  ;;  %v6172_v35 = vld [vmem:[#allocation17 + $0x20] sm:$0xff] }
 0x4e0   :  { %6088 = vmatprep.subr.bf16.mxu1 %v8378_v10  ;;  %v6215_v10 = vld [vmem:[#allocation17 + $0x178] sm:$0xff] }
 0x4e1   :  { %7208 = vmatpush3.msra.mxu0 %v6215_v10 }
 0x4e3   :  { %6089 = vmatpush1.bf16.msra.mxu1 %v8376_v12  ;;  %v6230_v12 = vld [vmem:[#allocation17 + $0x1f0] sm:$0xff] }
 0x4e4   :  { %6090 = vmatprep.subr.bf16.mxu1 %v8381_v13  ;;  %v6187_v13 = vld [vmem:[#allocation17 + $0x98] sm:$0xff]  ;;  %7209 = vmatprep.subr.mxu0 %v6230_v12 }
 0x4e7   :  { %6091 = vmatpush1.bf16.msra.mxu1 %v8379_v45  ;;  %v6214_v45 = vld [vmem:[#allocation17 + $0x170] sm:$0xff] }
 0x4e8   :  { %6092 = vmatprep.subr.bf16.mxu1 %v8384_v28  ;;  %v6171_v28 = vld [vmem:[#allocation17 + $0x18] sm:$0xff]  ;;  %7210 = vmatpush3.msra.mxu0 %v6214_v45 }
 0x4eb   :  { %6093 = vmatpush1.bf16.msra.mxu1 %v8382_v47  ;;  %v6229_v47 = vld [vmem:[#allocation17 + $0x1e8] sm:$0xff] }
 0x4ec   :  { %6094 = vmatprep.subr.bf16.mxu1 %v8387_v19  ;;  %v6186_v19 = vld [vmem:[#allocation17 + $0x90] sm:$0xff]  ;;  %7211 = vmatprep.subr.mxu0 %v6229_v47 }
 0x4ef   :  { %6095 = vmatpush1.bf16.msra.mxu1 %v8385_v50  ;;  %v6213_v50 = vld [vmem:[#allocation17 + $0x168] sm:$0xff] }
 0x4f0   :  { %6096 = vmatprep.subr.bf16.mxu1 %v8390_v0  ;;  %v6170_v0 = vld [vmem:[#allocation17 + $0x10] sm:$0xff]  ;;  %7212 = vmatpush3.msra.mxu0 %v6213_v50 }
 0x4f3   :  { %6097 = vmatpush1.bf16.msra.mxu1 %v8388_v15  ;;  %v6228_v15 = vld [vmem:[#allocation17 + $0x1e0] sm:$0xff] }
 0x4f4   :  { %6098 = vmatprep.subr.bf16.mxu1 %v8393_v14  ;;  %v6185_v14 = vld [vmem:[#allocation17 + $0x88] sm:$0xff]  ;;  %7213 = vmatprep.subr.mxu0 %v6228_v15 }
 0x4f7   :  { %6099 = vmatpush2.bf16.msra.mxu1 %v8391_v16  ;;  %v6212_v16 = vld [vmem:[#allocation17 + $0x160] sm:$0xff] }
 0x4f8   :  { %6100 = vmatprep.subr.bf16.mxu1 %v8396_v17  ;;  %v6169_v17 = vld [vmem:[#allocation17 + $0x8] sm:$0xff]  ;;  %7214 = vmatpush3.msra.mxu0 %v6212_v16 }
 0x4fb   :  { %6101 = vmatpush2.bf16.msra.mxu1 %v8394_v55  ;;  %v6227_v55 = vld [vmem:[#allocation17 + $0x1d8] sm:$0xff] }
 0x4fc   :  { %6102 = vmatprep.subr.bf16.mxu1 %v8399_v11  ;;  %v6184_v11 = vld [vmem:[#allocation17 + $0x80] sm:$0xff]  ;;  %7215 = vmatprep.subr.mxu0 %v6227_v55 }
 0x4ff   :  { %6103 = vmatpush2.bf16.msra.mxu1 %v8397_v18  ;;  %v6211_v18 = vld [vmem:[#allocation17 + $0x158] sm:$0xff] }
 0x500   :  { %6104 = vmatprep.subr.bf16.mxu1 %v8402_v20  ;;  %v6168_v20 = vld [vmem:[#allocation17] sm:$0xff]  ;;  %7216 = vmatpush3.msra.mxu0 %v6211_v18 }
 0x503   :  { %6105 = vmatpush2.bf16.msra.mxu1 %v8400_v61  ;;  %v6226_v61 = vld [vmem:[#allocation17 + $0x1d0] sm:$0xff] }
 0x504   :  { %6106 = vmatprep.subr.bf16.mxu1 %v8405_v23  ;;  %7217 = vmatprep.subr.mxu0 %v6226_v61  ;;  %v6210_v23 = vld [vmem:[#allocation17 + $0x150] sm:$0xff] }
 0x505   :  { %7218 = vmatpush3.msra.mxu0 %v6210_v23 }
 0x507   :  { %6107 = vmatpush2.bf16.msra.mxu1 %v8403_v26  ;;  %v6225_v26 = vld [vmem:[#allocation17 + $0x1c8] sm:$0xff] }
 0x508   :  { %6108 = vmatprep.subr.bf16.mxu1 %v8408_v27  ;;  %7219 = vmatprep.subr.mxu0 %v6225_v26 }
 0x50b   :  { %6109 = vmatpush2.bf16.msra.mxu1 %v8406_v5  ;;  %v6209_v5 = vld [vmem:[#allocation17 + $0x148] sm:$0xff] }
 0x50c   :  { %6110 = vmatprep.subr.bf16.mxu1 %v8411_v37  ;;  %7220 = vmatpush3.msra.mxu0 %v6209_v5  ;;  %v6224_v37 = vld [vmem:[#allocation17 + $0x1c0] sm:$0xff] }
 0x50d   :  { %7221 = vmatprep.subr.mxu0 %v6224_v37 }
 0x50f   :  { %6111 = vmatpush2.bf16.msra.mxu1 %v8409_v38 }
 0x510   :  { %6112 = vmatprep.subr.bf16.mxu1 %v8414_v9  ;;  %v6208_v9 = vld [vmem:[#allocation17 + $0x140] sm:$0xff] }
 0x511   :  { %7222 = vmatpush3.msra.mxu0 %v6208_v9 }
 0x513   :  { %6113 = vmatpush2.bf16.msra.mxu1 %v8412_v39  ;;  %v6223_v39 = vld [vmem:[#allocation17 + $0x1b8] sm:$0xff] }
 0x514   :  { %7172 = vmatprep.subr.mxu1 %v6199_v43  ;;  %7223 = vmatprep.subr.mxu0 %v6223_v39 }
 0x515   :  { %7224 = vmatpush3.msra.mxu0 %v6207_v44 }
 0x516   :  { %6115 = vmatmul.mubr.bf16.vlgmr.msra.gmra.mxu1 %v9017_v36  ;;  %v6195_v36 = vld [vmem:[#allocation17 + $0xd8] sm:$0xff] }
 0x517   :  { %7173 = vmatpush3.msra.mxu1 %v6183_v46  ;;  %v6222_v46 = vld [vmem:[#allocation17 + $0x1b0] sm:$0xff] }
 0x518   :  { %v5993_v6 = vpop.f32.mrf.mxu0  ;;  %7174 = vmatprep.subr.mxu1 %v6198_v58  ;;  %v6221_v58 = vld [vmem:[#allocation17 + $0x1a8] sm:$0xff]  ;;  %7225 = vmatprep.subr.mxu0 %v6222_v46 }
 0x519   :  { %v9049_v30 = vadd.f32 %v5993_v6, %v5953_v49  ;;  %7175 = vmatpush3.msra.mxu1 %v6182_v63  ;;  %v6205_v49 = vld [vmem:[#allocation17 + $0x128] sm:$0xff]  ;;  %7226 = vmatpush3.msra.mxu0 %v6206_v41  ;;  %v6204_v6 = vld [vmem:[#allocation17 + $0x120] sm:$0xff] }
 0x51a   :  { %v5995_v54 = vpop.f32.mrf.mxu0  ;;  %7176 = vmatprep.subr.mxu1 %v6197_v42  ;;  %v6220_v42 = vld [vmem:[#allocation17 + $0x1a0] sm:$0xff]  ;;  %7227 = vmatprep.subr.mxu0 %v6221_v58 }
 0x51b   :  { %v9051_v56 = vadd.f32 %v5995_v54, %v5955_v29  ;;  %7177 = vmatpush3.msra.mxu1 %v6181_v48  ;;  %7228 = vmatpush3.msra.mxu0 %v6205_v49  ;;  %v6219_v48 = vld [vmem:[#allocation17 + $0x198] sm:$0xff]  ;;  %v6202_v54 = vld [vmem:[#allocation17 + $0x110] sm:$0xff] }
 0x51c   :  { %v5997_v8 = vpop.f32.mrf.mxu0  ;;  %7178 = vmatprep.subr.mxu1 %v6196_v60  ;;  %7229 = vmatprep.subr.mxu0 %v6220_v42  ;;  %v6203_v29 = vld [vmem:[#allocation17 + $0x118] sm:$0xff]  ;;  %v6218_v60 = vld [vmem:[#allocation17 + $0x190] sm:$0xff] }
 0x51d   :  { %7179 = vmatpush3.msra.mxu1 %v6180_v33  ;;  %7230 = vmatpush3.msra.mxu0 %v6204_v6  ;;  %v6217_v33 = vld [vmem:[#allocation17 + $0x188] sm:$0xff]  ;;  %v6216_v8 = vld [vmem:[#allocation17 + $0x180] sm:$0xff] }
 0x51e   :  { %v5998_v24 = vpop.f32.mrf.mxu0  ;;  %7180 = vmatprep.subr.mxu1 %v6195_v36  ;;  %7231 = vmatprep.subr.mxu0 %v6219_v48  ;;  %v6201_v36 = vld [vmem:[#allocation17 + $0x108] sm:$0xff] }
 0x51f   :  { %7181 = vmatpush3.msra.mxu1 %v6179_v51  ;;  %7232 = vmatpush3.msra.mxu0 %v6203_v29  ;;  %v6200_v51 = vld [vmem:[#allocation17 + $0x100] sm:$0xff] }
 0x520   :  { %7182 = vmatprep.subr.mxu1 %v6194_v57  ;;  %7233 = vmatprep.subr.mxu0 %v6218_v60 }
 0x521   :  { %7183 = vmatpush3.msra.mxu1 %v6178_v32  ;;  %7234 = vmatpush3.msra.mxu0 %v6202_v54 }
 0x522   :  { %7184 = vmatprep.subr.mxu1 %v6193_v62  ;;  %7235 = vmatprep.subr.mxu0 %v6217_v33 }
 0x523   :  { %7185 = vmatpush3.msra.mxu1 %v6177_v53  ;;  %7236 = vmatpush3.msra.mxu0 %v6201_v36 }
 0x524   :  { %7186 = vmatprep.subr.mxu1 %v6192_v25  ;;  %7237 = vmatprep.subr.mxu0 %v6216_v8 }
 0x525   :  { %7187 = vmatpush3.msra.mxu1 %v6176_v21  ;;  %7238 = vmatpush3.msra.mxu0 %v6200_v51 }
 0x526   :  { %7188 = vmatprep.subr.mxu1 %v6191_v22 }
 0x527   :  { %7189 = vmatpush3.msra.mxu1 %v6175_v59 }
 0x528   :  { %7190 = vmatprep.subr.mxu1 %v6190_v2 }
 0x529   :  { %7191 = vmatpush3.msra.mxu1 %v6174_v52 }
 0x52a   :  { %7192 = vmatprep.subr.mxu1 %v6189_v3 }
 0x52b   :  { %7193 = vmatpush3.msra.mxu1 %v6173_v1  ;;  %v4949_v1 = vrot.slane %v9040_v40, %v8836_v31 }
 0x52c   :  { %7194 = vmatprep.subr.mxu1 %v6188_v4 }
 0x52d   :  { %7195 = vmatpush3.msra.mxu1 %v6172_v35 }
 0x52e   :  { %7196 = vmatprep.subr.mxu1 %v6187_v13 }
 0x52f   :  { %7197 = vmatpush3.msra.mxu1 %v6171_v28 }
 0x530   :  { %7198 = vmatprep.subr.mxu1 %v6186_v19 }
 0x531   :  { %7199 = vmatpush3.msra.mxu1 %v6170_v0 }
 0x532   :  { %7200 = vmatprep.subr.mxu1 %v6185_v14 }
 0x533   :  { %7201 = vmatpush3.msra.mxu1 %v6169_v17 }
 0x534   :  { %7202 = vmatprep.subr.mxu1 %v6184_v11 }
 0x535   :  { %7203 = vmatpush3.msra.mxu1 %v6168_v20 }
 0x558   :  { %v6075_v27 = vpop.f32.mrf.mxu0 }
 0x559   :  { %v6076_v4 = vadd.f32 %v6075_v27, %v4949_v1 }
 0x55a   :  { %v6077_v38 = vpop.f32.mrf.mxu0 }
 0x55c   :  { %v6079_v43 = vpop.f32.mrf.mxu0 }
 0x55e   :  { %v6080_v63 = vpop.f32.mrf.mxu0 }
 0x596   :  { %v6034_v57 = vpop.f32.mrf.mxu1 }
 0x597   :  { %v6035_v24 = vadd.f32 %v6034_v57, %v9049_v30  ;;  %v4953_v30 = vrot.slane %v9040_v40, %v8844_v34  ;;  %v7171_v34 = vld [vmem:[#allocation19] ss:$0 sm:$0xff] }
 0x598   :  { %v6157_v32 = vpop.f32.mrf.mxu0  ;;  %v6036_v62 = vpop.f32.mrf.mxu1 }
 0x599   :  { %v6037_v53 = vadd.f32 %v6036_v62, %v9051_v56  ;;  %v6078_v56 = vadd.f32 %v6077_v38, %v4953_v30 }
 0x59a   :  { %v6159_v25 = vpop.f32.mrf.mxu0  ;;  %v6038_v21 = vpop.f32.mrf.mxu1 }
 0x59b   :  { %8451 = vtanh.f32 %v6037_v53 }
 0x59c   :  { %8453 = vtanh.f32 %v6035_v24  ;;  %v6161_v22 = vpop.f32.mrf.mxu0  ;;  %v6039_v59 = vpop.f32.mrf.mxu1 }
 0x59e   :  { %v6162_v2 = vpop.f32.mrf.mxu0 }
 0x5a8   :  { %v8452_v52 = vpop.eup %8451 }
 0x5a9   :  { %v8454_v3 = vpop.eup %8453  ;;  %6303 = vmatprep.mubr.f32.mxu1 %v8452_v52 }
 0x5aa   :  { %6304 = vmatmul.mubr.f32.vlgmr.msra.gmra.mxu1 %v8454_v3 }
 0x5d6   :  { %v6116_v35 = vpop.f32.mrf.mxu1 }
 0x5d7   :  { %v6117_v7 = vadd.f32 %v6116_v35, %v6076_v4 }
 0x5d8   :  { %v6118_v10 = vpop.f32.mrf.mxu1 }
 0x5d9   :  { %v6158_v12 = vadd.f32 %v6157_v32, %v6117_v7  ;;  %v6119_v13 = vadd.f32 %v6118_v10, %v6078_v56 }
 0x5da   :  { %v6120_v45 = vpop.f32.mrf.mxu1 }
 0x5db   :  { %v6160_v28 = vadd.f32 %v6159_v25, %v6119_v13 }
 0x5dc   :  { %v6121_v47 = vpop.f32.mrf.mxu1 }
 0x5dd   :  { %8455 = vtanh.f32 %v6160_v28 }
 0x5de   :  { %8457 = vtanh.f32 %v6158_v12 }
 0x5ea   :  { %v8456_v19 = vpop.eup %8455 }
 0x5eb   :  { %v8458_v50 = vpop.eup %8457  ;;  %6373 = vmatprep.mubr.f32.mxu0 %v8456_v19 }
 0x5ec   :  { %6374 = vmatmul.mubr.f32.vlgmr.msra.gmra.mxu0 %v8458_v50 }
 0x66a   :  { %v7204_v31 = vpop.f32.mrf.mxu1 }
 0x66c   :  { %v7205_v0 = vpop.f32.mrf.mxu1 }
 0x66d   :  { %v7206_v15 = vadd.f32 %v7205_v0, %v7204_v31 }
 0x66f   :  { %v6306_v16 = vadd.f32 %v7206_v15, %v7171_v34 }
 0x6ac   :  { %v7239_v40 = vpop.f32.mrf.mxu0 }
 0x6ae   :  { %v7240_v14 = vpop.f32.mrf.mxu0 }
 0x6af   :  { %v7241_v17 = vadd.f32 %v7240_v14, %v7239_v40 }
 0x6b1   :  { %v6376_v55 = vadd.f32 %v7241_v17, %v6306_v16 }
 0x6b3   :  { %6379 = vst [vmem:[#allocation20] sm:$0xff] %v6376_v55 }
 0x6b4   :  { %8690 = shalt.err (!%p8687_p3)
}
 0x6b5   :  { %6389 = dma.vmem_to_hbm [thread:$0]  %s6387_s10, 128, %s9073_s11, [#allocation4]  }
 0x6b6   :  { %8711 = dma.done.wait [#allocation4], 128  }
 0x6b7   :  { %8712 = vsyncadd [#allocation4], 4294967168 }
 0x6b8   :  { %6393 = vsyncpa [#allocation3], 1 }
 0x6b9   :  { %6394 = vsyncpa [#allocation6], 1 }
 0x6ba   :  { %6395 = vsyncpa [#allocation9], 1 }
 0x6bb   :  { %6396 = vsyncpa [#allocation12], 1 }
 0x6bc   :  { %6397 = vsyncpa [#allocation15], 1 }
 0x6bd   :  { %6398 = vsyncpa [#allocation18], 1 }
 0x6be   :  { %6399 = vsyncpa [#allocation4], 1 }

// kernel: tpu_custom_call.1
= control target key start
LH: loop header
LB: loop body
LE: loop exit
PB: predicated region body
PF: predicated region fallthrough
CT: control target
= control target key end

     0   :  { %16 = vsyncpa [#allocation3], 0  ;;  %s9062_s0 = inlined_call_operand.hbm [shape: f32[8,32], index: 0, kind: input, shape index: {}]   ;;  %s9063_s1 = inlined_call_operand.hbm [shape: f32[32,768], index: 1, kind: input, shape index: {}]   ;;  %s9064_s2 = inlined_call_operand.hbm [shape: f32[1,768], index: 2, kind: input, shape index: {}]   ;;  %s9065_s3 = inlined_call_operand.hbm [shape: bf16[768,768], index: 3, kind: input, shape index: {}]   ;;  %s9066_s4 = inlined_call_operand.hbm [shape: f32[1,768], index: 4, kind: input, shape index: {}]   ;;  %s9067_s5 = inlined_call_operand.hbm [shape: bf16[768,768], index: 5, kind: input, shape index: {}]   ;;  %s9068_s6 = inlined_call_operand.hbm [shape: f32[1,768], index: 6, kind: input, shape index: {}]   ;;  %s9069_s7 = inlined_call_operand.hbm [shape: bf16[768,512], index: 7, kind: input, shape index: {}]   ;;  %s9070_s8 = inlined_call_operand.hbm [shape: f32[1,512], index: 8, kind: input, shape index: {}]   ;;  %s9071_s9 = inlined_call_operand.hbm [shape: f32[512,128], index: 9, kind: input, shape index: {}]   ;;  %s9072_s10 = inlined_call_operand.hbm [shape: f32[1,128], index: 10, kind: input, shape index: {}]   ;;  %s9073_s11 = inlined_call_operand.hbm [shape: f32[8,128], index: 11, kind: output, shape index: {}]  }
   0x1   :  { %17 = vsyncpa [#allocation6], 0 }
   0x2   :  { %18 = vsyncpa [#allocation9], 0 }
   0x3   :  { %19 = vsyncpa [#allocation12], 0 }
   0x4   :  { %20 = vsyncpa [#allocation15], 0 }
   0x5   :  { %21 = vsyncpa [#allocation18], 0 }
   0x6   :  { %22 = vsyncpa [#allocation4], 0  ;;  %s8713_s17 = smov [#allocation5]  }
   0x7   :  { %s38_s18 = sshll.u32 %s8713_s17, 4  ;;  %s39_s18 = int_to_ptr.vmem [resolvable:$true] %s38_s18 }
   0x8   :  { %s8467_s19 = scalar_lea.vmem %s39_s18, 3072  ;;  %p8472_p1 = scmp.lt.s32.totalorder %s39_s18, %s39_s18 }
   0x9   :  { %p8468_p0 = scmp.ne.s32.totalorder %s39_s18, %s8467_s19  ;;  %p8473_p2 = scmp.lt.s32.totalorder %s8467_s19, %s8467_s19 }
   0xb   :  { %p8474_p3 = por %p8473_p2, %p8472_p1 }
   0xd   :  { %p8475_p4 = pnand %p8474_p3, %p8468_p0 }
   0xf   :  { %8478 = shalt.err (!%p8475_p4)
}
  0x10   :  { %s8714_s20 = smov 768   ;;  %s8715_s21 = smov 48  }
  0x11   :  { %44 = dma.hbm_to_vmem [thread:$0]  %s9063_s1, 3072, %s39_s18, [#allocation6], %s8714_s20, %s8714_s20, %s8715_s21  }
  0x12   :  { %s8716_s24 = smov [#allocation8]  }
  0x13   :  { %s60_s25 = sshll.u32 %s8716_s24, 4  ;;  %s61_s25 = int_to_ptr.vmem [resolvable:$true] %s60_s25 }
  0x14   :  { %s8487_s26 = scalar_lea.vmem %s61_s25, 36864  ;;  %p8492_p6 = scmp.lt.s32.totalorder %s61_s25, %s61_s25 }
  0x15   :  { %p8488_p5 = scmp.ne.s32.totalorder %s61_s25, %s8487_s26  ;;  %p8493_p7 = scmp.lt.s32.totalorder %s8487_s26, %s8487_s26 }
  0x17   :  { %p8494_p8 = por %p8493_p7, %p8492_p6 }
  0x19   :  { %p8495_p9 = pnand %p8494_p8, %p8488_p5 }
  0x1b   :  { %8498 = shalt.err (!%p8495_p9)
}
  0x1c   :  { %s8717_s27 = smov 384   ;;  %s8718_s28 = smov 24  }
  0x1d   :  { %66 = dma.hbm_to_vmem [thread:$0]  %s9065_s3, 36864, %s61_s25, [#allocation9], %s8717_s27, %s8717_s27, %s8718_s28  }
  0x1e   :  { %s8719_s12 = smov [#allocation11]   ;;  %s8720_s14 = smov [#allocation14]  }
  0x1f   :  { %s82_s13 = sshll.u32 %s8719_s12, 4  ;;  %s104_s1 = sshll.u32 %s8720_s14, 4  ;;  %s83_s13 = int_to_ptr.vmem [resolvable:$true] %s82_s13  ;;  %s105_s1 = int_to_ptr.vmem [resolvable:$true] %s104_s1 }
  0x20   :  { %s8507_s15 = scalar_lea.vmem %s83_s13, 36864  ;;  %p8512_p11 = scmp.lt.s32.totalorder %s83_s13, %s83_s13 }
  0x21   :  { %p8508_p10 = scmp.ne.s32.totalorder %s83_s13, %s8507_s15  ;;  %p8513_p12 = scmp.lt.s32.totalorder %s8507_s15, %s8507_s15 }
  0x23   :  { %p8514_p13 = por %p8513_p12, %p8512_p11 }
  0x25   :  { %p8515_p0 = pnand %p8514_p13, %p8508_p10 }
  0x27   :  { %8518 = shalt.err (!%p8515_p0)
}
  0x28   :  { %88 = dma.hbm_to_vmem [thread:$0]  %s9067_s5, 36864, %s83_s13, [#allocation12], %s8717_s27, %s8717_s27, %s8718_s28  }
  0x29   :  { %s8527_s18 = scalar_lea.vmem %s105_s1, 24576  ;;  %p8532_p2 = scmp.lt.s32.totalorder %s105_s1, %s105_s1 }
  0x2a   :  { %p8528_p1 = scmp.ne.s32.totalorder %s105_s1, %s8527_s18  ;;  %p8533_p3 = scmp.lt.s32.totalorder %s8527_s18, %s8527_s18 }
  0x2c   :  { %p8534_p4 = por %p8533_p3, %p8532_p2 }
  0x2e   :  { %p8535_p5 = pnand %p8534_p4, %p8528_p1 }
  0x30   :  { %8538 = shalt.err (!%p8535_p5)
}
  0x31   :  { %s8721_s3 = smov 256   ;;  %s8722_s19 = smov 16  }
  0x32   :  { %110 = dma.hbm_to_vmem [thread:$0]  %s9069_s7, 24576, %s105_s1, [#allocation15], %s8721_s3, %s8721_s3, %s8722_s19  }
  0x33   :  { %s8723_s22 = smov [#allocation17]  }
  0x34   :  { %s126_s23 = sshll.u32 %s8723_s22, 4  ;;  %s127_s23 = int_to_ptr.vmem [resolvable:$true] %s126_s23 }
  0x35   :  { %s8547_s24 = scalar_lea.vmem %s127_s23, 8192  ;;  %p8552_p7 = scmp.lt.s32.totalorder %s127_s23, %s127_s23 }
  0x36   :  { %p8548_p6 = scmp.ne.s32.totalorder %s127_s23, %s8547_s24  ;;  %p8553_p8 = scmp.lt.s32.totalorder %s8547_s24, %s8547_s24 }
  0x38   :  { %p8554_p9 = por %p8553_p8, %p8552_p7 }
  0x3a   :  { %p8555_p10 = pnand %p8554_p9, %p8548_p6 }
  0x3c   :  { %8558 = shalt.err (!%p8555_p10)
}
  0x3d   :  { %s8724_s5 = smov 128   ;;  %s8725_s25 = smov 8  }
  0x3e   :  { %132 = dma.hbm_to_vmem [thread:$0]  %s9071_s9, 8192, %s127_s23, [#allocation18], %s8724_s5, %s8724_s5, %s8725_s25  }
  0x3f   :  { %s8726_s28 = smov [#allocation2]   ;;  %s8727_s7 = smov [#allocation7]  }
  0x40   :  { %s29_s29 = sshll.u32 %s8726_s28, 4  ;;  %s51_s30 = sshll.u32 %s8727_s7, 4  ;;  %s30_s29 = int_to_ptr.vmem [resolvable:$true] %s29_s29  ;;  %s52_s30 = int_to_ptr.vmem [resolvable:$true] %s51_s30 }
  0x41   :  { %s8567_s12 = scalar_lea.vmem %s30_s29, 128  ;;  %p8572_p12 = scmp.lt.s32.totalorder %s30_s29, %s30_s29 }
  0x42   :  { %p8568_p11 = scmp.ne.s32.totalorder %s30_s29, %s8567_s12  ;;  %p8573_p13 = scmp.lt.s32.totalorder %s8567_s12, %s8567_s12 }
  0x44   :  { %p8574_p0 = por %p8573_p13, %p8572_p12 }
  0x46   :  { %p8575_p1 = pnand %p8574_p0, %p8568_p11 }
  0x48   :  { %8578 = shalt.err (!%p8575_p1)
}
  0x49   :  { %32 = dma.hbm_to_vmem [thread:$0]  %s9062_s0, 128, %s30_s29, [#allocation3]  }
  0x4a   :  { %s8587_s1 = scalar_lea.vmem %s52_s30, 96  ;;  %p8592_p3 = scmp.lt.s32.totalorder %s52_s30, %s52_s30 }
  0x4b   :  { %p8588_p2 = scmp.ne.s32.totalorder %s52_s30, %s8587_s1  ;;  %p8593_p4 = scmp.lt.s32.totalorder %s8587_s1, %s8587_s1 }
  0x4d   :  { %p8594_p5 = por %p8593_p4, %p8592_p3 }
  0x4f   :  { %p8595_p6 = pnand %p8594_p5, %p8588_p2 }
  0x51   :  { %8598 = shalt.err (!%p8595_p6)
}
  0x52   :  { %54 = dma.hbm_to_vmem [thread:$0]  %s9064_s2, 96, %s52_s30, [#allocation6]  }
  0x53   :  { %s8728_s16 = smov [#allocation10]   ;;  %s8729_s18 = smov [#allocation13]  }
  0x54   :  { %s73_s17 = sshll.u32 %s8728_s16, 4  ;;  %s95_s3 = sshll.u32 %s8729_s18, 4  ;;  %s74_s17 = int_to_ptr.vmem [resolvable:$true] %s73_s17  ;;  %s96_s3 = int_to_ptr.vmem [resolvable:$true] %s95_s3 }
  0x55   :  { %s8607_s19 = scalar_lea.vmem %s74_s17, 96  ;;  %p8612_p8 = scmp.lt.s32.totalorder %s74_s17, %s74_s17 }
  0x56   :  { %p8608_p7 = scmp.ne.s32.totalorder %s74_s17, %s8607_s19  ;;  %p8613_p9 = scmp.lt.s32.totalorder %s8607_s19, %s8607_s19 }
  0x58   :  { %p8614_p10 = por %p8613_p9, %p8612_p8 }
  0x5a   :  { %p8615_p11 = pnand %p8614_p10, %p8608_p7 }
  0x5c   :  { %8618 = shalt.err (!%p8615_p11)
}
  0x5d   :  { %76 = dma.hbm_to_vmem [thread:$0]  %s9066_s4, 96, %s74_s17, [#allocation9]  }
  0x5e   :  { %s8627_s21 = scalar_lea.vmem %s96_s3, 96  ;;  %p8632_p13 = scmp.lt.s32.totalorder %s96_s3, %s96_s3 }
  0x5f   :  { %p8628_p12 = scmp.ne.s32.totalorder %s96_s3, %s8627_s21  ;;  %p8633_p0 = scmp.lt.s32.totalorder %s8627_s21, %s8627_s21 }
  0x61   :  { %p8634_p1 = por %p8633_p0, %p8632_p13 }
  0x63   :  { %p8635_p2 = pnand %p8634_p1, %p8628_p12 }
  0x65   :  { %8638 = shalt.err (!%p8635_p2)
}
  0x66   :  { %98 = dma.hbm_to_vmem [thread:$0]  %s9068_s6, 96, %s96_s3, [#allocation12]  }
  0x67   :  { %s8730_s23 = smov [#allocation16]   ;;  %s8731_s5 = smov [#allocation19]  }
  0x68   :  { %s117_s24 = sshll.u32 %s8730_s23, 4  ;;  %s139_s25 = sshll.u32 %s8731_s5, 4  ;;  %s118_s24 = int_to_ptr.vmem [resolvable:$true] %s117_s24  ;;  %s140_s25 = int_to_ptr.vmem [resolvable:$true] %s139_s25 }
  0x69   :  { %s8647_s26 = scalar_lea.vmem %s118_s24, 64  ;;  %p8652_p4 = scmp.lt.s32.totalorder %s118_s24, %s118_s24 }
  0x6a   :  { %p8648_p3 = scmp.ne.s32.totalorder %s118_s24, %s8647_s26  ;;  %p8653_p5 = scmp.lt.s32.totalorder %s8647_s26, %s8647_s26 }
  0x6c   :  { %p8654_p6 = por %p8653_p5, %p8652_p4 }
  0x6e   :  { %p8655_p7 = pnand %p8654_p6, %p8648_p3 }
  0x70   :  { %8658 = shalt.err (!%p8655_p7)
}
  0x71   :  { %120 = dma.hbm_to_vmem [thread:$0]  %s9070_s8, 64, %s118_s24, [#allocation15]  }
  0x72   :  { %s8667_s28 = scalar_lea.vmem %s140_s25, 16  ;;  %s8671_s6 = scalar_lea.vmem %s140_s25, 32 }
  0x73   :  { %p8668_p8 = scmp.ne.s32.totalorder %s140_s25, %s8667_s28  ;;  %p8672_p9 = scmp.lt.s32.totalorder %s140_s25, %s140_s25 }
  0x74   :  { %p8673_p10 = scmp.lt.s32.totalorder %s8671_s6, %s8667_s28 }
  0x76   :  { %p8674_p11 = por %p8673_p10, %p8672_p9 }
  0x78   :  { %p8675_p12 = pnand %p8674_p11, %p8668_p8 }
  0x7a   :  { %8678 = shalt.err (!%p8675_p12)
}
  0x7b   :  { %142 = dma.hbm_to_vmem [thread:$0]  %s9072_s10, 16, %s140_s25, [#allocation18]  }
  0x7c   :  { %8699 = dma.done.wait [#allocation3], 128  }
  0x7d   :  { %8700 = vsyncadd [#allocation3], 4294967168 }
  0x7e   :  { %8701 = dma.done.wait [#allocation6], 3168  }
  0x7f   :  { %8702 = vsyncadd [#allocation6], 4294964128 }
  0x80   :  { %8703 = dma.done.wait [#allocation9], 36960  }
  0x81   :  { %8704 = vsyncadd [#allocation9], 4294930336 }
  0x82   :  { %8705 = dma.done.wait [#allocation12], 36960  }
  0x83   :  { %8706 = vsyncadd [#allocation12], 4294930336 }
  0x84   :  { %8707 = dma.done.wait [#allocation15], 24640  }
  0x85   :  { %8708 = vsyncadd [#allocation15], 4294942656 }
  0x86   :  { %8709 = dma.done.wait [#allocation18], 8208  }
  0x87   :  { %8710 = vsyncadd [#allocation18], 4294959088  ;;  %v8732_v0 = vmov 0.0   ;;  %v196_v1 = vld [vmem:[#allocation5 + $0x98] sm:$0xff]  ;;  %v198_v2 = vld [vmem:[#allocation5 + $0xa8] sm:$0xff]  ;;  %vm233_vm0 = vcmask 261120  }
  0x88   :  { %301 = vmatprep.mubr.f32.mxu0 %v8732_v0  ;;  %372 = vmatprep.mubr.f32.mxu1 %v8732_v0  ;;  %v195_v3 = vld [vmem:[#allocation5 + $0x90] sm:$0xff]  ;;  %v197_v4 = vld [vmem:[#allocation5 + $0xa0] sm:$0xff]  ;;  %v190_v5 = vld [vmem:[#allocation5 + $0x68] sm:$0xff]  ;;  %s8733_s8 = smov [#allocation20]  }
  0x89   :  { %261 = vmatprep.subr.mxu0 %v196_v1  ;;  %332 = vmatprep.subr.mxu1 %v198_v2  ;;  %v192_v6 = vld [vmem:[#allocation5 + $0x78] sm:$0xff]  ;;  %v189_v7 = vld [vmem:[#allocation5 + $0x60] sm:$0xff]  ;;  %v191_v8 = vld [vmem:[#allocation5 + $0x70] sm:$0xff]  ;;  %s6386_s10 = sshll.u32 %s8733_s8, 4  ;;  %s6387_s10 = int_to_ptr.vmem [resolvable:$true] %s6386_s10 }
  0x8a   :  { %262 = vmatpush1.msra.mxu0 %v195_v3  ;;  %333 = vmatpush1.msra.mxu1 %v197_v4  ;;  %v184_v9 = vld [vmem:[#allocation5 + $0x38] sm:$0xff]  ;;  %v186_v10 = vld [vmem:[#allocation5 + $0x48] sm:$0xff]  ;;  %v183_v11 = vld [vmem:[#allocation5 + $0x30] sm:$0xff]  ;;  %s8679_s30 = scalar_lea.vmem %s6387_s10, 128  ;;  %p8684_p0 = scmp.lt.s32.totalorder %s6387_s10, %s6387_s10 }
  0x8b   :  { %263 = vmatprep.subr.mxu0 %v190_v5  ;;  %334 = vmatprep.subr.mxu1 %v192_v6  ;;  %v185_v12 = vld [vmem:[#allocation5 + $0x40] sm:$0xff]  ;;  %v178_v13 = vld [vmem:[#allocation5 + $0x8] sm:$0xff]  ;;  %v180_v14 = vld [vmem:[#allocation5 + $0x18] sm:$0xff]  ;;  %p8680_p13 = scmp.ne.s32.totalorder %s6387_s10, %s8679_s30  ;;  %p8685_p1 = scmp.lt.s32.totalorder %s8679_s30, %s8679_s30 }
  0x8c   :  { %264 = vmatpush1.msra.mxu0 %v189_v7  ;;  %335 = vmatpush1.msra.mxu1 %v191_v8  ;;  %v177_v15 = vld [vmem:[#allocation5] sm:$0xff]  ;;  %v179_v16 = vld [vmem:[#allocation5 + $0x10] sm:$0xff]  ;;  %v176_v17 = vld [vmem:[#allocation2] sm:$0xff] }
  0x8d   :  { %265 = vmatprep.subr.mxu0 %v184_v9  ;;  %336 = vmatprep.subr.mxu1 %v186_v10  ;;  %v200_v18 = vld [vmem:[#allocation5 + $0xb8] sm:$0xff]  ;;  %v199_v19 = vld [vmem:[#allocation5 + $0xb0] sm:$0xff]  ;;  %v194_v20 = vld [vmem:[#allocation5 + $0x88] sm:$0xff]  ;;  %p8686_p2 = por %p8685_p1, %p8684_p0 }
  0x8e   :  { %266 = vmatpush1.msra.mxu0 %v183_v11  ;;  %337 = vmatpush1.msra.mxu1 %v185_v12  ;;  %v193_v21 = vld [vmem:[#allocation5 + $0x80] sm:$0xff]  ;;  %v7263_v22 = vld [vmem:[#allocation8 + $0x150] ss:$24 sps:$4 sm:$0xff]   ;;  %v7265_v23 = vld [vmem:[#allocation8 + $0x154] ss:$24 sps:$4 sm:$0xff]  }
  0x8f   :  { %267 = vmatprep.subr.mxu0 %v178_v13  ;;  %338 = vmatprep.subr.mxu1 %v180_v14  ;;  %v188_v24 = vld [vmem:[#allocation5 + $0x58] sm:$0xff]  ;;  %v187_v25 = vld [vmem:[#allocation5 + $0x50] sm:$0xff]  ;;  %v182_v26 = vld [vmem:[#allocation5 + $0x28] sm:$0xff]  ;;  %p8687_p3 = pnand %p8686_p2, %p8680_p13 }
  0x90   :  { %268 = vmatpush1.msra.mxu0 %v177_v15  ;;  %339 = vmatpush1.msra.mxu1 %v179_v16  ;;  %v7269_v27 = vld [vmem:[#allocation8 + $0x120] ss:$24 sps:$4 sm:$0xff]   ;;  %v7271_v28 = vld [vmem:[#allocation8 + $0x124] ss:$24 sps:$4 sm:$0xff]   ;;  %v7266_v30 = vld [vmem:[#allocation8 + $0x450] ss:$24 sps:$4 sm:$0xff]  }
  0x91   :  { %6400 = vmatmul.mubr.msk.f32.vlgmr.msra.gmra.mxu0 %vm233_vm0, %v176_v17  ;;  %6401 = vmatmul.mubr.msk.f32.vlgmr.msra.gmra.mxu1 %vm233_vm0, %v176_v17  ;;  %v181_v29 = vld [vmem:[#allocation5 + $0x20] sm:$0xff]  ;;  %v7268_v31 = vld [vmem:[#allocation8 + $0x454] ss:$24 sps:$4 sm:$0xff]   ;;  %v7275_v34 = vld [vmem:[#allocation8 + $0xf0] ss:$24 sps:$4 sm:$0xff]  }
  0x92   :  { %403 = vmatprep.subr.mxu0 %v200_v18  ;;  %443 = vmatprep.mubr.f32.mxu0 %v8732_v0  ;;  %v7277_v32 = vld [vmem:[#allocation8 + $0xf4] ss:$24 sps:$4 sm:$0xff]   ;;  %v7274_v33 = vld [vmem:[#allocation8 + $0x424] ss:$24 sps:$4 sm:$0xff]   ;;  %v7272_v36 = vld [vmem:[#allocation8 + $0x420] ss:$24 sps:$4 sm:$0xff]  }
  0x93   :  { %404 = vmatpush1.msra.mxu0 %v199_v19  ;;  %2222 = vmatprep.subr.bf16.mxu1 %v7265_v23  ;;  %v7283_v35 = vld [vmem:[#allocation8 + $0xc4] ss:$24 sps:$4 sm:$0xff]   ;;  %v7280_v37 = vld [vmem:[#allocation8 + $0x3f4] ss:$24 sps:$4 sm:$0xff]   ;;  %v7281_v38 = vld [vmem:[#allocation8 + $0xc0] ss:$24 sps:$4 sm:$0xff]  }
  0x94   :  { %405 = vmatprep.subr.mxu0 %v194_v20  ;;  %2223 = vmatpush1.bf16.msra.mxu1 %v7263_v22  ;;  %v7289_v39 = vld [vmem:[#allocation8 + $0x94] ss:$24 sps:$4 sm:$0xff]   ;;  %v7278_v40 = vld [vmem:[#allocation8 + $0x3f0] ss:$24 sps:$4 sm:$0xff]   ;;  %v7286_v41 = vld [vmem:[#allocation8 + $0x3c4] ss:$24 sps:$4 sm:$0xff]  }
  0x95   :  { %406 = vmatpush1.msra.mxu0 %v193_v21  ;;  %2224 = vmatprep.subr.bf16.mxu1 %v7271_v28  ;;  %v7287_v42 = vld [vmem:[#allocation8 + $0x90] ss:$24 sps:$4 sm:$0xff]   ;;  %v7295_v43 = vld [vmem:[#allocation8 + $0x64] ss:$24 sps:$4 sm:$0xff]   ;;  %v7284_v44 = vld [vmem:[#allocation8 + $0x3c0] ss:$24 sps:$4 sm:$0xff]   ;;  %v203_v28 = vlaneseq }
  0x96   :  { %407 = vmatprep.subr.mxu0 %v188_v24  ;;  %v7292_v45 = vld [vmem:[#allocation8 + $0x394] ss:$24 sps:$4 sm:$0xff]   ;;  %v7293_v46 = vld [vmem:[#allocation8 + $0x60] ss:$24 sps:$4 sm:$0xff]   ;;  %v7290_v48 = vld [vmem:[#allocation8 + $0x390] ss:$24 sps:$4 sm:$0xff]  }
  0x97   :  { %408 = vmatpush1.msra.mxu0 %v187_v25  ;;  %v7301_v47 = vld [vmem:[#allocation8 + $0x34] ss:$24 sps:$4 sm:$0xff]   ;;  %v7298_v49 = vld [vmem:[#allocation8 + $0x364] ss:$24 sps:$4 sm:$0xff]   ;;  %v7299_v50 = vld [vmem:[#allocation8 + $0x30] ss:$24 sps:$4 sm:$0xff]  }
  0x98   :  { %409 = vmatprep.subr.mxu0 %v182_v26  ;;  %2225 = vmatpush1.bf16.msra.mxu1 %v7269_v27  ;;  %v7307_v51 = vld [vmem:[#allocation8 + $0x4] ss:$24 sps:$4 sm:$0xff]   ;;  %v7296_v52 = vld [vmem:[#allocation8 + $0x360] ss:$24 sps:$4 sm:$0xff]   ;;  %v7304_v53 = vld [vmem:[#allocation8 + $0x334] ss:$24 sps:$4 sm:$0xff]  }
  0x99   :  { %410 = vmatpush1.msra.mxu0 %v181_v29  ;;  %2226 = vmatprep.subr.bf16.mxu1 %v7277_v32  ;;  %v7305_v54 = vld [vmem:[#allocation8] ss:$24 sps:$4 sm:$0xff]   ;;  %v7302_v55 = vld [vmem:[#allocation8 + $0x330] ss:$24 sps:$4 sm:$0xff]   ;;  %v7313_v56 = vld [vmem:[#allocation8 + $0x2d4] ss:$24 sps:$4 sm:$0xff]  }
  0x9a   :  { %6402 = vmatmul.mubr.msk.f32.vlgmr.msra.gmra.mxu0 %vm233_vm0, %v176_v17  ;;  %2263 = vmatprep.subr.bf16.mxu0 %v7268_v31  ;;  %v7310_v57 = vld [vmem:[#allocation8 + $0x304] ss:$24 sps:$4 sm:$0xff]   ;;  %v7311_v58 = vld [vmem:[#allocation8 + $0x2d0] ss:$24 sps:$4 sm:$0xff]   ;;  %v7308_v60 = vld [vmem:[#allocation8 + $0x300] ss:$24 sps:$4 sm:$0xff]  }
  0x9b   :  { %2264 = vmatpush1.bf16.msra.mxu0 %v7266_v30  ;;  %v7319_v59 = vld [vmem:[#allocation8 + $0x2a4] ss:$24 sps:$4 sm:$0xff]   ;;  %v7316_v61 = vld [vmem:[#allocation8 + $0x5d4] ss:$24 sps:$4 sm:$0xff]   ;;  %v7317_v62 = vld [vmem:[#allocation8 + $0x2a0] ss:$24 sps:$4 sm:$0xff]  }
  0x9c   :  { %2265 = vmatprep.subr.bf16.mxu0 %v7274_v33  ;;  %2227 = vmatpush1.bf16.msra.mxu1 %v7275_v34  ;;  %v7325_v63 = vld [vmem:[#allocation8 + $0x274] ss:$24 sps:$4 sm:$0xff]   ;;  %v7314_v0 = vld [vmem:[#allocation8 + $0x5d0] ss:$24 sps:$4 sm:$0xff]   ;;  %v7322_v1 = vld [vmem:[#allocation8 + $0x5a4] ss:$24 sps:$4 sm:$0xff]  }
  0x9d   :  { %2228 = vmatprep.subr.bf16.mxu1 %v7283_v35  ;;  %v7323_v2 = vld [vmem:[#allocation8 + $0x270] ss:$24 sps:$4 sm:$0xff]   ;;  %v7320_v3 = vld [vmem:[#allocation8 + $0x5a0] ss:$24 sps:$4 sm:$0xff]   ;;  %v7328_v4 = vld [vmem:[#allocation8 + $0x574] ss:$24 sps:$4 sm:$0xff]  }
  0x9e   :  { %v7326_v5 = vld [vmem:[#allocation8 + $0x570] ss:$24 sps:$4 sm:$0xff]   ;;  %v7331_v6 = vld [vmem:[#allocation8 + $0x244] ss:$24 sps:$4 sm:$0xff]   ;;  %v7329_v8 = vld [vmem:[#allocation8 + $0x240] ss:$24 sps:$4 sm:$0xff]  }
  0x9f   :  { %2266 = vmatpush1.bf16.msra.mxu0 %v7272_v36  ;;  %v7334_v7 = vld [vmem:[#allocation8 + $0x544] ss:$24 sps:$4 sm:$0xff]   ;;  %v7332_v9 = vld [vmem:[#allocation8 + $0x540] ss:$24 sps:$4 sm:$0xff]   ;;  %v7337_v10 = vld [vmem:[#allocation8 + $0x214] ss:$24 sps:$4 sm:$0xff]  }
  0xa0   :  { %2267 = vmatprep.subr.bf16.mxu0 %v7280_v37  ;;  %2229 = vmatpush1.bf16.msra.mxu1 %v7281_v38  ;;  %v7340_v11 = vld [vmem:[#allocation8 + $0x514] ss:$24 sps:$4 sm:$0xff]   ;;  %v7335_v12 = vld [vmem:[#allocation8 + $0x210] ss:$24 sps:$4 sm:$0xff]   ;;  %v7341_v14 = vld [vmem:[#allocation8 + $0x1e0] ss:$24 sps:$4 sm:$0xff]  }
  0xa1   :  { %2230 = vmatprep.subr.bf16.mxu1 %v7289_v39  ;;  %v7338_v13 = vld [vmem:[#allocation8 + $0x510] ss:$24 sps:$4 sm:$0xff]   ;;  %v7343_v15 = vld [vmem:[#allocation8 + $0x1e4] ss:$24 sps:$4 sm:$0xff]   ;;  %v7344_v16 = vld [vmem:[#allocation8 + $0x4e0] ss:$24 sps:$4 sm:$0xff]  }
  0xa2   :  { %v7346_v17 = vld [vmem:[#allocation8 + $0x4e4] ss:$24 sps:$4 sm:$0xff]   ;;  %v7349_v18 = vld [vmem:[#allocation8 + $0x1b4] ss:$24 sps:$4 sm:$0xff]   ;;  %v7347_v19 = vld [vmem:[#allocation8 + $0x1b0] ss:$24 sps:$4 sm:$0xff]  }
  0xa3   :  { %2268 = vmatpush1.bf16.msra.mxu0 %v7278_v40  ;;  %v7352_v20 = vld [vmem:[#allocation8 + $0x4b4] ss:$24 sps:$4 sm:$0xff]   ;;  %v7350_v21 = vld [vmem:[#allocation8 + $0x4b0] ss:$24 sps:$4 sm:$0xff]   ;;  %v7355_v22 = vld [vmem:[#allocation8 + $0x184] ss:$24 sps:$4 sm:$0xff]  }
  0xa4   :  { %2269 = vmatprep.subr.bf16.mxu0 %v7286_v41  ;;  %2231 = vmatpush1.bf16.msra.mxu1 %v7287_v42  ;;  %v7358_v23 = vld [vmem:[#allocation8 + $0x484] ss:$24 sps:$4 sm:$0xff]   ;;  %v7353_v24 = vld [vmem:[#allocation8 + $0x180] ss:$24 sps:$4 sm:$0xff]   ;;  %v7361_v26 = vld [vmem:[#allocation8 + $0x754] ss:$24 sps:$4 sm:$0xff]  }
  0xa5   :  { %2232 = vmatprep.subr.bf16.mxu1 %v7295_v43  ;;  %v7356_v25 = vld [vmem:[#allocation8 + $0x480] ss:$24 sps:$4 sm:$0xff]   ;;  %v7364_v27 = vld [vmem:[#allocation8 + $0x15c] ss:$24 sps:$4 sm:$0xff]   ;;  %v8830_v29 = vshrl.u32 %v203_v28, 7 }
  0xa6   :  { %v8838_v32 = vld [vmem:[#allocation7] sm:$0x3f]  ;;  %v7409_v28 = vld [vmem:[#allocation8 + $0x8d4] ss:$24 sps:$4 sm:$0xff]  }
  0xa7   :  { %2270 = vmatpush1.bf16.msra.mxu0 %v7284_v44  ;;  %v8833_v30 = vsub.s32 0, %v8830_v29  ;;  %v8836_v31 = vsub.s32 2, %v8830_v29  ;;  %v8841_v33 = vsub.s32 1, %v8830_v29  ;;  %v8844_v34 = vsub.s32 3, %v8830_v29 }
  0xa8   :  { %2271 = vmatprep.subr.bf16.mxu0 %v7292_v45  ;;  %2233 = vmatpush1.bf16.msra.mxu1 %v7293_v46 }
  0xa9   :  { %2234 = vmatprep.subr.bf16.mxu1 %v7301_v47  ;;  %v206_v35 = vrot.slane %v8838_v32, %v8833_v30  ;;  %v214_v36 = vrot.slane %v8838_v32, %v8836_v31  ;;  %v210_v37 = vrot.slane %v8838_v32, %v8841_v33  ;;  %v218_v38 = vrot.slane %v8838_v32, %v8844_v34 }
  0xab   :  { %2272 = vmatpush1.bf16.msra.mxu0 %v7290_v48 }
  0xac   :  { %2273 = vmatprep.subr.bf16.mxu0 %v7298_v49  ;;  %2235 = vmatpush1.bf16.msra.mxu1 %v7299_v50  ;;  %v8855_v49 = vsub.s32 5, %v8830_v29 }
  0xad   :  { %2236 = vmatprep.subr.bf16.mxu1 %v7307_v51 }
  0xaf   :  { %2274 = vmatpush1.bf16.msra.mxu0 %v7296_v52  ;;  %v226_v52 = vrot.slane %v8838_v32, %v8855_v49 }
  0xb0   :  { %2275 = vmatprep.subr.bf16.mxu0 %v7304_v53  ;;  %2237 = vmatpush1.bf16.msra.mxu1 %v7305_v54 }
  0xb1   :  { %2238 = vmatprep.subr.bf16.mxu1 %v7313_v56 }
  0xb3   :  { %2276 = vmatpush1.bf16.msra.mxu0 %v7302_v55 }
  0xb4   :  { %2277 = vmatprep.subr.bf16.mxu0 %v7310_v57  ;;  %2239 = vmatpush2.bf16.msra.mxu1 %v7311_v58  ;;  %v7359_v57 = vld [vmem:[#allocation8 + $0x750] ss:$24 sps:$4 sm:$0xff]  }
  0xb5   :  { %2240 = vmatprep.subr.bf16.mxu1 %v7319_v59  ;;  %v7362_v59 = vld [vmem:[#allocation8 + $0x158] ss:$24 sps:$4 sm:$0xff]  }
  0xb7   :  { %2278 = vmatpush1.bf16.msra.mxu0 %v7308_v60 }
  0xb8   :  { %2279 = vmatprep.subr.bf16.mxu0 %v7316_v61  ;;  %2241 = vmatpush2.bf16.msra.mxu1 %v7317_v62  ;;  %v7367_v61 = vld [vmem:[#allocation8 + $0x724] ss:$24 sps:$4 sm:$0xff]  }
  0xb9   :  { %2242 = vmatprep.subr.bf16.mxu1 %v7325_v63  ;;  %v7370_v62 = vld [vmem:[#allocation8 + $0x12c] ss:$24 sps:$4 sm:$0xff]  }
  0xbb   :  { %2280 = vmatpush2.bf16.msra.mxu0 %v7314_v0 }
  0xbc   :  { %2281 = vmatprep.subr.bf16.mxu0 %v7322_v1  ;;  %2243 = vmatpush2.bf16.msra.mxu1 %v7323_v2  ;;  %v7365_v1 = vld [vmem:[#allocation8 + $0x720] ss:$24 sps:$4 sm:$0xff]  }
  0xbd   :  { %2244 = vmatprep.subr.bf16.mxu1 %v7331_v6  ;;  %v7368_v2 = vld [vmem:[#allocation8 + $0x128] ss:$24 sps:$4 sm:$0xff]   ;;  %v7374_v6 = vld [vmem:[#allocation8 + $0xf8] ss:$24 sps:$4 sm:$0xff]  }
  0xbf   :  { %2282 = vmatpush2.bf16.msra.mxu0 %v7320_v3  ;;  %v7373_v3 = vld [vmem:[#allocation8 + $0x6f4] ss:$24 sps:$4 sm:$0xff]  }
  0xc0   :  { %2283 = vmatprep.subr.bf16.mxu0 %v7328_v4  ;;  %2245 = vmatpush2.bf16.msra.mxu1 %v7329_v8  ;;  %v7376_v4 = vld [vmem:[#allocation8 + $0xfc] ss:$24 sps:$4 sm:$0xff]  }
  0xc1   :  { %2246 = vmatprep.subr.bf16.mxu1 %v7337_v10  ;;  %v7382_v10 = vld [vmem:[#allocation8 + $0xcc] ss:$24 sps:$4 sm:$0xff]  }
  0xc3   :  { %2284 = vmatpush2.bf16.msra.mxu0 %v7326_v5  ;;  %v7371_v5 = vld [vmem:[#allocation8 + $0x6f0] ss:$24 sps:$4 sm:$0xff]  }
  0xc4   :  { %2285 = vmatprep.subr.bf16.mxu0 %v7334_v7  ;;  %2247 = vmatpush2.bf16.msra.mxu1 %v7335_v12  ;;  %v7379_v7 = vld [vmem:[#allocation8 + $0x6c4] ss:$24 sps:$4 sm:$0xff]   ;;  %v7385_v12 = vld [vmem:[#allocation8 + $0x694] ss:$24 sps:$4 sm:$0xff]  }
  0xc5   :  { %2248 = vmatprep.subr.bf16.mxu1 %v7343_v15  ;;  %v7386_v15 = vld [vmem:[#allocation8 + $0x98] ss:$24 sps:$4 sm:$0xff]  }
  0xc7   :  { %2286 = vmatpush2.bf16.msra.mxu0 %v7332_v9  ;;  %v7377_v9 = vld [vmem:[#allocation8 + $0x6c0] ss:$24 sps:$4 sm:$0xff]  }
  0xc8   :  { %2287 = vmatprep.subr.bf16.mxu0 %v7340_v11  ;;  %2249 = vmatpush2.bf16.msra.mxu1 %v7341_v14  ;;  %v7380_v11 = vld [vmem:[#allocation8 + $0xc8] ss:$24 sps:$4 sm:$0xff]   ;;  %v7388_v14 = vld [vmem:[#allocation8 + $0x9c] ss:$24 sps:$4 sm:$0xff]  }
  0xc9   :  { %2250 = vmatprep.subr.bf16.mxu1 %v7349_v18  ;;  %v7394_v18 = vld [vmem:[#allocation8 + $0x6c] ss:$24 sps:$4 sm:$0xff]  }
  0xcb   :  { %2288 = vmatpush2.bf16.msra.mxu0 %v7338_v13  ;;  %v7383_v13 = vld [vmem:[#allocation8 + $0x690] ss:$24 sps:$4 sm:$0xff]  }
  0xcc   :  { %2289 = vmatprep.subr.bf16.mxu0 %v7346_v17  ;;  %2251 = vmatpush2.bf16.msra.mxu1 %v7347_v19  ;;  %v7389_v17 = vld [vmem:[#allocation8 + $0x660] ss:$24 sps:$4 sm:$0xff]  }
  0xcd   :  { %2252 = vmatprep.subr.bf16.mxu1 %v7355_v22  ;;  %v7392_v19 = vld [vmem:[#allocation8 + $0x68] ss:$24 sps:$4 sm:$0xff]   ;;  %v7400_v22 = vld [vmem:[#allocation8 + $0x3c] ss:$24 sps:$4 sm:$0xff]  }
  0xcf   :  { %2290 = vmatpush2.bf16.msra.mxu0 %v7344_v16  ;;  %v7391_v16 = vld [vmem:[#allocation8 + $0x664] ss:$24 sps:$4 sm:$0xff]  }
  0xd0   :  { %2291 = vmatprep.subr.bf16.mxu0 %v7352_v20  ;;  %2253 = vmatpush2.bf16.msra.mxu1 %v7353_v24  ;;  %v7397_v20 = vld [vmem:[#allocation8 + $0x634] ss:$24 sps:$4 sm:$0xff]   ;;  %v7403_v24 = vld [vmem:[#allocation8 + $0x604] ss:$24 sps:$4 sm:$0xff]  }
  0xd1   :  { %2304 = vmatprep.subr.bf16.mxu1 %v7361_v26  ;;  %v7406_v26 = vld [vmem:[#allocation8 + $0xc] ss:$24 sps:$4 sm:$0xff]  }
  0xd3   :  { %2292 = vmatpush2.bf16.msra.mxu0 %v7350_v21  ;;  %v7395_v21 = vld [vmem:[#allocation8 + $0x630] ss:$24 sps:$4 sm:$0xff]  }
  0xd4   :  { %2293 = vmatprep.subr.bf16.mxu0 %v7358_v23  ;;  %v7398_v23 = vld [vmem:[#allocation8 + $0x38] ss:$24 sps:$4 sm:$0xff]  }
  0xd7   :  { %2294 = vmatpush2.bf16.msra.mxu0 %v7356_v25  ;;  %v7401_v25 = vld [vmem:[#allocation8 + $0x600] ss:$24 sps:$4 sm:$0xff]  }
  0xd8   :  { %2345 = vmatprep.subr.bf16.mxu0 %v7364_v27  ;;  %v7404_v27 = vld [vmem:[#allocation8 + $0x8] ss:$24 sps:$4 sm:$0xff]  }
 0x151   :  { %v303_v39 = vpop.f32.mrf.mxu0  ;;  %v374_v40 = vpop.f32.mrf.mxu1 }
 0x152   :  { %v304_v41 = vadd.f32 %v303_v39, %v206_v35  ;;  %v375_v42 = vadd.f32 %v374_v40, %v214_v36  ;;  %v7407_v35 = vld [vmem:[#allocation8 + $0x8d0] ss:$24 sps:$4 sm:$0xff]   ;;  %v7412_v36 = vld [vmem:[#allocation8 + $0x2dc] ss:$24 sps:$4 sm:$0xff]   ;;  %v7413_v39 = vld [vmem:[#allocation8 + $0x8a0] ss:$24 sps:$4 sm:$0xff]  }
 0x153   :  { %v305_v43 = vpop.f32.mrf.mxu0  ;;  %v376_v44 = vpop.f32.mrf.mxu1  ;;  %v7418_v40 = vld [vmem:[#allocation8 + $0x2ac] ss:$24 sps:$4 sm:$0xff]  }
 0x154   :  { %v450_v45 = vpack.c.bf16 %v304_v41, %v304_v41  ;;  %v452_v46 = vpack.c.bf16 %v375_v42, %v375_v42  ;;  %v306_v47 = vadd.f32 %v305_v43, %v210_v37  ;;  %v377_v48 = vadd.f32 %v376_v44, %v218_v38  ;;  %v7410_v37 = vld [vmem:[#allocation8 + $0x2d8] ss:$24 sps:$4 sm:$0xff]   ;;  %v7415_v38 = vld [vmem:[#allocation8 + $0x8a4] ss:$24 sps:$4 sm:$0xff]   ;;  %v7416_v42 = vld [vmem:[#allocation8 + $0x2a8] ss:$24 sps:$4 sm:$0xff]  }
 0x155   :  { %v8878_v41 = vsub.s32 4, %v8830_v29  ;;  %v7421_v43 = vld [vmem:[#allocation8 + $0x874] ss:$24 sps:$4 sm:$0xff]   ;;  %v7419_v44 = vld [vmem:[#allocation8 + $0x870] ss:$24 sps:$4 sm:$0xff]  }
 0x156   :  { %8415 = vtanh.bf16 %v450_v45  ;;  %v451_v50 = vpack.c.bf16 %v306_v47, %v306_v47  ;;  %v453_v51 = vpack.c.bf16 %v377_v48, %v377_v48  ;;  %v7424_v45 = vld [vmem:[#allocation8 + $0x27c] ss:$24 sps:$4 sm:$0xff]   ;;  %v7422_v47 = vld [vmem:[#allocation8 + $0x278] ss:$24 sps:$4 sm:$0xff]  }
 0x157   :  { %8417 = vtanh.bf16 %v452_v46  ;;  %v222_v46 = vrot.slane %v8838_v32, %v8878_v41  ;;  %v7427_v48 = vld [vmem:[#allocation8 + $0x844] ss:$24 sps:$4 sm:$0xff]   ;;  %v7434_v32 = vld [vmem:[#allocation8 + $0x218] ss:$24 sps:$4 sm:$0xff]  }
 0x158   :  { %8419 = vtanh.bf16 %v451_v50  ;;  %v7425_v50 = vld [vmem:[#allocation8 + $0x840] ss:$24 sps:$4 sm:$0xff]  }
 0x159   :  { %8421 = vtanh.bf16 %v453_v51  ;;  %v7430_v51 = vld [vmem:[#allocation8 + $0x24c] ss:$24 sps:$4 sm:$0xff]  }
 0x15a   :  { %v8859_v53 = vpop.f32.mrf.mxu0 }
 0x15b   :  { %v446_v29 = vadd.f32 %v8859_v53, %v222_v46  ;;  %v7440_v53 = vld [vmem:[#allocation8 + $0x1e8] ss:$24 sps:$4 sm:$0xff]   ;;  %v7499_v46 = vld [vmem:[#allocation8 + $0x30c] ss:$24 sps:$4 sm:$0xff]  }
 0x15c   :  { %v447_v54 = vpop.f32.mrf.mxu0 }
 0x15d   :  { %v448_v55 = vadd.f32 %v447_v54, %v226_v52  ;;  %v7428_v52 = vld [vmem:[#allocation8 + $0x248] ss:$24 sps:$4 sm:$0xff]   ;;  %v7433_v54 = vld [vmem:[#allocation8 + $0x814] ss:$24 sps:$4 sm:$0xff]  }
 0x15f   :  { %v455_v56 = vpack.c.bf16 %v448_v55, %v448_v55  ;;  %v7431_v55 = vld [vmem:[#allocation8 + $0x810] ss:$24 sps:$4 sm:$0xff]  }
 0x161   :  { %8423 = vtanh.bf16 %v455_v56  ;;  %v7436_v56 = vld [vmem:[#allocation8 + $0x21c] ss:$24 sps:$4 sm:$0xff]  }
 0x164   :  { %v8861_v58 = vpop.eup %8415 }
 0x165   :  { %v8863_v60 = vpop.eup %8417 }
 0x166   :  { %v8865_v63 = vpop.eup %8419 }
 0x167   :  { %v8867_v0 = vpop.eup %8421  ;;  %2254 = vmatprep.mubr.bf16.mxu1 %v8865_v63 }
 0x168   :  { %2295 = vmatprep.mubr.bf16.mxu0 %v8867_v0  ;;  %2255 = vmatmul.mubr.bf16.vlgmr.msra.gmra.mxu1 %v8861_v58 }
 0x169   :  { %2296 = vmatmul.mubr.bf16.vlgmr.msra.gmra.mxu0 %v8863_v60  ;;  %2305 = vmatpush1.bf16.msra.mxu1 %v7359_v57  ;;  %v454_v57 = vpack.c.bf16 %v446_v29, %v446_v29  ;;  %v7508_v29 = vld [vmem:[#allocation8 + $0x8dc] ss:$24 sps:$4 sm:$0xff]  }
 0x16a   :  { %2346 = vmatpush1.bf16.msra.mxu0 %v7362_v59  ;;  %2377 = vmatprep.mubr.bf16.mxu0 %v8865_v63  ;;  %v7439_v59 = vld [vmem:[#allocation8 + $0x7e4] ss:$24 sps:$4 sm:$0xff]  }
 0x16b   :  { %2306 = vmatprep.subr.bf16.mxu1 %v7367_v61  ;;  %2347 = vmatprep.subr.bf16.mxu0 %v7370_v62  ;;  %v7437_v61 = vld [vmem:[#allocation8 + $0x7e0] ss:$24 sps:$4 sm:$0xff]   ;;  %v7442_v62 = vld [vmem:[#allocation8 + $0x1ec] ss:$24 sps:$4 sm:$0xff]   ;;  %8425 = vtanh.bf16 %v454_v57 }
 0x16c   :  { %v7509_v57 = vld [vmem:[#allocation8 + $0x5a8] ss:$24 sps:$4 sm:$0xff]  }
 0x16d   :  { %2307 = vmatpush1.bf16.msra.mxu1 %v7365_v1  ;;  %v7445_v1 = vld [vmem:[#allocation8 + $0x7b4] ss:$24 sps:$4 sm:$0xff]  }
 0x16e   :  { %2348 = vmatpush1.bf16.msra.mxu0 %v7368_v2  ;;  %2308 = vmatprep.subr.bf16.mxu1 %v7373_v3  ;;  %v7443_v2 = vld [vmem:[#allocation8 + $0x7b0] ss:$24 sps:$4 sm:$0xff]   ;;  %v7448_v3 = vld [vmem:[#allocation8 + $0x1bc] ss:$24 sps:$4 sm:$0xff]  }
 0x16f   :  { %v8874_v8 = vpop.eup %8423  ;;  %2349 = vmatprep.subr.bf16.mxu0 %v7376_v4  ;;  %v7446_v4 = vld [vmem:[#allocation8 + $0x1b8] ss:$24 sps:$4 sm:$0xff]  }
 0x170   :  { %2336 = vmatprep.mubr.bf16.mxu1 %v8874_v8 }
 0x171   :  { %2309 = vmatpush1.bf16.msra.mxu1 %v7371_v5  ;;  %v7451_v5 = vld [vmem:[#allocation8 + $0x784] ss:$24 sps:$4 sm:$0xff]  }
 0x172   :  { %2350 = vmatpush1.bf16.msra.mxu0 %v7374_v6  ;;  %2310 = vmatprep.subr.bf16.mxu1 %v7379_v7  ;;  %v7449_v6 = vld [vmem:[#allocation8 + $0x780] ss:$24 sps:$4 sm:$0xff]   ;;  %v7454_v7 = vld [vmem:[#allocation8 + $0x18c] ss:$24 sps:$4 sm:$0xff]  }
 0x173   :  { %2351 = vmatprep.subr.bf16.mxu0 %v7382_v10  ;;  %v7457_v10 = vld [vmem:[#allocation8 + $0x45c] ss:$24 sps:$4 sm:$0xff]  }
 0x175   :  { %2311 = vmatpush1.bf16.msra.mxu1 %v7377_v9  ;;  %v7452_v9 = vld [vmem:[#allocation8 + $0x188] ss:$24 sps:$4 sm:$0xff]  }
 0x176   :  { %2352 = vmatpush1.bf16.msra.mxu0 %v7380_v11  ;;  %2312 = vmatprep.subr.bf16.mxu1 %v7385_v12  ;;  %v7460_v11 = vld [vmem:[#allocation8 + $0x75c] ss:$24 sps:$4 sm:$0xff]   ;;  %v7455_v12 = vld [vmem:[#allocation8 + $0x458] ss:$24 sps:$4 sm:$0xff]  }
 0x177   :  { %2353 = vmatprep.subr.bf16.mxu0 %v7388_v14  ;;  %v7463_v14 = vld [vmem:[#allocation8 + $0x42c] ss:$24 sps:$4 sm:$0xff]  }
 0x179   :  { %2313 = vmatpush1.bf16.msra.mxu1 %v7383_v13  ;;  %v7458_v13 = vld [vmem:[#allocation8 + $0x758] ss:$24 sps:$4 sm:$0xff]  }
 0x17a   :  { %2354 = vmatpush1.bf16.msra.mxu0 %v7386_v15  ;;  %2314 = vmatprep.subr.bf16.mxu1 %v7391_v16  ;;  %v8883_v15 = vpop.eup %8425  ;;  %v7461_v16 = vld [vmem:[#allocation8 + $0x428] ss:$24 sps:$4 sm:$0xff]  }
 0x17b   :  { %2355 = vmatprep.subr.bf16.mxu0 %v7394_v18  ;;  %v7464_v18 = vld [vmem:[#allocation8 + $0x728] ss:$24 sps:$4 sm:$0xff]  }
 0x17d   :  { %2315 = vmatpush1.bf16.msra.mxu1 %v7389_v17  ;;  %v7466_v17 = vld [vmem:[#allocation8 + $0x72c] ss:$24 sps:$4 sm:$0xff]  }
 0x17e   :  { %2356 = vmatpush1.bf16.msra.mxu0 %v7392_v19  ;;  %2316 = vmatprep.subr.bf16.mxu1 %v7397_v20  ;;  %v7469_v19 = vld [vmem:[#allocation8 + $0x3fc] ss:$24 sps:$4 sm:$0xff]   ;;  %v7467_v20 = vld [vmem:[#allocation8 + $0x3f8] ss:$24 sps:$4 sm:$0xff]  }
 0x17f   :  { %2357 = vmatprep.subr.bf16.mxu0 %v7400_v22  ;;  %v7470_v22 = vld [vmem:[#allocation8 + $0x6f8] ss:$24 sps:$4 sm:$0xff]  }
 0x181   :  { %2317 = vmatpush1.bf16.msra.mxu1 %v7395_v21  ;;  %v7472_v21 = vld [vmem:[#allocation8 + $0x6fc] ss:$24 sps:$4 sm:$0xff]  }
 0x182   :  { %2358 = vmatpush1.bf16.msra.mxu0 %v7398_v23  ;;  %2318 = vmatprep.subr.bf16.mxu1 %v7403_v24  ;;  %v7475_v23 = vld [vmem:[#allocation8 + $0x3cc] ss:$24 sps:$4 sm:$0xff]  }
 0x183   :  { %2359 = vmatprep.subr.bf16.mxu0 %v7406_v26  ;;  %v7478_v24 = vld [vmem:[#allocation8 + $0x6cc] ss:$24 sps:$4 sm:$0xff]   ;;  %v7476_v26 = vld [vmem:[#allocation8 + $0x6c8] ss:$24 sps:$4 sm:$0xff]  }
 0x185   :  { %2319 = vmatpush1.bf16.msra.mxu1 %v7401_v25  ;;  %v7473_v25 = vld [vmem:[#allocation8 + $0x3c8] ss:$24 sps:$4 sm:$0xff]  }
 0x186   :  { %2360 = vmatpush1.bf16.msra.mxu0 %v7404_v27  ;;  %2320 = vmatprep.subr.bf16.mxu1 %v7409_v28  ;;  %v7481_v27 = vld [vmem:[#allocation8 + $0x39c] ss:$24 sps:$4 sm:$0xff]  }
 0x187   :  { %2361 = vmatprep.subr.bf16.mxu0 %v7412_v36  ;;  %v7484_v28 = vld [vmem:[#allocation8 + $0x69c] ss:$24 sps:$4 sm:$0xff]   ;;  %v7482_v36 = vld [vmem:[#allocation8 + $0x698] ss:$24 sps:$4 sm:$0xff]  }
 0x189   :  { %2321 = vmatpush2.bf16.msra.mxu1 %v7407_v35  ;;  %v7479_v35 = vld [vmem:[#allocation8 + $0x398] ss:$24 sps:$4 sm:$0xff]  }
 0x18a   :  { %2362 = vmatpush2.bf16.msra.mxu0 %v7410_v37  ;;  %2322 = vmatprep.subr.bf16.mxu1 %v7415_v38  ;;  %v7487_v37 = vld [vmem:[#allocation8 + $0x36c] ss:$24 sps:$4 sm:$0xff]  }
 0x18b   :  { %2363 = vmatprep.subr.bf16.mxu0 %v7418_v40  ;;  %v7490_v38 = vld [vmem:[#allocation8 + $0x66c] ss:$24 sps:$4 sm:$0xff]   ;;  %v7488_v40 = vld [vmem:[#allocation8 + $0x668] ss:$24 sps:$4 sm:$0xff]  }
 0x18d   :  { %2323 = vmatpush2.bf16.msra.mxu1 %v7413_v39  ;;  %v7485_v39 = vld [vmem:[#allocation8 + $0x368] ss:$24 sps:$4 sm:$0xff]  }
 0x18e   :  { %2364 = vmatpush2.bf16.msra.mxu0 %v7416_v42  ;;  %2324 = vmatprep.subr.bf16.mxu1 %v7421_v43  ;;  %v7493_v42 = vld [vmem:[#allocation8 + $0x33c] ss:$24 sps:$4 sm:$0xff]  }
 0x18f   :  { %2365 = vmatprep.subr.bf16.mxu0 %v7424_v45  ;;  %v7496_v43 = vld [vmem:[#allocation8 + $0x63c] ss:$24 sps:$4 sm:$0xff]   ;;  %v7494_v45 = vld [vmem:[#allocation8 + $0x638] ss:$24 sps:$4 sm:$0xff]  }
 0x191   :  { %2325 = vmatpush2.bf16.msra.mxu1 %v7419_v44  ;;  %v7491_v44 = vld [vmem:[#allocation8 + $0x338] ss:$24 sps:$4 sm:$0xff]  }
 0x192   :  { %2366 = vmatpush2.bf16.msra.mxu0 %v7422_v47  ;;  %2326 = vmatprep.subr.bf16.mxu1 %v7427_v48  ;;  %v7502_v47 = vld [vmem:[#allocation8 + $0x60c] ss:$24 sps:$4 sm:$0xff]   ;;  %v7497_v48 = vld [vmem:[#allocation8 + $0x308] ss:$24 sps:$4 sm:$0xff]  }
 0x193   :  { %2367 = vmatprep.subr.bf16.mxu0 %v7430_v51  ;;  %v7505_v51 = vld [vmem:[#allocation8 + $0x5dc] ss:$24 sps:$4 sm:$0xff]  }
 0x195   :  { %2327 = vmatpush2.bf16.msra.mxu1 %v7425_v50  ;;  %v7500_v50 = vld [vmem:[#allocation8 + $0x608] ss:$24 sps:$4 sm:$0xff]  }
 0x196   :  { %2368 = vmatpush2.bf16.msra.mxu0 %v7428_v52  ;;  %2328 = vmatprep.subr.bf16.mxu1 %v7433_v54  ;;  %v7503_v52 = vld [vmem:[#allocation8 + $0x5d8] ss:$24 sps:$4 sm:$0xff]  }
 0x197   :  { %2369 = vmatprep.subr.bf16.mxu0 %v7436_v56  ;;  %v7506_v54 = vld [vmem:[#allocation8 + $0x8d8] ss:$24 sps:$4 sm:$0xff]   ;;  %v7514_v56 = vld [vmem:[#allocation8 + $0x8ac] ss:$24 sps:$4 sm:$0xff]  }
 0x199   :  { %2329 = vmatpush2.bf16.msra.mxu1 %v7431_v55  ;;  %v7511_v55 = vld [vmem:[#allocation8 + $0x5ac] ss:$24 sps:$4 sm:$0xff]  }
 0x19a   :  { %2370 = vmatpush2.bf16.msra.mxu0 %v7434_v32  ;;  %2330 = vmatprep.subr.bf16.mxu1 %v7439_v59  ;;  %v7512_v32 = vld [vmem:[#allocation8 + $0x8a8] ss:$24 sps:$4 sm:$0xff]   ;;  %v7517_v59 = vld [vmem:[#allocation8 + $0x57c] ss:$24 sps:$4 sm:$0xff]  }
 0x19b   :  { %2371 = vmatprep.subr.bf16.mxu0 %v7442_v62  ;;  %v7515_v62 = vld [vmem:[#allocation8 + $0x578] ss:$24 sps:$4 sm:$0xff]  }
 0x19d   :  { %2331 = vmatpush2.bf16.msra.mxu1 %v7437_v61  ;;  %v7520_v61 = vld [vmem:[#allocation8 + $0x87c] ss:$24 sps:$4 sm:$0xff]  }
 0x19e   :  { %2372 = vmatpush2.bf16.msra.mxu0 %v7440_v53  ;;  %2332 = vmatprep.subr.bf16.mxu1 %v7445_v1  ;;  %v7518_v53 = vld [vmem:[#allocation8 + $0x878] ss:$24 sps:$4 sm:$0xff]   ;;  %v7523_v1 = vld [vmem:[#allocation8 + $0x54c] ss:$24 sps:$4 sm:$0xff]  }
 0x19f   :  { %2373 = vmatprep.subr.bf16.mxu0 %v7448_v3  ;;  %v7521_v3 = vld [vmem:[#allocation8 + $0x548] ss:$24 sps:$4 sm:$0xff]  }
 0x1a1   :  { %2333 = vmatpush2.bf16.msra.mxu1 %v7443_v2  ;;  %v7526_v2 = vld [vmem:[#allocation8 + $0x84c] ss:$24 sps:$4 sm:$0xff]  }
 0x1a2   :  { %2374 = vmatpush2.bf16.msra.mxu0 %v7446_v4  ;;  %2334 = vmatprep.subr.bf16.mxu1 %v7451_v5  ;;  %v7524_v4 = vld [vmem:[#allocation8 + $0x848] ss:$24 sps:$4 sm:$0xff]   ;;  %v7529_v5 = vld [vmem:[#allocation8 + $0x51c] ss:$24 sps:$4 sm:$0xff]  }
 0x1a3   :  { %2375 = vmatprep.subr.bf16.mxu0 %v7454_v7  ;;  %v7527_v7 = vld [vmem:[#allocation8 + $0x518] ss:$24 sps:$4 sm:$0xff]  }
 0x1a5   :  { %2335 = vmatpush2.bf16.msra.mxu1 %v7449_v6  ;;  %v7532_v6 = vld [vmem:[#allocation8 + $0x81c] ss:$24 sps:$4 sm:$0xff]  }
 0x1a6   :  { %2376 = vmatpush2.bf16.msra.mxu0 %v7452_v9  ;;  %2386 = vmatprep.subr.bf16.mxu1 %v7457_v10  ;;  %v7530_v9 = vld [vmem:[#allocation8 + $0x818] ss:$24 sps:$4 sm:$0xff]   ;;  %v7535_v10 = vld [vmem:[#allocation8 + $0x4ec] ss:$24 sps:$4 sm:$0xff]  }
 0x1a7   :  { %2427 = vmatprep.subr.bf16.mxu0 %v7460_v11  ;;  %v7538_v11 = vld [vmem:[#allocation8 + $0x7ec] ss:$24 sps:$4 sm:$0xff]  }
 0x1a8   :  { %2337 = vmatmul.mubr.bf16.vlgmr.msra.gmra.mxu1 %v8883_v15 }
 0x1a9   :  { %2378 = vmatmul.mubr.bf16.vlgmr.msra.gmra.mxu0 %v8861_v58  ;;  %2387 = vmatpush1.bf16.msra.mxu1 %v7455_v12  ;;  %v7533_v12 = vld [vmem:[#allocation8 + $0x4e8] ss:$24 sps:$4 sm:$0xff]  }
 0x1aa   :  { %2418 = vmatprep.mubr.bf16.mxu1 %v8867_v0  ;;  %2428 = vmatpush1.bf16.msra.mxu0 %v7458_v13  ;;  %v7536_v13 = vld [vmem:[#allocation8 + $0x7e8] ss:$24 sps:$4 sm:$0xff]  }
 0x1ab   :  { %2459 = vmatprep.mubr.bf16.mxu0 %v8874_v8  ;;  %2388 = vmatprep.subr.bf16.mxu1 %v7463_v14  ;;  %v7541_v14 = vld [vmem:[#allocation8 + $0x4bc] ss:$24 sps:$4 sm:$0xff]  }
 0x1ac   :  { %2429 = vmatprep.subr.bf16.mxu0 %v7466_v17  ;;  %v7539_v17 = vld [vmem:[#allocation8 + $0x4b8] ss:$24 sps:$4 sm:$0xff]  }
 0x1ad   :  { %2389 = vmatpush1.bf16.msra.mxu1 %v7461_v16  ;;  %v7544_v16 = vld [vmem:[#allocation8 + $0x7bc] ss:$24 sps:$4 sm:$0xff]  }
 0x1ae   :  { %2430 = vmatpush1.bf16.msra.mxu0 %v7464_v18  ;;  %2390 = vmatprep.subr.bf16.mxu1 %v7469_v19  ;;  %v7542_v18 = vld [vmem:[#allocation8 + $0x7b8] ss:$24 sps:$4 sm:$0xff]   ;;  %v7547_v19 = vld [vmem:[#allocation8 + $0x48c] ss:$24 sps:$4 sm:$0xff]  }
 0x1af   :  { %2431 = vmatprep.subr.bf16.mxu0 %v7472_v21  ;;  %v7545_v21 = vld [vmem:[#allocation8 + $0x488] ss:$24 sps:$4 sm:$0xff]  }
 0x1b1   :  { %2391 = vmatpush1.bf16.msra.mxu1 %v7467_v20  ;;  %v7550_v20 = vld [vmem:[#allocation8 + $0x78c] ss:$24 sps:$4 sm:$0xff]  }
 0x1b2   :  { %2432 = vmatpush1.bf16.msra.mxu0 %v7470_v22  ;;  %2392 = vmatprep.subr.bf16.mxu1 %v7475_v23  ;;  %v7548_v22 = vld [vmem:[#allocation8 + $0x788] ss:$24 sps:$4 sm:$0xff]   ;;  %v7553_v23 = vld [vmem:[#allocation8 + $0x164] ss:$24 sps:$4 sm:$0xff]  }
 0x1b3   :  { %2433 = vmatprep.subr.bf16.mxu0 %v7478_v24  ;;  %v7556_v24 = vld [vmem:[#allocation8 + $0x464] ss:$24 sps:$4 sm:$0xff]  }
 0x1b5   :  { %2393 = vmatpush1.bf16.msra.mxu1 %v7473_v25  ;;  %v7551_v25 = vld [vmem:[#allocation8 + $0x160] ss:$24 sps:$4 sm:$0xff]  }
 0x1b6   :  { %2434 = vmatpush1.bf16.msra.mxu0 %v7476_v26  ;;  %2394 = vmatprep.subr.bf16.mxu1 %v7481_v27  ;;  %v7554_v26 = vld [vmem:[#allocation8 + $0x460] ss:$24 sps:$4 sm:$0xff]   ;;  %v7559_v27 = vld [vmem:[#allocation8 + $0x134] ss:$24 sps:$4 sm:$0xff]  }
 0x1b7   :  { %2435 = vmatprep.subr.bf16.mxu0 %v7484_v28  ;;  %v7562_v28 = vld [vmem:[#allocation8 + $0x434] ss:$24 sps:$4 sm:$0xff]  }
 0x1b9   :  { %2395 = vmatpush1.bf16.msra.mxu1 %v7479_v35  ;;  %v7557_v35 = vld [vmem:[#allocation8 + $0x130] ss:$24 sps:$4 sm:$0xff]  }
 0x1ba   :  { %2436 = vmatpush1.bf16.msra.mxu0 %v7482_v36  ;;  %2396 = vmatprep.subr.bf16.mxu1 %v7487_v37  ;;  %v7560_v36 = vld [vmem:[#allocation8 + $0x430] ss:$24 sps:$4 sm:$0xff]   ;;  %v7565_v37 = vld [vmem:[#allocation8 + $0x104] ss:$24 sps:$4 sm:$0xff]  }
 0x1bb   :  { %2437 = vmatprep.subr.bf16.mxu0 %v7490_v38  ;;  %v7563_v38 = vld [vmem:[#allocation8 + $0x100] ss:$24 sps:$4 sm:$0xff]  }
 0x1bd   :  { %2397 = vmatpush1.bf16.msra.mxu1 %v7485_v39  ;;  %v7568_v39 = vld [vmem:[#allocation8 + $0x404] ss:$24 sps:$4 sm:$0xff]  }
 0x1be   :  { %2438 = vmatpush1.bf16.msra.mxu0 %v7488_v40  ;;  %2398 = vmatprep.subr.bf16.mxu1 %v7493_v42  ;;  %v7566_v40 = vld [vmem:[#allocation8 + $0x400] ss:$24 sps:$4 sm:$0xff]   ;;  %v7571_v42 = vld [vmem:[#allocation8 + $0xd4] ss:$24 sps:$4 sm:$0xff]  }
 0x1bf   :  { %2439 = vmatprep.subr.bf16.mxu0 %v7496_v43  ;;  %v7574_v43 = vld [vmem:[#allocation8 + $0x3d4] ss:$24 sps:$4 sm:$0xff]  }
 0x1c1   :  { %2399 = vmatpush1.bf16.msra.mxu1 %v7491_v44  ;;  %v7569_v44 = vld [vmem:[#allocation8 + $0xd0] ss:$24 sps:$4 sm:$0xff]  }
 0x1c2   :  { %2440 = vmatpush1.bf16.msra.mxu0 %v7494_v45  ;;  %2400 = vmatprep.subr.bf16.mxu1 %v7499_v46  ;;  %v7572_v45 = vld [vmem:[#allocation8 + $0x3d0] ss:$24 sps:$4 sm:$0xff]   ;;  %v7577_v46 = vld [vmem:[#allocation8 + $0xa4] ss:$24 sps:$4 sm:$0xff]  }
 0x1c3   :  { %2441 = vmatprep.subr.bf16.mxu0 %v7502_v47  ;;  %v7580_v47 = vld [vmem:[#allocation8 + $0x3a4] ss:$24 sps:$4 sm:$0xff]  }
 0x1c5   :  { %2401 = vmatpush1.bf16.msra.mxu1 %v7497_v48  ;;  %v7583_v48 = vld [vmem:[#allocation8 + $0x74] ss:$24 sps:$4 sm:$0xff]  }
 0x1c6   :  { %2442 = vmatpush1.bf16.msra.mxu0 %v7500_v50  ;;  %2402 = vmatprep.subr.bf16.mxu1 %v7505_v51  ;;  %v7586_v50 = vld [vmem:[#allocation8 + $0x374] ss:$24 sps:$4 sm:$0xff]   ;;  %v7581_v51 = vld [vmem:[#allocation8 + $0x70] ss:$24 sps:$4 sm:$0xff]  }
 0x1c7   :  { %2443 = vmatprep.subr.bf16.mxu0 %v7508_v29  ;;  %v7584_v29 = vld [vmem:[#allocation8 + $0x370] ss:$24 sps:$4 sm:$0xff]  }
 0x1c9   :  { %2403 = vmatpush2.bf16.msra.mxu1 %v7503_v52  ;;  %v7589_v52 = vld [vmem:[#allocation8 + $0x44] ss:$24 sps:$4 sm:$0xff]  }
 0x1ca   :  { %2444 = vmatpush2.bf16.msra.mxu0 %v7506_v54  ;;  %2404 = vmatprep.subr.bf16.mxu1 %v7511_v55  ;;  %v7592_v54 = vld [vmem:[#allocation8 + $0x344] ss:$24 sps:$4 sm:$0xff]   ;;  %v7587_v55 = vld [vmem:[#allocation8 + $0x40] ss:$24 sps:$4 sm:$0xff]  }
 0x1cb   :  { %2445 = vmatprep.subr.bf16.mxu0 %v7514_v56  ;;  %v7590_v56 = vld [vmem:[#allocation8 + $0x340] ss:$24 sps:$4 sm:$0xff]  }
 0x1cd   :  { %2405 = vmatpush2.bf16.msra.mxu1 %v7509_v57  ;;  %v7595_v57 = vld [vmem:[#allocation8 + $0x14] ss:$24 sps:$4 sm:$0xff]  }
 0x1ce   :  { %2446 = vmatpush2.bf16.msra.mxu0 %v7512_v32  ;;  %2406 = vmatprep.subr.bf16.mxu1 %v7517_v59  ;;  %v7598_v32 = vld [vmem:[#allocation8 + $0x314] ss:$24 sps:$4 sm:$0xff]   ;;  %v7593_v59 = vld [vmem:[#allocation8 + $0x10] ss:$24 sps:$4 sm:$0xff]  }
 0x1cf   :  { %2447 = vmatprep.subr.bf16.mxu0 %v7520_v61  ;;  %v7596_v61 = vld [vmem:[#allocation8 + $0x310] ss:$24 sps:$4 sm:$0xff]  }
 0x1d1   :  { %2407 = vmatpush2.bf16.msra.mxu1 %v7515_v62  ;;  %v7601_v62 = vld [vmem:[#allocation8 + $0x2e4] ss:$24 sps:$4 sm:$0xff]  }
 0x1d2   :  { %2448 = vmatpush2.bf16.msra.mxu0 %v7518_v53  ;;  %2408 = vmatprep.subr.bf16.mxu1 %v7523_v1  ;;  %v7604_v53 = vld [vmem:[#allocation8 + $0x5e4] ss:$24 sps:$4 sm:$0xff]   ;;  %v7599_v1 = vld [vmem:[#allocation8 + $0x2e0] ss:$24 sps:$4 sm:$0xff]  }
 0x1d3   :  { %2449 = vmatprep.subr.bf16.mxu0 %v7526_v2  ;;  %v7602_v2 = vld [vmem:[#allocation8 + $0x5e0] ss:$24 sps:$4 sm:$0xff]  }
 0x1d5   :  { %2409 = vmatpush2.bf16.msra.mxu1 %v7521_v3  ;;  %v7607_v3 = vld [vmem:[#allocation8 + $0x2b4] ss:$24 sps:$4 sm:$0xff]  }
 0x1d6   :  { %2450 = vmatpush2.bf16.msra.mxu0 %v7524_v4  ;;  %2410 = vmatprep.subr.bf16.mxu1 %v7529_v5  ;;  %v7610_v4 = vld [vmem:[#allocation8 + $0x5b4] ss:$24 sps:$4 sm:$0xff]   ;;  %v7605_v5 = vld [vmem:[#allocation8 + $0x2b0] ss:$24 sps:$4 sm:$0xff]  }
 0x1d7   :  { %2451 = vmatprep.subr.bf16.mxu0 %v7532_v6  ;;  %v7608_v6 = vld [vmem:[#allocation8 + $0x5b0] ss:$24 sps:$4 sm:$0xff]  }
 0x1d9   :  { %2411 = vmatpush2.bf16.msra.mxu1 %v7527_v7  ;;  %v7613_v7 = vld [vmem:[#allocation8 + $0x284] ss:$24 sps:$4 sm:$0xff]  }
 0x1da   :  { %2452 = vmatpush2.bf16.msra.mxu0 %v7530_v9  ;;  %2412 = vmatprep.subr.bf16.mxu1 %v7535_v10  ;;  %v7616_v9 = vld [vmem:[#allocation8 + $0x584] ss:$24 sps:$4 sm:$0xff]   ;;  %v7611_v10 = vld [vmem:[#allocation8 + $0x280] ss:$24 sps:$4 sm:$0xff]  }
 0x1db   :  { %2453 = vmatprep.subr.bf16.mxu0 %v7538_v11  ;;  %v7614_v11 = vld [vmem:[#allocation8 + $0x580] ss:$24 sps:$4 sm:$0xff]  }
 0x1dd   :  { %2413 = vmatpush2.bf16.msra.mxu1 %v7533_v12  ;;  %v7619_v12 = vld [vmem:[#allocation8 + $0x254] ss:$24 sps:$4 sm:$0xff]  }
 0x1de   :  { %2454 = vmatpush2.bf16.msra.mxu0 %v7536_v13  ;;  %2414 = vmatprep.subr.bf16.mxu1 %v7541_v14  ;;  %v7622_v13 = vld [vmem:[#allocation8 + $0x554] ss:$24 sps:$4 sm:$0xff]   ;;  %v7617_v14 = vld [vmem:[#allocation8 + $0x250] ss:$24 sps:$4 sm:$0xff]  }
 0x1df   :  { %2455 = vmatprep.subr.bf16.mxu0 %v7544_v16  ;;  %v7620_v16 = vld [vmem:[#allocation8 + $0x550] ss:$24 sps:$4 sm:$0xff]  }
 0x1e1   :  { %2415 = vmatpush2.bf16.msra.mxu1 %v7539_v17  ;;  %v7625_v17 = vld [vmem:[#allocation8 + $0x224] ss:$24 sps:$4 sm:$0xff]  }
 0x1e2   :  { %2456 = vmatpush2.bf16.msra.mxu0 %v7542_v18  ;;  %2416 = vmatprep.subr.bf16.mxu1 %v7547_v19  ;;  %v7628_v18 = vld [vmem:[#allocation8 + $0x524] ss:$24 sps:$4 sm:$0xff]   ;;  %v7623_v19 = vld [vmem:[#allocation8 + $0x220] ss:$24 sps:$4 sm:$0xff]  }
 0x1e3   :  { %2457 = vmatprep.subr.bf16.mxu0 %v7550_v20  ;;  %v7626_v20 = vld [vmem:[#allocation8 + $0x520] ss:$24 sps:$4 sm:$0xff]  }
 0x1e5   :  { %2417 = vmatpush2.bf16.msra.mxu1 %v7545_v21  ;;  %v7631_v21 = vld [vmem:[#allocation8 + $0x1f4] ss:$24 sps:$4 sm:$0xff]  }
 0x1e6   :  { %2458 = vmatpush2.bf16.msra.mxu0 %v7548_v22  ;;  %2468 = vmatprep.subr.bf16.mxu1 %v7553_v23  ;;  %v7634_v22 = vld [vmem:[#allocation8 + $0x4f4] ss:$24 sps:$4 sm:$0xff]   ;;  %v7629_v23 = vld [vmem:[#allocation8 + $0x1f0] ss:$24 sps:$4 sm:$0xff]  }
 0x1e7   :  { %2509 = vmatprep.subr.bf16.mxu0 %v7556_v24  ;;  %v7632_v24 = vld [vmem:[#allocation8 + $0x4f0] ss:$24 sps:$4 sm:$0xff]  }
 0x1e8   :  { %2419 = vmatmul.mubr.bf16.vlgmr.msra.gmra.mxu1 %v8863_v60 }
 0x1e9   :  { %2460 = vmatmul.mubr.bf16.vlgmr.msra.gmra.mxu0 %v8883_v15  ;;  %2469 = vmatpush1.bf16.msra.mxu1 %v7551_v25  ;;  %v7637_v25 = vld [vmem:[#allocation8 + $0x1c4] ss:$24 sps:$4 sm:$0xff]  }
 0x1ea   :  { %2500 = vmatprep.mubr.bf16.mxu1 %v8865_v63  ;;  %2510 = vmatpush1.bf16.msra.mxu0 %v7554_v26  ;;  %v7575_v63 = vld [vmem:[#allocation8 + $0xa0] ss:$24 sps:$4 sm:$0xff]   ;;  %v7640_v26 = vld [vmem:[#allocation8 + $0x4c4] ss:$24 sps:$4 sm:$0xff]  }
 0x1eb   :  { %2541 = vmatprep.mubr.bf16.mxu0 %v8867_v0  ;;  %2470 = vmatprep.subr.bf16.mxu1 %v7559_v27  ;;  %v7578_v0 = vld [vmem:[#allocation8 + $0x3a0] ss:$24 sps:$4 sm:$0xff]  }
 0x1ec   :  { %2511 = vmatprep.subr.bf16.mxu0 %v7562_v28  ;;  %v7635_v27 = vld [vmem:[#allocation8 + $0x1c0] ss:$24 sps:$4 sm:$0xff]  }
 0x1ed   :  { %2471 = vmatpush1.bf16.msra.mxu1 %v7557_v35  ;;  %v7638_v28 = vld [vmem:[#allocation8 + $0x4c0] ss:$24 sps:$4 sm:$0xff]   ;;  %v7643_v35 = vld [vmem:[#allocation8 + $0x194] ss:$24 sps:$4 sm:$0xff]  }
 0x1ee   :  { %2512 = vmatpush1.bf16.msra.mxu0 %v7560_v36  ;;  %2472 = vmatprep.subr.bf16.mxu1 %v7565_v37  ;;  %v7646_v36 = vld [vmem:[#allocation8 + $0x494] ss:$24 sps:$4 sm:$0xff]   ;;  %v7641_v37 = vld [vmem:[#allocation8 + $0x190] ss:$24 sps:$4 sm:$0xff]  }
 0x1ef   :  { %2513 = vmatprep.subr.bf16.mxu0 %v7568_v39  ;;  %v7649_v39 = vld [vmem:[#allocation8 + $0x764] ss:$24 sps:$4 sm:$0xff]  }
 0x1f1   :  { %2473 = vmatpush1.bf16.msra.mxu1 %v7563_v38  ;;  %v7644_v38 = vld [vmem:[#allocation8 + $0x490] ss:$24 sps:$4 sm:$0xff]  }
 0x1f2   :  { %2514 = vmatpush1.bf16.msra.mxu0 %v7566_v40  ;;  %2474 = vmatprep.subr.bf16.mxu1 %v7571_v42  ;;  %v7667_v40 = vld [vmem:[#allocation11 + $0x154] ss:$24 sps:$4 sm:$0xff]  }
 0x1f3   :  { %2515 = vmatprep.subr.bf16.mxu0 %v7574_v43  ;;  %v7647_v42 = vld [vmem:[#allocation8 + $0x760] ss:$24 sps:$4 sm:$0xff]   ;;  %v7652_v43 = vld [vmem:[#allocation8 + $0x734] ss:$24 sps:$4 sm:$0xff]  }
 0x1f5   :  { %2475 = vmatpush1.bf16.msra.mxu1 %v7569_v44  ;;  %v7665_v44 = vld [vmem:[#allocation11 + $0x150] ss:$24 sps:$4 sm:$0xff]  }
 0x1f6   :  { %2516 = vmatpush1.bf16.msra.mxu0 %v7572_v45  ;;  %2476 = vmatprep.subr.bf16.mxu1 %v7577_v46  ;;  %v7673_v46 = vld [vmem:[#allocation11 + $0x124] ss:$24 sps:$4 sm:$0xff]  }
 0x1f7   :  { %2517 = vmatprep.subr.bf16.mxu0 %v7580_v47 }
 0x1f9   :  { %2477 = vmatpush1.bf16.msra.mxu1 %v7575_v63  ;;  %v7650_v63 = vld [vmem:[#allocation8 + $0x730] ss:$24 sps:$4 sm:$0xff]  }
 0x1fa   :  { %2518 = vmatpush1.bf16.msra.mxu0 %v7578_v0  ;;  %2478 = vmatprep.subr.bf16.mxu1 %v7583_v48  ;;  %v7655_v48 = vld [vmem:[#allocation8 + $0x704] ss:$24 sps:$4 sm:$0xff]  }
 0x1fb   :  { %2519 = vmatprep.subr.bf16.mxu0 %v7586_v50 }
 0x1fd   :  { %2479 = vmatpush1.bf16.msra.mxu1 %v7581_v51  ;;  %v7671_v51 = vld [vmem:[#allocation11 + $0x120] ss:$24 sps:$4 sm:$0xff]  }
 0x1fe   :  { %2520 = vmatpush1.bf16.msra.mxu0 %v7584_v29  ;;  %2480 = vmatprep.subr.bf16.mxu1 %v7589_v52  ;;  %v7679_v29 = vld [vmem:[#allocation11 + $0xf4] ss:$24 sps:$4 sm:$0xff]  }
 0x1ff   :  { %2521 = vmatprep.subr.bf16.mxu0 %v7592_v54  ;;  %v7653_v52 = vld [vmem:[#allocation8 + $0x700] ss:$24 sps:$4 sm:$0xff]  }
 0x201   :  { %2481 = vmatpush1.bf16.msra.mxu1 %v7587_v55  ;;  %v7658_v55 = vld [vmem:[#allocation8 + $0x6d4] ss:$24 sps:$4 sm:$0xff]  }
 0x202   :  { %2522 = vmatpush1.bf16.msra.mxu0 %v7590_v56  ;;  %2482 = vmatprep.subr.bf16.mxu1 %v7595_v57  ;;  %v7677_v56 = vld [vmem:[#allocation11 + $0xf0] ss:$24 sps:$4 sm:$0xff]   ;;  %v7685_v57 = vld [vmem:[#allocation11 + $0xc4] ss:$24 sps:$4 sm:$0xff]  }
 0x203   :  { %2523 = vmatprep.subr.bf16.mxu0 %v7598_v32  ;;  %v7656_v32 = vld [vmem:[#allocation8 + $0x6d0] ss:$24 sps:$4 sm:$0xff]  }
 0x205   :  { %2483 = vmatpush1.bf16.msra.mxu1 %v7593_v59  ;;  %v7661_v59 = vld [vmem:[#allocation8 + $0x6a4] ss:$24 sps:$4 sm:$0xff]  }
 0x206   :  { %2524 = vmatpush1.bf16.msra.mxu0 %v7596_v61  ;;  %2484 = vmatprep.subr.bf16.mxu1 %v7601_v62  ;;  %v7683_v61 = vld [vmem:[#allocation11 + $0xc0] ss:$24 sps:$4 sm:$0xff]   ;;  %v7691_v62 = vld [vmem:[#allocation11 + $0x94] ss:$24 sps:$4 sm:$0xff]  }
 0x207   :  { %2525 = vmatprep.subr.bf16.mxu0 %v7604_v53  ;;  %v7659_v53 = vld [vmem:[#allocation8 + $0x6a0] ss:$24 sps:$4 sm:$0xff]  }
 0x209   :  { %2485 = vmatpush2.bf16.msra.mxu1 %v7599_v1  ;;  %v7664_v1 = vld [vmem:[#allocation8 + $0x674] ss:$24 sps:$4 sm:$0xff]  }
 0x20a   :  { %2526 = vmatpush2.bf16.msra.mxu0 %v7602_v2  ;;  %2486 = vmatprep.subr.bf16.mxu1 %v7607_v3  ;;  %v7689_v2 = vld [vmem:[#allocation11 + $0x90] ss:$24 sps:$4 sm:$0xff]   ;;  %v7697_v3 = vld [vmem:[#allocation11 + $0x64] ss:$24 sps:$4 sm:$0xff]  }
 0x20b   :  { %2527 = vmatprep.subr.bf16.mxu0 %v7610_v4  ;;  %v7662_v4 = vld [vmem:[#allocation8 + $0x670] ss:$24 sps:$4 sm:$0xff]  }
 0x20d   :  { %2487 = vmatpush2.bf16.msra.mxu1 %v7605_v5  ;;  %v7670_v5 = vld [vmem:[#allocation8 + $0x644] ss:$24 sps:$4 sm:$0xff]  }
 0x20e   :  { %2528 = vmatpush2.bf16.msra.mxu0 %v7608_v6  ;;  %2488 = vmatprep.subr.bf16.mxu1 %v7613_v7  ;;  %v7695_v6 = vld [vmem:[#allocation11 + $0x60] ss:$24 sps:$4 sm:$0xff]   ;;  %v7703_v7 = vld [vmem:[#allocation11 + $0x34] ss:$24 sps:$4 sm:$0xff]  }
 0x20f   :  { %2529 = vmatprep.subr.bf16.mxu0 %v7616_v9  ;;  %v7668_v9 = vld [vmem:[#allocation8 + $0x640] ss:$24 sps:$4 sm:$0xff]  }
 0x211   :  { %2489 = vmatpush2.bf16.msra.mxu1 %v7611_v10  ;;  %v7676_v10 = vld [vmem:[#allocation8 + $0x614] ss:$24 sps:$4 sm:$0xff]  }
 0x212   :  { %2530 = vmatpush2.bf16.msra.mxu0 %v7614_v11  ;;  %2490 = vmatprep.subr.bf16.mxu1 %v7619_v12  ;;  %v7701_v11 = vld [vmem:[#allocation11 + $0x30] ss:$24 sps:$4 sm:$0xff]   ;;  %v7709_v12 = vld [vmem:[#allocation11 + $0x4] ss:$24 sps:$4 sm:$0xff]  }
 0x213   :  { %2531 = vmatprep.subr.bf16.mxu0 %v7622_v13  ;;  %v7674_v13 = vld [vmem:[#allocation8 + $0x610] ss:$24 sps:$4 sm:$0xff]  }
 0x215   :  { %2491 = vmatpush2.bf16.msra.mxu1 %v7617_v14  ;;  %v7682_v14 = vld [vmem:[#allocation8 + $0x8e4] ss:$24 sps:$4 sm:$0xff]  }
 0x216   :  { %2532 = vmatpush2.bf16.msra.mxu0 %v7620_v16  ;;  %2492 = vmatprep.subr.bf16.mxu1 %v7625_v17  ;;  %v7707_v16 = vld [vmem:[#allocation11] ss:$24 sps:$4 sm:$0xff]   ;;  %v7715_v17 = vld [vmem:[#allocation11 + $0x2d4] ss:$24 sps:$4 sm:$0xff]  }
 0x217   :  { %2533 = vmatprep.subr.bf16.mxu0 %v7628_v18  ;;  %v7680_v18 = vld [vmem:[#allocation8 + $0x8e0] ss:$24 sps:$4 sm:$0xff]  }
 0x219   :  { %2493 = vmatpush2.bf16.msra.mxu1 %v7623_v19  ;;  %v7688_v19 = vld [vmem:[#allocation8 + $0x8b4] ss:$24 sps:$4 sm:$0xff]  }
 0x21a   :  { %2534 = vmatpush2.bf16.msra.mxu0 %v7626_v20  ;;  %2494 = vmatprep.subr.bf16.mxu1 %v7631_v21  ;;  %v7713_v20 = vld [vmem:[#allocation11 + $0x2d0] ss:$24 sps:$4 sm:$0xff]   ;;  %v7721_v21 = vld [vmem:[#allocation11 + $0x2a4] ss:$24 sps:$4 sm:$0xff]  }
 0x21b   :  { %2535 = vmatprep.subr.bf16.mxu0 %v7634_v22  ;;  %v7686_v22 = vld [vmem:[#allocation8 + $0x8b0] ss:$24 sps:$4 sm:$0xff]  }
 0x21d   :  { %2495 = vmatpush2.bf16.msra.mxu1 %v7629_v23  ;;  %v7694_v23 = vld [vmem:[#allocation8 + $0x884] ss:$24 sps:$4 sm:$0xff]  }
 0x21e   :  { %2536 = vmatpush2.bf16.msra.mxu0 %v7632_v24  ;;  %2496 = vmatprep.subr.bf16.mxu1 %v7637_v25  ;;  %v7719_v24 = vld [vmem:[#allocation11 + $0x2a0] ss:$24 sps:$4 sm:$0xff]   ;;  %v7727_v25 = vld [vmem:[#allocation11 + $0x274] ss:$24 sps:$4 sm:$0xff]  }
 0x21f   :  { %2537 = vmatprep.subr.bf16.mxu0 %v7640_v26  ;;  %v7692_v26 = vld [vmem:[#allocation8 + $0x880] ss:$24 sps:$4 sm:$0xff]  }
 0x221   :  { %2497 = vmatpush2.bf16.msra.mxu1 %v7635_v27  ;;  %v7700_v27 = vld [vmem:[#allocation8 + $0x854] ss:$24 sps:$4 sm:$0xff]  }
 0x222   :  { %2538 = vmatpush2.bf16.msra.mxu0 %v7638_v28  ;;  %2498 = vmatprep.subr.bf16.mxu1 %v7643_v35  ;;  %v7725_v28 = vld [vmem:[#allocation11 + $0x270] ss:$24 sps:$4 sm:$0xff]   ;;  %v7730_v35 = vld [vmem:[#allocation11 + $0x244] ss:$24 sps:$4 sm:$0xff]  }
 0x223   :  { %2539 = vmatprep.subr.bf16.mxu0 %v7646_v36  ;;  %v7698_v36 = vld [vmem:[#allocation8 + $0x850] ss:$24 sps:$4 sm:$0xff]  }
 0x225   :  { %2499 = vmatpush2.bf16.msra.mxu1 %v7641_v37  ;;  %v7706_v37 = vld [vmem:[#allocation8 + $0x824] ss:$24 sps:$4 sm:$0xff]  }
 0x226   :  { %2540 = vmatpush2.bf16.msra.mxu0 %v7644_v38  ;;  %2550 = vmatprep.subr.bf16.mxu1 %v7649_v39  ;;  %v7728_v38 = vld [vmem:[#allocation11 + $0x240] ss:$24 sps:$4 sm:$0xff]   ;;  %v7733_v39 = vld [vmem:[#allocation11 + $0x214] ss:$24 sps:$4 sm:$0xff]  }
 0x227   :  { %4363 = vmatprep.subr.bf16.mxu0 %v7667_v40  ;;  %v7704_v40 = vld [vmem:[#allocation8 + $0x820] ss:$24 sps:$4 sm:$0xff]  }
 0x228   :  { %2501 = vmatmul.mubr.bf16.vlgmr.msra.gmra.mxu1 %v8861_v58  ;;  %v8894_v45 = vpop.f32.mrf.mxu1 }
 0x229   :  { %2542 = vmatmul.mubr.bf16.vlgmr.msra.gmra.mxu0 %v8863_v60  ;;  %2551 = vmatpush1.bf16.msra.mxu1 %v7647_v42  ;;  %v8897_v47 = vpop.f32.mrf.mxu0  ;;  %v7712_v42 = vld [vmem:[#allocation8 + $0x7f4] ss:$24 sps:$4 sm:$0xff]  }
 0x22a   :  { %2582 = vmatprep.mubr.bf16.mxu1 %v8874_v8  ;;  %v8900_v0 = vpop.f32.mrf.mxu1  ;;  %2552 = vmatprep.subr.bf16.mxu1 %v7652_v43  ;;  %v7731_v43 = vld [vmem:[#allocation11 + $0x210] ss:$24 sps:$4 sm:$0xff]  }
 0x22b   :  { %v8902_v50 = vpop.f32.mrf.mxu0  ;;  %4364 = vmatpush1.bf16.msra.mxu0 %v7665_v44  ;;  %v7736_v44 = vld [vmem:[#allocation11 + $0x1e4] ss:$24 sps:$4 sm:$0xff]  }
 0x22c   :  { %v2260_v58 = vpop.f32.mrf.mxu1  ;;  %4365 = vmatprep.subr.bf16.mxu0 %v7673_v46  ;;  %v7710_v46 = vld [vmem:[#allocation8 + $0x7f0] ss:$24 sps:$4 sm:$0xff]  }
 0x22d   :  { %2553 = vmatpush1.bf16.msra.mxu1 %v7650_v63  ;;  %v2301_v60 = vpop.f32.mrf.mxu0  ;;  %v7718_v63 = vld [vmem:[#allocation8 + $0x7c4] ss:$24 sps:$4 sm:$0xff]  }
 0x22e   :  { %v2261_v54 = vpop.f32.mrf.mxu1  ;;  %2554 = vmatprep.subr.bf16.mxu1 %v7655_v48  ;;  %v7734_v48 = vld [vmem:[#allocation11 + $0x1e0] ss:$24 sps:$4 sm:$0xff]   ;;  %v7739_v58 = vld [vmem:[#allocation11 + $0x1b4] ss:$24 sps:$4 sm:$0xff]  }
 0x22f   :  { %4366 = vmatpush1.bf16.msra.mxu0 %v7671_v51  ;;  %v2302_v8 = vpop.f32.mrf.mxu0  ;;  %v8904_v51 = vld [vmem:[#allocation10] sm:$0x3f]  ;;  %v7737_v54 = vld [vmem:[#allocation11 + $0x1b0] ss:$24 sps:$4 sm:$0xff]  }
 0x230   :  { %4367 = vmatprep.subr.bf16.mxu0 %v7679_v29  ;;  %v7716_v29 = vld [vmem:[#allocation8 + $0x7c0] ss:$24 sps:$4 sm:$0xff]   ;;  %v755_v60 = vrot.slane %v8904_v51, %v8833_v30  ;;  %v7722_v8 = vld [vmem:[#allocation8 + $0x790] ss:$24 sps:$4 sm:$0xff]  }
 0x231   :  { %2555 = vmatpush1.bf16.msra.mxu1 %v7653_v52  ;;  %v7724_v52 = vld [vmem:[#allocation8 + $0x794] ss:$24 sps:$4 sm:$0xff]  }
 0x232   :  { %2556 = vmatprep.subr.bf16.mxu1 %v7658_v55  ;;  %v7742_v55 = vld [vmem:[#allocation11 + $0x184] ss:$24 sps:$4 sm:$0xff]  }
 0x233   :  { %4368 = vmatpush1.bf16.msra.mxu0 %v7677_v56  ;;  %v759_v56 = vrot.slane %v8904_v51, %v8841_v33 }
 0x234   :  { %4369 = vmatprep.subr.bf16.mxu0 %v7685_v57  ;;  %v7745_v57 = vld [vmem:[#allocation11 + $0x454] ss:$24 sps:$4 sm:$0xff]  }
 0x235   :  { %2557 = vmatpush1.bf16.msra.mxu1 %v7656_v32  ;;  %v2257_v32 = vadd.f32 %v8894_v45, %v755_v60  ;;  %v7746_v45 = vld [vmem:[#allocation11 + $0x420] ss:$24 sps:$4 sm:$0xff]  }
 0x236   :  { %2558 = vmatprep.subr.bf16.mxu1 %v7661_v59  ;;  %v7740_v59 = vld [vmem:[#allocation11 + $0x180] ss:$24 sps:$4 sm:$0xff]  }
 0x237   :  { %4370 = vmatpush1.bf16.msra.mxu0 %v7683_v61  ;;  %v2259_v61 = vadd.f32 %v8900_v0, %v759_v56  ;;  %v7751_v0 = vld [vmem:[#allocation11 + $0x3f4] ss:$24 sps:$4 sm:$0xff]   ;;  %v7776_v60 = vld [vmem:[#allocation11 + $0x540] ss:$24 sps:$4 sm:$0xff]   ;;  %v7871_v56 = vld [vmem:[#allocation11 + $0x664] ss:$24 sps:$4 sm:$0xff]  }
 0x238   :  { %4371 = vmatprep.subr.bf16.mxu0 %v7691_v62  ;;  %v7743_v62 = vld [vmem:[#allocation11 + $0x450] ss:$24 sps:$4 sm:$0xff]  }
 0x239   :  { %2559 = vmatpush1.bf16.msra.mxu1 %v7659_v53  ;;  %v7748_v53 = vld [vmem:[#allocation11 + $0x424] ss:$24 sps:$4 sm:$0xff]  }
 0x23a   :  { %2560 = vmatprep.subr.bf16.mxu1 %v7664_v1  ;;  %v2298_v1 = vadd.f32 %v8897_v47, %v2257_v32  ;;  %v7875_v32 = vld [vmem:[#allocation11 + $0x630] ss:$24 sps:$4 sm:$0xff]  }
 0x23b   :  { %4372 = vmatpush1.bf16.msra.mxu0 %v7689_v2 }
 0x23c   :  { %4373 = vmatprep.subr.bf16.mxu0 %v7697_v3  ;;  %v2300_v3 = vadd.f32 %v8902_v50, %v2259_v61  ;;  %v7754_v50 = vld [vmem:[#allocation11 + $0x3c4] ss:$24 sps:$4 sm:$0xff]   ;;  %v7782_v61 = vld [vmem:[#allocation11 + $0x4e0] ss:$24 sps:$4 sm:$0xff]  }
 0x23d   :  { %2561 = vmatpush1.bf16.msra.mxu1 %v7662_v4 }
 0x23e   :  { %2562 = vmatprep.subr.bf16.mxu1 %v7670_v5 }
 0x23f   :  { %4374 = vmatpush1.bf16.msra.mxu0 %v7695_v6 }
 0x240   :  { %4375 = vmatprep.subr.bf16.mxu0 %v7703_v7 }
 0x241   :  { %2563 = vmatpush1.bf16.msra.mxu1 %v7668_v9 }
 0x242   :  { %2564 = vmatprep.subr.bf16.mxu1 %v7676_v10 }
 0x243   :  { %4376 = vmatpush1.bf16.msra.mxu0 %v7701_v11 }
 0x244   :  { %4377 = vmatprep.subr.bf16.mxu0 %v7709_v12 }
 0x245   :  { %2565 = vmatpush1.bf16.msra.mxu1 %v7674_v13  ;;  %v7749_v13 = vld [vmem:[#allocation11 + $0x3f0] ss:$24 sps:$4 sm:$0xff]  }
 0x246   :  { %2566 = vmatprep.subr.bf16.mxu1 %v7682_v14 }
 0x247   :  { %4378 = vmatpush1.bf16.msra.mxu0 %v7707_v16  ;;  %v7752_v16 = vld [vmem:[#allocation11 + $0x3c0] ss:$24 sps:$4 sm:$0xff]  }
 0x248   :  { %4379 = vmatprep.subr.bf16.mxu0 %v7715_v17  ;;  %v7757_v17 = vld [vmem:[#allocation11 + $0x394] ss:$24 sps:$4 sm:$0xff]  }
 0x249   :  { %2567 = vmatpush2.bf16.msra.mxu1 %v7680_v18  ;;  %v7755_v18 = vld [vmem:[#allocation11 + $0x390] ss:$24 sps:$4 sm:$0xff]  }
 0x24a   :  { %2568 = vmatprep.subr.bf16.mxu1 %v7688_v19  ;;  %v7760_v19 = vld [vmem:[#allocation11 + $0x364] ss:$24 sps:$4 sm:$0xff]  }
 0x24b   :  { %4380 = vmatpush2.bf16.msra.mxu0 %v7713_v20  ;;  %v7758_v20 = vld [vmem:[#allocation11 + $0x360] ss:$24 sps:$4 sm:$0xff]  }
 0x24c   :  { %4381 = vmatprep.subr.bf16.mxu0 %v7721_v21  ;;  %v7763_v21 = vld [vmem:[#allocation11 + $0x334] ss:$24 sps:$4 sm:$0xff]  }
 0x24d   :  { %2569 = vmatpush2.bf16.msra.mxu1 %v7686_v22 }
 0x24e   :  { %2570 = vmatprep.subr.bf16.mxu1 %v7694_v23  ;;  %v7761_v23 = vld [vmem:[#allocation11 + $0x330] ss:$24 sps:$4 sm:$0xff]  }
 0x24f   :  { %4382 = vmatpush2.bf16.msra.mxu0 %v7719_v24 }
 0x250   :  { %4383 = vmatprep.subr.bf16.mxu0 %v7727_v25  ;;  %v7766_v25 = vld [vmem:[#allocation11 + $0x304] ss:$24 sps:$4 sm:$0xff]  }
 0x251   :  { %2571 = vmatpush2.bf16.msra.mxu1 %v7692_v26  ;;  %v7839_v26 = vld [vmem:[#allocation11 + $0x750] ss:$24 sps:$4 sm:$0xff]  }
 0x252   :  { %2572 = vmatprep.subr.bf16.mxu1 %v7700_v27  ;;  %v7841_v27 = vld [vmem:[#allocation11 + $0x754] ss:$24 sps:$4 sm:$0xff]  }
 0x253   :  { %4384 = vmatpush2.bf16.msra.mxu0 %v7725_v28  ;;  %v7764_v28 = vld [vmem:[#allocation11 + $0x300] ss:$24 sps:$4 sm:$0xff]  }
 0x254   :  { %4385 = vmatprep.subr.bf16.mxu0 %v7730_v35  ;;  %v7769_v35 = vld [vmem:[#allocation11 + $0x5d4] ss:$24 sps:$4 sm:$0xff]  }
 0x255   :  { %2573 = vmatpush2.bf16.msra.mxu1 %v7698_v36  ;;  %v7845_v36 = vld [vmem:[#allocation11 + $0x720] ss:$24 sps:$4 sm:$0xff]  }
 0x256   :  { %2574 = vmatprep.subr.bf16.mxu1 %v7706_v37  ;;  %v7847_v37 = vld [vmem:[#allocation11 + $0x724] ss:$24 sps:$4 sm:$0xff]  }
 0x257   :  { %4386 = vmatpush2.bf16.msra.mxu0 %v7728_v38  ;;  %v7767_v38 = vld [vmem:[#allocation11 + $0x5d0] ss:$24 sps:$4 sm:$0xff]  }
 0x258   :  { %4387 = vmatprep.subr.bf16.mxu0 %v7733_v39  ;;  %v7772_v39 = vld [vmem:[#allocation11 + $0x5a4] ss:$24 sps:$4 sm:$0xff]  }
 0x259   :  { %2575 = vmatpush2.bf16.msra.mxu1 %v7704_v40  ;;  %v7851_v40 = vld [vmem:[#allocation11 + $0x6f0] ss:$24 sps:$4 sm:$0xff]  }
 0x25a   :  { %2576 = vmatprep.subr.bf16.mxu1 %v7712_v42  ;;  %v7853_v42 = vld [vmem:[#allocation11 + $0x6f4] ss:$24 sps:$4 sm:$0xff]  }
 0x25b   :  { %4388 = vmatpush2.bf16.msra.mxu0 %v7731_v43  ;;  %v7770_v43 = vld [vmem:[#allocation11 + $0x5a0] ss:$24 sps:$4 sm:$0xff]  }
 0x25c   :  { %4389 = vmatprep.subr.bf16.mxu0 %v7736_v44  ;;  %v7775_v44 = vld [vmem:[#allocation11 + $0x574] ss:$24 sps:$4 sm:$0xff]  }
 0x25d   :  { %2577 = vmatpush2.bf16.msra.mxu1 %v7710_v46  ;;  %v7857_v46 = vld [vmem:[#allocation11 + $0x6c0] ss:$24 sps:$4 sm:$0xff]  }
 0x25e   :  { %2578 = vmatprep.subr.bf16.mxu1 %v7718_v63  ;;  %v7859_v63 = vld [vmem:[#allocation11 + $0x6c4] ss:$24 sps:$4 sm:$0xff]  }
 0x25f   :  { %4390 = vmatpush2.bf16.msra.mxu0 %v7734_v48  ;;  %v7773_v48 = vld [vmem:[#allocation11 + $0x570] ss:$24 sps:$4 sm:$0xff]  }
 0x260   :  { %4391 = vmatprep.subr.bf16.mxu0 %v7739_v58  ;;  %v7778_v58 = vld [vmem:[#allocation11 + $0x544] ss:$24 sps:$4 sm:$0xff]  }
 0x261   :  { %2579 = vmatpush2.bf16.msra.mxu1 %v7716_v29  ;;  %v7863_v29 = vld [vmem:[#allocation11 + $0x690] ss:$24 sps:$4 sm:$0xff]  }
 0x262   :  { %2580 = vmatprep.subr.bf16.mxu1 %v7724_v52  ;;  %v7865_v52 = vld [vmem:[#allocation11 + $0x694] ss:$24 sps:$4 sm:$0xff]  }
 0x263   :  { %4392 = vmatpush2.bf16.msra.mxu0 %v7737_v54  ;;  %v7781_v54 = vld [vmem:[#allocation11 + $0x514] ss:$24 sps:$4 sm:$0xff]  }
 0x264   :  { %4393 = vmatprep.subr.bf16.mxu0 %v7742_v55  ;;  %v7869_v55 = vld [vmem:[#allocation11 + $0x660] ss:$24 sps:$4 sm:$0xff]  }
 0x265   :  { %2581 = vmatpush2.bf16.msra.mxu1 %v7722_v8  ;;  %v7779_v8 = vld [vmem:[#allocation11 + $0x510] ss:$24 sps:$4 sm:$0xff]  }
 0x266   :  { %4404 = vmatprep.subr.bf16.mxu1 %v7745_v57  ;;  %v7784_v57 = vld [vmem:[#allocation11 + $0x4e4] ss:$24 sps:$4 sm:$0xff]  }
 0x267   :  { %4394 = vmatpush2.bf16.msra.mxu0 %v7740_v59  ;;  %v7877_v59 = vld [vmem:[#allocation11 + $0x634] ss:$24 sps:$4 sm:$0xff]  }
 0x268   :  { %v2338_v2 = vpop.f32.mrf.mxu1  ;;  %2583 = vmatmul.mubr.bf16.vlgmr.msra.gmra.mxu1 %v8883_v15  ;;  %4445 = vmatprep.subr.bf16.mxu0 %v7841_v27 }
 0x269   :  { %v2339_v4 = vadd.f32 %v2338_v2, %v2298_v1  ;;  %v8915_v5 = vpop.f32.mrf.mxu0  ;;  %4405 = vmatpush1.bf16.msra.mxu1 %v7743_v62  ;;  %v7787_v62 = vld [vmem:[#allocation11 + $0x4b4] ss:$24 sps:$4 sm:$0xff]   ;;  %v7883_v1 = vld [vmem:[#allocation11 + $0x604] ss:$24 sps:$4 sm:$0xff]   ;;  %v7785_v2 = vld [vmem:[#allocation11 + $0x4b0] ss:$24 sps:$4 sm:$0xff]  }
 0x26a   :  { %v2340_v6 = vpop.f32.mrf.mxu1  ;;  %4406 = vmatprep.subr.bf16.mxu1 %v7748_v53  ;;  %v7881_v53 = vld [vmem:[#allocation11 + $0x600] ss:$24 sps:$4 sm:$0xff]  }
 0x26b   :  { %v2341_v7 = vadd.f32 %v2340_v6, %v2300_v3  ;;  %v8917_v9 = vpop.f32.mrf.mxu0  ;;  %v2591_v10 = vpack.c.bf16 %v2339_v4, %v2339_v4  ;;  %v7790_v3 = vld [vmem:[#allocation11 + $0x484] ss:$24 sps:$4 sm:$0xff]   ;;  %v7887_v4 = vld [vmem:[#allocation11 + $0x8d0] ss:$24 sps:$4 sm:$0xff]   ;;  %v7788_v6 = vld [vmem:[#allocation11 + $0x480] ss:$24 sps:$4 sm:$0xff]  }
 0x26c   :  { %v2342_v11 = vpop.f32.mrf.mxu1 }
 0x26d   :  { %v2592_v47 = vpack.c.bf16 %v2341_v7, %v2341_v7  ;;  %v2383_v12 = vpop.f32.mrf.mxu0  ;;  %4407 = vmatpush1.bf16.msra.mxu1 %v7746_v45  ;;  %v7889_v45 = vld [vmem:[#allocation11 + $0x8d4] ss:$24 sps:$4 sm:$0xff]   ;;  %v7893_v7 = vld [vmem:[#allocation11 + $0x8a0] ss:$24 sps:$4 sm:$0xff]   ;;  %v763_v11 = vrot.slane %v8904_v51, %v8836_v31 }
 0x26e   :  { %v2343_v15 = vpop.f32.mrf.mxu1  ;;  %4408 = vmatprep.subr.bf16.mxu1 %v7751_v0  ;;  %v7793_v0 = vld [vmem:[#allocation11 + $0x15c] ss:$24 sps:$4 sm:$0xff]   ;;  %v7899_v12 = vld [vmem:[#allocation11 + $0x870] ss:$24 sps:$4 sm:$0xff]  }
 0x26f   :  { %8427 = vtanh.bf16 %v2592_v47  ;;  %v2384_v14 = vpop.f32.mrf.mxu0  ;;  %v767_v47 = vrot.slane %v8904_v51, %v8844_v34  ;;  %v2380_v15 = vadd.f32 %v8915_v5, %v763_v11 }
 0x270   :  { %8429 = vtanh.bf16 %v2591_v10  ;;  %v7895_v10 = vld [vmem:[#allocation11 + $0x8a4] ss:$24 sps:$4 sm:$0xff]  }
 0x271   :  { %4409 = vmatpush1.bf16.msra.mxu1 %v7749_v13  ;;  %v7901_v13 = vld [vmem:[#allocation11 + $0x874] ss:$24 sps:$4 sm:$0xff]   ;;  %v2382_v14 = vadd.f32 %v8917_v9, %v767_v47  ;;  %v7911_v9 = vld [vmem:[#allocation11 + $0x810] ss:$24 sps:$4 sm:$0xff]  }
 0x272   :  { %4410 = vmatprep.subr.bf16.mxu1 %v7754_v50 }
 0x275   :  { %4411 = vmatpush1.bf16.msra.mxu1 %v7752_v16 }
 0x276   :  { %4412 = vmatprep.subr.bf16.mxu1 %v7757_v17 }
 0x279   :  { %4413 = vmatpush1.bf16.msra.mxu1 %v7755_v18 }
 0x27a   :  { %4414 = vmatprep.subr.bf16.mxu1 %v7760_v19  ;;  %v7907_v19 = vld [vmem:[#allocation11 + $0x844] ss:$24 sps:$4 sm:$0xff]  }
 0x27d   :  { %v8919_v22 = vpop.eup %8427  ;;  %4415 = vmatpush1.bf16.msra.mxu1 %v7758_v20 }
 0x27e   :  { %v8921_v24 = vpop.eup %8429  ;;  %4395 = vmatprep.mubr.bf16.mxu0 %v8919_v22  ;;  %4416 = vmatprep.subr.bf16.mxu1 %v7763_v21 }
 0x27f   :  { %4396 = vmatmul.mubr.bf16.vlgmr.msra.gmra.mxu0 %v8921_v24 }
 0x280   :  { %4446 = vmatpush1.bf16.msra.mxu0 %v7839_v26 }
 0x281   :  { %4417 = vmatpush1.bf16.msra.mxu1 %v7761_v23  ;;  %4447 = vmatprep.subr.bf16.mxu0 %v7847_v37 }
 0x282   :  { %4418 = vmatprep.subr.bf16.mxu1 %v7766_v25  ;;  %v7905_v25 = vld [vmem:[#allocation11 + $0x840] ss:$24 sps:$4 sm:$0xff]  }
 0x284   :  { %4448 = vmatpush1.bf16.msra.mxu0 %v7845_v36  ;;  %v7913_v36 = vld [vmem:[#allocation11 + $0x814] ss:$24 sps:$4 sm:$0xff]  }
 0x285   :  { %4419 = vmatpush1.bf16.msra.mxu1 %v7764_v28  ;;  %4449 = vmatprep.subr.bf16.mxu0 %v7853_v42  ;;  %v7923_v42 = vld [vmem:[#allocation11 + $0x7b0] ss:$24 sps:$4 sm:$0xff]  }
 0x286   :  { %4420 = vmatprep.subr.bf16.mxu1 %v7769_v35 }
 0x288   :  { %4450 = vmatpush1.bf16.msra.mxu0 %v7851_v40  ;;  %v7919_v40 = vld [vmem:[#allocation11 + $0x7e4] ss:$24 sps:$4 sm:$0xff]  }
 0x289   :  { %4421 = vmatpush2.bf16.msra.mxu1 %v7767_v38  ;;  %4451 = vmatprep.subr.bf16.mxu0 %v7859_v63  ;;  %v7791_v63 = vld [vmem:[#allocation11 + $0x158] ss:$24 sps:$4 sm:$0xff]  }
 0x28a   :  { %4422 = vmatprep.subr.bf16.mxu1 %v7772_v39  ;;  %v7917_v39 = vld [vmem:[#allocation11 + $0x7e0] ss:$24 sps:$4 sm:$0xff]  }
 0x28c   :  { %4452 = vmatpush1.bf16.msra.mxu0 %v7857_v46  ;;  %v7931_v46 = vld [vmem:[#allocation11 + $0x784] ss:$24 sps:$4 sm:$0xff]  }
 0x28d   :  { %4423 = vmatpush2.bf16.msra.mxu1 %v7770_v43  ;;  %4453 = vmatprep.subr.bf16.mxu0 %v7865_v52  ;;  %v7925_v43 = vld [vmem:[#allocation11 + $0x7b4] ss:$24 sps:$4 sm:$0xff]  }
 0x28e   :  { %4424 = vmatprep.subr.bf16.mxu1 %v7775_v44  ;;  %v7929_v44 = vld [vmem:[#allocation11 + $0x780] ss:$24 sps:$4 sm:$0xff]  }
 0x290   :  { %4454 = vmatpush1.bf16.msra.mxu0 %v7863_v29  ;;  %v7796_v29 = vld [vmem:[#allocation11 + $0x12c] ss:$24 sps:$4 sm:$0xff]  }
 0x291   :  { %4425 = vmatpush2.bf16.msra.mxu1 %v7773_v48  ;;  %4455 = vmatprep.subr.bf16.mxu0 %v7871_v56  ;;  %v7937_v48 = vld [vmem:[#allocation11 + $0x45c] ss:$24 sps:$4 sm:$0xff]   ;;  %v7802_v56 = vld [vmem:[#allocation11 + $0xcc] ss:$24 sps:$4 sm:$0xff]  }
 0x292   :  { %4426 = vmatprep.subr.bf16.mxu1 %v7778_v58 }
 0x294   :  { %4456 = vmatpush1.bf16.msra.mxu0 %v7869_v55  ;;  %v7797_v55 = vld [vmem:[#allocation11 + $0xf8] ss:$24 sps:$4 sm:$0xff]  }
 0x295   :  { %4427 = vmatpush2.bf16.msra.mxu1 %v7776_v60  ;;  %4457 = vmatprep.subr.bf16.mxu0 %v7877_v59  ;;  %v7794_v60 = vld [vmem:[#allocation11 + $0x128] ss:$24 sps:$4 sm:$0xff]   ;;  %v7808_v59 = vld [vmem:[#allocation11 + $0x6c] ss:$24 sps:$4 sm:$0xff]  }
 0x296   :  { %4428 = vmatprep.subr.bf16.mxu1 %v7781_v54  ;;  %v7799_v54 = vld [vmem:[#allocation11 + $0xfc] ss:$24 sps:$4 sm:$0xff]  }
 0x298   :  { %4458 = vmatpush1.bf16.msra.mxu0 %v7875_v32  ;;  %v7803_v32 = vld [vmem:[#allocation11 + $0x98] ss:$24 sps:$4 sm:$0xff]  }
 0x299   :  { %4429 = vmatpush2.bf16.msra.mxu1 %v7779_v8  ;;  %4459 = vmatprep.subr.bf16.mxu0 %v7883_v1  ;;  %v7800_v8 = vld [vmem:[#allocation11 + $0xc8] ss:$24 sps:$4 sm:$0xff]   ;;  %v7814_v1 = vld [vmem:[#allocation11 + $0xc] ss:$24 sps:$4 sm:$0xff]  }
 0x29a   :  { %4430 = vmatprep.subr.bf16.mxu1 %v7784_v57  ;;  %v7805_v57 = vld [vmem:[#allocation11 + $0x9c] ss:$24 sps:$4 sm:$0xff]  }
 0x29c   :  { %4460 = vmatpush1.bf16.msra.mxu0 %v7881_v53  ;;  %v7809_v53 = vld [vmem:[#allocation11 + $0x38] ss:$24 sps:$4 sm:$0xff]  }
 0x29d   :  { %4431 = vmatpush2.bf16.msra.mxu1 %v7782_v61  ;;  %4461 = vmatprep.subr.bf16.mxu0 %v7889_v45  ;;  %v7806_v61 = vld [vmem:[#allocation11 + $0x68] ss:$24 sps:$4 sm:$0xff]   ;;  %v7820_v45 = vld [vmem:[#allocation11 + $0x2ac] ss:$24 sps:$4 sm:$0xff]  }
 0x29e   :  { %4432 = vmatprep.subr.bf16.mxu1 %v7787_v62  ;;  %v7811_v62 = vld [vmem:[#allocation11 + $0x3c] ss:$24 sps:$4 sm:$0xff]  }
 0x2a0   :  { %4462 = vmatpush2.bf16.msra.mxu0 %v7887_v4  ;;  %v7815_v4 = vld [vmem:[#allocation11 + $0x2d8] ss:$24 sps:$4 sm:$0xff]  }
 0x2a1   :  { %4433 = vmatpush2.bf16.msra.mxu1 %v7785_v2  ;;  %4463 = vmatprep.subr.bf16.mxu0 %v7895_v10  ;;  %v7812_v2 = vld [vmem:[#allocation11 + $0x8] ss:$24 sps:$4 sm:$0xff]   ;;  %v7826_v10 = vld [vmem:[#allocation11 + $0x24c] ss:$24 sps:$4 sm:$0xff]  }
 0x2a2   :  { %4434 = vmatprep.subr.bf16.mxu1 %v7790_v3  ;;  %v7817_v3 = vld [vmem:[#allocation11 + $0x2dc] ss:$24 sps:$4 sm:$0xff]  }
 0x2a4   :  { %4464 = vmatpush2.bf16.msra.mxu0 %v7893_v7  ;;  %v7821_v7 = vld [vmem:[#allocation11 + $0x278] ss:$24 sps:$4 sm:$0xff]  }
 0x2a5   :  { %4435 = vmatpush2.bf16.msra.mxu1 %v7788_v6  ;;  %4465 = vmatprep.subr.bf16.mxu0 %v7901_v13  ;;  %v7818_v6 = vld [vmem:[#allocation11 + $0x2a8] ss:$24 sps:$4 sm:$0xff]  }
 0x2a6   :  { %4486 = vmatprep.subr.bf16.mxu1 %v7793_v0  ;;  %v7823_v0 = vld [vmem:[#allocation11 + $0x27c] ss:$24 sps:$4 sm:$0xff]   ;;  %v7824_v13 = vld [vmem:[#allocation11 + $0x248] ss:$24 sps:$4 sm:$0xff]  }
 0x2a8   :  { %v2420_v50 = vpop.f32.mrf.mxu1  ;;  %4466 = vmatpush2.bf16.msra.mxu0 %v7899_v12 }
 0x2a9   :  { %v2421_v16 = vadd.f32 %v2420_v50, %v2380_v15  ;;  %v2461_v17 = vpop.f32.mrf.mxu0  ;;  %4467 = vmatprep.subr.bf16.mxu0 %v7907_v19  ;;  %v7829_v50 = vld [vmem:[#allocation11 + $0x21c] ss:$24 sps:$4 sm:$0xff]  }
 0x2aa   :  { %v2422_v18 = vpop.f32.mrf.mxu1 }
 0x2ab   :  { %v2462_v20 = vadd.f32 %v2461_v17, %v2421_v16  ;;  %v2423_v21 = vadd.f32 %v2422_v18, %v2382_v14  ;;  %v2463_v23 = vpop.f32.mrf.mxu0  ;;  %v7827_v18 = vld [vmem:[#allocation11 + $0x218] ss:$24 sps:$4 sm:$0xff]  }
 0x2ac   :  { %v2424_v26 = vpop.f32.mrf.mxu1  ;;  %4468 = vmatpush2.bf16.msra.mxu0 %v7905_v25  ;;  %v7833_v25 = vld [vmem:[#allocation11 + $0x1b8] ss:$24 sps:$4 sm:$0xff]  }
 0x2ad   :  { %v2464_v27 = vadd.f32 %v2463_v23, %v2423_v21  ;;  %v2465_v28 = vpop.f32.mrf.mxu0  ;;  %v2593_v35 = vpack.c.bf16 %v2462_v20, %v2462_v20  ;;  %4469 = vmatprep.subr.bf16.mxu0 %v7913_v36  ;;  %v7832_v20 = vld [vmem:[#allocation11 + $0x1ec] ss:$24 sps:$4 sm:$0xff]   ;;  %v7830_v21 = vld [vmem:[#allocation11 + $0x1e8] ss:$24 sps:$4 sm:$0xff]   ;;  %v7835_v23 = vld [vmem:[#allocation11 + $0x1bc] ss:$24 sps:$4 sm:$0xff]  }
 0x2ae   :  { %v2425_v5 = vpop.f32.mrf.mxu1  ;;  %v7838_v26 = vld [vmem:[#allocation11 + $0x18c] ss:$24 sps:$4 sm:$0xff]   ;;  %v7844_v28 = vld [vmem:[#allocation11 + $0x75c] ss:$24 sps:$4 sm:$0xff]   ;;  %v7848_v36 = vld [vmem:[#allocation11 + $0x728] ss:$24 sps:$4 sm:$0xff]  }
 0x2af   :  { %v2594_v37 = vpack.c.bf16 %v2464_v27, %v2464_v27  ;;  %v2466_v38 = vpop.f32.mrf.mxu0  ;;  %v7836_v27 = vld [vmem:[#allocation11 + $0x188] ss:$24 sps:$4 sm:$0xff]   ;;  %v7850_v5 = vld [vmem:[#allocation11 + $0x72c] ss:$24 sps:$4 sm:$0xff]  }
 0x2b0   :  { %4470 = vmatpush2.bf16.msra.mxu0 %v7911_v9  ;;  %v7854_v38 = vld [vmem:[#allocation11 + $0x6f8] ss:$24 sps:$4 sm:$0xff]   ;;  %v7862_v9 = vld [vmem:[#allocation11 + $0x6cc] ss:$24 sps:$4 sm:$0xff]  }
 0x2b1   :  { %8431 = vtanh.bf16 %v2594_v37  ;;  %4471 = vmatprep.subr.bf16.mxu0 %v7919_v40  ;;  %v7856_v37 = vld [vmem:[#allocation11 + $0x6fc] ss:$24 sps:$4 sm:$0xff]  }
 0x2b2   :  { %8433 = vtanh.bf16 %v2593_v35  ;;  %v7842_v35 = vld [vmem:[#allocation11 + $0x758] ss:$24 sps:$4 sm:$0xff]   ;;  %v7868_v40 = vld [vmem:[#allocation11 + $0x69c] ss:$24 sps:$4 sm:$0xff]  }
 0x2b4   :  { %4472 = vmatpush2.bf16.msra.mxu0 %v7917_v39  ;;  %v7860_v39 = vld [vmem:[#allocation11 + $0x6c8] ss:$24 sps:$4 sm:$0xff]  }
 0x2b5   :  { %4473 = vmatprep.subr.bf16.mxu0 %v7925_v43  ;;  %v7874_v43 = vld [vmem:[#allocation11 + $0x66c] ss:$24 sps:$4 sm:$0xff]  }
 0x2b8   :  { %4474 = vmatpush2.bf16.msra.mxu0 %v7923_v42  ;;  %v7866_v42 = vld [vmem:[#allocation11 + $0x698] ss:$24 sps:$4 sm:$0xff]  }
 0x2b9   :  { %4475 = vmatprep.subr.bf16.mxu0 %v7931_v46  ;;  %v7880_v46 = vld [vmem:[#allocation11 + $0x63c] ss:$24 sps:$4 sm:$0xff]  }
 0x2bc   :  { %4476 = vmatpush2.bf16.msra.mxu0 %v7929_v44  ;;  %v7872_v44 = vld [vmem:[#allocation11 + $0x668] ss:$24 sps:$4 sm:$0xff]  }
 0x2bd   :  { %4527 = vmatprep.subr.bf16.mxu0 %v7937_v48  ;;  %v7886_v48 = vld [vmem:[#allocation11 + $0x60c] ss:$24 sps:$4 sm:$0xff]  }
 0x2bf   :  { %v8931_v58 = vpop.eup %8431 }
 0x2c0   :  { %v8933_v52 = vpop.eup %8433  ;;  %4436 = vmatprep.mubr.bf16.mxu1 %v8931_v58 }
 0x2c1   :  { %4437 = vmatmul.mubr.bf16.vlgmr.msra.gmra.mxu1 %v8933_v52 }
 0x2c2   :  { %4487 = vmatpush1.bf16.msra.mxu1 %v7791_v63  ;;  %4518 = vmatprep.mubr.bf16.mxu1 %v8919_v22  ;;  %v7878_v63 = vld [vmem:[#allocation11 + $0x638] ss:$24 sps:$4 sm:$0xff]  }
 0x2c3   :  { %4488 = vmatprep.subr.bf16.mxu1 %v7796_v29  ;;  %v7884_v29 = vld [vmem:[#allocation11 + $0x608] ss:$24 sps:$4 sm:$0xff]  }
 0x2c6   :  { %4489 = vmatpush1.bf16.msra.mxu1 %v7794_v60  ;;  %v7892_v60 = vld [vmem:[#allocation11 + $0x8dc] ss:$24 sps:$4 sm:$0xff]  }
 0x2c7   :  { %4490 = vmatprep.subr.bf16.mxu1 %v7799_v54  ;;  %v7890_v54 = vld [vmem:[#allocation11 + $0x8d8] ss:$24 sps:$4 sm:$0xff]  }
 0x2ca   :  { %4491 = vmatpush1.bf16.msra.mxu1 %v7797_v55  ;;  %v771_v55 = vrot.slane %v8904_v51, %v8878_v41 }
 0x2cb   :  { %4492 = vmatprep.subr.bf16.mxu1 %v7802_v56  ;;  %v7898_v56 = vld [vmem:[#allocation11 + $0x8ac] ss:$24 sps:$4 sm:$0xff]  }
 0x2ce   :  { %4493 = vmatpush1.bf16.msra.mxu1 %v7800_v8  ;;  %v775_v8 = vrot.slane %v8904_v51, %v8855_v49 }
 0x2cf   :  { %4494 = vmatprep.subr.bf16.mxu1 %v7805_v57  ;;  %v7896_v57 = vld [vmem:[#allocation11 + $0x8a8] ss:$24 sps:$4 sm:$0xff]  }
 0x2d2   :  { %4495 = vmatpush1.bf16.msra.mxu1 %v7803_v32 }
 0x2d3   :  { %4496 = vmatprep.subr.bf16.mxu1 %v7808_v59  ;;  %v7904_v59 = vld [vmem:[#allocation11 + $0x87c] ss:$24 sps:$4 sm:$0xff]  }
 0x2d6   :  { %4497 = vmatpush1.bf16.msra.mxu1 %v7806_v61 }
 0x2d7   :  { %4498 = vmatprep.subr.bf16.mxu1 %v7811_v62  ;;  %v7902_v62 = vld [vmem:[#allocation11 + $0x878] ss:$24 sps:$4 sm:$0xff]  }
 0x2da   :  { %4499 = vmatpush1.bf16.msra.mxu1 %v7809_v53 }
 0x2db   :  { %4500 = vmatprep.subr.bf16.mxu1 %v7814_v1  ;;  %v7910_v1 = vld [vmem:[#allocation11 + $0x84c] ss:$24 sps:$4 sm:$0xff]  }
 0x2de   :  { %4501 = vmatpush1.bf16.msra.mxu1 %v7812_v2 }
 0x2df   :  { %4502 = vmatprep.subr.bf16.mxu1 %v7817_v3 }
 0x2e2   :  { %4503 = vmatpush2.bf16.msra.mxu1 %v7815_v4 }
 0x2e3   :  { %4504 = vmatprep.subr.bf16.mxu1 %v7820_v45  ;;  %v7908_v45 = vld [vmem:[#allocation11 + $0x848] ss:$24 sps:$4 sm:$0xff]  }
 0x2e6   :  { %4505 = vmatpush2.bf16.msra.mxu1 %v7818_v6 }
 0x2e7   :  { %4506 = vmatprep.subr.bf16.mxu1 %v7823_v0  ;;  %v7916_v0 = vld [vmem:[#allocation11 + $0x81c] ss:$24 sps:$4 sm:$0xff]  }
 0x2e8   :  { %v8938_v11 = vpop.f32.mrf.mxu1 }
 0x2e9   :  { %v8940_v47 = vpop.f32.mrf.mxu0  ;;  %v2503_v32 = vadd.f32 %v8938_v11, %v771_v55  ;;  %v7965_v55 = vld [vmem:[#allocation11 + $0x368] ss:$24 sps:$4 sm:$0xff]  }
 0x2ea   :  { %4507 = vmatpush2.bf16.msra.mxu1 %v7821_v7  ;;  %v8942_v12 = vpop.f32.mrf.mxu1 }
 0x2eb   :  { %v8944_v15 = vpop.f32.mrf.mxu0  ;;  %4508 = vmatprep.subr.bf16.mxu1 %v7826_v10  ;;  %v2505_v61 = vadd.f32 %v8942_v12, %v775_v8  ;;  %v2544_v53 = vadd.f32 %v8940_v47, %v2503_v32  ;;  %v7922_v47 = vld [vmem:[#allocation11 + $0x7ec] ss:$24 sps:$4 sm:$0xff]   ;;  %v7968_v8 = vld [vmem:[#allocation11 + $0x370] ss:$24 sps:$4 sm:$0xff]  }
 0x2ec   :  { %v2506_v14 = vpop.f32.mrf.mxu1  ;;  %v7971_v32 = vld [vmem:[#allocation11 + $0x338] ss:$24 sps:$4 sm:$0xff]  }
 0x2ed   :  { %v2547_v16 = vpop.f32.mrf.mxu0  ;;  %v2546_v3 = vadd.f32 %v8944_v15, %v2505_v61  ;;  %v7928_v15 = vld [vmem:[#allocation11 + $0x7bc] ss:$24 sps:$4 sm:$0xff]   ;;  %v7926_v14 = vld [vmem:[#allocation11 + $0x7b8] ss:$24 sps:$4 sm:$0xff]  }
 0x2ee   :  { %4509 = vmatpush2.bf16.msra.mxu1 %v7824_v13  ;;  %v2507_v17 = vpop.f32.mrf.mxu1  ;;  %v7914_v13 = vld [vmem:[#allocation11 + $0x818] ss:$24 sps:$4 sm:$0xff]   ;;  %v7934_v16 = vld [vmem:[#allocation11 + $0x78c] ss:$24 sps:$4 sm:$0xff]  }
 0x2ef   :  { %v2548_v19 = vpop.f32.mrf.mxu0  ;;  %4510 = vmatprep.subr.bf16.mxu1 %v7829_v50  ;;  %v7920_v50 = vld [vmem:[#allocation11 + $0x7e8] ss:$24 sps:$4 sm:$0xff]  }
 0x2f0   :  { %v7932_v17 = vld [vmem:[#allocation11 + $0x788] ss:$24 sps:$4 sm:$0xff]  }
 0x2f1   :  { %v7974_v61 = vld [vmem:[#allocation11 + $0x340] ss:$24 sps:$4 sm:$0xff]  }
 0x2f2   :  { %4511 = vmatpush2.bf16.msra.mxu1 %v7827_v18  ;;  %v7935_v18 = vld [vmem:[#allocation11 + $0x458] ss:$24 sps:$4 sm:$0xff]  }
 0x2f3   :  { %4512 = vmatprep.subr.bf16.mxu1 %v7832_v20  ;;  %v7940_v20 = vld [vmem:[#allocation11 + $0x464] ss:$24 sps:$4 sm:$0xff]  }
 0x2f6   :  { %4513 = vmatpush2.bf16.msra.mxu1 %v7830_v21 }
 0x2f7   :  { %4514 = vmatprep.subr.bf16.mxu1 %v7835_v23  ;;  %v7938_v23 = vld [vmem:[#allocation11 + $0x460] ss:$24 sps:$4 sm:$0xff]  }
 0x2fa   :  { %4515 = vmatpush2.bf16.msra.mxu1 %v7833_v25 }
 0x2fb   :  { %4516 = vmatprep.subr.bf16.mxu1 %v7838_v26  ;;  %v7943_v26 = vld [vmem:[#allocation11 + $0x42c] ss:$24 sps:$4 sm:$0xff]  }
 0x2fe   :  { %4517 = vmatpush2.bf16.msra.mxu1 %v7836_v27  ;;  %v7946_v27 = vld [vmem:[#allocation11 + $0x434] ss:$24 sps:$4 sm:$0xff]  }
 0x2ff   :  { %4568 = vmatprep.subr.bf16.mxu1 %v7844_v28  ;;  %v7941_v28 = vld [vmem:[#allocation11 + $0x428] ss:$24 sps:$4 sm:$0xff]  }
 0x301   :  { %4519 = vmatmul.mubr.bf16.vlgmr.msra.gmra.mxu1 %v8921_v24 }
 0x302   :  { %4569 = vmatpush1.bf16.msra.mxu1 %v7842_v35 }
 0x303   :  { %4570 = vmatprep.subr.bf16.mxu1 %v7850_v5  ;;  %v7949_v5 = vld [vmem:[#allocation11 + $0x3fc] ss:$24 sps:$4 sm:$0xff]  }
 0x306   :  { %4571 = vmatpush1.bf16.msra.mxu1 %v7848_v36  ;;  %v7944_v36 = vld [vmem:[#allocation11 + $0x430] ss:$24 sps:$4 sm:$0xff]  }
 0x307   :  { %4572 = vmatprep.subr.bf16.mxu1 %v7856_v37 }
 0x30a   :  { %4573 = vmatpush1.bf16.msra.mxu1 %v7854_v38  ;;  %v7952_v38 = vld [vmem:[#allocation11 + $0x404] ss:$24 sps:$4 sm:$0xff]  }
 0x30b   :  { %4574 = vmatprep.subr.bf16.mxu1 %v7862_v9  ;;  %v7947_v9 = vld [vmem:[#allocation11 + $0x3f8] ss:$24 sps:$4 sm:$0xff]  }
 0x30e   :  { %4575 = vmatpush1.bf16.msra.mxu1 %v7860_v39 }
 0x30f   :  { %4576 = vmatprep.subr.bf16.mxu1 %v7868_v40  ;;  %v7955_v40 = vld [vmem:[#allocation11 + $0x3cc] ss:$24 sps:$4 sm:$0xff]  }
 0x312   :  { %4577 = vmatpush1.bf16.msra.mxu1 %v7866_v42  ;;  %v7950_v42 = vld [vmem:[#allocation11 + $0x400] ss:$24 sps:$4 sm:$0xff]  }
 0x313   :  { %4578 = vmatprep.subr.bf16.mxu1 %v7874_v43  ;;  %v7958_v43 = vld [vmem:[#allocation11 + $0x3d4] ss:$24 sps:$4 sm:$0xff]  }
 0x316   :  { %4579 = vmatpush1.bf16.msra.mxu1 %v7872_v44  ;;  %v7953_v44 = vld [vmem:[#allocation11 + $0x3c8] ss:$24 sps:$4 sm:$0xff]  }
 0x317   :  { %4580 = vmatprep.subr.bf16.mxu1 %v7880_v46  ;;  %v7961_v46 = vld [vmem:[#allocation11 + $0x39c] ss:$24 sps:$4 sm:$0xff]  }
 0x31a   :  { %4581 = vmatpush1.bf16.msra.mxu1 %v7878_v63  ;;  %v7964_v63 = vld [vmem:[#allocation11 + $0x3a4] ss:$24 sps:$4 sm:$0xff]  }
 0x31b   :  { %4582 = vmatprep.subr.bf16.mxu1 %v7886_v48  ;;  %v7959_v48 = vld [vmem:[#allocation11 + $0x398] ss:$24 sps:$4 sm:$0xff]  }
 0x31e   :  { %4583 = vmatpush1.bf16.msra.mxu1 %v7884_v29  ;;  %v7967_v29 = vld [vmem:[#allocation11 + $0x36c] ss:$24 sps:$4 sm:$0xff]  }
 0x31f   :  { %4584 = vmatprep.subr.bf16.mxu1 %v7892_v60  ;;  %v7962_v60 = vld [vmem:[#allocation11 + $0x3a0] ss:$24 sps:$4 sm:$0xff]  }
 0x322   :  { %4585 = vmatpush2.bf16.msra.mxu1 %v7890_v54  ;;  %v7970_v54 = vld [vmem:[#allocation11 + $0x374] ss:$24 sps:$4 sm:$0xff]  }
 0x323   :  { %4586 = vmatprep.subr.bf16.mxu1 %v7898_v56  ;;  %v7973_v56 = vld [vmem:[#allocation11 + $0x33c] ss:$24 sps:$4 sm:$0xff]  }
 0x326   :  { %4587 = vmatpush2.bf16.msra.mxu1 %v7896_v57  ;;  %v7976_v57 = vld [vmem:[#allocation11 + $0x344] ss:$24 sps:$4 sm:$0xff]  }
 0x327   :  { %4588 = vmatprep.subr.bf16.mxu1 %v7904_v59  ;;  %v7979_v59 = vld [vmem:[#allocation11 + $0x30c] ss:$24 sps:$4 sm:$0xff]  }
 0x328   :  { %v2584_v2 = vpop.f32.mrf.mxu1 }
 0x329   :  { %v2585_v4 = vadd.f32 %v2584_v2, %v2544_v53  ;;  %v7977_v53 = vld [vmem:[#allocation11 + $0x308] ss:$24 sps:$4 sm:$0xff]  }
 0x32a   :  { %4589 = vmatpush2.bf16.msra.mxu1 %v7902_v62  ;;  %v2586_v51 = vpop.f32.mrf.mxu1  ;;  %v7982_v62 = vld [vmem:[#allocation11 + $0x314] ss:$24 sps:$4 sm:$0xff]   ;;  %v7980_v2 = vld [vmem:[#allocation11 + $0x310] ss:$24 sps:$4 sm:$0xff]  }
 0x32b   :  { %v2587_v6 = vadd.f32 %v2586_v51, %v2546_v3  ;;  %4590 = vmatprep.subr.bf16.mxu1 %v7910_v1  ;;  %v2595_v7 = vpack.c.bf16 %v2585_v4, %v2585_v4  ;;  %v7985_v1 = vld [vmem:[#allocation11 + $0x5dc] ss:$24 sps:$4 sm:$0xff]   ;;  %v7983_v4 = vld [vmem:[#allocation11 + $0x5d8] ss:$24 sps:$4 sm:$0xff]   ;;  %v7991_v51 = vld [vmem:[#allocation11 + $0x5ac] ss:$24 sps:$4 sm:$0xff]  }
 0x32c   :  { %v2588_v10 = vpop.f32.mrf.mxu1  ;;  %v7988_v3 = vld [vmem:[#allocation11 + $0x5e4] ss:$24 sps:$4 sm:$0xff]  }
 0x32d   :  { %v2596_v11 = vpack.c.bf16 %v2587_v6, %v2587_v6  ;;  %v7994_v6 = vld [vmem:[#allocation11 + $0x5b4] ss:$24 sps:$4 sm:$0xff]   ;;  %v7992_v10 = vld [vmem:[#allocation11 + $0x5b0] ss:$24 sps:$4 sm:$0xff]  }
 0x32e   :  { %4591 = vmatpush2.bf16.msra.mxu1 %v7908_v45  ;;  %v2589_v12 = vpop.f32.mrf.mxu1  ;;  %v7986_v45 = vld [vmem:[#allocation11 + $0x5e0] ss:$24 sps:$4 sm:$0xff]  }
 0x32f   :  { %8435 = vtanh.bf16 %v2596_v11  ;;  %4592 = vmatprep.subr.bf16.mxu1 %v7916_v0  ;;  %v7989_v0 = vld [vmem:[#allocation11 + $0x5a8] ss:$24 sps:$4 sm:$0xff]   ;;  %v8000_v11 = vld [vmem:[#allocation11 + $0x584] ss:$24 sps:$4 sm:$0xff]   ;;  %v7995_v12 = vld [vmem:[#allocation11 + $0x578] ss:$24 sps:$4 sm:$0xff]  }
 0x330   :  { %8437 = vtanh.bf16 %v2595_v7  ;;  %v7997_v7 = vld [vmem:[#allocation11 + $0x57c] ss:$24 sps:$4 sm:$0xff]  }
 0x332   :  { %4593 = vmatpush2.bf16.msra.mxu1 %v7914_v13  ;;  %v8003_v13 = vld [vmem:[#allocation11 + $0x54c] ss:$24 sps:$4 sm:$0xff]  }
 0x333   :  { %4594 = vmatprep.subr.bf16.mxu1 %v7922_v47  ;;  %v7998_v47 = vld [vmem:[#allocation11 + $0x580] ss:$24 sps:$4 sm:$0xff]  }
 0x336   :  { %4595 = vmatpush2.bf16.msra.mxu1 %v7920_v50  ;;  %v8006_v50 = vld [vmem:[#allocation11 + $0x554] ss:$24 sps:$4 sm:$0xff]  }
 0x337   :  { %4596 = vmatprep.subr.bf16.mxu1 %v7928_v15  ;;  %v8001_v15 = vld [vmem:[#allocation11 + $0x548] ss:$24 sps:$4 sm:$0xff]  }
 0x33a   :  { %4597 = vmatpush2.bf16.msra.mxu1 %v7926_v14  ;;  %v8009_v14 = vld [vmem:[#allocation11 + $0x51c] ss:$24 sps:$4 sm:$0xff]  }
 0x33b   :  { %4598 = vmatprep.subr.bf16.mxu1 %v7934_v16  ;;  %v8004_v16 = vld [vmem:[#allocation11 + $0x550] ss:$24 sps:$4 sm:$0xff]  }
 0x33d   :  { %v8955_v19 = vpop.eup %8435 }
 0x33e   :  { %v8957_v21 = vpop.eup %8437  ;;  %4599 = vmatpush2.bf16.msra.mxu1 %v7932_v17  ;;  %4477 = vmatprep.mubr.bf16.mxu0 %v8955_v19  ;;  %v8012_v17 = vld [vmem:[#allocation11 + $0x524] ss:$24 sps:$4 sm:$0xff]  }
 0x33f   :  { %4600 = vmatprep.mubr.bf16.mxu1 %v8955_v19  ;;  %v8961_v25 = vpop.f32.mrf.mxu0  ;;  %4478 = vmatmul.mubr.bf16.vlgmr.msra.gmra.mxu0 %v8957_v21 }
 0x340   :  { %4528 = vmatpush1.bf16.msra.mxu0 %v7935_v18  ;;  %4559 = vmatprep.mubr.bf16.mxu0 %v8931_v58  ;;  %v8007_v18 = vld [vmem:[#allocation11 + $0x518] ss:$24 sps:$4 sm:$0xff]  }
 0x341   :  { %4601 = vmatmul.mubr.bf16.vlgmr.msra.gmra.mxu1 %v8957_v21  ;;  %4650 = vmatprep.subr.bf16.mxu1 %v7940_v20  ;;  %v8966_v35 = vpop.f32.mrf.mxu0  ;;  %v8015_v20 = vld [vmem:[#allocation11 + $0x4ec] ss:$24 sps:$4 sm:$0xff]  }
 0x342   :  { %4651 = vmatpush1.bf16.msra.mxu1 %v7938_v23  ;;  %4682 = vmatprep.mubr.bf16.mxu1 %v8931_v58  ;;  %v7956_v58 = vld [vmem:[#allocation11 + $0x3d0] ss:$24 sps:$4 sm:$0xff]   ;;  %v8010_v23 = vld [vmem:[#allocation11 + $0x520] ss:$24 sps:$4 sm:$0xff]  }
 0x343   :  { %4529 = vmatprep.subr.bf16.mxu0 %v7943_v26  ;;  %v4401_v37 = vpop.f32.mrf.mxu0  ;;  %4652 = vmatprep.subr.bf16.mxu1 %v7946_v27  ;;  %v8018_v26 = vld [vmem:[#allocation11 + $0x4f4] ss:$24 sps:$4 sm:$0xff]   ;;  %v8013_v27 = vld [vmem:[#allocation11 + $0x4e8] ss:$24 sps:$4 sm:$0xff]  }
 0x344   :  { %4530 = vmatpush1.bf16.msra.mxu0 %v7941_v28  ;;  %v8021_v28 = vld [vmem:[#allocation11 + $0x4bc] ss:$24 sps:$4 sm:$0xff]   ;;  %v8019_v37 = vld [vmem:[#allocation11 + $0x4b8] ss:$24 sps:$4 sm:$0xff]  }
 0x345   :  { %v4402_v39 = vpop.f32.mrf.mxu0  ;;  %4531 = vmatprep.subr.bf16.mxu0 %v7949_v5  ;;  %v8016_v5 = vld [vmem:[#allocation11 + $0x4f0] ss:$24 sps:$4 sm:$0xff]  }
 0x346   :  { %4653 = vmatpush1.bf16.msra.mxu1 %v7944_v36  ;;  %v8024_v36 = vld [vmem:[#allocation11 + $0x4c4] ss:$24 sps:$4 sm:$0xff]   ;;  %v8030_v39 = vld [vmem:[#allocation11 + $0x494] ss:$24 sps:$4 sm:$0xff]  }
 0x347   :  { %4654 = vmatprep.subr.bf16.mxu1 %v7952_v38  ;;  %v8027_v38 = vld [vmem:[#allocation11 + $0x48c] ss:$24 sps:$4 sm:$0xff]  }
 0x348   :  { %4532 = vmatpush1.bf16.msra.mxu0 %v7947_v9  ;;  %v8022_v9 = vld [vmem:[#allocation11 + $0x4c0] ss:$24 sps:$4 sm:$0xff]  }
 0x349   :  { %4533 = vmatprep.subr.bf16.mxu0 %v7955_v40  ;;  %v8025_v40 = vld [vmem:[#allocation11 + $0x488] ss:$24 sps:$4 sm:$0xff]  }
 0x34a   :  { %4655 = vmatpush1.bf16.msra.mxu1 %v7950_v42  ;;  %v8969_v42 = vld [vmem:[#allocation13] sm:$0x3f] }
 0x34b   :  { %4656 = vmatprep.subr.bf16.mxu1 %v7958_v43  ;;  %v8033_v43 = vld [vmem:[#allocation11 + $0x164] ss:$24 sps:$4 sm:$0xff]  }
 0x34c   :  { %4534 = vmatpush1.bf16.msra.mxu0 %v7953_v44  ;;  %v8028_v44 = vld [vmem:[#allocation11 + $0x490] ss:$24 sps:$4 sm:$0xff]  }
 0x34d   :  { %4535 = vmatprep.subr.bf16.mxu0 %v7961_v46  ;;  %v8102_v46 = vld [vmem:[#allocation14 + $0xe4] ss:$16 sps:$4 sm:$0xff]  }
 0x34e   :  { %4657 = vmatpush1.bf16.msra.mxu1 %v7956_v58  ;;  %v2896_v58 = vrot.slane %v8969_v42, %v8833_v30 }
 0x34f   :  { %4658 = vmatprep.subr.bf16.mxu1 %v7964_v63  ;;  %v8031_v63 = vld [vmem:[#allocation11 + $0x160] ss:$24 sps:$4 sm:$0xff]  }
 0x350   :  { %4536 = vmatpush1.bf16.msra.mxu0 %v7959_v48  ;;  %v8036_v48 = vld [vmem:[#allocation11 + $0x134] ss:$24 sps:$4 sm:$0xff]  }
 0x351   :  { %4537 = vmatprep.subr.bf16.mxu0 %v7967_v29  ;;  %v2900_v29 = vrot.slane %v8969_v42, %v8841_v33 }
 0x352   :  { %4659 = vmatpush1.bf16.msra.mxu1 %v7962_v60  ;;  %v8100_v60 = vld [vmem:[#allocation14 + $0xe0] ss:$16 sps:$4 sm:$0xff]  }
 0x353   :  { %4660 = vmatprep.subr.bf16.mxu1 %v7970_v54  ;;  %v8108_v54 = vld [vmem:[#allocation14 + $0xc4] ss:$16 sps:$4 sm:$0xff]  }
 0x354   :  { %4538 = vmatpush1.bf16.msra.mxu0 %v7965_v55  ;;  %v4398_v55 = vadd.f32 %v8961_v25, %v2896_v58  ;;  %v8037_v25 = vld [vmem:[#allocation11 + $0x100] ss:$24 sps:$4 sm:$0xff]   ;;  %v8064_v58 = vld [vmem:[#allocation11 + $0x250] ss:$24 sps:$4 sm:$0xff]  }
 0x355   :  { %4539 = vmatprep.subr.bf16.mxu0 %v7973_v56  ;;  %v8034_v56 = vld [vmem:[#allocation11 + $0x130] ss:$24 sps:$4 sm:$0xff]  }
 0x356   :  { %4661 = vmatpush1.bf16.msra.mxu1 %v7968_v8 }
 0x357   :  { %4662 = vmatprep.subr.bf16.mxu1 %v7976_v57  ;;  %v8039_v57 = vld [vmem:[#allocation11 + $0x104] ss:$24 sps:$4 sm:$0xff]  }
 0x358   :  { %4540 = vmatpush1.bf16.msra.mxu0 %v7971_v32  ;;  %v4400_v32 = vadd.f32 %v8966_v35, %v2900_v29  ;;  %v8040_v35 = vld [vmem:[#allocation11 + $0xd0] ss:$24 sps:$4 sm:$0xff]  }
 0x359   :  { %4541 = vmatprep.subr.bf16.mxu0 %v7979_v59  ;;  %v8165_v29 = vld [vmem:[#allocation14 + $0x164] ss:$16 sps:$4 sm:$0xff]  }
 0x35a   :  { %4663 = vmatpush1.bf16.msra.mxu1 %v7974_v61  ;;  %v8106_v61 = vld [vmem:[#allocation14 + $0xc0] ss:$16 sps:$4 sm:$0xff]  }
 0x35b   :  { %4664 = vmatprep.subr.bf16.mxu1 %v7982_v62 }
 0x35c   :  { %4542 = vmatpush1.bf16.msra.mxu0 %v7977_v53  ;;  %v8114_v53 = vld [vmem:[#allocation14 + $0xa4] ss:$16 sps:$4 sm:$0xff]  }
 0x35d   :  { %4543 = vmatprep.subr.bf16.mxu0 %v7985_v1 }
 0x35e   :  { %4665 = vmatpush1.bf16.msra.mxu1 %v7980_v2  ;;  %v8042_v2 = vld [vmem:[#allocation11 + $0xd4] ss:$24 sps:$4 sm:$0xff]  }
 0x35f   :  { %4666 = vmatprep.subr.bf16.mxu1 %v7988_v3 }
 0x360   :  { %4544 = vmatpush2.bf16.msra.mxu0 %v7983_v4  ;;  %v8120_v4 = vld [vmem:[#allocation14 + $0x84] ss:$16 sps:$4 sm:$0xff]  }
 0x361   :  { %4545 = vmatprep.subr.bf16.mxu0 %v7991_v51  ;;  %v8045_v51 = vld [vmem:[#allocation11 + $0xa4] ss:$24 sps:$4 sm:$0xff]  }
 0x362   :  { %4667 = vmatpush2.bf16.msra.mxu1 %v7986_v45  ;;  %v8118_v45 = vld [vmem:[#allocation14 + $0x80] ss:$16 sps:$4 sm:$0xff]  }
 0x363   :  { %4668 = vmatprep.subr.bf16.mxu1 %v7994_v6  ;;  %v8126_v6 = vld [vmem:[#allocation14 + $0x64] ss:$16 sps:$4 sm:$0xff]  }
 0x364   :  { %4546 = vmatpush2.bf16.msra.mxu0 %v7989_v0  ;;  %v8043_v0 = vld [vmem:[#allocation11 + $0xa0] ss:$24 sps:$4 sm:$0xff]  }
 0x365   :  { %4547 = vmatprep.subr.bf16.mxu0 %v7997_v7  ;;  %v8048_v7 = vld [vmem:[#allocation11 + $0x74] ss:$24 sps:$4 sm:$0xff]  }
 0x366   :  { %4669 = vmatpush2.bf16.msra.mxu1 %v7992_v10  ;;  %v8124_v10 = vld [vmem:[#allocation14 + $0x60] ss:$16 sps:$4 sm:$0xff]  }
 0x367   :  { %4670 = vmatprep.subr.bf16.mxu1 %v8000_v11  ;;  %v8132_v11 = vld [vmem:[#allocation14 + $0x44] ss:$16 sps:$4 sm:$0xff]  }
 0x368   :  { %4548 = vmatpush2.bf16.msra.mxu0 %v7995_v12  ;;  %v8046_v12 = vld [vmem:[#allocation11 + $0x70] ss:$24 sps:$4 sm:$0xff]  }
 0x369   :  { %4549 = vmatprep.subr.bf16.mxu0 %v8003_v13  ;;  %v8051_v13 = vld [vmem:[#allocation11 + $0x44] ss:$24 sps:$4 sm:$0xff]  }
 0x36a   :  { %4671 = vmatpush2.bf16.msra.mxu1 %v7998_v47  ;;  %v8130_v47 = vld [vmem:[#allocation14 + $0x40] ss:$16 sps:$4 sm:$0xff]  }
 0x36b   :  { %4672 = vmatprep.subr.bf16.mxu1 %v8006_v50  ;;  %v8138_v50 = vld [vmem:[#allocation14 + $0x24] ss:$16 sps:$4 sm:$0xff]  }
 0x36c   :  { %4550 = vmatpush2.bf16.msra.mxu0 %v8001_v15  ;;  %v8049_v15 = vld [vmem:[#allocation11 + $0x40] ss:$24 sps:$4 sm:$0xff]  }
 0x36d   :  { %4551 = vmatprep.subr.bf16.mxu0 %v8009_v14  ;;  %v8054_v14 = vld [vmem:[#allocation11 + $0x14] ss:$24 sps:$4 sm:$0xff]  }
 0x36e   :  { %4673 = vmatpush2.bf16.msra.mxu1 %v8004_v16  ;;  %v8136_v16 = vld [vmem:[#allocation14 + $0x20] ss:$16 sps:$4 sm:$0xff]  }
 0x36f   :  { %4674 = vmatprep.subr.bf16.mxu1 %v8012_v17  ;;  %v8144_v17 = vld [vmem:[#allocation14 + $0x4] ss:$16 sps:$4 sm:$0xff]  }
 0x370   :  { %4552 = vmatpush2.bf16.msra.mxu0 %v8007_v18  ;;  %v8052_v18 = vld [vmem:[#allocation11 + $0x10] ss:$24 sps:$4 sm:$0xff]  }
 0x371   :  { %4553 = vmatprep.subr.bf16.mxu0 %v8015_v20  ;;  %v8057_v20 = vld [vmem:[#allocation11 + $0x2e4] ss:$24 sps:$4 sm:$0xff]  }
 0x372   :  { %4675 = vmatpush2.bf16.msra.mxu1 %v8010_v23  ;;  %v8142_v23 = vld [vmem:[#allocation14] ss:$16 sps:$4 sm:$0xff]  }
 0x373   :  { %4676 = vmatprep.subr.bf16.mxu1 %v8018_v26  ;;  %v8150_v26 = vld [vmem:[#allocation14 + $0x1e4] ss:$16 sps:$4 sm:$0xff]  }
 0x374   :  { %4554 = vmatpush2.bf16.msra.mxu0 %v8013_v27  ;;  %v8055_v27 = vld [vmem:[#allocation11 + $0x2e0] ss:$24 sps:$4 sm:$0xff]  }
 0x375   :  { %4555 = vmatprep.subr.bf16.mxu0 %v8021_v28  ;;  %v8060_v28 = vld [vmem:[#allocation11 + $0x2b4] ss:$24 sps:$4 sm:$0xff]  }
 0x376   :  { %4677 = vmatpush2.bf16.msra.mxu1 %v8016_v5  ;;  %v8148_v5 = vld [vmem:[#allocation14 + $0x1e0] ss:$16 sps:$4 sm:$0xff]  }
 0x377   :  { %4678 = vmatprep.subr.bf16.mxu1 %v8024_v36  ;;  %v8156_v36 = vld [vmem:[#allocation14 + $0x1c4] ss:$16 sps:$4 sm:$0xff]  }
 0x378   :  { %4556 = vmatpush2.bf16.msra.mxu0 %v8019_v37  ;;  %v8058_v37 = vld [vmem:[#allocation11 + $0x2b0] ss:$24 sps:$4 sm:$0xff]  }
 0x379   :  { %4557 = vmatprep.subr.bf16.mxu0 %v8027_v38  ;;  %v8063_v38 = vld [vmem:[#allocation11 + $0x284] ss:$24 sps:$4 sm:$0xff]  }
 0x37a   :  { %4679 = vmatpush2.bf16.msra.mxu1 %v8022_v9  ;;  %v8154_v9 = vld [vmem:[#allocation14 + $0x1c0] ss:$16 sps:$4 sm:$0xff]  }
 0x37b   :  { %4680 = vmatprep.subr.bf16.mxu1 %v8030_v39  ;;  %v8159_v39 = vld [vmem:[#allocation14 + $0x1a4] ss:$16 sps:$4 sm:$0xff]  }
 0x37c   :  { %4558 = vmatpush2.bf16.msra.mxu0 %v8025_v40  ;;  %v8061_v40 = vld [vmem:[#allocation11 + $0x280] ss:$24 sps:$4 sm:$0xff]  }
 0x37d   :  { %4609 = vmatprep.subr.bf16.mxu0 %v8033_v43  ;;  %v8066_v43 = vld [vmem:[#allocation11 + $0x254] ss:$24 sps:$4 sm:$0xff]  }
 0x37e   :  { %4681 = vmatpush2.bf16.msra.mxu1 %v8028_v44  ;;  %v8157_v44 = vld [vmem:[#allocation14 + $0x1a0] ss:$16 sps:$4 sm:$0xff]  }
 0x37f   :  { %4560 = vmatmul.mubr.bf16.vlgmr.msra.gmra.mxu0 %v8933_v52  ;;  %5918 = vmatprep.subr.bf16.mxu1 %v8102_v46  ;;  %v8162_v46 = vld [vmem:[#allocation14 + $0x184] ss:$16 sps:$4 sm:$0xff]  }
 0x380   :  { %4610 = vmatpush1.bf16.msra.mxu0 %v8031_v63  ;;  %4641 = vmatprep.mubr.bf16.mxu0 %v8919_v22  ;;  %v8069_v63 = vld [vmem:[#allocation11 + $0x224] ss:$24 sps:$4 sm:$0xff]  }
 0x381   :  { %4683 = vmatmul.mubr.bf16.vlgmr.msra.gmra.mxu1 %v8933_v52  ;;  %v4438_v8 = vpop.f32.mrf.mxu1  ;;  %4611 = vmatprep.subr.bf16.mxu0 %v8036_v48  ;;  %v8112_v52 = vld [vmem:[#allocation14 + $0xa0] ss:$16 sps:$4 sm:$0xff]  }
 0x382   :  { %v8980_v59 = vadd.f32 %v4438_v8, %v4398_v55  ;;  %5919 = vmatpush1.bf16.msra.mxu1 %v8100_v60  ;;  %v8160_v48 = vld [vmem:[#allocation14 + $0x180] ss:$16 sps:$4 sm:$0xff]  }
 0x383   :  { %v4440_v62 = vpop.f32.mrf.mxu1  ;;  %5920 = vmatprep.subr.bf16.mxu1 %v8108_v54  ;;  %v8067_v60 = vld [vmem:[#allocation11 + $0x220] ss:$24 sps:$4 sm:$0xff]   ;;  %v8072_v54 = vld [vmem:[#allocation11 + $0x1f4] ss:$24 sps:$4 sm:$0xff]   ;;  %v8070_v8 = vld [vmem:[#allocation11 + $0x1f0] ss:$24 sps:$4 sm:$0xff]  }
 0x384   :  { %v8982_v1 = vadd.f32 %v4440_v62, %v4400_v32  ;;  %4612 = vmatpush1.bf16.msra.mxu0 %v8034_v56  ;;  %v8163_v55 = vld [vmem:[#allocation14 + $0x160] ss:$16 sps:$4 sm:$0xff]   ;;  %v8168_v56 = vld [vmem:[#allocation14 + $0x144] ss:$16 sps:$4 sm:$0xff]  }
 0x385   :  { %v4442_v22 = vpop.f32.mrf.mxu1  ;;  %4613 = vmatprep.subr.bf16.mxu0 %v8039_v57  ;;  %v8075_v57 = vld [vmem:[#allocation11 + $0x1c4] ss:$24 sps:$4 sm:$0xff]   ;;  %v8073_v62 = vld [vmem:[#allocation11 + $0x1c0] ss:$24 sps:$4 sm:$0xff]  }
 0x386   :  { %5921 = vmatpush1.bf16.msra.mxu1 %v8106_v61  ;;  %v8166_v32 = vld [vmem:[#allocation14 + $0x140] ss:$16 sps:$4 sm:$0xff]   ;;  %v8171_v61 = vld [vmem:[#allocation14 + $0x124] ss:$16 sps:$4 sm:$0xff]  }
 0x387   :  { %v4443_v3 = vpop.f32.mrf.mxu1  ;;  %5922 = vmatprep.subr.bf16.mxu1 %v8114_v53  ;;  %v8078_v53 = vld [vmem:[#allocation11 + $0x194] ss:$24 sps:$4 sm:$0xff]  }
 0x388   :  { %4614 = vmatpush1.bf16.msra.mxu0 %v8037_v25  ;;  %v8169_v25 = vld [vmem:[#allocation14 + $0x120] ss:$16 sps:$4 sm:$0xff]   ;;  %v8174_v22 = vld [vmem:[#allocation14 + $0x104] ss:$16 sps:$4 sm:$0xff]  }
 0x389   :  { %4615 = vmatprep.subr.bf16.mxu0 %v8042_v2  ;;  %v8076_v2 = vld [vmem:[#allocation11 + $0x190] ss:$24 sps:$4 sm:$0xff]  }
 0x38a   :  { %5923 = vmatpush1.bf16.msra.mxu1 %v8112_v52  ;;  %v8081_v52 = vld [vmem:[#allocation11 + $0x764] ss:$24 sps:$4 sm:$0xff]  }
 0x38b   :  { %5924 = vmatprep.subr.bf16.mxu1 %v8120_v4  ;;  %v8172_v3 = vld [vmem:[#allocation14 + $0x100] ss:$16 sps:$4 sm:$0xff]  }
 0x38c   :  { %4616 = vmatpush1.bf16.msra.mxu0 %v8040_v35  ;;  %v8079_v4 = vld [vmem:[#allocation11 + $0x760] ss:$24 sps:$4 sm:$0xff]   ;;  %v8084_v35 = vld [vmem:[#allocation11 + $0x734] ss:$24 sps:$4 sm:$0xff]  }
 0x38d   :  { %4617 = vmatprep.subr.bf16.mxu0 %v8045_v51  ;;  %v8082_v51 = vld [vmem:[#allocation11 + $0x730] ss:$24 sps:$4 sm:$0xff]  }
 0x38e   :  { %5925 = vmatpush1.bf16.msra.mxu1 %v8118_v45 }
 0x38f   :  { %5926 = vmatprep.subr.bf16.mxu1 %v8126_v6  ;;  %v8087_v6 = vld [vmem:[#allocation11 + $0x704] ss:$24 sps:$4 sm:$0xff]  }
 0x390   :  { %4618 = vmatpush1.bf16.msra.mxu0 %v8043_v0 }
 0x391   :  { %4619 = vmatprep.subr.bf16.mxu0 %v8048_v7  ;;  %v8085_v7 = vld [vmem:[#allocation11 + $0x700] ss:$24 sps:$4 sm:$0xff]  }
 0x392   :  { %5927 = vmatpush1.bf16.msra.mxu1 %v8124_v10 }
 0x393   :  { %5928 = vmatprep.subr.bf16.mxu1 %v8132_v11  ;;  %v8090_v11 = vld [vmem:[#allocation11 + $0x6d4] ss:$24 sps:$4 sm:$0xff]  }
 0x394   :  { %4620 = vmatpush1.bf16.msra.mxu0 %v8046_v12 }
 0x395   :  { %4621 = vmatprep.subr.bf16.mxu0 %v8051_v13  ;;  %v8088_v13 = vld [vmem:[#allocation11 + $0x6d0] ss:$24 sps:$4 sm:$0xff]  }
 0x396   :  { %5929 = vmatpush1.bf16.msra.mxu1 %v8130_v47  ;;  %v8091_v47 = vld [vmem:[#allocation11 + $0x6a0] ss:$24 sps:$4 sm:$0xff]  }
 0x397   :  { %5930 = vmatprep.subr.bf16.mxu1 %v8138_v50  ;;  %v8094_v50 = vld [vmem:[#allocation11 + $0x670] ss:$24 sps:$4 sm:$0xff]  }
 0x398   :  { %4622 = vmatpush1.bf16.msra.mxu0 %v8049_v15  ;;  %v8099_v15 = vld [vmem:[#allocation11 + $0x644] ss:$24 sps:$4 sm:$0xff]  }
 0x399   :  { %4623 = vmatprep.subr.bf16.mxu0 %v8054_v14  ;;  %v8097_v14 = vld [vmem:[#allocation11 + $0x640] ss:$24 sps:$4 sm:$0xff]  }
 0x39a   :  { %5931 = vmatpush1.bf16.msra.mxu1 %v8136_v16  ;;  %v8105_v16 = vld [vmem:[#allocation11 + $0x614] ss:$24 sps:$4 sm:$0xff]  }
 0x39b   :  { %5932 = vmatprep.subr.bf16.mxu1 %v8144_v17  ;;  %v8103_v17 = vld [vmem:[#allocation11 + $0x610] ss:$24 sps:$4 sm:$0xff]  }
 0x39c   :  { %4624 = vmatpush1.bf16.msra.mxu0 %v8052_v18  ;;  %v8111_v18 = vld [vmem:[#allocation11 + $0x8e4] ss:$24 sps:$4 sm:$0xff]  }
 0x39d   :  { %4625 = vmatprep.subr.bf16.mxu0 %v8057_v20  ;;  %v8109_v20 = vld [vmem:[#allocation11 + $0x8e0] ss:$24 sps:$4 sm:$0xff]  }
 0x39e   :  { %5933 = vmatpush1.bf16.msra.mxu1 %v8142_v23  ;;  %v8117_v23 = vld [vmem:[#allocation11 + $0x8b4] ss:$24 sps:$4 sm:$0xff]  }
 0x39f   :  { %5934 = vmatprep.subr.bf16.mxu1 %v8150_v26  ;;  %v8115_v26 = vld [vmem:[#allocation11 + $0x8b0] ss:$24 sps:$4 sm:$0xff]  }
 0x3a0   :  { %4626 = vmatpush2.bf16.msra.mxu0 %v8055_v27  ;;  %v8123_v27 = vld [vmem:[#allocation11 + $0x884] ss:$24 sps:$4 sm:$0xff]  }
 0x3a1   :  { %4627 = vmatprep.subr.bf16.mxu0 %v8060_v28  ;;  %v8121_v28 = vld [vmem:[#allocation11 + $0x880] ss:$24 sps:$4 sm:$0xff]  }
 0x3a2   :  { %5935 = vmatpush2.bf16.msra.mxu1 %v8148_v5  ;;  %v8129_v5 = vld [vmem:[#allocation11 + $0x854] ss:$24 sps:$4 sm:$0xff]  }
 0x3a3   :  { %5936 = vmatprep.subr.bf16.mxu1 %v8156_v36  ;;  %v8127_v36 = vld [vmem:[#allocation11 + $0x850] ss:$24 sps:$4 sm:$0xff]  }
 0x3a4   :  { %4628 = vmatpush2.bf16.msra.mxu0 %v8058_v37  ;;  %v8135_v37 = vld [vmem:[#allocation11 + $0x824] ss:$24 sps:$4 sm:$0xff]  }
 0x3a5   :  { %4629 = vmatprep.subr.bf16.mxu0 %v8063_v38  ;;  %v8133_v38 = vld [vmem:[#allocation11 + $0x820] ss:$24 sps:$4 sm:$0xff]  }
 0x3a6   :  { %5937 = vmatpush2.bf16.msra.mxu1 %v8154_v9  ;;  %v8141_v9 = vld [vmem:[#allocation11 + $0x7f4] ss:$24 sps:$4 sm:$0xff]  }
 0x3a7   :  { %5938 = vmatprep.subr.bf16.mxu1 %v8159_v39  ;;  %v8139_v39 = vld [vmem:[#allocation11 + $0x7f0] ss:$24 sps:$4 sm:$0xff]  }
 0x3a8   :  { %4630 = vmatpush2.bf16.msra.mxu0 %v8061_v40  ;;  %v8147_v40 = vld [vmem:[#allocation11 + $0x7c4] ss:$24 sps:$4 sm:$0xff]  }
 0x3a9   :  { %4631 = vmatprep.subr.bf16.mxu0 %v8066_v43  ;;  %v8145_v43 = vld [vmem:[#allocation11 + $0x7c0] ss:$24 sps:$4 sm:$0xff]  }
 0x3aa   :  { %5939 = vmatpush2.bf16.msra.mxu1 %v8157_v44  ;;  %v8153_v44 = vld [vmem:[#allocation11 + $0x794] ss:$24 sps:$4 sm:$0xff]  }
 0x3ab   :  { %5940 = vmatprep.subr.bf16.mxu1 %v8162_v46  ;;  %v8151_v46 = vld [vmem:[#allocation11 + $0x790] ss:$24 sps:$4 sm:$0xff]  }
 0x3ac   :  { %4632 = vmatpush2.bf16.msra.mxu0 %v8064_v58  ;;  %v8177_v58 = vld [vmem:[#allocation14 + $0x2e4] ss:$16 sps:$4 sm:$0xff]  }
 0x3ad   :  { %4633 = vmatprep.subr.bf16.mxu0 %v8069_v63  ;;  %v8175_v63 = vld [vmem:[#allocation14 + $0x2e0] ss:$16 sps:$4 sm:$0xff]  }
 0x3ae   :  { %5941 = vmatpush2.bf16.msra.mxu1 %v8160_v48  ;;  %v8180_v48 = vld [vmem:[#allocation14 + $0x2c4] ss:$16 sps:$4 sm:$0xff]  }
 0x3af   :  { %5942 = vmatprep.subr.bf16.mxu1 %v8165_v29 }
 0x3b0   :  { %4634 = vmatpush2.bf16.msra.mxu0 %v8067_v60 }
 0x3b1   :  { %4635 = vmatprep.subr.bf16.mxu0 %v8072_v54  ;;  %v8178_v54 = vld [vmem:[#allocation14 + $0x2c0] ss:$16 sps:$4 sm:$0xff]  }
 0x3b2   :  { %5943 = vmatpush2.bf16.msra.mxu1 %v8163_v55 }
 0x3b3   :  { %5944 = vmatprep.subr.bf16.mxu1 %v8168_v56 }
 0x3b4   :  { %4636 = vmatpush2.bf16.msra.mxu0 %v8070_v8  ;;  %v8183_v8 = vld [vmem:[#allocation14 + $0x2a4] ss:$16 sps:$4 sm:$0xff]  }
 0x3b5   :  { %4637 = vmatprep.subr.bf16.mxu0 %v8075_v57 }
 0x3b6   :  { %5945 = vmatpush2.bf16.msra.mxu1 %v8166_v32 }
 0x3b7   :  { %5946 = vmatprep.subr.bf16.mxu1 %v8171_v61 }
 0x3b8   :  { %4638 = vmatpush2.bf16.msra.mxu0 %v8073_v62 }
 0x3b9   :  { %4639 = vmatprep.subr.bf16.mxu0 %v8078_v53 }
 0x3ba   :  { %5947 = vmatpush2.bf16.msra.mxu1 %v8169_v25  ;;  %v8181_v25 = vld [vmem:[#allocation14 + $0x2a0] ss:$16 sps:$4 sm:$0xff]  }
 0x3bb   :  { %5948 = vmatprep.subr.bf16.mxu1 %v8174_v22 }
 0x3bc   :  { %4640 = vmatpush2.bf16.msra.mxu0 %v8076_v2 }
 0x3bd   :  { %4691 = vmatprep.subr.bf16.mxu0 %v8081_v52  ;;  %v8184_v52 = vld [vmem:[#allocation14 + $0x280] ss:$16 sps:$4 sm:$0xff]  }
 0x3be   :  { %5949 = vmatpush2.bf16.msra.mxu1 %v8172_v3  ;;  %v8189_v3 = vld [vmem:[#allocation14 + $0x264] ss:$16 sps:$4 sm:$0xff]  }
 0x3bf   :  { %4642 = vmatmul.mubr.bf16.vlgmr.msra.gmra.mxu0 %v8921_v24  ;;  %v8093_v24 = vld [vmem:[#allocation11 + $0x6a4] ss:$24 sps:$4 sm:$0xff]  }
 0x3c0   :  { %4692 = vmatpush1.bf16.msra.mxu0 %v8079_v4  ;;  %4723 = vmatprep.mubr.bf16.mxu0 %v8955_v19  ;;  %v8096_v19 = vld [vmem:[#allocation11 + $0x674] ss:$24 sps:$4 sm:$0xff]  }
 0x3c1   :  { %v8986_v45 = vpop.f32.mrf.mxu1  ;;  %4693 = vmatprep.subr.bf16.mxu0 %v8084_v35  ;;  %v8192_v4 = vld [vmem:[#allocation14 + $0x244] ss:$16 sps:$4 sm:$0xff]   ;;  %v8190_v35 = vld [vmem:[#allocation14 + $0x240] ss:$16 sps:$4 sm:$0xff]  }
 0x3c3   :  { %v8988_v0 = vpop.f32.mrf.mxu1 }
 0x3c4   :  { %4694 = vmatpush1.bf16.msra.mxu0 %v8082_v51  ;;  %v8195_v51 = vld [vmem:[#allocation14 + $0x224] ss:$16 sps:$4 sm:$0xff]  }
 0x3c5   :  { %v4524_v10 = vpop.f32.mrf.mxu1  ;;  %4695 = vmatprep.subr.bf16.mxu0 %v8087_v6 }
 0x3c6   :  { %v8273_v10 = vld [vmem:[#allocation14 + $0x4e4] ss:$16 sps:$4 sm:$0xff]  }
 0x3c7   :  { %v4525_v12 = vpop.f32.mrf.mxu1  ;;  %6000 = vmatprep.subr.bf16.mxu1 %v8273_v10 }
 0x3c8   :  { %4696 = vmatpush1.bf16.msra.mxu0 %v8085_v7  ;;  %v8193_v7 = vld [vmem:[#allocation14 + $0x220] ss:$16 sps:$4 sm:$0xff]   ;;  %v8198_v12 = vld [vmem:[#allocation14 + $0x204] ss:$16 sps:$4 sm:$0xff]  }
 0x3c9   :  { %4697 = vmatprep.subr.bf16.mxu0 %v8090_v11 }
 0x3cc   :  { %4698 = vmatpush1.bf16.msra.mxu0 %v8088_v13  ;;  %v8271_v13 = vld [vmem:[#allocation14 + $0x4e0] ss:$16 sps:$4 sm:$0xff]  }
 0x3cd   :  { %4699 = vmatprep.subr.bf16.mxu0 %v8093_v24  ;;  %v8196_v24 = vld [vmem:[#allocation14 + $0x200] ss:$16 sps:$4 sm:$0xff]  }
 0x3d0   :  { %4700 = vmatpush1.bf16.msra.mxu0 %v8091_v47  ;;  %v8279_v47 = vld [vmem:[#allocation14 + $0x4c4] ss:$16 sps:$4 sm:$0xff]  }
 0x3d1   :  { %4701 = vmatprep.subr.bf16.mxu0 %v8096_v19  ;;  %v8201_v19 = vld [vmem:[#allocation14 + $0x3e4] ss:$16 sps:$4 sm:$0xff]  }
 0x3d4   :  { %4702 = vmatpush1.bf16.msra.mxu0 %v8094_v50  ;;  %v8277_v50 = vld [vmem:[#allocation14 + $0x4c0] ss:$16 sps:$4 sm:$0xff]  }
 0x3d5   :  { %4703 = vmatprep.subr.bf16.mxu0 %v8099_v15  ;;  %v8199_v15 = vld [vmem:[#allocation14 + $0x3e0] ss:$16 sps:$4 sm:$0xff]  }
 0x3d8   :  { %4704 = vmatpush1.bf16.msra.mxu0 %v8097_v14  ;;  %v8285_v14 = vld [vmem:[#allocation14 + $0x4a4] ss:$16 sps:$4 sm:$0xff]  }
 0x3d9   :  { %4705 = vmatprep.subr.bf16.mxu0 %v8105_v16  ;;  %v8204_v16 = vld [vmem:[#allocation14 + $0x3c4] ss:$16 sps:$4 sm:$0xff]  }
 0x3dc   :  { %4706 = vmatpush1.bf16.msra.mxu0 %v8103_v17  ;;  %v8283_v17 = vld [vmem:[#allocation14 + $0x4a0] ss:$16 sps:$4 sm:$0xff]  }
 0x3dd   :  { %4707 = vmatprep.subr.bf16.mxu0 %v8111_v18  ;;  %v8202_v18 = vld [vmem:[#allocation14 + $0x3c0] ss:$16 sps:$4 sm:$0xff]  }
 0x3e0   :  { %4708 = vmatpush2.bf16.msra.mxu0 %v8109_v20  ;;  %v8291_v20 = vld [vmem:[#allocation14 + $0x484] ss:$16 sps:$4 sm:$0xff]  }
 0x3e1   :  { %4709 = vmatprep.subr.bf16.mxu0 %v8117_v23  ;;  %v8207_v23 = vld [vmem:[#allocation14 + $0x3a4] ss:$16 sps:$4 sm:$0xff]  }
 0x3e4   :  { %4710 = vmatpush2.bf16.msra.mxu0 %v8115_v26  ;;  %v8289_v26 = vld [vmem:[#allocation14 + $0x480] ss:$16 sps:$4 sm:$0xff]  }
 0x3e5   :  { %4711 = vmatprep.subr.bf16.mxu0 %v8123_v27  ;;  %v8205_v27 = vld [vmem:[#allocation14 + $0x3a0] ss:$16 sps:$4 sm:$0xff]  }
 0x3e8   :  { %4712 = vmatpush2.bf16.msra.mxu0 %v8121_v28  ;;  %v8297_v28 = vld [vmem:[#allocation14 + $0x464] ss:$16 sps:$4 sm:$0xff]  }
 0x3e9   :  { %4713 = vmatprep.subr.bf16.mxu0 %v8129_v5  ;;  %v8210_v5 = vld [vmem:[#allocation14 + $0x384] ss:$16 sps:$4 sm:$0xff]  }
 0x3ec   :  { %4714 = vmatpush2.bf16.msra.mxu0 %v8127_v36  ;;  %v8295_v36 = vld [vmem:[#allocation14 + $0x460] ss:$16 sps:$4 sm:$0xff]  }
 0x3ed   :  { %4715 = vmatprep.subr.bf16.mxu0 %v8135_v37  ;;  %v8208_v37 = vld [vmem:[#allocation14 + $0x380] ss:$16 sps:$4 sm:$0xff]  }
 0x3f0   :  { %4716 = vmatpush2.bf16.msra.mxu0 %v8133_v38  ;;  %v8303_v38 = vld [vmem:[#allocation14 + $0x444] ss:$16 sps:$4 sm:$0xff]  }
 0x3f1   :  { %4717 = vmatprep.subr.bf16.mxu0 %v8141_v9  ;;  %v8213_v9 = vld [vmem:[#allocation14 + $0x364] ss:$16 sps:$4 sm:$0xff]  }
 0x3f4   :  { %4718 = vmatpush2.bf16.msra.mxu0 %v8139_v39  ;;  %v8301_v39 = vld [vmem:[#allocation14 + $0x440] ss:$16 sps:$4 sm:$0xff]  }
 0x3f5   :  { %4719 = vmatprep.subr.bf16.mxu0 %v8147_v40  ;;  %v8211_v40 = vld [vmem:[#allocation14 + $0x360] ss:$16 sps:$4 sm:$0xff]  }
 0x3f8   :  { %4720 = vmatpush2.bf16.msra.mxu0 %v8145_v43  ;;  %v8309_v43 = vld [vmem:[#allocation14 + $0x424] ss:$16 sps:$4 sm:$0xff]  }
 0x3f9   :  { %4721 = vmatprep.subr.bf16.mxu0 %v8153_v44  ;;  %v8216_v44 = vld [vmem:[#allocation14 + $0x344] ss:$16 sps:$4 sm:$0xff]  }
 0x3fc   :  { %4722 = vmatpush2.bf16.msra.mxu0 %v8151_v46  ;;  %v8307_v46 = vld [vmem:[#allocation14 + $0x420] ss:$16 sps:$4 sm:$0xff]  }
 0x3fd   :  { %5959 = vmatprep.subr.bf16.mxu0 %v8177_v58  ;;  %v8214_v58 = vld [vmem:[#allocation14 + $0x340] ss:$16 sps:$4 sm:$0xff]  }
 0x3ff   :  { %4724 = vmatmul.mubr.bf16.vlgmr.msra.gmra.mxu0 %v8957_v21  ;;  %v4479_v29 = vpop.f32.mrf.mxu0 }
 0x400   :  { %v4480_v60 = vadd.f32 %v4479_v29, %v8980_v59  ;;  %5960 = vmatpush1.bf16.msra.mxu0 %v8175_v63  ;;  %v8186_v59 = vld [vmem:[#allocation14 + $0x284] ss:$16 sps:$4 sm:$0xff]   ;;  %v8313_v29 = vld [vmem:[#allocation14 + $0x400] ss:$16 sps:$4 sm:$0xff]  }
 0x401   :  { %v8992_v55 = vpop.f32.mrf.mxu1  ;;  %v4481_v56 = vpop.f32.mrf.mxu0  ;;  %5961 = vmatprep.subr.bf16.mxu0 %v8180_v48  ;;  %v8315_v63 = vld [vmem:[#allocation14 + $0x404] ss:$16 sps:$4 sm:$0xff]  }
 0x402   :  { %v4482_v57 = vadd.f32 %v4481_v56, %v8982_v1  ;;  %v4732_v32 = vpack.c.bf16 %v4480_v60, %v4480_v60  ;;  %v8187_v1 = vld [vmem:[#allocation14 + $0x260] ss:$16 sps:$4 sm:$0xff]   ;;  %v8219_v48 = vld [vmem:[#allocation14 + $0x324] ss:$16 sps:$4 sm:$0xff]  }
 0x403   :  { %v8995_v61 = vpop.f32.mrf.mxu1  ;;  %v4483_v62 = vpop.f32.mrf.mxu0  ;;  %v8217_v60 = vld [vmem:[#allocation14 + $0x320] ss:$16 sps:$4 sm:$0xff]   ;;  %v8222_v56 = vld [vmem:[#allocation14 + $0x304] ss:$16 sps:$4 sm:$0xff]  }
 0x404   :  { %v4733_v53 = vpack.c.bf16 %v4482_v57, %v4482_v57  ;;  %5962 = vmatpush1.bf16.msra.mxu0 %v8178_v54  ;;  %v8321_v54 = vld [vmem:[#allocation14 + $0x5e4] ss:$16 sps:$4 sm:$0xff]   ;;  %v8220_v57 = vld [vmem:[#allocation14 + $0x300] ss:$16 sps:$4 sm:$0xff]   ;;  %v8225_v62 = vld [vmem:[#allocation14 + $0xec] ss:$16 sps:$4 sm:$0xff]  }
 0x405   :  { %v4606_v21 = vpop.f32.mrf.mxu1  ;;  %v4484_v22 = vpop.f32.mrf.mxu0  ;;  %5963 = vmatprep.subr.bf16.mxu0 %v8183_v8  ;;  %v8319_v8 = vld [vmem:[#allocation14 + $0x5e0] ss:$16 sps:$4 sm:$0xff]  }
 0x406   :  { %8439 = vtanh.bf16 %v4733_v53  ;;  %v8325_v53 = vld [vmem:[#allocation14 + $0x5c0] ss:$16 sps:$4 sm:$0xff]   ;;  %v2908_v21 = vrot.slane %v8969_v42, %v8844_v34  ;;  %v8333_v22 = vld [vmem:[#allocation14 + $0x5a4] ss:$16 sps:$4 sm:$0xff]  }
 0x407   :  { %8441 = vtanh.bf16 %v4732_v32  ;;  %v4607_v2 = vpop.f32.mrf.mxu1  ;;  %v8327_v32 = vld [vmem:[#allocation14 + $0x5c4] ss:$16 sps:$4 sm:$0xff]  }
 0x408   :  { %5964 = vmatpush1.bf16.msra.mxu0 %v8181_v25  ;;  %v2904_v25 = vrot.slane %v8969_v42, %v8836_v31 }
 0x409   :  { %5965 = vmatprep.subr.bf16.mxu0 %v8186_v59  ;;  %v8331_v59 = vld [vmem:[#allocation14 + $0x5a0] ss:$16 sps:$4 sm:$0xff]  }
 0x40a   :  { %v4521_v2 = vadd.f32 %v8986_v45, %v2904_v25 }
 0x40c   :  { %5966 = vmatpush1.bf16.msra.mxu0 %v8184_v52 }
 0x40d   :  { %5967 = vmatprep.subr.bf16.mxu0 %v8189_v3  ;;  %v4523_v3 = vadd.f32 %v8988_v0, %v2908_v21  ;;  %v8256_v21 = vld [vmem:[#allocation14 + $0x188] ss:$16 sps:$4 sm:$0xff]  }
 0x410   :  { %5968 = vmatpush1.bf16.msra.mxu0 %v8187_v1 }
 0x411   :  { %5969 = vmatprep.subr.bf16.mxu0 %v8192_v4  ;;  %v8339_v4 = vld [vmem:[#allocation14 + $0x584] ss:$16 sps:$4 sm:$0xff]  }
 0x414   :  { %v8997_v6 = vpop.eup %8439  ;;  %5970 = vmatpush1.bf16.msra.mxu0 %v8190_v35 }
 0x415   :  { %v8999_v11 = vpop.eup %8441  ;;  %5950 = vmatprep.mubr.bf16.mxu1 %v8997_v6  ;;  %5971 = vmatprep.subr.bf16.mxu0 %v8195_v51 }
 0x416   :  { %5951 = vmatmul.mubr.bf16.vlgmr.msra.gmra.mxu1 %v8999_v11 }
 0x417   :  { %6001 = vmatpush1.bf16.msra.mxu1 %v8271_v13 }
 0x418   :  { %5972 = vmatpush1.bf16.msra.mxu0 %v8193_v7  ;;  %6002 = vmatprep.subr.bf16.mxu1 %v8279_v47  ;;  %v8337_v7 = vld [vmem:[#allocation14 + $0x580] ss:$16 sps:$4 sm:$0xff]   ;;  %v8345_v47 = vld [vmem:[#allocation14 + $0x564] ss:$16 sps:$4 sm:$0xff]  }
 0x419   :  { %5973 = vmatprep.subr.bf16.mxu0 %v8198_v12 }
 0x41b   :  { %6003 = vmatpush1.bf16.msra.mxu1 %v8277_v50 }
 0x41c   :  { %5974 = vmatpush1.bf16.msra.mxu0 %v8196_v24  ;;  %6004 = vmatprep.subr.bf16.mxu1 %v8285_v14 }
 0x41d   :  { %5975 = vmatprep.subr.bf16.mxu0 %v8201_v19 }
 0x41f   :  { %6005 = vmatpush1.bf16.msra.mxu1 %v8283_v17  ;;  %v8351_v17 = vld [vmem:[#allocation14 + $0x544] ss:$16 sps:$4 sm:$0xff]  }
 0x420   :  { %5976 = vmatpush2.bf16.msra.mxu0 %v8199_v15  ;;  %6006 = vmatprep.subr.bf16.mxu1 %v8291_v20  ;;  %v8343_v15 = vld [vmem:[#allocation14 + $0x560] ss:$16 sps:$4 sm:$0xff]  }
 0x421   :  { %5977 = vmatprep.subr.bf16.mxu0 %v8204_v16  ;;  %v8355_v20 = vld [vmem:[#allocation14 + $0x520] ss:$16 sps:$4 sm:$0xff]  }
 0x423   :  { %6007 = vmatpush1.bf16.msra.mxu1 %v8289_v26  ;;  %v8369_v26 = vld [vmem:[#allocation14 + $0x2ec] ss:$16 sps:$4 sm:$0xff]  }
 0x424   :  { %5978 = vmatpush2.bf16.msra.mxu0 %v8202_v18  ;;  %6008 = vmatprep.subr.bf16.mxu1 %v8297_v28  ;;  %v8357_v18 = vld [vmem:[#allocation14 + $0x524] ss:$16 sps:$4 sm:$0xff]  }
 0x425   :  { %5979 = vmatprep.subr.bf16.mxu0 %v8207_v23  ;;  %v8361_v23 = vld [vmem:[#allocation14 + $0x500] ss:$16 sps:$4 sm:$0xff]  }
 0x427   :  { %6009 = vmatpush1.bf16.msra.mxu1 %v8295_v36 }
 0x428   :  { %5980 = vmatpush2.bf16.msra.mxu0 %v8205_v27  ;;  %6010 = vmatprep.subr.bf16.mxu1 %v8303_v38  ;;  %v8223_v27 = vld [vmem:[#allocation14 + $0xe8] ss:$16 sps:$4 sm:$0xff]   ;;  %v8231_v38 = vld [vmem:[#allocation14 + $0xac] ss:$16 sps:$4 sm:$0xff]  }
 0x429   :  { %5981 = vmatprep.subr.bf16.mxu0 %v8210_v5  ;;  %v8228_v5 = vld [vmem:[#allocation14 + $0xcc] ss:$16 sps:$4 sm:$0xff]  }
 0x42b   :  { %6011 = vmatpush1.bf16.msra.mxu1 %v8301_v39  ;;  %v8234_v39 = vld [vmem:[#allocation14 + $0x8c] ss:$16 sps:$4 sm:$0xff]  }
 0x42c   :  { %5982 = vmatpush2.bf16.msra.mxu0 %v8208_v37  ;;  %6012 = vmatprep.subr.bf16.mxu1 %v8309_v43  ;;  %v8226_v37 = vld [vmem:[#allocation14 + $0xc8] ss:$16 sps:$4 sm:$0xff]   ;;  %v8237_v43 = vld [vmem:[#allocation14 + $0x6c] ss:$16 sps:$4 sm:$0xff]  }
 0x42d   :  { %5983 = vmatprep.subr.bf16.mxu0 %v8213_v9  ;;  %v8229_v9 = vld [vmem:[#allocation14 + $0xa8] ss:$16 sps:$4 sm:$0xff]  }
 0x42f   :  { %6013 = vmatpush1.bf16.msra.mxu1 %v8307_v46  ;;  %v8240_v46 = vld [vmem:[#allocation14 + $0x4c] ss:$16 sps:$4 sm:$0xff]  }
 0x430   :  { %5984 = vmatpush2.bf16.msra.mxu0 %v8211_v40  ;;  %6014 = vmatprep.subr.bf16.mxu1 %v8315_v63  ;;  %v8232_v40 = vld [vmem:[#allocation14 + $0x88] ss:$16 sps:$4 sm:$0xff]   ;;  %v8243_v63 = vld [vmem:[#allocation14 + $0x2c] ss:$16 sps:$4 sm:$0xff]  }
 0x431   :  { %5985 = vmatprep.subr.bf16.mxu0 %v8216_v44  ;;  %v8235_v44 = vld [vmem:[#allocation14 + $0x68] ss:$16 sps:$4 sm:$0xff]  }
 0x433   :  { %6015 = vmatpush1.bf16.msra.mxu1 %v8313_v29  ;;  %v8244_v29 = vld [vmem:[#allocation14 + $0x8] ss:$16 sps:$4 sm:$0xff]  }
 0x434   :  { %5986 = vmatpush2.bf16.msra.mxu0 %v8214_v58  ;;  %6016 = vmatprep.subr.bf16.mxu1 %v8321_v54  ;;  %v8238_v58 = vld [vmem:[#allocation14 + $0x48] ss:$16 sps:$4 sm:$0xff]  }
 0x435   :  { %5987 = vmatprep.subr.bf16.mxu0 %v8219_v48  ;;  %v8246_v48 = vld [vmem:[#allocation14 + $0xc] ss:$16 sps:$4 sm:$0xff]   ;;  %v8247_v54 = vld [vmem:[#allocation14 + $0x1e8] ss:$16 sps:$4 sm:$0xff]  }
 0x437   :  { %6017 = vmatpush2.bf16.msra.mxu1 %v8319_v8  ;;  %v8250_v8 = vld [vmem:[#allocation14 + $0x1c8] ss:$16 sps:$4 sm:$0xff]  }
 0x438   :  { %5988 = vmatpush2.bf16.msra.mxu0 %v8217_v60  ;;  %6018 = vmatprep.subr.bf16.mxu1 %v8327_v32  ;;  %v8249_v60 = vld [vmem:[#allocation14 + $0x1ec] ss:$16 sps:$4 sm:$0xff]   ;;  %v8253_v32 = vld [vmem:[#allocation14 + $0x1a8] ss:$16 sps:$4 sm:$0xff]  }
 0x439   :  { %5989 = vmatprep.subr.bf16.mxu0 %v8222_v56  ;;  %v8252_v56 = vld [vmem:[#allocation14 + $0x1cc] ss:$16 sps:$4 sm:$0xff]  }
 0x43b   :  { %6019 = vmatpush2.bf16.msra.mxu1 %v8325_v53 }
 0x43c   :  { %5990 = vmatpush2.bf16.msra.mxu0 %v8220_v57  ;;  %6020 = vmatprep.subr.bf16.mxu1 %v8333_v22  ;;  %v8255_v57 = vld [vmem:[#allocation14 + $0x1ac] ss:$16 sps:$4 sm:$0xff]  }
 0x43d   :  { %6041 = vmatprep.subr.bf16.mxu0 %v8225_v62  ;;  %v8258_v62 = vld [vmem:[#allocation14 + $0x18c] ss:$16 sps:$4 sm:$0xff]  }
 0x43e   :  { %v8261_v22 = vld [vmem:[#allocation14 + $0x16c] ss:$16 sps:$4 sm:$0xff]  }
 0x43f   :  { %v4561_v52 = vpop.f32.mrf.mxu0  ;;  %6021 = vmatpush2.bf16.msra.mxu1 %v8331_v59 }
 0x440   :  { %v4562_v1 = vadd.f32 %v4561_v52, %v4521_v2  ;;  %6022 = vmatprep.subr.bf16.mxu1 %v8339_v4  ;;  %v8259_v52 = vld [vmem:[#allocation14 + $0x168] ss:$16 sps:$4 sm:$0xff]   ;;  %v8267_v4 = vld [vmem:[#allocation14 + $0x12c] ss:$16 sps:$4 sm:$0xff]  }
 0x441   :  { %v4563_v35 = vpop.f32.mrf.mxu0  ;;  %v9009_v51 = vpop.f32.mrf.mxu1 }
 0x442   :  { %v4603_v10 = vadd.f32 %v8992_v55, %v4562_v1  ;;  %v4564_v12 = vadd.f32 %v4563_v35, %v4523_v3  ;;  %v8349_v55 = vld [vmem:[#allocation14 + $0x540] ss:$16 sps:$4 sm:$0xff]   ;;  %v8264_v3 = vld [vmem:[#allocation14 + $0x14c] ss:$16 sps:$4 sm:$0xff]   ;;  %v8262_v1 = vld [vmem:[#allocation14 + $0x148] ss:$16 sps:$4 sm:$0xff]  }
 0x443   :  { %v4565_v13 = vpop.f32.mrf.mxu0  ;;  %v9012_v24 = vpop.f32.mrf.mxu1  ;;  %6023 = vmatpush2.bf16.msra.mxu1 %v8337_v7  ;;  %v8265_v35 = vld [vmem:[#allocation14 + $0x128] ss:$16 sps:$4 sm:$0xff]   ;;  %v8270_v7 = vld [vmem:[#allocation14 + $0x10c] ss:$16 sps:$4 sm:$0xff]  }
 0x444   :  { %v4605_v45 = vadd.f32 %v8995_v61, %v4564_v12  ;;  %v4734_v19 = vpack.c.bf16 %v4603_v10, %v4603_v10  ;;  %6024 = vmatprep.subr.bf16.mxu1 %v8345_v47  ;;  %v8363_v61 = vld [vmem:[#allocation14 + $0x504] ss:$16 sps:$4 sm:$0xff]   ;;  %v8268_v10 = vld [vmem:[#allocation14 + $0x108] ss:$16 sps:$4 sm:$0xff]   ;;  %v8276_v12 = vld [vmem:[#allocation14 + $0x4ec] ss:$16 sps:$4 sm:$0xff]  }
 0x445   :  { %v4566_v50 = vpop.f32.mrf.mxu0  ;;  %v4688_v0 = vpop.f32.mrf.mxu1  ;;  %v8274_v13 = vld [vmem:[#allocation14 + $0x4e8] ss:$16 sps:$4 sm:$0xff]  }
 0x446   :  { %v4735_v14 = vpack.c.bf16 %v4605_v45, %v4605_v45  ;;  %v8282_v45 = vld [vmem:[#allocation14 + $0x4cc] ss:$16 sps:$4 sm:$0xff]   ;;  %v8280_v47 = vld [vmem:[#allocation14 + $0x4c8] ss:$16 sps:$4 sm:$0xff]  }
 0x447   :  { %v4689_v16 = vpop.f32.mrf.mxu1  ;;  %6025 = vmatpush2.bf16.msra.mxu1 %v8343_v15  ;;  %v8286_v50 = vld [vmem:[#allocation14 + $0x4a8] ss:$16 sps:$4 sm:$0xff]   ;;  %v8294_v0 = vld [vmem:[#allocation14 + $0x48c] ss:$16 sps:$4 sm:$0xff]  }
 0x448   :  { %8443 = vtanh.bf16 %v4735_v14  ;;  %6026 = vmatprep.subr.bf16.mxu1 %v8351_v17  ;;  %v8292_v15 = vld [vmem:[#allocation14 + $0x488] ss:$16 sps:$4 sm:$0xff]   ;;  %v8300_v14 = vld [vmem:[#allocation14 + $0x46c] ss:$16 sps:$4 sm:$0xff]  }
 0x449   :  { %8445 = vtanh.bf16 %v4734_v19  ;;  %v8288_v19 = vld [vmem:[#allocation14 + $0x4ac] ss:$16 sps:$4 sm:$0xff]   ;;  %v8298_v16 = vld [vmem:[#allocation14 + $0x468] ss:$16 sps:$4 sm:$0xff]  }
 0x44a   :  { %v8306_v17 = vld [vmem:[#allocation14 + $0x44c] ss:$16 sps:$4 sm:$0xff]  }
 0x44b   :  { %6027 = vmatpush2.bf16.msra.mxu1 %v8349_v55  ;;  %v8304_v55 = vld [vmem:[#allocation14 + $0x448] ss:$16 sps:$4 sm:$0xff]  }
 0x44c   :  { %6028 = vmatprep.subr.bf16.mxu1 %v8357_v18  ;;  %v8310_v18 = vld [vmem:[#allocation14 + $0x428] ss:$16 sps:$4 sm:$0xff]  }
 0x44f   :  { %6029 = vmatpush2.bf16.msra.mxu1 %v8355_v20  ;;  %v8318_v20 = vld [vmem:[#allocation14 + $0x40c] ss:$16 sps:$4 sm:$0xff]  }
 0x450   :  { %6030 = vmatprep.subr.bf16.mxu1 %v8363_v61  ;;  %v8316_v61 = vld [vmem:[#allocation14 + $0x408] ss:$16 sps:$4 sm:$0xff]  }
 0x453   :  { %6031 = vmatpush2.bf16.msra.mxu1 %v8361_v23  ;;  %v8324_v23 = vld [vmem:[#allocation14 + $0x5ec] ss:$16 sps:$4 sm:$0xff]  }
 0x454   :  { %6082 = vmatprep.subr.bf16.mxu1 %v8369_v26  ;;  %v8322_v26 = vld [vmem:[#allocation14 + $0x5e8] ss:$16 sps:$4 sm:$0xff]  }
 0x456   :  { %v9015_v28 = vpop.eup %8443 }
 0x457   :  { %v9017_v36 = vpop.eup %8445  ;;  %5991 = vmatprep.mubr.bf16.mxu0 %v9015_v28 }
 0x458   :  { %5992 = vmatmul.mubr.bf16.vlgmr.msra.gmra.mxu0 %v9017_v36 }
 0x459   :  { %6042 = vmatpush1.bf16.msra.mxu0 %v8223_v27  ;;  %6073 = vmatprep.mubr.bf16.mxu0 %v8997_v6  ;;  %v8241_v6 = vld [vmem:[#allocation14 + $0x28] ss:$16 sps:$4 sm:$0xff]   ;;  %v2912_v27 = vrot.slane %v8969_v42, %v8878_v41 }
 0x45a   :  { %6043 = vmatprep.subr.bf16.mxu0 %v8228_v5  ;;  %v8330_v5 = vld [vmem:[#allocation14 + $0x5cc] ss:$16 sps:$4 sm:$0xff]  }
 0x45d   :  { %6044 = vmatpush1.bf16.msra.mxu0 %v8226_v37  ;;  %v2916_v37 = vrot.slane %v8969_v42, %v8855_v49  ;;  %v8340_v42 = vld [vmem:[#allocation14 + $0x588] ss:$16 sps:$4 sm:$0xff]  }
 0x45e   :  { %6045 = vmatprep.subr.bf16.mxu0 %v8231_v38  ;;  %v8328_v38 = vld [vmem:[#allocation14 + $0x5c8] ss:$16 sps:$4 sm:$0xff]  }
 0x461   :  { %6046 = vmatpush1.bf16.msra.mxu0 %v8229_v9 }
 0x462   :  { %6047 = vmatprep.subr.bf16.mxu0 %v8234_v39  ;;  %v8336_v39 = vld [vmem:[#allocation14 + $0x5ac] ss:$16 sps:$4 sm:$0xff]  }
 0x465   :  { %6048 = vmatpush1.bf16.msra.mxu0 %v8232_v40 }
 0x466   :  { %6049 = vmatprep.subr.bf16.mxu0 %v8237_v43  ;;  %v8334_v43 = vld [vmem:[#allocation14 + $0x5a8] ss:$16 sps:$4 sm:$0xff]  }
 0x469   :  { %6050 = vmatpush1.bf16.msra.mxu0 %v8235_v44 }
 0x46a   :  { %6051 = vmatprep.subr.bf16.mxu0 %v8240_v46  ;;  %v8342_v46 = vld [vmem:[#allocation14 + $0x58c] ss:$16 sps:$4 sm:$0xff]  }
 0x46d   :  { %6052 = vmatpush1.bf16.msra.mxu0 %v8238_v58 }
 0x46e   :  { %6053 = vmatprep.subr.bf16.mxu0 %v8243_v63 }
 0x471   :  { %6054 = vmatpush1.bf16.msra.mxu0 %v8241_v6 }
 0x472   :  { %6055 = vmatprep.subr.bf16.mxu0 %v8246_v48  ;;  %v8348_v48 = vld [vmem:[#allocation14 + $0x56c] ss:$16 sps:$4 sm:$0xff]  }
 0x475   :  { %6056 = vmatpush1.bf16.msra.mxu0 %v8244_v29 }
 0x476   :  { %6057 = vmatprep.subr.bf16.mxu0 %v8249_v60 }
 0x479   :  { %6058 = vmatpush2.bf16.msra.mxu0 %v8247_v54 }
 0x47a   :  { %6059 = vmatprep.subr.bf16.mxu0 %v8252_v56 }
 0x47d   :  { %6060 = vmatpush2.bf16.msra.mxu0 %v8250_v8  ;;  %v8346_v8 = vld [vmem:[#allocation14 + $0x568] ss:$16 sps:$4 sm:$0xff]  }
 0x47e   :  { %6061 = vmatprep.subr.bf16.mxu0 %v8255_v57  ;;  %v8352_v57 = vld [vmem:[#allocation14 + $0x548] ss:$16 sps:$4 sm:$0xff]  }
 0x47f   :  { %v9022_v53 = vpop.f32.mrf.mxu0 }
 0x480   :  { %v4644_v9 = vadd.f32 %v9022_v53, %v2912_v27  ;;  %v8364_v53 = vld [vmem:[#allocation14 + $0x508] ss:$16 sps:$4 sm:$0xff]   ;;  %v8408_v27 = vld [vmem:[#allocation14 + $0x34c] ss:$16 sps:$4 sm:$0xff]  }
 0x481   :  { %6062 = vmatpush2.bf16.msra.mxu0 %v8253_v32  ;;  %v9024_v25 = vpop.f32.mrf.mxu0  ;;  %v8358_v32 = vld [vmem:[#allocation14 + $0x528] ss:$16 sps:$4 sm:$0xff]  }
 0x482   :  { %6063 = vmatprep.subr.bf16.mxu0 %v8258_v62  ;;  %v4646_v40 = vadd.f32 %v9024_v25, %v2916_v37  ;;  %v4685_v44 = vadd.f32 %v9009_v51, %v4644_v9  ;;  %v8354_v51 = vld [vmem:[#allocation14 + $0x54c] ss:$16 sps:$4 sm:$0xff]   ;;  %v8367_v25 = vld [vmem:[#allocation14 + $0x2e8] ss:$16 sps:$4 sm:$0xff]  }
 0x483   :  { %v4647_v59 = vpop.f32.mrf.mxu0  ;;  %v8366_v62 = vld [vmem:[#allocation14 + $0x50c] ss:$16 sps:$4 sm:$0xff]  }
 0x484   :  { %v4687_v63 = vadd.f32 %v9012_v24, %v4646_v40  ;;  %v8360_v24 = vld [vmem:[#allocation14 + $0x52c] ss:$16 sps:$4 sm:$0xff]   ;;  %v9040_v40 = vld [vmem:[#allocation16] sm:$0xf] }
 0x485   :  { %6064 = vmatpush2.bf16.msra.mxu0 %v8256_v21  ;;  %v4648_v2 = vpop.f32.mrf.mxu0  ;;  %v8411_v37 = vld [vmem:[#allocation14 + $0x32c] ss:$16 sps:$4 sm:$0xff]  }
 0x486   :  { %6065 = vmatprep.subr.bf16.mxu0 %v8261_v22  ;;  %v8372_v22 = vld [vmem:[#allocation14 + $0x2cc] ss:$16 sps:$4 sm:$0xff]  }
 0x487   :  { %v8414_v9 = vld [vmem:[#allocation14 + $0x30c] ss:$16 sps:$4 sm:$0xff]  }
 0x489   :  { %6066 = vmatpush2.bf16.msra.mxu0 %v8259_v52  ;;  %v8370_v52 = vld [vmem:[#allocation14 + $0x2c8] ss:$16 sps:$4 sm:$0xff]  }
 0x48a   :  { %6067 = vmatprep.subr.bf16.mxu0 %v8264_v3 }
 0x48d   :  { %6068 = vmatpush2.bf16.msra.mxu0 %v8262_v1  ;;  %v8375_v1 = vld [vmem:[#allocation14 + $0x2ac] ss:$16 sps:$4 sm:$0xff]  }
 0x48e   :  { %6069 = vmatprep.subr.bf16.mxu0 %v8267_v4 }
 0x491   :  { %6070 = vmatpush2.bf16.msra.mxu0 %v8265_v35  ;;  %v8373_v35 = vld [vmem:[#allocation14 + $0x2a8] ss:$16 sps:$4 sm:$0xff]  }
 0x492   :  { %6071 = vmatprep.subr.bf16.mxu0 %v8270_v7 }
 0x495   :  { %6072 = vmatpush2.bf16.msra.mxu0 %v8268_v10  ;;  %v8378_v10 = vld [vmem:[#allocation14 + $0x28c] ss:$16 sps:$4 sm:$0xff]  }
 0x496   :  { %6123 = vmatprep.subr.bf16.mxu0 %v8276_v12  ;;  %v8376_v12 = vld [vmem:[#allocation14 + $0x288] ss:$16 sps:$4 sm:$0xff]  }
 0x498   :  { %6074 = vmatmul.mubr.bf16.vlgmr.msra.gmra.mxu0 %v8999_v11  ;;  %v8312_v11 = vld [vmem:[#allocation14 + $0x42c] ss:$16 sps:$4 sm:$0xff]  }
 0x499   :  { %6124 = vmatpush1.bf16.msra.mxu0 %v8274_v13  ;;  %v8381_v13 = vld [vmem:[#allocation14 + $0x26c] ss:$16 sps:$4 sm:$0xff]  }
 0x49a   :  { %6125 = vmatprep.subr.bf16.mxu0 %v8282_v45  ;;  %v8379_v45 = vld [vmem:[#allocation14 + $0x268] ss:$16 sps:$4 sm:$0xff]  }
 0x49d   :  { %6126 = vmatpush1.bf16.msra.mxu0 %v8280_v47  ;;  %v8382_v47 = vld [vmem:[#allocation14 + $0x248] ss:$16 sps:$4 sm:$0xff]  }
 0x49e   :  { %6127 = vmatprep.subr.bf16.mxu0 %v8288_v19  ;;  %v8387_v19 = vld [vmem:[#allocation14 + $0x22c] ss:$16 sps:$4 sm:$0xff]  }
 0x4a1   :  { %6128 = vmatpush1.bf16.msra.mxu0 %v8286_v50  ;;  %v8385_v50 = vld [vmem:[#allocation14 + $0x228] ss:$16 sps:$4 sm:$0xff]  }
 0x4a2   :  { %6129 = vmatprep.subr.bf16.mxu0 %v8294_v0  ;;  %v8390_v0 = vld [vmem:[#allocation14 + $0x20c] ss:$16 sps:$4 sm:$0xff]  }
 0x4a5   :  { %6130 = vmatpush1.bf16.msra.mxu0 %v8292_v15  ;;  %v8388_v15 = vld [vmem:[#allocation14 + $0x208] ss:$16 sps:$4 sm:$0xff]  }
 0x4a6   :  { %6131 = vmatprep.subr.bf16.mxu0 %v8300_v14  ;;  %v8393_v14 = vld [vmem:[#allocation14 + $0x3ec] ss:$16 sps:$4 sm:$0xff]  }
 0x4a9   :  { %6132 = vmatpush1.bf16.msra.mxu0 %v8298_v16  ;;  %v8391_v16 = vld [vmem:[#allocation14 + $0x3e8] ss:$16 sps:$4 sm:$0xff]  }
 0x4aa   :  { %6133 = vmatprep.subr.bf16.mxu0 %v8306_v17  ;;  %v8396_v17 = vld [vmem:[#allocation14 + $0x3cc] ss:$16 sps:$4 sm:$0xff]  }
 0x4ad   :  { %6134 = vmatpush1.bf16.msra.mxu0 %v8304_v55  ;;  %v8394_v55 = vld [vmem:[#allocation14 + $0x3c8] ss:$16 sps:$4 sm:$0xff]  }
 0x4ae   :  { %6135 = vmatprep.subr.bf16.mxu0 %v8312_v11  ;;  %v8399_v11 = vld [vmem:[#allocation14 + $0x3ac] ss:$16 sps:$4 sm:$0xff]  }
 0x4b1   :  { %6136 = vmatpush1.bf16.msra.mxu0 %v8310_v18  ;;  %v8397_v18 = vld [vmem:[#allocation14 + $0x3a8] ss:$16 sps:$4 sm:$0xff]  }
 0x4b2   :  { %6137 = vmatprep.subr.bf16.mxu0 %v8318_v20  ;;  %v8402_v20 = vld [vmem:[#allocation14 + $0x38c] ss:$16 sps:$4 sm:$0xff]  }
 0x4b5   :  { %6138 = vmatpush1.bf16.msra.mxu0 %v8316_v61  ;;  %v8400_v61 = vld [vmem:[#allocation14 + $0x388] ss:$16 sps:$4 sm:$0xff]  }
 0x4b6   :  { %6139 = vmatprep.subr.bf16.mxu0 %v8324_v23  ;;  %v8405_v23 = vld [vmem:[#allocation14 + $0x36c] ss:$16 sps:$4 sm:$0xff]  }
 0x4b9   :  { %6140 = vmatpush2.bf16.msra.mxu0 %v8322_v26  ;;  %v8403_v26 = vld [vmem:[#allocation14 + $0x368] ss:$16 sps:$4 sm:$0xff]  }
 0x4ba   :  { %6141 = vmatprep.subr.bf16.mxu0 %v8330_v5  ;;  %v8406_v5 = vld [vmem:[#allocation14 + $0x348] ss:$16 sps:$4 sm:$0xff]  }
 0x4bd   :  { %6142 = vmatpush2.bf16.msra.mxu0 %v8328_v38  ;;  %v8409_v38 = vld [vmem:[#allocation14 + $0x328] ss:$16 sps:$4 sm:$0xff]  }
 0x4be   :  { %6143 = vmatprep.subr.bf16.mxu0 %v8336_v39  ;;  %v8412_v39 = vld [vmem:[#allocation14 + $0x308] ss:$16 sps:$4 sm:$0xff]  }
 0x4bf   :  { %v4725_v41 = vpop.f32.mrf.mxu0 }
 0x4c0   :  { %v4726_v58 = vadd.f32 %v4725_v41, %v4685_v44  ;;  %v4941_v44 = vrot.slane %v9040_v40, %v8833_v30  ;;  %v4945_v41 = vrot.slane %v9040_v40, %v8841_v33  ;;  %v6180_v33 = vld [vmem:[#allocation17 + $0x60] sm:$0xff] }
 0x4c1   :  { %6144 = vmatpush2.bf16.msra.mxu0 %v8334_v43  ;;  %v4727_v49 = vpop.f32.mrf.mxu0  ;;  %v6199_v43 = vld [vmem:[#allocation17 + $0xf8] sm:$0xff] }
 0x4c2   :  { %v4728_v6 = vadd.f32 %v4727_v49, %v4687_v63  ;;  %6145 = vmatprep.subr.bf16.mxu0 %v8342_v46  ;;  %v4736_v29 = vpack.c.bf16 %v4726_v58, %v4726_v58  ;;  %v6183_v46 = vld [vmem:[#allocation17 + $0x78] sm:$0xff]  ;;  %v6198_v58 = vld [vmem:[#allocation17 + $0xf0] sm:$0xff] }
 0x4c3   :  { %v4729_v60 = vpop.f32.mrf.mxu0  ;;  %v6182_v63 = vld [vmem:[#allocation17 + $0x70] sm:$0xff] }
 0x4c4   :  { %v4737_v54 = vpack.c.bf16 %v4728_v6, %v4728_v6  ;;  %v6196_v60 = vld [vmem:[#allocation17 + $0xe0] sm:$0xff] }
 0x4c5   :  { %6146 = vmatpush2.bf16.msra.mxu0 %v8340_v42  ;;  %v4730_v56 = vpop.f32.mrf.mxu0  ;;  %v6197_v42 = vld [vmem:[#allocation17 + $0xe8] sm:$0xff] }
 0x4c6   :  { %8447 = vtanh.bf16 %v4737_v54  ;;  %6147 = vmatprep.subr.bf16.mxu0 %v8348_v48  ;;  %v6181_v48 = vld [vmem:[#allocation17 + $0x68] sm:$0xff] }
 0x4c7   :  { %8449 = vtanh.bf16 %v4736_v29 }
 0x4c9   :  { %6148 = vmatpush2.bf16.msra.mxu0 %v8346_v8 }
 0x4ca   :  { %6149 = vmatprep.subr.bf16.mxu0 %v8354_v51  ;;  %v6179_v51 = vld [vmem:[#allocation17 + $0x58] sm:$0xff] }
 0x4cd   :  { %6150 = vmatpush2.bf16.msra.mxu0 %v8352_v57  ;;  %v6194_v57 = vld [vmem:[#allocation17 + $0xd0] sm:$0xff] }
 0x4ce   :  { %6151 = vmatprep.subr.bf16.mxu0 %v8360_v24 }
 0x4d1   :  { %6152 = vmatpush2.bf16.msra.mxu0 %v8358_v32  ;;  %v6178_v32 = vld [vmem:[#allocation17 + $0x50] sm:$0xff] }
 0x4d2   :  { %6153 = vmatprep.subr.bf16.mxu0 %v8366_v62  ;;  %v6193_v62 = vld [vmem:[#allocation17 + $0xc8] sm:$0xff] }
 0x4d4   :  { %v8448_v21 = vpop.eup %8447 }
 0x4d5   :  { %v8450_v59 = vpop.eup %8449  ;;  %6154 = vmatpush2.bf16.msra.mxu0 %v8364_v53  ;;  %6032 = vmatprep.mubr.bf16.mxu1 %v8448_v21  ;;  %v6177_v53 = vld [vmem:[#allocation17 + $0x48] sm:$0xff] }
 0x4d6   :  { %6155 = vmatprep.mubr.bf16.mxu0 %v8448_v21  ;;  %6033 = vmatmul.mubr.bf16.vlgmr.msra.gmra.mxu1 %v8450_v59  ;;  %v9035_v2 = vpop.f32.mrf.mxu1  ;;  %v6176_v21 = vld [vmem:[#allocation17 + $0x40] sm:$0xff] }
 0x4d7   :  { %6083 = vmatpush1.bf16.msra.mxu1 %v8367_v25  ;;  %6114 = vmatprep.mubr.bf16.mxu1 %v9015_v28  ;;  %v8384_v28 = vld [vmem:[#allocation14 + $0x24c] ss:$16 sps:$4 sm:$0xff]   ;;  %v5953_v49 = vadd.f32 %v9035_v2, %v4941_v44  ;;  %v6192_v25 = vld [vmem:[#allocation17 + $0xc0] sm:$0xff]  ;;  %v6190_v2 = vld [vmem:[#allocation17 + $0xb0] sm:$0xff] }
 0x4d8   :  { %6156 = vmatmul.mubr.bf16.vlgmr.msra.gmra.mxu0 %v8450_v59  ;;  %v9038_v3 = vpop.f32.mrf.mxu1  ;;  %6084 = vmatprep.subr.bf16.mxu1 %v8372_v22  ;;  %v6191_v22 = vld [vmem:[#allocation17 + $0xb8] sm:$0xff] }
 0x4d9   :  { %v5955_v29 = vadd.f32 %v9038_v3, %v4945_v41  ;;  %v6175_v59 = vld [vmem:[#allocation17 + $0x38] sm:$0xff]  ;;  %v6189_v3 = vld [vmem:[#allocation17 + $0xa8] sm:$0xff]  ;;  %v6206_v41 = vld [vmem:[#allocation17 + $0x130] sm:$0xff] }
 0x4da   :  { %v5956_v4 = vpop.f32.mrf.mxu1  ;;  %v6207_v44 = vld [vmem:[#allocation17 + $0x138] sm:$0xff] }
 0x4db   :  { %6085 = vmatpush1.bf16.msra.mxu1 %v8370_v52  ;;  %v6174_v52 = vld [vmem:[#allocation17 + $0x30] sm:$0xff]  ;;  %v6188_v4 = vld [vmem:[#allocation17 + $0xa0] sm:$0xff] }
 0x4dc   :  { %v5957_v7 = vpop.f32.mrf.mxu1  ;;  %6086 = vmatprep.subr.bf16.mxu1 %v8375_v1  ;;  %v6173_v1 = vld [vmem:[#allocation17 + $0x28] sm:$0xff] }
 0x4dd   :  { %v6231_v7 = vld [vmem:[#allocation17 + $0x1f8] sm:$0xff] }
 0x4de   :  { %7207 = vmatprep.subr.mxu0 %v6231_v7 }
 0x4df   :  { %6087 = vmatpush1.bf16.msra.mxu1 %v8373_v35  ;;  %v6172_v35 = vld [vmem:[#allocation17 + $0x20] sm:$0xff] }
 0x4e0   :  { %6088 = vmatprep.subr.bf16.mxu1 %v8378_v10  ;;  %v6215_v10 = vld [vmem:[#allocation17 + $0x178] sm:$0xff] }
 0x4e1   :  { %7208 = vmatpush3.msra.mxu0 %v6215_v10 }
 0x4e3   :  { %6089 = vmatpush1.bf16.msra.mxu1 %v8376_v12  ;;  %v6230_v12 = vld [vmem:[#allocation17 + $0x1f0] sm:$0xff] }
 0x4e4   :  { %6090 = vmatprep.subr.bf16.mxu1 %v8381_v13  ;;  %v6187_v13 = vld [vmem:[#allocation17 + $0x98] sm:$0xff]  ;;  %7209 = vmatprep.subr.mxu0 %v6230_v12 }
 0x4e7   :  { %6091 = vmatpush1.bf16.msra.mxu1 %v8379_v45  ;;  %v6214_v45 = vld [vmem:[#allocation17 + $0x170] sm:$0xff] }
 0x4e8   :  { %6092 = vmatprep.subr.bf16.mxu1 %v8384_v28  ;;  %v6171_v28 = vld [vmem:[#allocation17 + $0x18] sm:$0xff]  ;;  %7210 = vmatpush3.msra.mxu0 %v6214_v45 }
 0x4eb   :  { %6093 = vmatpush1.bf16.msra.mxu1 %v8382_v47  ;;  %v6229_v47 = vld [vmem:[#allocation17 + $0x1e8] sm:$0xff] }
 0x4ec   :  { %6094 = vmatprep.subr.bf16.mxu1 %v8387_v19  ;;  %v6186_v19 = vld [vmem:[#allocation17 + $0x90] sm:$0xff]  ;;  %7211 = vmatprep.subr.mxu0 %v6229_v47 }
 0x4ef   :  { %6095 = vmatpush1.bf16.msra.mxu1 %v8385_v50  ;;  %v6213_v50 = vld [vmem:[#allocation17 + $0x168] sm:$0xff] }
 0x4f0   :  { %6096 = vmatprep.subr.bf16.mxu1 %v8390_v0  ;;  %v6170_v0 = vld [vmem:[#allocation17 + $0x10] sm:$0xff]  ;;  %7212 = vmatpush3.msra.mxu0 %v6213_v50 }
 0x4f3   :  { %6097 = vmatpush1.bf16.msra.mxu1 %v8388_v15  ;;  %v6228_v15 = vld [vmem:[#allocation17 + $0x1e0] sm:$0xff] }
 0x4f4   :  { %6098 = vmatprep.subr.bf16.mxu1 %v8393_v14  ;;  %v6185_v14 = vld [vmem:[#allocation17 + $0x88] sm:$0xff]  ;;  %7213 = vmatprep.subr.mxu0 %v6228_v15 }
 0x4f7   :  { %6099 = vmatpush2.bf16.msra.mxu1 %v8391_v16  ;;  %v6212_v16 = vld [vmem:[#allocation17 + $0x160] sm:$0xff] }
 0x4f8   :  { %6100 = vmatprep.subr.bf16.mxu1 %v8396_v17  ;;  %v6169_v17 = vld [vmem:[#allocation17 + $0x8] sm:$0xff]  ;;  %7214 = vmatpush3.msra.mxu0 %v6212_v16 }
 0x4fb   :  { %6101 = vmatpush2.bf16.msra.mxu1 %v8394_v55  ;;  %v6227_v55 = vld [vmem:[#allocation17 + $0x1d8] sm:$0xff] }
 0x4fc   :  { %6102 = vmatprep.subr.bf16.mxu1 %v8399_v11  ;;  %v6184_v11 = vld [vmem:[#allocation17 + $0x80] sm:$0xff]  ;;  %7215 = vmatprep.subr.mxu0 %v6227_v55 }
 0x4ff   :  { %6103 = vmatpush2.bf16.msra.mxu1 %v8397_v18  ;;  %v6211_v18 = vld [vmem:[#allocation17 + $0x158] sm:$0xff] }
 0x500   :  { %6104 = vmatprep.subr.bf16.mxu1 %v8402_v20  ;;  %v6168_v20 = vld [vmem:[#allocation17] sm:$0xff]  ;;  %7216 = vmatpush3.msra.mxu0 %v6211_v18 }
 0x503   :  { %6105 = vmatpush2.bf16.msra.mxu1 %v8400_v61  ;;  %v6226_v61 = vld [vmem:[#allocation17 + $0x1d0] sm:$0xff] }
 0x504   :  { %6106 = vmatprep.subr.bf16.mxu1 %v8405_v23  ;;  %7217 = vmatprep.subr.mxu0 %v6226_v61  ;;  %v6210_v23 = vld [vmem:[#allocation17 + $0x150] sm:$0xff] }
 0x505   :  { %7218 = vmatpush3.msra.mxu0 %v6210_v23 }
 0x507   :  { %6107 = vmatpush2.bf16.msra.mxu1 %v8403_v26  ;;  %v6225_v26 = vld [vmem:[#allocation17 + $0x1c8] sm:$0xff] }
 0x508   :  { %6108 = vmatprep.subr.bf16.mxu1 %v8408_v27  ;;  %7219 = vmatprep.subr.mxu0 %v6225_v26 }
 0x50b   :  { %6109 = vmatpush2.bf16.msra.mxu1 %v8406_v5  ;;  %v6209_v5 = vld [vmem:[#allocation17 + $0x148] sm:$0xff] }
 0x50c   :  { %6110 = vmatprep.subr.bf16.mxu1 %v8411_v37  ;;  %7220 = vmatpush3.msra.mxu0 %v6209_v5  ;;  %v6224_v37 = vld [vmem:[#allocation17 + $0x1c0] sm:$0xff] }
 0x50d   :  { %7221 = vmatprep.subr.mxu0 %v6224_v37 }
 0x50f   :  { %6111 = vmatpush2.bf16.msra.mxu1 %v8409_v38 }
 0x510   :  { %6112 = vmatprep.subr.bf16.mxu1 %v8414_v9  ;;  %v6208_v9 = vld [vmem:[#allocation17 + $0x140] sm:$0xff] }
 0x511   :  { %7222 = vmatpush3.msra.mxu0 %v6208_v9 }
 0x513   :  { %6113 = vmatpush2.bf16.msra.mxu1 %v8412_v39  ;;  %v6223_v39 = vld [vmem:[#allocation17 + $0x1b8] sm:$0xff] }
 0x514   :  { %7172 = vmatprep.subr.mxu1 %v6199_v43  ;;  %7223 = vmatprep.subr.mxu0 %v6223_v39 }
 0x515   :  { %7224 = vmatpush3.msra.mxu0 %v6207_v44 }
 0x516   :  { %6115 = vmatmul.mubr.bf16.vlgmr.msra.gmra.mxu1 %v9017_v36  ;;  %v6195_v36 = vld [vmem:[#allocation17 + $0xd8] sm:$0xff] }
 0x517   :  { %7173 = vmatpush3.msra.mxu1 %v6183_v46  ;;  %v6222_v46 = vld [vmem:[#allocation17 + $0x1b0] sm:$0xff] }
 0x518   :  { %v5993_v6 = vpop.f32.mrf.mxu0  ;;  %7174 = vmatprep.subr.mxu1 %v6198_v58  ;;  %v6221_v58 = vld [vmem:[#allocation17 + $0x1a8] sm:$0xff]  ;;  %7225 = vmatprep.subr.mxu0 %v6222_v46 }
 0x519   :  { %v9049_v30 = vadd.f32 %v5993_v6, %v5953_v49  ;;  %7175 = vmatpush3.msra.mxu1 %v6182_v63  ;;  %v6205_v49 = vld [vmem:[#allocation17 + $0x128] sm:$0xff]  ;;  %7226 = vmatpush3.msra.mxu0 %v6206_v41  ;;  %v6204_v6 = vld [vmem:[#allocation17 + $0x120] sm:$0xff] }
 0x51a   :  { %v5995_v54 = vpop.f32.mrf.mxu0  ;;  %7176 = vmatprep.subr.mxu1 %v6197_v42  ;;  %v6220_v42 = vld [vmem:[#allocation17 + $0x1a0] sm:$0xff]  ;;  %7227 = vmatprep.subr.mxu0 %v6221_v58 }
 0x51b   :  { %v9051_v56 = vadd.f32 %v5995_v54, %v5955_v29  ;;  %7177 = vmatpush3.msra.mxu1 %v6181_v48  ;;  %7228 = vmatpush3.msra.mxu0 %v6205_v49  ;;  %v6219_v48 = vld [vmem:[#allocation17 + $0x198] sm:$0xff]  ;;  %v6202_v54 = vld [vmem:[#allocation17 + $0x110] sm:$0xff] }
 0x51c   :  { %v5997_v8 = vpop.f32.mrf.mxu0  ;;  %7178 = vmatprep.subr.mxu1 %v6196_v60  ;;  %7229 = vmatprep.subr.mxu0 %v6220_v42  ;;  %v6203_v29 = vld [vmem:[#allocation17 + $0x118] sm:$0xff]  ;;  %v6218_v60 = vld [vmem:[#allocation17 + $0x190] sm:$0xff] }
 0x51d   :  { %7179 = vmatpush3.msra.mxu1 %v6180_v33  ;;  %7230 = vmatpush3.msra.mxu0 %v6204_v6  ;;  %v6217_v33 = vld [vmem:[#allocation17 + $0x188] sm:$0xff]  ;;  %v6216_v8 = vld [vmem:[#allocation17 + $0x180] sm:$0xff] }
 0x51e   :  { %v5998_v24 = vpop.f32.mrf.mxu0  ;;  %7180 = vmatprep.subr.mxu1 %v6195_v36  ;;  %7231 = vmatprep.subr.mxu0 %v6219_v48  ;;  %v6201_v36 = vld [vmem:[#allocation17 + $0x108] sm:$0xff] }
 0x51f   :  { %7181 = vmatpush3.msra.mxu1 %v6179_v51  ;;  %7232 = vmatpush3.msra.mxu0 %v6203_v29  ;;  %v6200_v51 = vld [vmem:[#allocation17 + $0x100] sm:$0xff] }
 0x520   :  { %7182 = vmatprep.subr.mxu1 %v6194_v57  ;;  %7233 = vmatprep.subr.mxu0 %v6218_v60 }
 0x521   :  { %7183 = vmatpush3.msra.mxu1 %v6178_v32  ;;  %7234 = vmatpush3.msra.mxu0 %v6202_v54 }
 0x522   :  { %7184 = vmatprep.subr.mxu1 %v6193_v62  ;;  %7235 = vmatprep.subr.mxu0 %v6217_v33 }
 0x523   :  { %7185 = vmatpush3.msra.mxu1 %v6177_v53  ;;  %7236 = vmatpush3.msra.mxu0 %v6201_v36 }
 0x524   :  { %7186 = vmatprep.subr.mxu1 %v6192_v25  ;;  %7237 = vmatprep.subr.mxu0 %v6216_v8 }
 0x525   :  { %7187 = vmatpush3.msra.mxu1 %v6176_v21  ;;  %7238 = vmatpush3.msra.mxu0 %v6200_v51 }
 0x526   :  { %7188 = vmatprep.subr.mxu1 %v6191_v22 }
 0x527   :  { %7189 = vmatpush3.msra.mxu1 %v6175_v59 }
 0x528   :  { %7190 = vmatprep.subr.mxu1 %v6190_v2 }
 0x529   :  { %7191 = vmatpush3.msra.mxu1 %v6174_v52 }
 0x52a   :  { %7192 = vmatprep.subr.mxu1 %v6189_v3 }
 0x52b   :  { %7193 = vmatpush3.msra.mxu1 %v6173_v1  ;;  %v4949_v1 = vrot.slane %v9040_v40, %v8836_v31 }
 0x52c   :  { %7194 = vmatprep.subr.mxu1 %v6188_v4 }
 0x52d   :  { %7195 = vmatpush3.msra.mxu1 %v6172_v35 }
 0x52e   :  { %7196 = vmatprep.subr.mxu1 %v6187_v13 }
 0x52f   :  { %7197 = vmatpush3.msra.mxu1 %v6171_v28 }
 0x530   :  { %7198 = vmatprep.subr.mxu1 %v6186_v19 }
 0x531   :  { %7199 = vmatpush3.msra.mxu1 %v6170_v0 }
 0x532   :  { %7200 = vmatprep.subr.mxu1 %v6185_v14 }
 0x533   :  { %7201 = vmatpush3.msra.mxu1 %v6169_v17 }
 0x534   :  { %7202 = vmatprep.subr.mxu1 %v6184_v11 }
 0x535   :  { %7203 = vmatpush3.msra.mxu1 %v6168_v20 }
 0x558   :  { %v6075_v27 = vpop.f32.mrf.mxu0 }
 0x559   :  { %v6076_v4 = vadd.f32 %v6075_v27, %v4949_v1 }
 0x55a   :  { %v6077_v38 = vpop.f32.mrf.mxu0 }
 0x55c   :  { %v6079_v43 = vpop.f32.mrf.mxu0 }
 0x55e   :  { %v6080_v63 = vpop.f32.mrf.mxu0 }
 0x596   :  { %v6034_v57 = vpop.f32.mrf.mxu1 }
 0x597   :  { %v6035_v24 = vadd.f32 %v6034_v57, %v9049_v30  ;;  %v4953_v30 = vrot.slane %v9040_v40, %v8844_v34  ;;  %v7171_v34 = vld [vmem:[#allocation19] ss:$0 sm:$0xff] }
 0x598   :  { %v6157_v32 = vpop.f32.mrf.mxu0  ;;  %v6036_v62 = vpop.f32.mrf.mxu1 }
 0x599   :  { %v6037_v53 = vadd.f32 %v6036_v62, %v9051_v56  ;;  %v6078_v56 = vadd.f32 %v6077_v38, %v4953_v30 }
 0x59a   :  { %v6159_v25 = vpop.f32.mrf.mxu0  ;;  %v6038_v21 = vpop.f32.mrf.mxu1 }
 0x59b   :  { %8451 = vtanh.f32 %v6037_v53 }
 0x59c   :  { %8453 = vtanh.f32 %v6035_v24  ;;  %v6161_v22 = vpop.f32.mrf.mxu0  ;;  %v6039_v59 = vpop.f32.mrf.mxu1 }
 0x59e   :  { %v6162_v2 = vpop.f32.mrf.mxu0 }
 0x5a8   :  { %v8452_v52 = vpop.eup %8451 }
 0x5a9   :  { %v8454_v3 = vpop.eup %8453  ;;  %6303 = vmatprep.mubr.f32.mxu1 %v8452_v52 }
 0x5aa   :  { %6304 = vmatmul.mubr.f32.vlgmr.msra.gmra.mxu1 %v8454_v3 }
 0x5d6   :  { %v6116_v35 = vpop.f32.mrf.mxu1 }
 0x5d7   :  { %v6117_v7 = vadd.f32 %v6116_v35, %v6076_v4 }
 0x5d8   :  { %v6118_v10 = vpop.f32.mrf.mxu1 }
 0x5d9   :  { %v6158_v12 = vadd.f32 %v6157_v32, %v6117_v7  ;;  %v6119_v13 = vadd.f32 %v6118_v10, %v6078_v56 }
 0x5da   :  { %v6120_v45 = vpop.f32.mrf.mxu1 }
 0x5db   :  { %v6160_v28 = vadd.f32 %v6159_v25, %v6119_v13 }
 0x5dc   :  { %v6121_v47 = vpop.f32.mrf.mxu1 }
 0x5dd   :  { %8455 = vtanh.f32 %v6160_v28 }
 0x5de   :  { %8457 = vtanh.f32 %v6158_v12 }
 0x5ea   :  { %v8456_v19 = vpop.eup %8455 }
 0x5eb   :  { %v8458_v50 = vpop.eup %8457  ;;  %6373 = vmatprep.mubr.f32.mxu0 %v8456_v19 }
 0x5ec   :  { %6374 = vmatmul.mubr.f32.vlgmr.msra.gmra.mxu0 %v8458_v50 }
 0x66a   :  { %v7204_v31 = vpop.f32.mrf.mxu1 }
 0x66c   :  { %v7205_v0 = vpop.f32.mrf.mxu1 }
 0x66d   :  { %v7206_v15 = vadd.f32 %v7205_v0, %v7204_v31 }
 0x66f   :  { %v6306_v16 = vadd.f32 %v7206_v15, %v7171_v34 }
 0x6ac   :  { %v7239_v40 = vpop.f32.mrf.mxu0 }
 0x6ae   :  { %v7240_v14 = vpop.f32.mrf.mxu0 }
 0x6af   :  { %v7241_v17 = vadd.f32 %v7240_v14, %v7239_v40 }
 0x6b1   :  { %v6376_v55 = vadd.f32 %v7241_v17, %v6306_v16 }
 0x6b3   :  { %6379 = vst [vmem:[#allocation20] sm:$0xff] %v6376_v55 }
 0x6b4   :  { %8690 = shalt.err (!%p8687_p3)
}
 0x6b5   :  { %6389 = dma.vmem_to_hbm [thread:$0]  %s6387_s10, 128, %s9073_s11, [#allocation4]  }
 0x6b6   :  { %8711 = dma.done.wait [#allocation4], 128  }
 0x6b7   :  { %8712 = vsyncadd [#allocation4], 4294967168 }
 0x6b8   :  { %6393 = vsyncpa [#allocation3], 1 }
 0x6b9   :  { %6394 = vsyncpa [#allocation6], 1 }
 0x6ba   :  { %6395 = vsyncpa [#allocation9], 1 }
 0x6bb   :  { %6396 = vsyncpa [#allocation12], 1 }
 0x6bc   :  { %6397 = vsyncpa [#allocation15], 1 }
 0x6bd   :  { %6398 = vsyncpa [#allocation18], 1 }
 0x6be   :  { %6399 = vsyncpa [#allocation4], 1 }

</bundles_post_ra>
